<compile_context>
chip_gen: v5e
topology: v5e:2x2
jax: 0.10.0
libtpu: 0.0.40
codegen_flags: <defaults>
</compile_context>

<pallas_src>
import jax
import jax.numpy as jnp
import numpy as np
from jax import lax
from jax.experimental import pallas as pl
from jax.experimental.pallas import tpu as pltpu

# ------------------------- small synthetic config --------------------------
C_IN = 32      # in_channels (== MASK_HEAD conv width here, for kernel simplicity)
C = 32         # MODEL.ROI_MASK_HEAD conv layer width
P = 8          # POOLER_RESOLUTION
K = 8          # NUM_CLASSES
NCONV = 4      # mask_fcn1..mask_fcn4
B = 2          # images
R_PER_IMG = 32 # proposals per image (eval detections)
R = B * R_PER_IMG
R_BLK = 16     # ROIs per grid step -> grid of 4 (multiple of 2 keeps both v7x TCs busy)
HF = WF = 32   # feature-map spatial size
SPATIAL_SCALE = 0.25

M2 = R_BLK * P        # rows per matmul            = 128
PC = P * C            # activation lane width      = 256
ZC = P * 4 * C        # deconv lane width          = 1024
LK = P * 4 * K        # logits lane width          = 256


# ------------------------------- Pallas kernel ------------------------------
def mask_head_kernel(x_ref, sm1_ref, sp1_ref, wc_ref, bc_ref,
                     wd_ref, bd_ref, wl_ref, bl_ref, feat_ref, logit_ref):
    """R_BLK ROIs per grid step.  Activation layout: rows = (roi, y), lanes = (x, c).
      x_ref    : (R_BLK, P, P*C)        pooled ROI features (f32, lane-dense)
      sm1_ref  : (M2, M2)   bf16        0/1 matrix: row m picks row m-1 (0 at ROI top)
      sp1_ref  : (M2, M2)   bf16        0/1 matrix: row m picks row m+1 (0 at ROI bottom)
      wc_ref   : (NCONV*3, P*C, P*C)    banded conv3x3 weights per (layer, ky), bf16
      bc_ref   : (NCONV, 1, P*C)        conv biases tiled over x, f32
      wd_ref   : (P*C, P*4*C)  bf16     block-diag ConvTranspose2d(2,s=2) weights
      bd_ref   : (1, P*4*C)    f32
      wl_ref   : (P*4*C, P*4*K) bf16    block-diag 1x1-conv logit weights
      bl_ref   : (1, P*4*K)    f32
      feat_ref : (R_BLK, P, P*C)        feature-extractor output "x"
      logit_ref: (R_BLK, P, P*4*K)      mask logits, lanes = (x, ky*2+kx, class)
    """
    cur = x_ref[...].reshape(M2, PC)            # f32, free leading-dim merge
    sm1 = sm1_ref[...]
    sp1 = sp1_ref[...]

    # ---- feature extractor: 4 x (conv3x3 pad=1 + ReLU), 5 matmuls each, all MXU.
    # out[y] = (in[y-1] @ Wband[ky=0]) + (in[y] @ Wband[1]) + (in[y+1] @ Wband[2]);
    # in[y +/- 1] (with y zero-padding and per-ROI boundaries) = shift-matrix @ in.
    for layer in range(NCONV):
        cur_bf = cur.astype(jnp.bfloat16)
        up = jnp.dot(sm1, cur_bf, preferred_element_type=jnp.float32).astype(jnp.bfloat16)
        dn = jnp.dot(sp1, cur_bf, preferred_element_type=jnp.float32).astype(jnp.bfloat16)
        acc = jnp.dot(up, wc_ref[3 * layer + 0], preferred_element_type=jnp.float32)
        acc = acc + jnp.dot(cur_bf, wc_ref[3 * layer + 1], preferred_element_type=jnp.float32)
        acc = acc + jnp.dot(dn, wc_ref[3 * layer + 2], preferred_element_type=jnp.float32)
        cur = jnp.maximum(acc + bc_ref[layer], 0.0)

    feat_ref[...] = cur.reshape(R_BLK, P, PC)   # lane-dense store (256 lanes)

    # ---- predictor (fused): ConvTranspose2d(C,C,2,s=2)+ReLU then Conv2d(C,K,1).
    # stride 2 / kernel 2 => the 4 output sub-pixels are independent; both weights
    # are block-diagonal over x (and x,sub), keeping everything lane-dense.
    z = jnp.dot(cur.astype(jnp.bfloat16), wd_ref[...], preferred_element_type=jnp.float32)
    z = jnp.maximum(z + bd_ref[...], 0.0)                        # (M2, P*4*C)
    lg = jnp.dot(z.astype(jnp.bfloat16), wl_ref[...],
                 preferred_element_type=jnp.float32) + bl_ref[...]
    logit_ref[...] = lg.reshape(R_BLK, P, LK)   # lane-dense store (256 lanes)


# --------------------- wrapper-side weight preprocessing ---------------------
def _banded_conv_weights(w_fcn):
    """(NCONV,3,3,C,C)[l,ky,kx,ci,co] -> (NCONV*3, P*C, P*C) banded block slabs."""
    sel = np.zeros((3, P, P), np.float32)
    for kx in range(3):
        for xo in range(P):
            xi = xo + kx - 1
            if 0 <= xi < P:
                sel[kx, xi, xo] = 1.0          # zero x-padding folded in here
    wb = jnp.einsum("abkij,kpq->abpiqj", w_fcn, jnp.asarray(sel))
    return wb.reshape(NCONV * 3, PC, PC)


def _row_shift_matrices():
    """0/1 matrices that shift rows by +/-1 within each ROI (zero y-padding)."""
    m = np.arange(M2)
    up = np.zeros((M2, M2), np.float32)
    ok = m % P != 0
    up[m[ok], m[ok] - 1] = 1.0
    dn = np.zeros((M2, M2), np.float32)
    ok = m % P != P - 1
    dn[m[ok], m[ok] + 1] = 1.0
    return jnp.asarray(up), jnp.asarray(dn)


def mask_head_pallas(x_pooled, params):
    """x_pooled: (R, P, P, C) channels-last pooled ROI features.
    Returns (x_out NCHW (R,C,P,P), mask_logits NCHW (R,K,2P,2P))."""
    n = x_pooled.shape[0]
    pad = (-n) % R_BLK
    if pad:
        x_pooled = jnp.concatenate(
            [x_pooled, jnp.zeros((pad,) + x_pooled.shape[1:], x_pooled.dtype)], 0)
    n_pad = n + pad
    xk = x_pooled.reshape(n_pad, P, PC)                           # free flatten

    bf16 = jnp.bfloat16
    w_conv = _banded_conv_weights(params["w_fcn"]).astype(bf16)   # (12, 256, 256)
    b_conv = jnp.tile(params["b_fcn"][:, None, :], (1, 1, P))     # (NCONV, 1, PC)
    sm1, sp1 = _row_shift_matrices()
    sm1 = sm1.astype(bf16)
    sp1 = sp1.astype(bf16)
    # deconv: (2,2,C,C)[ky,kx,c,d] -> per-position (C, 4C), block-diag over x
    wd_flat = params["w_deconv"].reshape(4, C, C).transpose(1, 0, 2).reshape(C, 4 * C)
    w_dec = jnp.kron(jnp.eye(P, dtype=jnp.float32), wd_flat).astype(bf16)       # (PC, ZC)
    b_dec = jnp.tile(params["b_deconv"][None, :], (1, 4 * P))                    # (1, ZC)
    # 1x1 logit conv, block-diag over (x, sub-pixel)
    w_lg = jnp.kron(jnp.eye(4 * P, dtype=jnp.float32), params["w_logit"]).astype(bf16)  # (ZC, LK)
    b_lg = jnp.tile(params["b_logit"][None, :], (1, 4 * P))                      # (1, LK)

    feat, logits = pl.pallas_call(
        mask_head_kernel,
        out_shape=(
            jax.ShapeDtypeStruct((n_pad, P, PC), jnp.float32),
            jax.ShapeDtypeStruct((n_pad, P, LK), jnp.float32),
        ),
        grid_spec=pltpu.PrefetchScalarGridSpec(
            num_scalar_prefetch=0,
            grid=(n_pad // R_BLK,),
            in_specs=[
                pl.BlockSpec((R_BLK, P, PC), lambda r: (r, 0, 0)),
                pl.BlockSpec((M2, M2), lambda r: (0, 0)),
                pl.BlockSpec((M2, M2), lambda r: (0, 0)),
                pl.BlockSpec((NCONV * 3, PC, PC), lambda r: (0, 0, 0)),
                pl.BlockSpec((NCONV, 1, PC), lambda r: (0, 0, 0)),
                pl.BlockSpec((PC, ZC), lambda r: (0, 0)),
                pl.BlockSpec((1, ZC), lambda r: (0, 0)),
                pl.BlockSpec((ZC, LK), lambda r: (0, 0)),
                pl.BlockSpec((1, LK), lambda r: (0, 0)),
            ],
            out_specs=[
                pl.BlockSpec((R_BLK, P, PC), lambda r: (r, 0, 0)),
                pl.BlockSpec((R_BLK, P, LK), lambda r: (r, 0, 0)),
            ],
        ),
        compiler_params=pltpu.CompilerParams(
            dimension_semantics=("parallel",)),
    )(xk, sm1, sp1, w_conv, b_conv, w_dec, b_dec, w_lg, b_lg)

    feat = feat[:n]
    logits = logits[:n]
    # un-flatten lane-dense output slabs (cheap reshapes/transposes in XLA)
    x_out = feat.reshape(n, P, P, C).transpose(0, 3, 1, 2)        # back to NCHW
    # logits lanes are (x, ky, kx, class): paste sub-pixels into the 2Px2P mask
    lg6 = logits.reshape(n, P, P, 2, 2, K)
    mask_logits = lg6.transpose(0, 5, 1, 3, 2, 4).reshape(n, K, 2 * P, 2 * P)
    return x_out, mask_logits


# ---------------------------- JAX glue: ROIAlign ----------------------------
def roi_align_nhwc(feature_chw, boxes, out_size, spatial_scale):
    """feature_chw: (C, Hf, Wf). boxes: (n, 4) x1,y1,x2,y2 in image coords.
    Returns (n, out_size, out_size, C), channels-last."""
    # TODO(synk): sampling_ratio fixed to 1 (bin-center sample); maskrcnn default is 2.
    Cc, Hf, Wf = feature_chw.shape

    def one(box):
        x1, y1, x2, y2 = box * spatial_scale
        roi_w = jnp.maximum(x2 - x1, 1.0)
        roi_h = jnp.maximum(y2 - y1, 1.0)
        ys = y1 + (jnp.arange(out_size, dtype=jnp.float32) + 0.5) * (roi_h / out_size)
        xs = x1 + (jnp.arange(out_size, dtype=jnp.float32) + 0.5) * (roi_w / out_size)

        def bilin(y, x):
            y = jnp.clip(y, 0.0, Hf - 1.0)
            x = jnp.clip(x, 0.0, Wf - 1.0)
            y0 = jnp.floor(y).astype(jnp.int32)
            x0 = jnp.floor(x).astype(jnp.int32)
            y1i = jnp.minimum(y0 + 1, Hf - 1)
            x1i = jnp.minimum(x0 + 1, Wf - 1)
            ly = y - y0.astype(jnp.float32)
            lx = x - x0.astype(jnp.float32)
            v00 = feature_chw[:, y0, x0]
            v01 = feature_chw[:, y0, x1i]
            v10 = feature_chw[:, y1i, x0]
            v11 = feature_chw[:, y1i, x1i]
            return (v00 * (1 - ly) * (1 - lx) + v01 * (1 - ly) * lx
                    + v10 * ly * (1 - lx) + v11 * ly * lx)

        return jax.vmap(lambda y: jax.vmap(lambda x: bilin(y, x))(xs))(ys)  # (P,P,C)

    return jax.vmap(one)(boxes)


# ------------------------------ plain-JAX reference -------------------------
def ref_forward(pooled, params):
    """bf16-matched reference (same rounding points as the kernel, f32 accumulation)."""
    bf16 = jnp.bfloat16
    x = pooled
    for i in range(NCONV):
        x = lax.conv_general_dilated(
            x.astype(bf16), params["w_fcn"][i].astype(bf16), (1, 1), "SAME",
            dimension_numbers=("NHWC", "HWIO", "NHWC"),
            preferred_element_type=jnp.float32)
        x = jax.nn.relu(x + params["b_fcn"][i].reshape(1, 1, 1, C))
    feat = x
    y = jnp.einsum("ryxc,ijcd->ryxijd", feat.astype(bf16),
                   params["w_deconv"].astype(bf16),
                   preferred_element_type=jnp.float32)
    y = jax.nn.relu(y + params["b_deconv"].reshape(1, 1, 1, 1, 1, C))
    lg = jnp.einsum("ryxijd,dk->ryxijk", y.astype(bf16),
                    params["w_logit"].astype(bf16),
                    preferred_element_type=jnp.float32)
    lg = lg + params["b_logit"].reshape(1, 1, 1, 1, 1, K)
    n = pooled.shape[0]
    logits = lg.transpose(0, 5, 1, 3, 2, 4).reshape(n, K, 2 * P, 2 * P)
    return feat.transpose(0, 3, 1, 2), logits


# ----------------------------------- main -----------------------------------
if __name__ == "__main__":
    key = jax.random.PRNGKey(0)
    keys = jax.random.split(key, 10)

    # features: list of one FPN level, NCHW like PyTorch
    features = [jax.random.normal(keys[0], (B, C_IN, HF, WF), jnp.float32)]

    # proposals: per-image boxes (x1, y1, x2, y2) in image coords (labels > 0 in eval)
    def make_boxes(k, n):
        k1, k2 = jax.random.split(k)
        xy1 = jax.random.uniform(k1, (n, 2), minval=0.0, maxval=80.0)
        wh = jax.random.uniform(k2, (n, 2), minval=16.0, maxval=47.0)
        xy2 = jnp.minimum(xy1 + wh, 127.0)
        return jnp.concatenate([xy1, xy2], axis=-1)

    proposals = [make_boxes(keys[1], R_PER_IMG), make_boxes(keys[2], R_PER_IMG)]

    def rnd(k, shape, fan_in, scale=1.0):
        return jax.random.normal(k, shape, jnp.float32) * jnp.sqrt(2.0 / fan_in) * scale

    params = dict(
        w_fcn=rnd(keys[3], (NCONV, 3, 3, C, C), 9 * C),    # mask_fcn1..4  [l,ky,kx,ci,co]
        b_fcn=rnd(keys[4], (NCONV, C), C, 0.1),
        w_deconv=rnd(keys[5], (2, 2, C, C), C),            # conv5_mask (ConvTranspose2d 2x2 s=2)
        b_deconv=rnd(keys[6], (C,), C, 0.1),
        w_logit=rnd(keys[7], (C, K), C),                   # mask_fcn_logits (1x1 conv)
        b_logit=rnd(keys[8], (K,), K, 0.1),
    )

    # --- eval-mode forward ---
    # pooler (ROIAlign) = glue; conv stack + predictor = Pallas kernel
    pooled = jnp.concatenate(
        [roi_align_nhwc(features[0][img], proposals[img], P, SPATIAL_SCALE)
         for img in range(B)], axis=0)                     # (R, P, P, C)

    x_out, mask_logits = jax.jit(mask_head_pallas)(pooled, params)
    jax.block_until_ready((x_out, mask_logits))

    # post_processor: sigmoid over class mask logits
    # TODO(synk): per-box class selection + Masker paste-into-image has no clean Pallas equivalent.
    mask_prob = jax.nn.sigmoid(mask_logits)
    jax.block_until_ready(mask_prob)

    # numerical sanity check against a bf16-matched plain-JAX reference
    x_ref, logits_ref = ref_forward(pooled, params)
    assert x_out.shape == (R, C, P, P)
    assert mask_logits.shape == (R, K, 2 * P, 2 * P)
    np.testing.assert_allclose(np.asarray(x_out), np.asarray(x_ref), rtol=3e-2, atol=3e-2)
    np.testing.assert_allclose(np.asarray(mask_logits), np.asarray(logits_ref),
                               rtol=3e-2, atol=3e-2)

    print("KERNEL_OK")
</pallas_src>

<mosaic_0001>
module attributes {stable_mosaic.version = 11 : i64} {
  func.func @mask_head_kernel(%arg0: i32, %arg1: memref<16x8x256xf32, #tpu.memory_space<vmem>>, %arg2: memref<128x128xbf16, #tpu.memory_space<vmem>>, %arg3: memref<128x128xbf16, #tpu.memory_space<vmem>>, %arg4: memref<12x256x256xbf16, #tpu.memory_space<vmem>>, %arg5: memref<4x1x256xf32, #tpu.memory_space<vmem>>, %arg6: memref<256x1024xbf16, #tpu.memory_space<vmem>>, %arg7: memref<1x1024xf32, #tpu.memory_space<vmem>>, %arg8: memref<1024x256xbf16, #tpu.memory_space<vmem>>, %arg9: memref<1x256xf32, #tpu.memory_space<vmem>>, %arg10: memref<16x8x256xf32, #tpu.memory_space<vmem>>, %arg11: memref<16x8x256xf32, #tpu.memory_space<vmem>>) attributes {dimension_semantics = [#tpu.dimension_semantics<parallel>], iteration_bounds = array<i64: 4>, scalar_prefetch = 0 : i64, scratch_operands = 0 : i64, tpu.core_type = #tpu.core_type<tc>, window_params = [{transform_indices = @transform_0, window_bounds = array<i64: 16, 8, 256>}, {pipeline_mode = #tpu.pipeline_mode<synchronous>, transform_indices = @transform_1, window_bounds = array<i64: 128, 128>}, {pipeline_mode = #tpu.pipeline_mode<synchronous>, transform_indices = @transform_2, window_bounds = array<i64: 128, 128>}, {pipeline_mode = #tpu.pipeline_mode<synchronous>, transform_indices = @transform_3, window_bounds = array<i64: 12, 256, 256>}, {pipeline_mode = #tpu.pipeline_mode<synchronous>, transform_indices = @transform_4, window_bounds = array<i64: 4, 1, 256>}, {pipeline_mode = #tpu.pipeline_mode<synchronous>, transform_indices = @transform_5, window_bounds = array<i64: 256, 1024>}, {pipeline_mode = #tpu.pipeline_mode<synchronous>, transform_indices = @transform_6, window_bounds = array<i64: 1, 1024>}, {pipeline_mode = #tpu.pipeline_mode<synchronous>, transform_indices = @transform_7, window_bounds = array<i64: 1024, 256>}, {pipeline_mode = #tpu.pipeline_mode<synchronous>, transform_indices = @transform_8, window_bounds = array<i64: 1, 256>}, {transform_indices = @transform_9, window_bounds = array<i64: 16, 8, 256>}, {transform_indices = @transform_10, window_bounds = array<i64: 16, 8, 256>}]} {
    %c0 = arith.constant 0 : index
    %c0_0 = arith.constant 0 : index
    %c0_1 = arith.constant 0 : index
    %0 = vector.load %arg1[%c0, %c0_0, %c0_1] : memref<16x8x256xf32, #tpu.memory_space<vmem>>, vector<16x8x256xf32>
    %1 = vector.shape_cast %0 : vector<16x8x256xf32> to vector<128x256xf32>
    %c0_2 = arith.constant 0 : index
    %c0_3 = arith.constant 0 : index
    %2 = vector.load %arg2[%c0_2, %c0_3] : memref<128x128xbf16, #tpu.memory_space<vmem>>, vector<128x128xbf16>
    %c0_4 = arith.constant 0 : index
    %c0_5 = arith.constant 0 : index
    %3 = vector.load %arg3[%c0_4, %c0_5] : memref<128x128xbf16, #tpu.memory_space<vmem>>, vector<128x128xbf16>
    %4 = arith.truncf %1 : vector<128x256xf32> to vector<128x256xbf16>
    %cst = arith.constant dense<0.000000e+00> : vector<128x256xf32>
    %5 = tpu.matmul %2, %4, %cst {dimension_numbers = #tpu.dot_dimension_numbers<[1], [0], [0], [1], [0, 0, 1, 1], [], []>} : vector<128x128xbf16>, vector<128x256xbf16>, vector<128x256xf32> -> vector<128x256xf32>
    %6 = arith.truncf %5 : vector<128x256xf32> to vector<128x256xbf16>
    %cst_6 = arith.constant dense<0.000000e+00> : vector<128x256xf32>
    %7 = tpu.matmul %3, %4, %cst_6 {dimension_numbers = #tpu.dot_dimension_numbers<[1], [0], [0], [1], [0, 0, 1, 1], [], []>} : vector<128x128xbf16>, vector<128x256xbf16>, vector<128x256xf32> -> vector<128x256xf32>
    %8 = arith.truncf %7 : vector<128x256xf32> to vector<128x256xbf16>
    %c0_7 = arith.constant 0 : index
    %c0_8 = arith.constant 0 : index
    %c0_9 = arith.constant 0 : index
    %9 = vector.load %arg4[%c0_7, %c0_8, %c0_9] : memref<12x256x256xbf16, #tpu.memory_space<vmem>>, vector<1x256x256xbf16>
    %10 = vector.shape_cast %9 : vector<1x256x256xbf16> to vector<256x256xbf16>
    %cst_10 = arith.constant dense<0.000000e+00> : vector<128x256xf32>
    %11 = tpu.matmul %6, %10, %cst_10 {dimension_numbers = #tpu.dot_dimension_numbers<[1], [0], [0], [1], [0, 0, 1, 1], [], []>} : vector<128x256xbf16>, vector<256x256xbf16>, vector<128x256xf32> -> vector<128x256xf32>
    %c1 = arith.constant 1 : index
    %c0_11 = arith.constant 0 : index
    %c0_12 = arith.constant 0 : index
    %12 = vector.load %arg4[%c1, %c0_11, %c0_12] : memref<12x256x256xbf16, #tpu.memory_space<vmem>>, vector<1x256x256xbf16>
    %13 = vector.shape_cast %12 : vector<1x256x256xbf16> to vector<256x256xbf16>
    %cst_13 = arith.constant dense<0.000000e+00> : vector<128x256xf32>
    %14 = tpu.matmul %4, %13, %cst_13 {dimension_numbers = #tpu.dot_dimension_numbers<[1], [0], [0], [1], [0, 0, 1, 1], [], []>} : vector<128x256xbf16>, vector<256x256xbf16>, vector<128x256xf32> -> vector<128x256xf32>
    %15 = arith.addf %11, %14 : vector<128x256xf32>
    %c2 = arith.constant 2 : index
    %c0_14 = arith.constant 0 : index
    %c0_15 = arith.constant 0 : index
    %16 = vector.load %arg4[%c2, %c0_14, %c0_15] : memref<12x256x256xbf16, #tpu.memory_space<vmem>>, vector<1x256x256xbf16>
    %17 = vector.shape_cast %16 : vector<1x256x256xbf16> to vector<256x256xbf16>
    %cst_16 = arith.constant dense<0.000000e+00> : vector<128x256xf32>
    %18 = tpu.matmul %8, %17, %cst_16 {dimension_numbers = #tpu.dot_dimension_numbers<[1], [0], [0], [1], [0, 0, 1, 1], [], []>} : vector<128x256xbf16>, vector<256x256xbf16>, vector<128x256xf32> -> vector<128x256xf32>
    %19 = arith.addf %15, %18 : vector<128x256xf32>
    %c0_17 = arith.constant 0 : index
    %c0_18 = arith.constant 0 : index
    %c0_19 = arith.constant 0 : index
    %20 = vector.load %arg5[%c0_17, %c0_18, %c0_19] : memref<4x1x256xf32, #tpu.memory_space<vmem>>, vector<1x1x256xf32>
    %21 = vector.shape_cast %20 : vector<1x1x256xf32> to vector<1x256xf32>
    %22 = vector.broadcast %21 : vector<1x256xf32> to vector<128x256xf32>
    %23 = arith.addf %19, %22 : vector<128x256xf32>
    %cst_20 = arith.constant 0.000000e+00 : f32
    %24 = vector.broadcast %cst_20 : f32 to vector<128x256xf32>
    %25 = arith.maximumf %23, %24 : vector<128x256xf32>
    %26 = arith.truncf %25 : vector<128x256xf32> to vector<128x256xbf16>
    %cst_21 = arith.constant dense<0.000000e+00> : vector<128x256xf32>
    %27 = tpu.matmul %2, %26, %cst_21 {dimension_numbers = #tpu.dot_dimension_numbers<[1], [0], [0], [1], [0, 0, 1, 1], [], []>} : vector<128x128xbf16>, vector<128x256xbf16>, vector<128x256xf32> -> vector<128x256xf32>
    %28 = arith.truncf %27 : vector<128x256xf32> to vector<128x256xbf16>
    %cst_22 = arith.constant dense<0.000000e+00> : vector<128x256xf32>
    %29 = tpu.matmul %3, %26, %cst_22 {dimension_numbers = #tpu.dot_dimension_numbers<[1], [0], [0], [1], [0, 0, 1, 1], [], []>} : vector<128x128xbf16>, vector<128x256xbf16>, vector<128x256xf32> -> vector<128x256xf32>
    %30 = arith.truncf %29 : vector<128x256xf32> to vector<128x256xbf16>
    %c3 = arith.constant 3 : index
    %c0_23 = arith.constant 0 : index
    %c0_24 = arith.constant 0 : index
    %31 = vector.load %arg4[%c3, %c0_23, %c0_24] : memref<12x256x256xbf16, #tpu.memory_space<vmem>>, vector<1x256x256xbf16>
    %32 = vector.shape_cast %31 : vector<1x256x256xbf16> to vector<256x256xbf16>
    %cst_25 = arith.constant dense<0.000000e+00> : vector<128x256xf32>
    %33 = tpu.matmul %28, %32, %cst_25 {dimension_numbers = #tpu.dot_dimension_numbers<[1], [0], [0], [1], [0, 0, 1, 1], [], []>} : vector<128x256xbf16>, vector<256x256xbf16>, vector<128x256xf32> -> vector<128x256xf32>
    %c4 = arith.constant 4 : index
    %c0_26 = arith.constant 0 : index
    %c0_27 = arith.constant 0 : index
    %34 = vector.load %arg4[%c4, %c0_26, %c0_27] : memref<12x256x256xbf16, #tpu.memory_space<vmem>>, vector<1x256x256xbf16>
    %35 = vector.shape_cast %34 : vector<1x256x256xbf16> to vector<256x256xbf16>
    %cst_28 = arith.constant dense<0.000000e+00> : vector<128x256xf32>
    %36 = tpu.matmul %26, %35, %cst_28 {dimension_numbers = #tpu.dot_dimension_numbers<[1], [0], [0], [1], [0, 0, 1, 1], [], []>} : vector<128x256xbf16>, vector<256x256xbf16>, vector<128x256xf32> -> vector<128x256xf32>
    %37 = arith.addf %33, %36 : vector<128x256xf32>
    %c5 = arith.constant 5 : index
    %c0_29 = arith.constant 0 : index
    %c0_30 = arith.constant 0 : index
    %38 = vector.load %arg4[%c5, %c0_29, %c0_30] : memref<12x256x256xbf16, #tpu.memory_space<vmem>>, vector<1x256x256xbf16>
    %39 = vector.shape_cast %38 : vector<1x256x256xbf16> to vector<256x256xbf16>
    %cst_31 = arith.constant dense<0.000000e+00> : vector<128x256xf32>
    %40 = tpu.matmul %30, %39, %cst_31 {dimension_numbers = #tpu.dot_dimension_numbers<[1], [0], [0], [1], [0, 0, 1, 1], [], []>} : vector<128x256xbf16>, vector<256x256xbf16>, vector<128x256xf32> -> vector<128x256xf32>
    %41 = arith.addf %37, %40 : vector<128x256xf32>
    %c1_32 = arith.constant 1 : index
    %c0_33 = arith.constant 0 : index
    %c0_34 = arith.constant 0 : index
    %42 = vector.load %arg5[%c1_32, %c0_33, %c0_34] : memref<4x1x256xf32, #tpu.memory_space<vmem>>, vector<1x1x256xf32>
    %43 = vector.shape_cast %42 : vector<1x1x256xf32> to vector<1x256xf32>
    %44 = vector.broadcast %43 : vector<1x256xf32> to vector<128x256xf32>
    %45 = arith.addf %41, %44 : vector<128x256xf32>
    %cst_35 = arith.constant 0.000000e+00 : f32
    %46 = vector.broadcast %cst_35 : f32 to vector<128x256xf32>
    %47 = arith.maximumf %45, %46 : vector<128x256xf32>
    %48 = arith.truncf %47 : vector<128x256xf32> to vector<128x256xbf16>
    %cst_36 = arith.constant dense<0.000000e+00> : vector<128x256xf32>
    %49 = tpu.matmul %2, %48, %cst_36 {dimension_numbers = #tpu.dot_dimension_numbers<[1], [0], [0], [1], [0, 0, 1, 1], [], []>} : vector<128x128xbf16>, vector<128x256xbf16>, vector<128x256xf32> -> vector<128x256xf32>
    %50 = arith.truncf %49 : vector<128x256xf32> to vector<128x256xbf16>
    %cst_37 = arith.constant dense<0.000000e+00> : vector<128x256xf32>
    %51 = tpu.matmul %3, %48, %cst_37 {dimension_numbers = #tpu.dot_dimension_numbers<[1], [0], [0], [1], [0, 0, 1, 1], [], []>} : vector<128x128xbf16>, vector<128x256xbf16>, vector<128x256xf32> -> vector<128x256xf32>
    %52 = arith.truncf %51 : vector<128x256xf32> to vector<128x256xbf16>
    %c6 = arith.constant 6 : index
    %c0_38 = arith.constant 0 : index
    %c0_39 = arith.constant 0 : index
    %53 = vector.load %arg4[%c6, %c0_38, %c0_39] : memref<12x256x256xbf16, #tpu.memory_space<vmem>>, vector<1x256x256xbf16>
    %54 = vector.shape_cast %53 : vector<1x256x256xbf16> to vector<256x256xbf16>
    %cst_40 = arith.constant dense<0.000000e+00> : vector<128x256xf32>
    %55 = tpu.matmul %50, %54, %cst_40 {dimension_numbers = #tpu.dot_dimension_numbers<[1], [0], [0], [1], [0, 0, 1, 1], [], []>} : vector<128x256xbf16>, vector<256x256xbf16>, vector<128x256xf32> -> vector<128x256xf32>
    %c7 = arith.constant 7 : index
    %c0_41 = arith.constant 0 : index
    %c0_42 = arith.constant 0 : index
    %56 = vector.load %arg4[%c7, %c0_41, %c0_42] : memref<12x256x256xbf16, #tpu.memory_space<vmem>>, vector<1x256x256xbf16>
    %57 = vector.shape_cast %56 : vector<1x256x256xbf16> to vector<256x256xbf16>
    %cst_43 = arith.constant dense<0.000000e+00> : vector<128x256xf32>
    %58 = tpu.matmul %48, %57, %cst_43 {dimension_numbers = #tpu.dot_dimension_numbers<[1], [0], [0], [1], [0, 0, 1, 1], [], []>} : vector<128x256xbf16>, vector<256x256xbf16>, vector<128x256xf32> -> vector<128x256xf32>
    %59 = arith.addf %55, %58 : vector<128x256xf32>
    %c8 = arith.constant 8 : index
    %c0_44 = arith.constant 0 : index
    %c0_45 = arith.constant 0 : index
    %60 = vector.load %arg4[%c8, %c0_44, %c0_45] : memref<12x256x256xbf16, #tpu.memory_space<vmem>>, vector<1x256x256xbf16>
    %61 = vector.shape_cast %60 : vector<1x256x256xbf16> to vector<256x256xbf16>
    %cst_46 = arith.constant dense<0.000000e+00> : vector<128x256xf32>
    %62 = tpu.matmul %52, %61, %cst_46 {dimension_numbers = #tpu.dot_dimension_numbers<[1], [0], [0], [1], [0, 0, 1, 1], [], []>} : vector<128x256xbf16>, vector<256x256xbf16>, vector<128x256xf32> -> vector<128x256xf32>
    %63 = arith.addf %59, %62 : vector<128x256xf32>
    %c2_47 = arith.constant 2 : index
    %c0_48 = arith.constant 0 : index
    %c0_49 = arith.constant 0 : index
    %64 = vector.load %arg5[%c2_47, %c0_48, %c0_49] : memref<4x1x256xf32, #tpu.memory_space<vmem>>, vector<1x1x256xf32>
    %65 = vector.shape_cast %64 : vector<1x1x256xf32> to vector<1x256xf32>
    %66 = vector.broadcast %65 : vector<1x256xf32> to vector<128x256xf32>
    %67 = arith.addf %63, %66 : vector<128x256xf32>
    %cst_50 = arith.constant 0.000000e+00 : f32
    %68 = vector.broadcast %cst_50 : f32 to vector<128x256xf32>
    %69 = arith.maximumf %67, %68 : vector<128x256xf32>
    %70 = arith.truncf %69 : vector<128x256xf32> to vector<128x256xbf16>
    %cst_51 = arith.constant dense<0.000000e+00> : vector<128x256xf32>
    %71 = tpu.matmul %2, %70, %cst_51 {dimension_numbers = #tpu.dot_dimension_numbers<[1], [0], [0], [1], [0, 0, 1, 1], [], []>} : vector<128x128xbf16>, vector<128x256xbf16>, vector<128x256xf32> -> vector<128x256xf32>
    %72 = arith.truncf %71 : vector<128x256xf32> to vector<128x256xbf16>
    %cst_52 = arith.constant dense<0.000000e+00> : vector<128x256xf32>
    %73 = tpu.matmul %3, %70, %cst_52 {dimension_numbers = #tpu.dot_dimension_numbers<[1], [0], [0], [1], [0, 0, 1, 1], [], []>} : vector<128x128xbf16>, vector<128x256xbf16>, vector<128x256xf32> -> vector<128x256xf32>
    %74 = arith.truncf %73 : vector<128x256xf32> to vector<128x256xbf16>
    %c9 = arith.constant 9 : index
    %c0_53 = arith.constant 0 : index
    %c0_54 = arith.constant 0 : index
    %75 = vector.load %arg4[%c9, %c0_53, %c0_54] : memref<12x256x256xbf16, #tpu.memory_space<vmem>>, vector<1x256x256xbf16>
    %76 = vector.shape_cast %75 : vector<1x256x256xbf16> to vector<256x256xbf16>
    %cst_55 = arith.constant dense<0.000000e+00> : vector<128x256xf32>
    %77 = tpu.matmul %72, %76, %cst_55 {dimension_numbers = #tpu.dot_dimension_numbers<[1], [0], [0], [1], [0, 0, 1, 1], [], []>} : vector<128x256xbf16>, vector<256x256xbf16>, vector<128x256xf32> -> vector<128x256xf32>
    %c10 = arith.constant 10 : index
    %c0_56 = arith.constant 0 : index
    %c0_57 = arith.constant 0 : index
    %78 = vector.load %arg4[%c10, %c0_56, %c0_57] : memref<12x256x256xbf16, #tpu.memory_space<vmem>>, vector<1x256x256xbf16>
    %79 = vector.shape_cast %78 : vector<1x256x256xbf16> to vector<256x256xbf16>
    %cst_58 = arith.constant dense<0.000000e+00> : vector<128x256xf32>
    %80 = tpu.matmul %70, %79, %cst_58 {dimension_numbers = #tpu.dot_dimension_numbers<[1], [0], [0], [1], [0, 0, 1, 1], [], []>} : vector<128x256xbf16>, vector<256x256xbf16>, vector<128x256xf32> -> vector<128x256xf32>
    %81 = arith.addf %77, %80 : vector<128x256xf32>
    %c11 = arith.constant 11 : index
    %c0_59 = arith.constant 0 : index
    %c0_60 = arith.constant 0 : index
    %82 = vector.load %arg4[%c11, %c0_59, %c0_60] : memref<12x256x256xbf16, #tpu.memory_space<vmem>>, vector<1x256x256xbf16>
    %83 = vector.shape_cast %82 : vector<1x256x256xbf16> to vector<256x256xbf16>
    %cst_61 = arith.constant dense<0.000000e+00> : vector<128x256xf32>
    %84 = tpu.matmul %74, %83, %cst_61 {dimension_numbers = #tpu.dot_dimension_numbers<[1], [0], [0], [1], [0, 0, 1, 1], [], []>} : vector<128x256xbf16>, vector<256x256xbf16>, vector<128x256xf32> -> vector<128x256xf32>
    %85 = arith.addf %81, %84 : vector<128x256xf32>
    %c3_62 = arith.constant 3 : index
    %c0_63 = arith.constant 0 : index
    %c0_64 = arith.constant 0 : index
    %86 = vector.load %arg5[%c3_62, %c0_63, %c0_64] : memref<4x1x256xf32, #tpu.memory_space<vmem>>, vector<1x1x256xf32>
    %87 = vector.shape_cast %86 : vector<1x1x256xf32> to vector<1x256xf32>
    %88 = vector.broadcast %87 : vector<1x256xf32> to vector<128x256xf32>
    %89 = arith.addf %85, %88 : vector<128x256xf32>
    %cst_65 = arith.constant 0.000000e+00 : f32
    %90 = vector.broadcast %cst_65 : f32 to vector<128x256xf32>
    %91 = arith.maximumf %89, %90 : vector<128x256xf32>
    %92 = vector.shape_cast %91 : vector<128x256xf32> to vector<16x8x256xf32>
    %c0_66 = arith.constant 0 : index
    %c0_67 = arith.constant 0 : index
    %c0_68 = arith.constant 0 : index
    %93 = vector.load %arg10[%c0_66, %c0_67, %c0_68] : memref<16x8x256xf32, #tpu.memory_space<vmem>>, vector<16x8x256xf32>
    tpu.vector_store %arg10[%c0_66, %c0_67, %c0_68], %92 {strides = array<i32>} : memref<16x8x256xf32, #tpu.memory_space<vmem>>, vector<16x8x256xf32>,
    %94 = arith.truncf %91 : vector<128x256xf32> to vector<128x256xbf16>
    %c0_69 = arith.constant 0 : index
    %c0_70 = arith.constant 0 : index
    %95 = vector.load %arg6[%c0_69, %c0_70] : memref<256x1024xbf16, #tpu.memory_space<vmem>>, vector<256x1024xbf16>
    %cst_71 = arith.constant dense<0.000000e+00> : vector<128x1024xf32>
    %96 = tpu.matmul %94, %95, %cst_71 {dimension_numbers = #tpu.dot_dimension_numbers<[1], [0], [0], [1], [0, 0, 1, 1], [], []>} : vector<128x256xbf16>, vector<256x1024xbf16>, vector<128x1024xf32> -> vector<128x1024xf32>
    %c0_72 = arith.constant 0 : index
    %c0_73 = arith.constant 0 : index
    %97 = vector.load %arg7[%c0_72, %c0_73] : memref<1x1024xf32, #tpu.memory_space<vmem>>, vector<1x1024xf32>
    %98 = vector.broadcast %97 : vector<1x1024xf32> to vector<128x1024xf32>
    %99 = arith.addf %96, %98 : vector<128x1024xf32>
    %cst_74 = arith.constant 0.000000e+00 : f32
    %100 = vector.broadcast %cst_74 : f32 to vector<128x1024xf32>
    %101 = arith.maximumf %99, %100 : vector<128x1024xf32>
    %102 = arith.truncf %101 : vector<128x1024xf32> to vector<128x1024xbf16>
    %c0_75 = arith.constant 0 : index
    %c0_76 = arith.constant 0 : index
    %103 = vector.load %arg8[%c0_75, %c0_76] : memref<1024x256xbf16, #tpu.memory_space<vmem>>, vector<1024x256xbf16>
    %cst_77 = arith.constant dense<0.000000e+00> : vector<128x256xf32>
    %104 = tpu.matmul %102, %103, %cst_77 {dimension_numbers = #tpu.dot_dimension_numbers<[1], [0], [0], [1], [0, 0, 1, 1], [], []>} : vector<128x1024xbf16>, vector<1024x256xbf16>, vector<128x256xf32> -> vector<128x256xf32>
    %c0_78 = arith.constant 0 : index
    %c0_79 = arith.constant 0 : index
    %105 = vector.load %arg9[%c0_78, %c0_79] : memref<1x256xf32, #tpu.memory_space<vmem>>, vector<1x256xf32>
    %106 = vector.broadcast %105 : vector<1x256xf32> to vector<128x256xf32>
    %107 = arith.addf %104, %106 : vector<128x256xf32>
    %108 = vector.shape_cast %107 : vector<128x256xf32> to vector<16x8x256xf32>
    %c0_80 = arith.constant 0 : index
    %c0_81 = arith.constant 0 : index
    %c0_82 = arith.constant 0 : index
    %109 = vector.load %arg11[%c0_80, %c0_81, %c0_82] : memref<16x8x256xf32, #tpu.memory_space<vmem>>, vector<16x8x256xf32>
    tpu.vector_store %arg11[%c0_80, %c0_81, %c0_82], %108 {strides = array<i32>} : memref<16x8x256xf32, #tpu.memory_space<vmem>>, vector<16x8x256xf32>,
    return
  }
  func.func @transform_0(%arg0: i32) -> (i32, i32, i32) {
    %c0_i32 = arith.constant 0 : i32
    %c0_i32_0 = arith.constant 0 : i32
    %c0_i32_1 = arith.constant 0 : i32
    return %arg0, %c0_i32, %c0_i32_0 : i32, i32, i32
  }
  func.func @transform_1(%arg0: i32) -> (i32, i32) {
    %c0_i32 = arith.constant 0 : i32
    %c0_i32_0 = arith.constant 0 : i32
    %c0_i32_1 = arith.constant 0 : i32
    return %c0_i32, %c0_i32_0 : i32, i32
  }
  func.func @transform_2(%arg0: i32) -> (i32, i32) {
    %c0_i32 = arith.constant 0 : i32
    %c0_i32_0 = arith.constant 0 : i32
    %c0_i32_1 = arith.constant 0 : i32
    return %c0_i32, %c0_i32_0 : i32, i32
  }
  func.func @transform_3(%arg0: i32) -> (i32, i32, i32) {
    %c0_i32 = arith.constant 0 : i32
    %c0_i32_0 = arith.constant 0 : i32
    %c0_i32_1 = arith.constant 0 : i32
    %c0_i32_2 = arith.constant 0 : i32
    return %c0_i32, %c0_i32_0, %c0_i32_1 : i32, i32, i32
  }
  func.func @transform_4(%arg0: i32) -> (i32, i32, i32) {
    %c0_i32 = arith.constant 0 : i32
    %c0_i32_0 = arith.constant 0 : i32
    %c0_i32_1 = arith.constant 0 : i32
    %c0_i32_2 = arith.constant 0 : i32
    return %c0_i32, %c0_i32_0, %c0_i32_1 : i32, i32, i32
  }
  func.func @transform_5(%arg0: i32) -> (i32, i32) {
    %c0_i32 = arith.constant 0 : i32
    %c0_i32_0 = arith.constant 0 : i32
    %c0_i32_1 = arith.constant 0 : i32
    return %c0_i32, %c0_i32_0 : i32, i32
  }
  func.func @transform_6(%arg0: i32) -> (i32, i32) {
    %c0_i32 = arith.constant 0 : i32
    %c0_i32_0 = arith.constant 0 : i32
    %c0_i32_1 = arith.constant 0 : i32
    return %c0_i32, %c0_i32_0 : i32, i32
  }
  func.func @transform_7(%arg0: i32) -> (i32, i32) {
    %c0_i32 = arith.constant 0 : i32
    %c0_i32_0 = arith.constant 0 : i32
    %c0_i32_1 = arith.constant 0 : i32
    return %c0_i32, %c0_i32_0 : i32, i32
  }
  func.func @transform_8(%arg0: i32) -> (i32, i32) {
    %c0_i32 = arith.constant 0 : i32
    %c0_i32_0 = arith.constant 0 : i32
    %c0_i32_1 = arith.constant 0 : i32
    return %c0_i32, %c0_i32_0 : i32, i32
  }
  func.func @transform_9(%arg0: i32) -> (i32, i32, i32) {
    %c0_i32 = arith.constant 0 : i32
    %c0_i32_0 = arith.constant 0 : i32
    %c0_i32_1 = arith.constant 0 : i32
    return %arg0, %c0_i32, %c0_i32_0 : i32, i32, i32
  }
  func.func @transform_10(%arg0: i32) -> (i32, i32, i32) {
    %c0_i32 = arith.constant 0 : i32
    %c0_i32_0 = arith.constant 0 : i32
    %c0_i32_1 = arith.constant 0 : i32
    return %arg0, %c0_i32, %c0_i32_0 : i32, i32, i32
  }
}

</mosaic_0001>

<bundles_post_ra>
// kernel: mul.4
= control target key start
LH: loop header
LB: loop body
LE: loop exit
PB: predicated region body
PF: predicated region fallthrough
CT: control target
= control target key end

     0   :  { %vm132_vm0 = vcmask 1047556   ;;  %s338_s15 = smov 96   ;;  %s339_s30 = smov 64   ;;  %vm134_vm1 = vcmask 261120   ;;  %vm171_vm2 = vcmask 1048320   ;;  %vm214_vm3 = vcmask 785920   ;;  %s535_s0 = inlined_call_operand.vmem [shape: f32[32,4,32], index: 0, kind: input, shape index: {}]   ;;  %s536_s1 = inlined_call_operand.vmem [shape: f32[32,128], index: 1, kind: output, shape index: {}]  }
   0x1   :  { %v316_v0 = vld [vmem:[%s535_s0 + $0x1c] sm:$0xf]  ;;  %v317_v1 = vld [vmem:[%s535_s0 + $0x18] sm:$0xf]  ;;  %v318_v2 = vld [vmem:[%s535_s0 + $0x14] sm:$0xf] }
   0x2   :  { %103 = vst [vmem:[#allocation0 + $0x38] sm:$0xf] %v316_v0  ;;  %v319_v3 = vld [vmem:[%s535_s0 + $0x10] sm:$0xf]  ;;  %v320_v4 = vld [vmem:[%s535_s0 + $0xc] sm:$0xf] }
   0x3   :  { %107 = vst [vmem:[#allocation0 + $0x30] sm:$0xf] %v317_v1  ;;  %v321_v5 = vld [vmem:[%s535_s0 + $0x8] sm:$0xf]  ;;  %v322_v6 = vld [vmem:[%s535_s0 + $0x4] sm:$0xf] }
   0x4   :  { %111 = vst [vmem:[#allocation0 + $0x28] sm:$0xf] %v318_v2  ;;  %v128_v7 = vld [vmem:[%s535_s0] sm:$0xf]  ;;  %v300_v8 = vld [vmem:[%s535_s0 + $0x5c] sm:$0xf] }
   0x5   :  { %115 = vst [vmem:[#allocation0 + $0x20] sm:$0xf] %v319_v3  ;;  %v301_v9 = vld [vmem:[%s535_s0 + $0x58] sm:$0xf]  ;;  %v302_v10 = vld [vmem:[%s535_s0 + $0x54] sm:$0xf] }
   0x6   :  { %119 = vst [vmem:[#allocation0 + $0x18] sm:$0xf] %v320_v4  ;;  %v303_v11 = vld [vmem:[%s535_s0 + $0x50] sm:$0xf]  ;;  %v304_v12 = vld [vmem:[%s535_s0 + $0x4c] sm:$0xf] }
   0x7   :  { %123 = vst [vmem:[#allocation0 + $0x10] sm:$0xf] %v321_v5  ;;  %v305_v13 = vld [vmem:[%s535_s0 + $0x48] sm:$0xf]  ;;  %v306_v14 = vld [vmem:[%s535_s0 + $0x44] sm:$0xf] }
   0x8   :  { %127 = vst [vmem:[#allocation0 + $0x8] sm:$0xf] %v322_v6  ;;  %v307_v15 = vld [vmem:[%s535_s0 + $0x40] sm:$0xf]  ;;  %v308_v17 = vld [vmem:[%s535_s0 + $0x3c] sm:$0xf] }
   0x9   :  { %129 = vst [vmem:[#allocation0] sm:$0xf] %v128_v7  ;;  %v309_v18 = vld [vmem:[%s535_s0 + $0x38] sm:$0xf]  ;;  %v310_v21 = vld [vmem:[%s535_s0 + $0x34] sm:$0xf] }
   0xa   :  { %39 = vst [vmem:[#allocation0 + $0xb8] sm:$0xf] %v300_v8  ;;  %v311_v22 = vld [vmem:[%s535_s0 + $0x30] sm:$0xf]  ;;  %v312_v23 = vld [vmem:[%s535_s0 + $0x2c] sm:$0xf] }
   0xb   :  { %43 = vst [vmem:[#allocation0 + $0xb0] sm:$0xf] %v301_v9  ;;  %v313_v24 = vld [vmem:[%s535_s0 + $0x28] sm:$0xf]  ;;  %v314_v25 = vld [vmem:[%s535_s0 + $0x24] sm:$0xf] }
   0xc   :  { %47 = vst [vmem:[#allocation0 + $0xa8] sm:$0xf] %v302_v10  ;;  %v166_v16 = vld [vmem:[#allocation0 + $0x3] ss:$8 sm:$0xf0]   ;;  %vm257_vm4 = vcmask 523520  }
   0xd   :  { %51 = vst [vmem:[#allocation0 + $0xa0] sm:$0xf] %v303_v11  ;;  %v315_v26 = vld [vmem:[%s535_s0 + $0x20] sm:$0xf]  ;;  %v292_v30 = vld [vmem:[%s535_s0 + $0x7c] sm:$0xf] }
   0xe   :  { %55 = vst [vmem:[#allocation0 + $0x98] sm:$0xf] %v304_v12  ;;  %v209_v29 = vld [vmem:[#allocation0 + $0x2] ss:$8 sm:$0xf0]  }
   0xf   :  { %59 = vst [vmem:[#allocation0 + $0x90] sm:$0xf] %v305_v13  ;;  %v293_v31 = vld [vmem:[%s535_s0 + $0x78] sm:$0xf]  ;;  %v294_v35 = vld [vmem:[%s535_s0 + $0x74] sm:$0xf] }
  0x10   :  { %v164_v19 = vld [vmem:[#allocation0 + $0x3] ss:$8 sm:$0xf]   ;;  %63 = vst [vmem:[#allocation0 + $0x88] sm:$0xf] %v306_v14 }
  0x11   :  { %v168_v20 = vsel %vm132_vm0, %v166_v16, %v164_v19  ;;  %67 = vst [vmem:[#allocation0 + $0x80] sm:$0xf] %v307_v15  ;;  %v207_v27 = vld [vmem:[#allocation0 + $0x2] ss:$8 sm:$0xf]  }
  0x12   :  { %169 = vrot.lane.b32.xlu0 %v168_v20, %s338_s15  ;;  %71 = vst [vmem:[#allocation0 + $0x78] sm:$0xf] %v308_v17  ;;  %v211_v32 = vsel %vm132_vm0, %v209_v29, %v207_v27  ;;  %v295_v36 = vld [vmem:[%s535_s0 + $0x70] sm:$0xf]  ;;  %v296_v37 = vld [vmem:[%s535_s0 + $0x6c] sm:$0xf] }
  0x13   :  { %75 = vst [vmem:[#allocation0 + $0x70] sm:$0xf] %v309_v18  ;;  %212 = vrot.lane.b32.xlu2 %v211_v32, %s339_s30  ;;  %v297_v38 = vld [vmem:[%s535_s0 + $0x68] sm:$0xf]  ;;  %v298_v39 = vld [vmem:[%s535_s0 + $0x64] sm:$0xf] }
  0x14   :  { %79 = vst [vmem:[#allocation0 + $0x68] sm:$0xf] %v310_v21  ;;  %v187_v28 = vld [vmem:[#allocation0 + $0x83] ss:$8 sm:$0xf0]  }
  0x15   :  { %83 = vst [vmem:[#allocation0 + $0x60] sm:$0xf] %v311_v22  ;;  %v299_v40 = vld [vmem:[%s535_s0 + $0x60] sm:$0xf]  ;;  %s340_s0 = smov 32  }
  0x16   :  { %87 = vst [vmem:[#allocation0 + $0x58] sm:$0xf] %v312_v23  ;;  %v230_v48 = vld [vmem:[#allocation0 + $0x82] ss:$8 sm:$0xf0]  }
  0x17   :  { %91 = vst [vmem:[#allocation0 + $0x50] sm:$0xf] %v313_v24  ;;  %v250_v49 = vld [vmem:[#allocation0 + $0x1] ss:$8 sm:$0xf]  }
  0x18   :  { %v185_v33 = vld [vmem:[#allocation0 + $0x83] ss:$8 sm:$0xf]   ;;  %95 = vst [vmem:[#allocation0 + $0x48] sm:$0xf] %v314_v25 }
  0x19   :  { %v189_v34 = vsel %vm132_vm0, %v187_v28, %v185_v33  ;;  %99 = vst [vmem:[#allocation0 + $0x40] sm:$0xf] %v315_v26  ;;  %v228_v47 = vld [vmem:[#allocation0 + $0x82] ss:$8 sm:$0xf]  }
  0x1a   :  { %190 = vrot.lane.b32.xlu1 %v189_v34, %s338_s15  ;;  %7 = vst [vmem:[#allocation0 + $0xf8] sm:$0xf] %v292_v30  ;;  %v252_v51 = vld [vmem:[#allocation0 + $0x1] ss:$8 sm:$0xf0]   ;;  %v232_v52 = vsel %vm132_vm0, %v230_v48, %v228_v47 }
  0x1b   :  { %11 = vst [vmem:[#allocation0 + $0xf0] sm:$0xf] %v293_v31  ;;  %v254_v55 = vsel %vm132_vm0, %v252_v51, %v250_v49  ;;  %v271_v1 = vld [vmem:[#allocation0 + $0x81] ss:$8 sm:$0xf]  }
  0x1c   :  { %15 = vst [vmem:[#allocation0 + $0xe8] sm:$0xf] %v294_v35  ;;  %v176_v41 = vld [vmem:[#allocation0 + $0x43] ss:$8 sm:$0xf0]  }
  0x1d   :  { %19 = vst [vmem:[#allocation0 + $0xe0] sm:$0xf] %v295_v36  ;;  %v219_v42 = vld [vmem:[#allocation0 + $0x42] ss:$8 sm:$0xf0]  }
  0x1e   :  { %23 = vst [vmem:[#allocation0 + $0xd8] sm:$0xf] %v296_v37  ;;  %v262_v57 = vld [vmem:[#allocation0 + $0x41] ss:$8 sm:$0xf0]  }
  0x1f   :  { %27 = vst [vmem:[#allocation0 + $0xd0] sm:$0xf] %v297_v38  ;;  %v273_v2 = vld [vmem:[#allocation0 + $0x81] ss:$8 sm:$0xf0]  }
  0x20   :  { %v174_v43 = vld [vmem:[#allocation0 + $0x43] ss:$8 sm:$0xf]   ;;  %31 = vst [vmem:[#allocation0 + $0xc8] sm:$0xf] %v298_v39  ;;  %v275_v3 = vsel %vm132_vm0, %v273_v2, %v271_v1 }
  0x21   :  { %v178_v44 = vsel %vm132_vm0, %v176_v41, %v174_v43  ;;  %35 = vst [vmem:[#allocation0 + $0xc0] sm:$0xf] %v299_v40  ;;  %v217_v45 = vld [vmem:[#allocation0 + $0x42] ss:$8 sm:$0xf]  }
  0x22   :  { %179 = vrot.lane.b32.xlu0 %v178_v44, %s338_s15  ;;  %v221_v46 = vsel %vm132_vm0, %v219_v42, %v217_v45  ;;  %v260_v56 = vld [vmem:[#allocation0 + $0x41] ss:$8 sm:$0xf]   ;;  %v130_v4 = vld [vmem:[#allocation0] ss:$8 sm:$0xf]  }
  0x23   :  { %222 = vrot.lane.b32.xlu2 %v221_v46, %s339_s30  ;;  %v264_v63 = vsel %vm132_vm0, %v262_v57, %v260_v56  ;;  %v131_v5 = vld [vmem:[#allocation0] ss:$8 sm:$0xf0]  }
  0x24   :  { %v198_v50 = vld [vmem:[#allocation0 + $0xc3] ss:$8 sm:$0xf0]   ;;  %v241_v59 = vld [vmem:[#allocation0 + $0xc2] ss:$8 sm:$0xf0]   ;;  %v133_v6 = vsel %vm132_vm0, %v131_v5, %v130_v4 }
  0x25   :  { %v284_v61 = vld [vmem:[#allocation0 + $0xc1] ss:$8 sm:$0xf0]   ;;  %135 = vst.msk [vmem:[%s536_s1] sm:$0xff] %vm134_vm1, %v133_v6  }
  0x26   :  { %v146_v7 = vld [vmem:[#allocation0 + $0x80] ss:$8 sm:$0xf]  }
  0x27   :  { %v148_v8 = vld [vmem:[#allocation0 + $0x80] ss:$8 sm:$0xf0]  }
  0x28   :  { %v196_v53 = vld [vmem:[#allocation0 + $0xc3] ss:$8 sm:$0xf]   ;;  %v239_v58 = vld [vmem:[#allocation0 + $0xc2] ss:$8 sm:$0xf]   ;;  %v150_v9 = vsel %vm132_vm0, %v148_v8, %v146_v7 }
  0x29   :  { %v200_v54 = vsel %vm132_vm0, %v198_v50, %v196_v53  ;;  %v282_v60 = vld [vmem:[#allocation0 + $0xc1] ss:$8 sm:$0xf]   ;;  %v243_v62 = vsel %vm132_vm0, %v241_v59, %v239_v58  ;;  %324 = vst.msk [vmem:[%s536_s1 + $0x10] sm:$0xff] %vm134_vm1, %v150_v9  }
  0x2a   :  { %201 = vrot.lane.b32.xlu1 %v200_v54, %s338_s15  ;;  %233 = vrot.lane.b32.xlu0 %v232_v52, %s339_s30  ;;  %v286_v0 = vsel %vm132_vm0, %v284_v61, %v282_v60  ;;  %v137_v11 = vld [vmem:[#allocation0 + $0x40] ss:$8 sm:$0xf]  }
  0x2b   :  { %255 = vrot.lane.b32.xlu2 %v254_v55, %s340_s0  ;;  %v139_v12 = vld [vmem:[#allocation0 + $0x40] ss:$8 sm:$0xf0]  }
  0x2c   :  { %v141_v13 = vsel %vm132_vm0, %v139_v12, %v137_v11  ;;  %v155_v14 = vld [vmem:[#allocation0 + $0xc0] ss:$8 sm:$0xf]  }
  0x2d   :  { %323 = vst.msk [vmem:[%s536_s1 + $0x8] sm:$0xff] %vm134_vm1, %v141_v13   ;;  %v157_v15 = vld [vmem:[#allocation0 + $0xc0] ss:$8 sm:$0xf0]  }
  0x2e   :  { %v159_v16 = vsel %vm132_vm0, %v157_v15, %v155_v14 }
  0x2f   :  { %325 = vst.msk [vmem:[%s536_s1 + $0x18] sm:$0xff] %vm134_vm1, %v159_v16  }
  0x32   :  { %244 = vrot.lane.b32.xlu1 %v243_v62, %s339_s30  ;;  %265 = vrot.lane.b32.xlu0 %v264_v63, %s340_s0 }
  0x33   :  { %287 = vrot.lane.b32.xlu2 %v286_v0, %s340_s0 }
  0x3a   :  { %276 = vrot.lane.b32.xlu1 %v275_v3, %s340_s0 }
  0x6d   :  { %v213_v10 = vpop.permute.xlu2 %212  }
  0x7d   :  { %v223_v17 = vpop.permute.xlu2 %222  }
  0x84   :  { %v170_v18 = vpop.permute.xlu0 %169  }
  0x85   :  { %172 = vst.msk [vmem:[%s536_s1] sm:$0xff] %vm171_vm2, %v170_v18   ;;  %v256_v19 = vpop.permute.xlu2 %255  }
  0x86   :  { %215 = vst.msk [vmem:[%s536_s1] sm:$0xff] %vm214_vm3, %v213_v10  }
  0x87   :  { %258 = vst.msk [vmem:[%s536_s1] sm:$0xff] %vm257_vm4, %v256_v19  }
  0x8c   :  { %v191_v20 = vpop.permute.xlu1 %190  }
  0x8d   :  { %327 = vst.msk [vmem:[%s536_s1 + $0x10] sm:$0xff] %vm171_vm2, %v191_v20   ;;  %v288_v21 = vpop.permute.xlu2 %287  }
  0x94   :  { %v180_v22 = vpop.permute.xlu0 %179  }
  0x95   :  { %326 = vst.msk [vmem:[%s536_s1 + $0x8] sm:$0xff] %vm171_vm2, %v180_v22  }
  0x96   :  { %329 = vst.msk [vmem:[%s536_s1 + $0x8] sm:$0xff] %vm214_vm3, %v223_v17  }
  0x9c   :  { %v202_v23 = vpop.permute.xlu1 %201   ;;  %v234_v24 = vpop.permute.xlu0 %233  }
  0x9d   :  { %328 = vst.msk [vmem:[%s536_s1 + $0x18] sm:$0xff] %vm171_vm2, %v202_v23  }
  0x9e   :  { %330 = vst.msk [vmem:[%s536_s1 + $0x10] sm:$0xff] %vm214_vm3, %v234_v24  }
  0xa4   :  { %v245_v25 = vpop.permute.xlu1 %244   ;;  %v266_v26 = vpop.permute.xlu0 %265  }
  0xa5   :  { %331 = vst.msk [vmem:[%s536_s1 + $0x18] sm:$0xff] %vm214_vm3, %v245_v25  }
  0xa6   :  { %332 = vst.msk [vmem:[%s536_s1 + $0x8] sm:$0xff] %vm257_vm4, %v266_v26  }
  0xa7   :  { %334 = vst.msk [vmem:[%s536_s1 + $0x18] sm:$0xff] %vm257_vm4, %v288_v21  }
  0xac   :  { %v277_v27 = vpop.permute.xlu1 %276  }
  0xad   :  { %333 = vst.msk [vmem:[%s536_s1 + $0x10] sm:$0xff] %vm257_vm4, %v277_v27  }

// kernel: mask_head_pallas.1
= control target key start
LH: loop header
LB: loop body
LE: loop exit
PB: predicated region body
PF: predicated region fallthrough
CT: control target
= control target key end

     0   :  { %s13867_s13 = smov 0   ;;  %s20715_s0 = inlined_call_operand.vmem [shape: f32[64,8,256], index: 0, kind: input, shape index: {}]   ;;  %s20716_s1 = inlined_call_operand.vmem [shape: bf16[128,128], index: 1, kind: input, shape index: {}]   ;;  %s20717_s2 = inlined_call_operand.vmem [shape: bf16[128,128], index: 2, kind: input, shape index: {}]   ;;  %s20718_s3 = inlined_call_operand.vmem [shape: bf16[12,256,256], index: 3, kind: input, shape index: {}]   ;;  %s20719_s4 = inlined_call_operand.vmem [shape: f32[4,1,256], index: 4, kind: input, shape index: {}]   ;;  %s20720_s5 = inlined_call_operand.vmem [shape: bf16[256,1024], index: 5, kind: input, shape index: {}]   ;;  %s20721_s6 = inlined_call_operand.vmem [shape: f32[1,1024], index: 6, kind: input, shape index: {}]   ;;  %s20722_s7 = inlined_call_operand.vmem [shape: bf16[1024,256], index: 7, kind: input, shape index: {}]   ;;  %s20723_s8 = inlined_call_operand.vmem [shape: f32[1,256], index: 8, kind: input, shape index: {}]   ;;  %s20724_s9 = inlined_call_operand.vmem [shape: f32[64,8,256], index: 9, kind: output, shape index: {0}]   ;;  %s20725_s10 = inlined_call_operand.vmem [shape: f32[64,8,256], index: 10, kind: output, shape index: {1}]  }
   0x1 LB: > { %s10092_s14 = sadd.s32 4294967295, %s13810_s13   ;;  %p10096_p0 = scmp.ge.s32.totalorder %s13810_s13, 1  ;;  %s13810_s13 = sphi %s13867_s13, %s21_s13  }
   0x2   : > { %p317_p1 = scmp.lt.s32.totalorder %s13810_s13, 5 }
   0x4   : > { %p318_p2 = pnand %p10096_p0, %p317_p1 }
   0x6   : > { %321 = sbr.rel (%p318_p2) target bundleno = 3768 (0xeb8), region = 56 }
   0xb   : > { %s10097_s15 = sshll.u32 %s10092_s14, 4  ;;  %v13090_v48 = vld [vmem:[%s20716_s1] sm:$0xff]  ;;  %v13091_v50 = vld [vmem:[%s20716_s1 + $0x8] sm:$0xff]  ;;  %v13092_v52 = vld [vmem:[%s20716_s1 + $0x10] sm:$0xff] }
   0xc   : > { %p364_p3 = scmp.lt.s32.totalorder %s10097_s15, 63  ;;  %v13098_v49 = vld [vmem:[%s20717_s2] sm:$0xff]  ;;  %v13099_v51 = vld [vmem:[%s20717_s2 + $0x8] sm:$0xff]  ;;  %v13100_v53 = vld [vmem:[%s20717_s2 + $0x10] sm:$0xff] }
   0xd   : > { %v13093_v54 = vld [vmem:[%s20716_s1 + $0x18] sm:$0xff]  ;;  %v13094_v56 = vld [vmem:[%s20716_s1 + $0x20] sm:$0xff]  ;;  %v10260_v58 = vld [vmem:[%s20718_s3 + $0x170] sm:$0xf] }
   0xe   : > { %s20861_s15 = smov (!%p364_p3, %s10097_s15), 63  ;;  %v13101_v55 = vld [vmem:[%s20717_s2 + $0x18] sm:$0xff]  ;;  %v13102_v57 = vld [vmem:[%s20717_s2 + $0x20] sm:$0xff]  ;;  %v10324_v61 = vld [vmem:[%s20718_s3 + $0x1f0] sm:$0xf] }
   0xf   : > { %s13875_s16 = sshll.u32 %s20861_s15, 4  ;;  %v13153_v59 = vld [vmem:[%s20718_s3 + $0x174] sm:$0xf0]  ;;  %v13152_v63 = vld [vmem:[%s20718_s3 + $0x174] sm:$0xf] }
  0x10   : > { %s13881_s19 = scalar_lea.vmem %s20715_s0, %s13875_s16  ;;  %v10261_v60 = vor.u32 %v13153_v59, %v10260_v58  ;;  %v13169_v62 = vld [vmem:[%s20718_s3 + $0x1f4] sm:$0xf0]  ;;  %s18443_s22 = scalar_lea.vmem %s20724_s9, %s13875_s16 }
  0x11   : > { %v412_v0 = vld [vmem:[%s13881_s19 + $0xe0] sm:$0xff]  ;;  %v414_v1 = vld [vmem:[%s13881_s19 + $0xf0] sm:$0xff]  ;;  %v413_v2 = vld [vmem:[%s13881_s19 + $0xe8] sm:$0xff]  ;;  %s20342_s12 = scalar_lea.vmem %s20725_s10, %s13875_s16 }
  0x12   : > { %v13886_v3 = vpack.c.bf16 %v414_v1, %v412_v0  ;;  %v415_v4 = vld [vmem:[%s13881_s19 + $0xf8] sm:$0xff]  ;;  %v408_v5 = vld [vmem:[%s13881_s19 + $0xc0] sm:$0xff]  ;;  %v410_v6 = vld [vmem:[%s13881_s19 + $0xd0] sm:$0xff]  ;;  %v10325_v0 = vor.u32 %v13169_v62, %v10324_v61 }
  0x13   : > { %v13891_v7 = vpack.c.bf16 %v415_v4, %v413_v2  ;;  %v409_v8 = vld [vmem:[%s13881_s19 + $0xc8] sm:$0xff]  ;;  %v411_v9 = vld [vmem:[%s13881_s19 + $0xd8] sm:$0xff]  ;;  %v13897_v10 = vpack.c.bf16 %v410_v6, %v408_v5  ;;  %v404_v12 = vld [vmem:[%s13881_s19 + $0xa0] sm:$0xff] }
  0x14   : > { %512 = vmatpush.bf16.msra.mxu0 %v13886_v3  ;;  %674 = vmatpush.bf16.msra.mxu2 %v13886_v3  ;;  %v13901_v11 = vpack.c.bf16 %v411_v9, %v409_v8  ;;  %v406_v13 = vld [vmem:[%s13881_s19 + $0xb0] sm:$0xff]  ;;  %v405_v14 = vld [vmem:[%s13881_s19 + $0xa8] sm:$0xff]  ;;  %v407_v15 = vld [vmem:[%s13881_s19 + $0xb8] sm:$0xff] }
  0x15   : > { %561 = vmatpush.bf16.msra.mxu1 %v13891_v7  ;;  %723 = vmatpush.bf16.msra.mxu3 %v13891_v7  ;;  %v13909_v16 = vpack.c.bf16 %v406_v13, %v404_v12  ;;  %v13913_v17 = vpack.c.bf16 %v407_v15, %v405_v14  ;;  %v400_v18 = vld [vmem:[%s13881_s19 + $0x80] sm:$0xff]  ;;  %v402_v19 = vld [vmem:[%s13881_s19 + $0x90] sm:$0xff]  ;;  %v401_v20 = vld [vmem:[%s13881_s19 + $0x88] sm:$0xff] }
  0x16   : > { %v403_v21 = vld [vmem:[%s13881_s19 + $0x98] sm:$0xff]  ;;  %v13921_v22 = vpack.c.bf16 %v402_v19, %v400_v18  ;;  %v396_v24 = vld [vmem:[%s13881_s19 + $0x60] sm:$0xff]  ;;  %v398_v25 = vld [vmem:[%s13881_s19 + $0x70] sm:$0xff] }
  0x17   : > { %v13925_v23 = vpack.c.bf16 %v403_v21, %v401_v20  ;;  %v397_v26 = vld [vmem:[%s13881_s19 + $0x68] sm:$0xff]  ;;  %v399_v27 = vld [vmem:[%s13881_s19 + $0x78] sm:$0xff]  ;;  %v13933_v28 = vpack.c.bf16 %v398_v25, %v396_v24  ;;  %v392_v30 = vld [vmem:[%s13881_s19 + $0x40] sm:$0xff] }
  0x18   : > { %513 = vmatpush.bf16.msra.mxu0 %v13897_v10  ;;  %675 = vmatpush.bf16.msra.mxu2 %v13897_v10  ;;  %v13937_v29 = vpack.c.bf16 %v399_v27, %v397_v26  ;;  %v394_v31 = vld [vmem:[%s13881_s19 + $0x50] sm:$0xff]  ;;  %v393_v32 = vld [vmem:[%s13881_s19 + $0x48] sm:$0xff]  ;;  %v395_v33 = vld [vmem:[%s13881_s19 + $0x58] sm:$0xff] }
  0x19   : > { %562 = vmatpush.bf16.msra.mxu1 %v13901_v11  ;;  %724 = vmatpush.bf16.msra.mxu3 %v13901_v11  ;;  %v13945_v34 = vpack.c.bf16 %v394_v31, %v392_v30  ;;  %v13949_v35 = vpack.c.bf16 %v395_v33, %v393_v32  ;;  %v388_v36 = vld [vmem:[%s13881_s19 + $0x20] sm:$0xff]  ;;  %v390_v37 = vld [vmem:[%s13881_s19 + $0x30] sm:$0xff]  ;;  %v389_v38 = vld [vmem:[%s13881_s19 + $0x28] sm:$0xff] }
  0x1a   : > { %v391_v39 = vld [vmem:[%s13881_s19 + $0x38] sm:$0xff]  ;;  %v13957_v40 = vpack.c.bf16 %v390_v37, %v388_v36  ;;  %v384_v42 = vld [vmem:[%s13881_s19] sm:$0xff]  ;;  %v386_v43 = vld [vmem:[%s13881_s19 + $0x10] sm:$0xff] }
  0x1b   : > { %v13961_v41 = vpack.c.bf16 %v391_v39, %v389_v38  ;;  %v385_v44 = vld [vmem:[%s13881_s19 + $0x8] sm:$0xff]  ;;  %v387_v45 = vld [vmem:[%s13881_s19 + $0x18] sm:$0xff]  ;;  %v13969_v46 = vpack.c.bf16 %v386_v43, %v384_v42  ;;  %v13168_v2 = vld [vmem:[%s20718_s3 + $0x1f4] sm:$0xf] }
  0x1c   : > { %514 = vmatpush.bf16.msra.mxu0 %v13909_v16  ;;  %676 = vmatpush.bf16.msra.mxu2 %v13909_v16  ;;  %v13973_v47 = vpack.c.bf16 %v387_v45, %v385_v44  ;;  %v10262_v1 = vld [vmem:[%s20718_s3 + $0x178] sm:$0xf0]  ;;  %v10252_v8 = vld [vmem:[%s20718_s3 + $0x160] sm:$0xf]  ;;  %v13151_v9 = vld [vmem:[%s20718_s3 + $0x164] sm:$0xf0] }
  0x1d   : > { %563 = vmatpush.bf16.msra.mxu1 %v13913_v17  ;;  %725 = vmatpush.bf16.msra.mxu3 %v13913_v17  ;;  %v10326_v4 = vld [vmem:[%s20718_s3 + $0x1f8] sm:$0xf0]  ;;  %v10265_v5 = vor.u32 %v13152_v63, %v10262_v1  ;;  %v10316_v12 = vld [vmem:[%s20718_s3 + $0x1e0] sm:$0xf]  ;;  %v10253_v13 = vor.u32 %v13151_v9, %v10252_v8  ;;  %v13167_v14 = vld [vmem:[%s20718_s3 + $0x1e4] sm:$0xf0] }
  0x1e   : > { %v10329_v6 = vor.u32 %v13168_v2, %v10326_v4  ;;  %v13150_v15 = vld [vmem:[%s20718_s3 + $0x164] sm:$0xf]  ;;  %v10254_v18 = vld [vmem:[%s20718_s3 + $0x168] sm:$0xf0]  ;;  %v10317_v19 = vor.u32 %v13167_v14, %v10316_v12  ;;  %v10244_v25 = vld [vmem:[%s20718_s3 + $0x150] sm:$0xf] }
  0x1f   : > { %v10257_v20 = vor.u32 %v13150_v15, %v10254_v18  ;;  %v13166_v21 = vld [vmem:[%s20718_s3 + $0x1e4] sm:$0xf]  ;;  %v10318_v24 = vld [vmem:[%s20718_s3 + $0x1e8] sm:$0xf0]  ;;  %v13149_v27 = vld [vmem:[%s20718_s3 + $0x154] sm:$0xf0] }
  0x20   : > { %515 = vmatpush.bf16.msra.mxu0 %v13921_v22  ;;  %677 = vmatpush.bf16.msra.mxu2 %v13921_v22  ;;  %v10321_v26 = vor.u32 %v13166_v21, %v10318_v24  ;;  %v10308_v30 = vld [vmem:[%s20718_s3 + $0x1d0] sm:$0xf]  ;;  %v13165_v31 = vld [vmem:[%s20718_s3 + $0x1d4] sm:$0xf0]  ;;  %v10245_v32 = vor.u32 %v13149_v27, %v10244_v25  ;;  %v13148_v33 = vld [vmem:[%s20718_s3 + $0x154] sm:$0xf] }
  0x21   : > { %564 = vmatpush.bf16.msra.mxu1 %v13925_v23  ;;  %726 = vmatpush.bf16.msra.mxu3 %v13925_v23  ;;  %v10246_v36 = vld [vmem:[%s20718_s3 + $0x158] sm:$0xf0]  ;;  %v13164_v37 = vld [vmem:[%s20718_s3 + $0x1d4] sm:$0xf]  ;;  %v10309_v38 = vor.u32 %v13165_v31, %v10308_v30  ;;  %v10236_v42 = vld [vmem:[%s20718_s3 + $0x140] sm:$0xf] }
  0x22   : > { %v10310_v39 = vld [vmem:[%s20718_s3 + $0x1d8] sm:$0xf0]  ;;  %v13147_v43 = vld [vmem:[%s20718_s3 + $0x144] sm:$0xf0]  ;;  %v10249_v44 = vor.u32 %v13148_v33, %v10246_v36  ;;  %v13145_v61 = vld [vmem:[%s20718_s3 + $0x134] sm:$0xf0] }
  0x23   : > { %v10313_v45 = vor.u32 %v13164_v37, %v10310_v39  ;;  %v10292_v63 = vld [vmem:[%s20718_s3 + $0x1b0] sm:$0xf]  ;;  %v13144_v1 = vld [vmem:[%s20718_s3 + $0x134] sm:$0xf]  ;;  %v10230_v4 = vld [vmem:[%s20718_s3 + $0x138] sm:$0xf0] }
  0x24   : > { %516 = vmatpush.bf16.msra.mxu0 %v13933_v28  ;;  %678 = vmatpush.bf16.msra.mxu2 %v13933_v28  ;;  %v10233_v8 = vor.u32 %v13144_v1, %v10230_v4  ;;  %v10220_v12 = vld [vmem:[%s20718_s3 + $0x120] sm:$0xf]  ;;  %v13159_v18 = vld [vmem:[%s20718_s3 + $0x1a4] sm:$0xf0]  ;;  %v13158_v24 = vld [vmem:[%s20718_s3 + $0x1a4] sm:$0xf] }
  0x25   : > { %565 = vmatpush.bf16.msra.mxu1 %v13937_v29  ;;  %727 = vmatpush.bf16.msra.mxu3 %v13937_v29  ;;  %v10284_v14 = vld [vmem:[%s20718_s3 + $0x1a0] sm:$0xf]  ;;  %v10286_v25 = vld [vmem:[%s20718_s3 + $0x1a8] sm:$0xf0]  ;;  %v13141_v27 = vld [vmem:[%s20718_s3 + $0x114] sm:$0xf0] }
  0x26   : > { %v10285_v21 = vor.u32 %v13159_v18, %v10284_v14  ;;  %v10276_v30 = vld [vmem:[%s20718_s3 + $0x190] sm:$0xf]  ;;  %v13157_v31 = vld [vmem:[%s20718_s3 + $0x194] sm:$0xf0]  ;;  %v10289_v33 = vor.u32 %v13158_v24, %v10286_v25  ;;  %v13140_v36 = vld [vmem:[%s20718_s3 + $0x114] sm:$0xf] }
  0x27   : > { %v10214_v39 = vld [vmem:[%s20718_s3 + $0x118] sm:$0xf0] }
  0x28   : > { %517 = vmatpush.bf16.msra.mxu0 %v13945_v34  ;;  %679 = vmatpush.bf16.msra.mxu2 %v13945_v34 }
  0x29   : > { %566 = vmatpush.bf16.msra.mxu1 %v13949_v35  ;;  %728 = vmatpush.bf16.msra.mxu3 %v13949_v35 }
  0x2c   : > { %518 = vmatpush.bf16.msra.mxu0 %v13957_v40  ;;  %680 = vmatpush.bf16.msra.mxu2 %v13957_v40 }
  0x2d   : > { %567 = vmatpush.bf16.msra.mxu1 %v13961_v41  ;;  %729 = vmatpush.bf16.msra.mxu3 %v13961_v41 }
  0x30   : > { %519 = vmatpush.bf16.msra.mxu0 %v13969_v46  ;;  %681 = vmatpush.bf16.msra.mxu2 %v13969_v46 }
  0x31   : > { %568 = vmatpush.bf16.msra.mxu1 %v13973_v47  ;;  %730 = vmatpush.bf16.msra.mxu3 %v13973_v47 }
  0x33   : > { %520 = vmatmul.bf16.vlgmr.msra.gmra.mxu0 %v13090_v48  ;;  %682 = vmatmul.bf16.vlgmr.msra.gmra.mxu2 %v13098_v49 }
  0x34   : > { %569 = vmatmul.bf16.vlgmr.msra.gmra.mxu1 %v13090_v48  ;;  %731 = vmatmul.bf16.vlgmr.msra.gmra.mxu3 %v13098_v49  ;;  %v10300_v48 = vld [vmem:[%s20718_s3 + $0x1c0] sm:$0xf]  ;;  %v13163_v49 = vld [vmem:[%s20718_s3 + $0x1c4] sm:$0xf0] }
  0x35   : > { %1013 = vmatpush.bf16.msrb.mxu0 %v10261_v60  ;;  %1062 = vmatpush.bf16.msrb.mxu1 %v10325_v0  ;;  %v10228_v60 = vld [vmem:[%s20718_s3 + $0x130] sm:$0xf]  ;;  %v13161_v0 = vld [vmem:[%s20718_s3 + $0x1b4] sm:$0xf0] }
  0x36   : > { %1111 = vmatpush.bf16.msrb.mxu2 %v10265_v5  ;;  %1160 = vmatpush.bf16.msrb.mxu3 %v10329_v6  ;;  %v10229_v62 = vor.u32 %v13145_v61, %v10228_v60  ;;  %v10293_v2 = vor.u32 %v13161_v0, %v10292_v63  ;;  %v13160_v5 = vld [vmem:[%s20718_s3 + $0x1b4] sm:$0xf]  ;;  %v10294_v6 = vld [vmem:[%s20718_s3 + $0x1b8] sm:$0xf0] }
  0x37   : > { %v10297_v9 = vor.u32 %v13160_v5, %v10294_v6  ;;  %v13105_v63 = vld [vmem:[%s20717_s2 + $0x38] sm:$0xff] }
  0x39   : > { %1014 = vmatpush.bf16.msrb.mxu0 %v10253_v13  ;;  %1063 = vmatpush.bf16.msrb.mxu1 %v10317_v19  ;;  %v13143_v13 = vld [vmem:[%s20718_s3 + $0x124] sm:$0xf0]  ;;  %v13142_v19 = vld [vmem:[%s20718_s3 + $0x124] sm:$0xf] }
  0x3a   : > { %1112 = vmatpush.bf16.msrb.mxu2 %v10257_v20  ;;  %1161 = vmatpush.bf16.msrb.mxu3 %v10321_v26  ;;  %v10221_v15 = vor.u32 %v13143_v13, %v10220_v12  ;;  %v10222_v20 = vld [vmem:[%s20718_s3 + $0x128] sm:$0xf0]  ;;  %v10212_v26 = vld [vmem:[%s20718_s3 + $0x110] sm:$0xf] }
  0x3b   : > { %v10213_v37 = vor.u32 %v13141_v27, %v10212_v26 }
  0x3d   : > { %1015 = vmatpush.bf16.msrb.mxu0 %v10245_v32  ;;  %1064 = vmatpush.bf16.msrb.mxu1 %v10309_v38  ;;  %v10225_v32 = vor.u32 %v13142_v19, %v10222_v20  ;;  %v10277_v38 = vor.u32 %v13157_v31, %v10276_v30 }
  0x3e   : > { %1113 = vmatpush.bf16.msrb.mxu2 %v10249_v44  ;;  %1162 = vmatpush.bf16.msrb.mxu3 %v10313_v45  ;;  %v13096_v44 = vld [vmem:[%s20716_s1 + $0x30] sm:$0xff] }
  0x3f   : > { %v13104_v45 = vld [vmem:[%s20717_s2 + $0x30] sm:$0xff] }
  0x43   : > { %525 = vmatmul.bf16.gmra.mxu0 %v13091_v50  ;;  %687 = vmatmul.bf16.gmra.mxu2 %v13099_v51 }
  0x44   : > { %574 = vmatmul.bf16.gmra.mxu1 %v13091_v50  ;;  %736 = vmatmul.bf16.gmra.mxu3 %v13099_v51  ;;  %v10237_v50 = vor.u32 %v13147_v43, %v10236_v42  ;;  %v13146_v51 = vld [vmem:[%s20718_s3 + $0x144] sm:$0xf]  ;;  %v13156_v42 = vld [vmem:[%s20718_s3 + $0x194] sm:$0xf]  ;;  %v10278_v43 = vld [vmem:[%s20718_s3 + $0x198] sm:$0xf0] }
  0x46   : > { %1016 = vmatpush.bf16.msrb.mxu0 %v10237_v50  ;;  %v10204_v50 = vld [vmem:[%s20718_s3 + $0x100] sm:$0xf] }
  0x4a   : > { %1017 = vmatpush.bf16.msrb.mxu0 %v10229_v62  ;;  %v13097_v62 = vld [vmem:[%s20716_s1 + $0x38] sm:$0xff] }
  0x4e   : > { %1018 = vmatpush.bf16.msrb.mxu0 %v10221_v15 }
  0x52   : > { %1019 = vmatpush.bf16.msrb.mxu0 %v10213_v37 }
  0x53   : > { %530 = vmatmul.bf16.gmra.mxu0 %v13092_v52  ;;  %692 = vmatmul.bf16.gmra.mxu2 %v13100_v53 }
  0x54   : > { %579 = vmatmul.bf16.gmra.mxu1 %v13092_v52  ;;  %741 = vmatmul.bf16.gmra.mxu3 %v13100_v53  ;;  %v10301_v52 = vor.u32 %v13163_v49, %v10300_v48  ;;  %v10238_v53 = vld [vmem:[%s20718_s3 + $0x148] sm:$0xf0]  ;;  %v10217_v48 = vor.u32 %v13140_v36, %v10214_v39  ;;  %v10281_v49 = vor.u32 %v13156_v42, %v10278_v43 }
  0x55   : > { %v10241_v58 = vor.u32 %v13146_v51, %v10238_v53  ;;  %v13139_v51 = vld [vmem:[%s20718_s3 + $0x104] sm:$0xf0] }
  0x56   : > { %1065 = vmatpush.bf16.msrb.mxu1 %v10301_v52  ;;  %v10268_v52 = vld [vmem:[%s20718_s3 + $0x180] sm:$0xf]  ;;  %v10205_v53 = vor.u32 %v13139_v51, %v10204_v50 }
  0x57   : > { %1114 = vmatpush.bf16.msrb.mxu2 %v10241_v58  ;;  %v13154_v58 = vld [vmem:[%s20718_s3 + $0x184] sm:$0xf] }
  0x58   : > { %1020 = vmatpush.bf16.msrb.mxu0 %v10205_v53 }
  0x5a   : > { %1066 = vmatpush.bf16.msrb.mxu1 %v10293_v2 }
  0x5b   : > { %1115 = vmatpush.bf16.msrb.mxu2 %v10233_v8 }
  0x5e   : > { %1067 = vmatpush.bf16.msrb.mxu1 %v10285_v21 }
  0x5f   : > { %1116 = vmatpush.bf16.msrb.mxu2 %v10225_v32 }
  0x62   : > { %1068 = vmatpush.bf16.msrb.mxu1 %v10277_v38 }
  0x63   : > { %535 = vmatmul.bf16.gmra.mxu0 %v13093_v54  ;;  %697 = vmatmul.bf16.gmra.mxu2 %v13101_v55 }
  0x64   : > { %584 = vmatmul.bf16.gmra.mxu1 %v13093_v54  ;;  %746 = vmatmul.bf16.gmra.mxu3 %v13101_v55  ;;  %v13162_v54 = vld [vmem:[%s20718_s3 + $0x1c4] sm:$0xf]  ;;  %v10302_v55 = vld [vmem:[%s20718_s3 + $0x1c8] sm:$0xf0] }
  0x65   : > { %v10305_v59 = vor.u32 %v13162_v54, %v10302_v55  ;;  %v13155_v54 = vld [vmem:[%s20718_s3 + $0x184] sm:$0xf0]  ;;  %v13138_v55 = vld [vmem:[%s20718_s3 + $0x104] sm:$0xf]  ;;  %1117 = vmatpush.bf16.msrb.mxu2 %v10217_v48 }
  0x67   : > { %1163 = vmatpush.bf16.msrb.mxu3 %v10305_v59  ;;  %v10270_v59 = vld [vmem:[%s20718_s3 + $0x188] sm:$0xf0] }
  0x68   : > { %v10273_v61 = vor.u32 %v13154_v58, %v10270_v59  ;;  %v13121_v59 = vld [vmem:[%s20718_s3 + $0x74] sm:$0xf0] }
  0x6b   : > { %1164 = vmatpush.bf16.msrb.mxu3 %v10297_v9 }
  0x6f   : > { %1165 = vmatpush.bf16.msrb.mxu3 %v10289_v33 }
  0x73   : > { %540 = vmatmul.bf16.gmra.mxu0 %v13094_v56  ;;  %702 = vmatmul.bf16.gmra.mxu2 %v13102_v57 }
  0x74   : > { %589 = vmatmul.bf16.gmra.mxu1 %v13094_v56  ;;  %751 = vmatmul.bf16.gmra.mxu3 %v13102_v57  ;;  %v13095_v56 = vld [vmem:[%s20716_s1 + $0x28] sm:$0xff] }
  0x75   : > { %v13103_v57 = vld [vmem:[%s20717_s2 + $0x28] sm:$0xff]  ;;  %1166 = vmatpush.bf16.msrb.mxu3 %v10281_v49 }
  0x79   : > { %1167 = vmatpush.bf16.msrb.mxu3 %v10273_v61 }
  0x83   : > { %545 = vmatmul.bf16.gmra.mxu0 %v13095_v56  ;;  %707 = vmatmul.bf16.gmra.mxu2 %v13103_v57 }
  0x84   : > { %594 = vmatmul.bf16.gmra.mxu1 %v13095_v56  ;;  %756 = vmatmul.bf16.gmra.mxu3 %v13103_v57  ;;  %v10206_v56 = vld [vmem:[%s20718_s3 + $0x108] sm:$0xf0]  ;;  %v10269_v57 = vor.u32 %v13155_v54, %v10268_v52 }
  0x85   : > { %v10209_v60 = vor.u32 %v13138_v55, %v10206_v56 }
  0x86   : > { %1069 = vmatpush.bf16.msrb.mxu1 %v10269_v57 }
  0x87   : > { %1118 = vmatpush.bf16.msrb.mxu2 %v10209_v60  ;;  %v10452_v60 = vld [vmem:[%s20718_s3 + $0xf0] sm:$0xf] }
  0x93   : > { %550 = vmatmul.bf16.gmra.mxu0 %v13096_v44  ;;  %712 = vmatmul.bf16.gmra.mxu2 %v13104_v45 }
  0x94   : > { %599 = vmatmul.bf16.gmra.mxu1 %v13096_v44  ;;  %761 = vmatmul.bf16.gmra.mxu3 %v13104_v45 }
  0xa3   : > { %555 = vmatmul.bf16.gmra.mxu0 %v13097_v62  ;;  %717 = vmatmul.bf16.gmra.mxu2 %v13105_v63 }
  0xa4   : > { %604 = vmatmul.bf16.gmra.mxu1 %v13097_v62  ;;  %766 = vmatmul.bf16.gmra.mxu3 %v13105_v63  ;;  %v13137_v62 = vld [vmem:[%s20718_s3 + $0xf4] sm:$0xf0]  ;;  %v13120_v63 = vld [vmem:[%s20718_s3 + $0x74] sm:$0xf] }
  0xb0   : > { %v521_v0 = vpop.f32.mrf.mxu0 }
  0xb1   : > { %v570_v1 = vpop.f32.mrf.mxu1 }
  0xb3   : > { %1021 = vmatmul.bf16.vlgmr.msrb.gmra.mxu0 %v13969_v46  ;;  %1119 = vmatmul.bf16.vlgmr.msrb.gmra.mxu2 %v13969_v46 }
  0xb4   : > { %1070 = vmatmul.bf16.vlgmr.msrb.gmra.mxu1 %v13973_v47  ;;  %1168 = vmatmul.bf16.vlgmr.msrb.gmra.mxu3 %v13973_v47 }
  0xb6   : > { %v683_v2 = vpop.f32.mrf.mxu2 }
  0xb7   : > { %v732_v4 = vpop.f32.mrf.mxu3 }
  0xb8   : > { %v523_v5 = vpop.f32.mrf.mxu0 }
  0xb9   : > { %v14223_v6 = vpack.c.bf16 %v523_v5, %v521_v0  ;;  %v572_v8 = vpop.f32.mrf.mxu1  ;;  %v10390_v0 = vld [vmem:[%s20718_s3 + $0x78] sm:$0xf0] }
  0xba   : > { %v14225_v9 = vpack.c.bf16 %v572_v8, %v570_v1  ;;  %v10453_v1 = vor.u32 %v13137_v62, %v10452_v60  ;;  %v13115_v60 = vld [vmem:[%s20718_s3 + $0x44] sm:$0xf0] }
  0xbc   : > { %1418 = vmatpush.bf16.msra.mxu1 %v10453_v1  ;;  %v13131_v1 = vld [vmem:[%s20718_s3 + $0xc4] sm:$0xf0] }
  0xbe   : > { %v685_v12 = vpop.f32.mrf.mxu2 }
  0xbf   : > { %v14227_v13 = vpack.c.bf16 %v685_v12, %v683_v2  ;;  %v734_v14 = vpop.f32.mrf.mxu3  ;;  %v10393_v2 = vor.u32 %v13120_v63, %v10390_v0  ;;  %v10380_v12 = vld [vmem:[%s20718_s3 + $0x60] sm:$0xf] }
  0xc0   : > { %v14229_v15 = vpack.c.bf16 %v734_v14, %v732_v4  ;;  %v526_v18 = vpop.f32.mrf.mxu0  ;;  %v10454_v4 = vld [vmem:[%s20718_s3 + $0xf8] sm:$0xf0]  ;;  %v10444_v14 = vld [vmem:[%s20718_s3 + $0xe0] sm:$0xf] }
  0xc1   : > { %v575_v46 = vpop.f32.mrf.mxu1  ;;  %1467 = vmatpush.bf16.msra.mxu2 %v10393_v2  ;;  %v13114_v2 = vld [vmem:[%s20718_s3 + $0x44] sm:$0xf] }
  0xc3   : > { %1026 = vmatmul.bf16.gmra.mxu0 %v13957_v40  ;;  %1124 = vmatmul.bf16.gmra.mxu2 %v13957_v40 }
  0xc4   : > { %1075 = vmatmul.bf16.gmra.mxu1 %v13961_v41  ;;  %1173 = vmatmul.bf16.gmra.mxu3 %v13961_v41 }
  0xc6   : > { %v688_v47 = vpop.f32.mrf.mxu2 }
  0xc7   : > { %v737_v19 = vpop.f32.mrf.mxu3 }
  0xc8   : > { %v528_v20 = vpop.f32.mrf.mxu0 }
  0xc9   : > { %v14235_v21 = vpack.c.bf16 %v528_v20, %v526_v18  ;;  %v577_v24 = vpop.f32.mrf.mxu1  ;;  %v10382_v20 = vld [vmem:[%s20718_s3 + $0x68] sm:$0xf0] }
  0xca   : > { %v14237_v25 = vpack.c.bf16 %v577_v24, %v575_v46 }
  0xce   : > { %v690_v26 = vpop.f32.mrf.mxu2 }
  0xcf   : > { %v14239_v27 = vpack.c.bf16 %v690_v26, %v688_v47  ;;  %v739_v30 = vpop.f32.mrf.mxu3  ;;  %v13135_v47 = vld [vmem:[%s20718_s3 + $0xe4] sm:$0xf0] }
  0xd0   : > { %v14241_v31 = vpack.c.bf16 %v739_v30, %v737_v19  ;;  %v531_v32 = vpop.f32.mrf.mxu0  ;;  %v13118_v19 = vld [vmem:[%s20718_s3 + $0x64] sm:$0xf]  ;;  %v10445_v26 = vor.u32 %v13135_v47, %v10444_v14  ;;  %v10430_v14 = vld [vmem:[%s20718_s3 + $0xc8] sm:$0xf0] }
  0xd1   : > { %v580_v40 = vpop.f32.mrf.mxu1  ;;  %v10385_v30 = vor.u32 %v13118_v19, %v10382_v20  ;;  %v13113_v19 = vld [vmem:[%s20718_s3 + $0x34] sm:$0xf0]  ;;  %v10420_v20 = vld [vmem:[%s20718_s3 + $0xb0] sm:$0xf] }
  0xd2   : > { %1419 = vmatpush.bf16.msra.mxu1 %v10445_v26  ;;  %v13129_v26 = vld [vmem:[%s20718_s3 + $0xb4] sm:$0xf0] }
  0xd3   : > { %1031 = vmatmul.bf16.gmra.mxu0 %v13945_v34  ;;  %1129 = vmatmul.bf16.gmra.mxu2 %v13945_v34 }
  0xd4   : > { %1080 = vmatmul.bf16.gmra.mxu1 %v13949_v35  ;;  %1178 = vmatmul.bf16.gmra.mxu3 %v13949_v35 }
  0xd5   : > { %1468 = vmatpush.bf16.msra.mxu2 %v10385_v30  ;;  %v13112_v30 = vld [vmem:[%s20718_s3 + $0x34] sm:$0xf] }
  0xd6   : > { %v693_v41 = vpop.f32.mrf.mxu2 }
  0xd7   : > { %v742_v33 = vpop.f32.mrf.mxu3 }
  0xd8   : > { %v533_v36 = vpop.f32.mrf.mxu0 }
  0xd9   : > { %v14247_v37 = vpack.c.bf16 %v533_v36, %v531_v32  ;;  %v582_v38 = vpop.f32.mrf.mxu1  ;;  %v13134_v32 = vld [vmem:[%s20718_s3 + $0xe4] sm:$0xf] }
  0xda   : > { %v14249_v39 = vpack.c.bf16 %v582_v38, %v580_v40  ;;  %v10446_v40 = vld [vmem:[%s20718_s3 + $0xe8] sm:$0xf0] }
  0xdb   : > { %v10449_v36 = vor.u32 %v13134_v32, %v10446_v40  ;;  %v10358_v32 = vld [vmem:[%s20718_s3 + $0x38] sm:$0xf0]  ;;  %v10421_v40 = vor.u32 %v13129_v26, %v10420_v20  ;;  %v13107_v26 = vld [vmem:[%s20718_s3 + $0x4] sm:$0xf0] }
  0xde   : > { %v695_v42 = vpop.f32.mrf.mxu2 }
  0xdf   : > { %v14251_v43 = vpack.c.bf16 %v695_v42, %v693_v41  ;;  %v744_v44 = vpop.f32.mrf.mxu3  ;;  %v10372_v42 = vld [vmem:[%s20718_s3 + $0x50] sm:$0xf] }
  0xe0   : > { %v14253_v45 = vpack.c.bf16 %v744_v44, %v742_v33  ;;  %v536_v48 = vpop.f32.mrf.mxu0  ;;  %v13117_v44 = vld [vmem:[%s20718_s3 + $0x54] sm:$0xf0] }
  0xe1   : > { %v585_v34 = vpop.f32.mrf.mxu1 }
  0xe3   : > { %1036 = vmatmul.bf16.gmra.mxu0 %v13933_v28  ;;  %1134 = vmatmul.bf16.gmra.mxu2 %v13933_v28 }
  0xe4   : > { %1085 = vmatmul.bf16.gmra.mxu1 %v13937_v29  ;;  %1183 = vmatmul.bf16.gmra.mxu3 %v13937_v29  ;;  %v10388_v29 = vld [vmem:[%s20718_s3 + $0x70] sm:$0xf] }
  0xe5   : > { %v10389_v61 = vor.u32 %v13121_v59, %v10388_v29  ;;  %v10364_v59 = vld [vmem:[%s20718_s3 + $0x40] sm:$0xf] }
  0xe6   : > { %v698_v35 = vpop.f32.mrf.mxu2  ;;  %v10365_v0 = vor.u32 %v13115_v60, %v10364_v59  ;;  %v10414_v59 = vld [vmem:[%s20718_s3 + $0xa8] sm:$0xf0] }
  0xe7   : > { %v747_v49 = vpop.f32.mrf.mxu3  ;;  %1369 = vmatpush.bf16.msra.mxu0 %v10389_v61  ;;  %v10428_v61 = vld [vmem:[%s20718_s3 + $0xc0] sm:$0xf] }
  0xe8   : > { %v538_v50 = vpop.f32.mrf.mxu0 }
  0xe9   : > { %v14259_v51 = vpack.c.bf16 %v538_v50, %v536_v48  ;;  %v587_v52 = vpop.f32.mrf.mxu1  ;;  %v10436_v48 = vld [vmem:[%s20718_s3 + $0xd0] sm:$0xf]  ;;  %v10374_v50 = vld [vmem:[%s20718_s3 + $0x58] sm:$0xf0] }
  0xea   : > { %v14261_v53 = vpack.c.bf16 %v587_v52, %v585_v34  ;;  %v10373_v34 = vor.u32 %v13117_v44, %v10372_v42 }
  0xee   : > { %v700_v54 = vpop.f32.mrf.mxu2 }
  0xef   : > { %v14263_v55 = vpack.c.bf16 %v700_v54, %v698_v35  ;;  %v749_v56 = vpop.f32.mrf.mxu3  ;;  %v13133_v35 = vld [vmem:[%s20718_s3 + $0xd4] sm:$0xf0] }
  0xf0   : > { %v14265_v57 = vpack.c.bf16 %v749_v56, %v747_v49  ;;  %v541_v58 = vpop.f32.mrf.mxu0  ;;  %v13116_v49 = vld [vmem:[%s20718_s3 + $0x54] sm:$0xf]  ;;  %v10437_v52 = vor.u32 %v13133_v35, %v10436_v48  ;;  %v13111_v48 = vld [vmem:[%s20718_s3 + $0x24] sm:$0xf0] }
  0xf1   : > { %v590_v28 = vpop.f32.mrf.mxu1  ;;  %v10377_v54 = vor.u32 %v13116_v49, %v10374_v50  ;;  %v13132_v56 = vld [vmem:[%s20718_s3 + $0xd4] sm:$0xf]  ;;  %v13127_v50 = vld [vmem:[%s20718_s3 + $0xa4] sm:$0xf0] }
  0xf2   : > { %1420 = vmatpush.bf16.msra.mxu1 %v10437_v52  ;;  %v13110_v52 = vld [vmem:[%s20718_s3 + $0x24] sm:$0xf] }
  0xf3   : > { %1041 = vmatmul.bf16.gmra.mxu0 %v13921_v22  ;;  %1139 = vmatmul.bf16.gmra.mxu2 %v13921_v22  ;;  %v13136_v22 = vld [vmem:[%s20718_s3 + $0xf4] sm:$0xf] }
  0xf4   : > { %1090 = vmatmul.bf16.gmra.mxu1 %v13925_v23  ;;  %1188 = vmatmul.bf16.gmra.mxu3 %v13925_v23  ;;  %v10457_v5 = vor.u32 %v13136_v22, %v10454_v4  ;;  %v13119_v23 = vld [vmem:[%s20718_s3 + $0x64] sm:$0xf0]  ;;  %v10366_v22 = vld [vmem:[%s20718_s3 + $0x48] sm:$0xf0] }
  0xf5   : > { %v10381_v46 = vor.u32 %v13119_v23, %v10380_v12  ;;  %1469 = vmatpush.bf16.msra.mxu2 %v10377_v54  ;;  %v10369_v12 = vor.u32 %v13114_v2, %v10366_v22  ;;  %v13130_v23 = vld [vmem:[%s20718_s3 + $0xc4] sm:$0xf]  ;;  %v10350_v54 = vld [vmem:[%s20718_s3 + $0x28] sm:$0xf0]  ;;  %v13109_v2 = vld [vmem:[%s20718_s3 + $0x14] sm:$0xf0] }
  0xf6   : > { %v703_v8 = vpop.f32.mrf.mxu2  ;;  %1516 = vmatpush.bf16.msra.mxu3 %v10457_v5  ;;  %v10433_v47 = vor.u32 %v13130_v23, %v10430_v14  ;;  %v10404_v22 = vld [vmem:[%s20718_s3 + $0x90] sm:$0xf]  ;;  %v10342_v23 = vld [vmem:[%s20718_s3 + $0x18] sm:$0xf0] }
  0xf7   : > { %v752_v18 = vpop.f32.mrf.mxu3  ;;  %1370 = vmatpush.bf16.msra.mxu0 %v10381_v46 }
  0xf8   : > { %v543_v24 = vpop.f32.mrf.mxu0 }
  0xf9   : > { %v14319_v41 = vpack.c.bf16 %v543_v24, %v541_v58  ;;  %v592_v33 = vpop.f32.mrf.mxu1  ;;  %v10438_v58 = vld [vmem:[%s20718_s3 + $0xd8] sm:$0xf0]  ;;  %1470 = vmatpush.bf16.msra.mxu2 %v10369_v12  ;;  %v13108_v12 = vld [vmem:[%s20718_s3 + $0x14] sm:$0xf] }
  0xfa   : > { %v14321_v38 = vpack.c.bf16 %v592_v33, %v590_v28  ;;  %1517 = vmatpush.bf16.msra.mxu3 %v10449_v36  ;;  %v10441_v28 = vor.u32 %v13132_v56, %v10438_v58  ;;  %v10361_v33 = vor.u32 %v13112_v30, %v10358_v32  ;;  %v10422_v36 = vld [vmem:[%s20718_s3 + $0xb8] sm:$0xf0]  ;;  %v10396_v30 = vld [vmem:[%s20718_s3 + $0x80] sm:$0xf] }
  0xfb   : > { %1371 = vmatpush.bf16.msra.mxu0 %v10373_v34  ;;  %v10412_v34 = vld [vmem:[%s20718_s3 + $0xa0] sm:$0xf] }
  0xfc   : > { %v10413_v58 = vor.u32 %v13127_v50, %v10412_v34  ;;  %v10398_v50 = vld [vmem:[%s20718_s3 + $0x88] sm:$0xf0] }
  0xfd   : > { %1471 = vmatpush.bf16.msra.mxu2 %v10361_v33 }
  0xfe   : > { %v705_v29 = vpop.f32.mrf.mxu2  ;;  %1518 = vmatpush.bf16.msra.mxu3 %v10441_v28  ;;  %v10353_v28 = vor.u32 %v13110_v52, %v10350_v54 }
  0xff   : > { %v14356_v62 = vpack.c.bf16 %v705_v29, %v703_v8  ;;  %v754_v63 = vpop.f32.mrf.mxu3  ;;  %v10429_v8 = vor.u32 %v13131_v1, %v10428_v61  ;;  %1372 = vmatpush.bf16.msra.mxu0 %v10365_v0  ;;  %v13126_v29 = vld [vmem:[%s20718_s3 + $0xa4] sm:$0xf]  ;;  %v10340_v1 = vld [vmem:[%s20718_s3 + $0x10] sm:$0xf] }
 0x100   : > { %v14367_v4 = vpack.c.bf16 %v754_v63, %v752_v18  ;;  %v546_v5 = vpop.f32.mrf.mxu0  ;;  %v10356_v18 = vld [vmem:[%s20718_s3 + $0x30] sm:$0xf]  ;;  %v10417_v63 = vor.u32 %v13126_v29, %v10414_v59 }
 0x101   : > { %v595_v46 = vpop.f32.mrf.mxu1  ;;  %1421 = vmatpush.bf16.msra.mxu1 %v10429_v8  ;;  %v10357_v24 = vor.u32 %v13113_v19, %v10356_v18  ;;  %1472 = vmatpush.bf16.msra.mxu2 %v10353_v28  ;;  %v13125_v8 = vld [vmem:[%s20718_s3 + $0x94] sm:$0xf0]  ;;  %v10406_v18 = vld [vmem:[%s20718_s3 + $0x98] sm:$0xf0] }
 0x102   : > { %1519 = vmatpush.bf16.msra.mxu3 %v10433_v47  ;;  %v10405_v14 = vor.u32 %v13125_v8, %v10404_v22  ;;  %v13124_v47 = vld [vmem:[%s20718_s3 + $0x94] sm:$0xf] }
 0x103   : > { %1046 = vmatmul.bf16.gmra.mxu0 %v13909_v16  ;;  %1144 = vmatmul.bf16.gmra.mxu2 %v13909_v16  ;;  %v13128_v16 = vld [vmem:[%s20718_s3 + $0xb4] sm:$0xf]  ;;  %v10409_v19 = vor.u32 %v13124_v47, %v10406_v18 }
 0x104   : > { %1095 = vmatmul.bf16.gmra.mxu1 %v13913_v17  ;;  %1193 = vmatmul.bf16.gmra.mxu3 %v13913_v17  ;;  %v10425_v42 = vor.u32 %v13128_v16, %v10422_v36  ;;  %v10348_v17 = vld [vmem:[%s20718_s3 + $0x20] sm:$0xf]  ;;  %v13123_v16 = vld [vmem:[%s20718_s3 + $0x84] sm:$0xf0]  ;;  %v13106_v36 = vld [vmem:[%s20718_s3 + $0x4] sm:$0xf] }
 0x105   : > { %1373 = vmatpush.bf16.msra.mxu0 %v10357_v24  ;;  %1422 = vmatpush.bf16.msra.mxu1 %v10421_v40  ;;  %v10349_v49 = vor.u32 %v13111_v48, %v10348_v17  ;;  %v10332_v24 = vld [vmem:[%s20718_s3] sm:$0xf]  ;;  %v10397_v34 = vor.u32 %v13123_v16, %v10396_v30 }
 0x106   : > { %v708_v44 = vpop.f32.mrf.mxu2  ;;  %1520 = vmatpush.bf16.msra.mxu3 %v10425_v42  ;;  %v10333_v33 = vor.u32 %v13107_v26, %v10332_v24  ;;  %v10334_v42 = vld [vmem:[%s20718_s3 + $0x8] sm:$0xf0] }
 0x107   : > { %v757_v35 = vpop.f32.mrf.mxu3 }
 0x108   : > { %v548_v56 = vpop.f32.mrf.mxu0 }
 0x109   : > { %v14427_v60 = vpack.c.bf16 %v548_v56, %v546_v5  ;;  %v597_v61 = vpop.f32.mrf.mxu1  ;;  %1374 = vmatpush.bf16.msra.mxu0 %v10349_v49  ;;  %1423 = vmatpush.bf16.msra.mxu1 %v10413_v58  ;;  %v10341_v5 = vor.u32 %v13109_v2, %v10340_v1  ;;  %v13122_v49 = vld [vmem:[%s20718_s3 + $0x84] sm:$0xf] }
 0x10a   : > { %v14429_v0 = vpack.c.bf16 %v597_v61, %v595_v46  ;;  %v10345_v46 = vor.u32 %v13108_v12, %v10342_v23  ;;  %1521 = vmatpush.bf16.msra.mxu3 %v10417_v63  ;;  %v10401_v54 = vor.u32 %v13122_v49, %v10398_v50 }
 0x10c   : > { %1473 = vmatpush.bf16.msra.mxu2 %v10345_v46 }
 0x10d   : > { %1375 = vmatpush.bf16.msra.mxu0 %v10341_v5  ;;  %1424 = vmatpush.bf16.msra.mxu1 %v10405_v14 }
 0x10e   : > { %v710_v20 = vpop.f32.mrf.mxu2  ;;  %1522 = vmatpush.bf16.msra.mxu3 %v10409_v19 }
 0x10f   : > { %v14464_v32 = vpack.c.bf16 %v710_v20, %v708_v44  ;;  %v759_v40 = vpop.f32.mrf.mxu3  ;;  %v10337_v44 = vor.u32 %v13106_v36, %v10334_v42 }
 0x110   : > { %v14475_v17 = vpack.c.bf16 %v759_v40, %v757_v35  ;;  %v551_v48 = vpop.f32.mrf.mxu0 }
 0x111   : > { %v600_v52 = vpop.f32.mrf.mxu1  ;;  %1376 = vmatpush.bf16.msra.mxu0 %v10333_v33  ;;  %1425 = vmatpush.bf16.msra.mxu1 %v10397_v34 }
 0x112   : > { %1474 = vmatpush.bf16.msra.mxu2 %v10337_v44  ;;  %1523 = vmatpush.bf16.msra.mxu3 %v10401_v54 }
 0x113   : > { %1051 = vmatmul.bf16.gmra.mxu0 %v13897_v10  ;;  %1149 = vmatmul.bf16.gmra.mxu2 %v13897_v10 }
 0x114   : > { %1100 = vmatmul.bf16.gmra.mxu1 %v13901_v11  ;;  %1198 = vmatmul.bf16.gmra.mxu3 %v13901_v11 }
 0x116   : > { %v713_v35 = vpop.f32.mrf.mxu2 }
 0x117   : > { %v762_v56 = vpop.f32.mrf.mxu3 }
 0x118   : > { %v553_v58 = vpop.f32.mrf.mxu0 }
 0x119   : > { %v14487_v28 = vpack.c.bf16 %v553_v58, %v551_v48  ;;  %v602_v29 = vpop.f32.mrf.mxu1 }
 0x11a   : > { %v14489_v59 = vpack.c.bf16 %v602_v29, %v600_v52 }
 0x11e   : > { %v715_v61 = vpop.f32.mrf.mxu2 }
 0x11f   : > { %v14491_v63 = vpack.c.bf16 %v715_v61, %v713_v35  ;;  %v764_v1 = vpop.f32.mrf.mxu3 }
 0x120   : > { %v14493_v2 = vpack.c.bf16 %v764_v1, %v762_v56  ;;  %v556_v10 = vpop.f32.mrf.mxu0 }
 0x121   : > { %v605_v22 = vpop.f32.mrf.mxu1 }
 0x123   : > { %1056 = vmatmul.bf16.gmra.mxu0 %v13886_v3  ;;  %1154 = vmatmul.bf16.gmra.mxu2 %v13886_v3 }
 0x124   : > { %1105 = vmatmul.bf16.gmra.mxu1 %v13891_v7  ;;  %1203 = vmatmul.bf16.gmra.mxu3 %v13891_v7 }
 0x126   : > { %v718_v11 = vpop.f32.mrf.mxu2 }
 0x127   : > { %v767_v5 = vpop.f32.mrf.mxu3 }
 0x128   : > { %v558_v8 = vpop.f32.mrf.mxu0 }
 0x129   : > { %v14499_v12 = vpack.c.bf16 %v558_v8, %v556_v10  ;;  %v607_v23 = vpop.f32.mrf.mxu1 }
 0x12a   : > { %v14501_v14 = vpack.c.bf16 %v607_v23, %v605_v22 }
 0x12e   : > { %v720_v46 = vpop.f32.mrf.mxu2 }
 0x12f   : > { %v14503_v47 = vpack.c.bf16 %v720_v46, %v718_v11  ;;  %v769_v18 = vpop.f32.mrf.mxu3 }
 0x130   : > { %v14505_v19 = vpack.c.bf16 %v769_v18, %v767_v5  ;;  %v1022_v20 = vpop.f32.mrf.mxu0 }
 0x131   : > { %v1071_v3 = vpop.f32.mrf.mxu1 }
 0x132   : > { %v14507_v24 = vadd.f32 %v1071_v3, %v1022_v20 }
 0x133   : > { %1377 = vmatmul.bf16.vlgmr.msra.gmra.mxu0 %v14223_v6  ;;  %1475 = vmatmul.bf16.vlgmr.msra.gmra.mxu2 %v14223_v6 }
 0x134   : > { %1426 = vmatmul.bf16.vlgmr.msra.gmra.mxu1 %v14225_v9  ;;  %1524 = vmatmul.bf16.vlgmr.msra.gmra.mxu3 %v14225_v9 }
 0x136   : > { %v1120_v7 = vpop.f32.mrf.mxu2 }
 0x137   : > { %v1169_v26 = vpop.f32.mrf.mxu3 }
 0x138   : > { %v14513_v30 = vadd.f32 %v1169_v26, %v1120_v7  ;;  %v1024_v40 = vpop.f32.mrf.mxu0 }
 0x139   : > { %v1073_v33 = vpop.f32.mrf.mxu1 }
 0x13a   : > { %v14515_v16 = vadd.f32 %v1073_v33, %v1024_v40 }
 0x13e   : > { %v1122_v36 = vpop.f32.mrf.mxu2 }
 0x13f   : > { %v1171_v42 = vpop.f32.mrf.mxu3 }
 0x140   : > { %v14517_v48 = vadd.f32 %v1171_v42, %v1122_v36  ;;  %v1027_v34 = vpop.f32.mrf.mxu0 }
 0x141   : > { %v1076_v44 = vpop.f32.mrf.mxu1 }
 0x142   : > { %v14519_v49 = vadd.f32 %v1076_v44, %v1027_v34 }
 0x143   : > { %1382 = vmatmul.bf16.gmra.mxu0 %v14235_v21  ;;  %1480 = vmatmul.bf16.gmra.mxu2 %v14235_v21 }
 0x144   : > { %1431 = vmatmul.bf16.gmra.mxu1 %v14237_v25  ;;  %1529 = vmatmul.bf16.gmra.mxu3 %v14237_v25 }
 0x146   : > { %v1125_v6 = vpop.f32.mrf.mxu2 }
 0x147   : > { %v1174_v9 = vpop.f32.mrf.mxu3 }
 0x148   : > { %v14525_v50 = vadd.f32 %v1174_v9, %v1125_v6  ;;  %v1029_v52 = vpop.f32.mrf.mxu0 }
 0x149   : > { %v1078_v54 = vpop.f32.mrf.mxu1 }
 0x14a   : > { %v14527_v35 = vadd.f32 %v1078_v54, %v1029_v52  ;;  %v10612_v54 = vld [vmem:[%s20718_s3 + $0x2f0] sm:$0xf] }
 0x14e   : > { %v1127_v56 = vpop.f32.mrf.mxu2 }
 0x14f   : > { %v1176_v58 = vpop.f32.mrf.mxu3 }
 0x150   : > { %v14529_v29 = vadd.f32 %v1176_v58, %v1127_v56  ;;  %v1032_v61 = vpop.f32.mrf.mxu0  ;;  %v13201_v58 = vld [vmem:[%s20718_s3 + $0x2f4] sm:$0xf0] }
 0x151   : > { %v1081_v1 = vpop.f32.mrf.mxu1 }
 0x152   : > { %v14531_v10 = vadd.f32 %v1081_v1, %v1032_v61  ;;  %v13184_v61 = vld [vmem:[%s20718_s3 + $0x274] sm:$0xf]  ;;  %v10550_v1 = vld [vmem:[%s20718_s3 + $0x278] sm:$0xf0] }
 0x153   : > { %1387 = vmatmul.bf16.gmra.mxu0 %v14247_v37  ;;  %1485 = vmatmul.bf16.gmra.mxu2 %v14247_v37 }
 0x154   : > { %1436 = vmatmul.bf16.gmra.mxu1 %v14249_v39  ;;  %1534 = vmatmul.bf16.gmra.mxu3 %v14249_v39 }
 0x156   : > { %v1130_v21 = vpop.f32.mrf.mxu2 }
 0x157   : > { %v1179_v25 = vpop.f32.mrf.mxu3 }
 0x158   : > { %v14537_v22 = vadd.f32 %v1179_v25, %v1130_v21  ;;  %v1034_v11 = vpop.f32.mrf.mxu0  ;;  %v10613_v21 = vor.u32 %v13201_v58, %v10612_v54  ;;  %v10553_v25 = vor.u32 %v13184_v61, %v10550_v1  ;;  %v10532_v61 = vld [vmem:[%s20718_s3 + $0x250] sm:$0xf]  ;;  %v13181_v1 = vld [vmem:[%s20718_s3 + $0x254] sm:$0xf0] }
 0x159   : > { %v1083_v5 = vpop.f32.mrf.mxu1 }
 0x15a   : > { %v14539_v8 = vadd.f32 %v1083_v5, %v1034_v11  ;;  %v10614_v11 = vld [vmem:[%s20718_s3 + $0x2f8] sm:$0xf0]  ;;  %1807 = vmatpush.bf16.msrb.mxu1 %v10613_v21  ;;  %1856 = vmatpush.bf16.msrb.mxu2 %v10553_v25  ;;  %v10596_v21 = vld [vmem:[%s20718_s3 + $0x2d0] sm:$0xf]  ;;  %v10533_v25 = vor.u32 %v13181_v1, %v10532_v61 }
 0x15e   : > { %v1132_v23 = vpop.f32.mrf.mxu2 }
 0x15f   : > { %v1181_v46 = vpop.f32.mrf.mxu3 }
 0x160   : > { %v14541_v18 = vadd.f32 %v1181_v46, %v1132_v23  ;;  %v1037_v20 = vpop.f32.mrf.mxu0  ;;  %v10540_v46 = vld [vmem:[%s20718_s3 + $0x260] sm:$0xf] }
 0x161   : > { %v1086_v3 = vpop.f32.mrf.mxu1 }
 0x162   : > { %v14543_v7 = vadd.f32 %v1086_v3, %v1037_v20  ;;  %v10604_v20 = vld [vmem:[%s20718_s3 + $0x2e0] sm:$0xf] }
 0x163   : > { %1392 = vmatmul.bf16.gmra.mxu0 %v14259_v51  ;;  %1490 = vmatmul.bf16.gmra.mxu2 %v14259_v51  ;;  %v10548_v51 = vld [vmem:[%s20718_s3 + $0x270] sm:$0xf] }
 0x164   : > { %1441 = vmatmul.bf16.gmra.mxu1 %v14261_v53  ;;  %1539 = vmatmul.bf16.gmra.mxu3 %v14261_v53  ;;  %v13185_v53 = vld [vmem:[%s20718_s3 + $0x274] sm:$0xf0] }
 0x165   : > { %v10549_v56 = vor.u32 %v13185_v53, %v10548_v51  ;;  %v13198_v51 = vld [vmem:[%s20718_s3 + $0x2e4] sm:$0xf]  ;;  %v10606_v53 = vld [vmem:[%s20718_s3 + $0x2e8] sm:$0xf0] }
 0x166   : > { %v1135_v37 = vpop.f32.mrf.mxu2 }
 0x167   : > { %v1184_v39 = vpop.f32.mrf.mxu3  ;;  %1758 = vmatpush.bf16.msrb.mxu0 %v10549_v56  ;;  %v10609_v56 = vor.u32 %v13198_v51, %v10606_v53  ;;  %v13178_v51 = vld [vmem:[%s20718_s3 + $0x244] sm:$0xf]  ;;  %v10526_v53 = vld [vmem:[%s20718_s3 + $0x248] sm:$0xf0] }
 0x168   : > { %v14549_v26 = vadd.f32 %v1184_v39, %v1135_v37  ;;  %v1039_v40 = vpop.f32.mrf.mxu0  ;;  %v13199_v39 = vld [vmem:[%s20718_s3 + $0x2e4] sm:$0xf0]  ;;  %v10529_v1 = vor.u32 %v13178_v51, %v10526_v53  ;;  %v10572_v53 = vld [vmem:[%s20718_s3 + $0x2a0] sm:$0xf] }
 0x169   : > { %v1088_v33 = vpop.f32.mrf.mxu1  ;;  %v13175_v51 = vld [vmem:[%s20718_s3 + $0x224] sm:$0xf0] }
 0x16a   : > { %v14551_v36 = vadd.f32 %v1088_v33, %v1039_v40  ;;  %v13182_v40 = vld [vmem:[%s20718_s3 + $0x264] sm:$0xf]  ;;  %v10542_v33 = vld [vmem:[%s20718_s3 + $0x268] sm:$0xf0] }
 0x16e   : > { %v1137_v42 = vpop.f32.mrf.mxu2 }
 0x16f   : > { %v1186_v34 = vpop.f32.mrf.mxu3 }
 0x170   : > { %v14553_v44 = vadd.f32 %v1186_v34, %v1137_v42  ;;  %v1042_v6 = vpop.f32.mrf.mxu0 }
 0x171   : > { %v1091_v9 = vpop.f32.mrf.mxu1 }
 0x172   : > { %v14555_v52 = vadd.f32 %v1091_v9, %v1042_v6  ;;  %v10605_v6 = vor.u32 %v13199_v39, %v10604_v20  ;;  %v10545_v9 = vor.u32 %v13182_v40, %v10542_v33  ;;  %v10598_v20 = vld [vmem:[%s20718_s3 + $0x2d8] sm:$0xf0]  ;;  %v10524_v39 = vld [vmem:[%s20718_s3 + $0x240] sm:$0xf]  ;;  %v13179_v40 = vld [vmem:[%s20718_s3 + $0x244] sm:$0xf0] }
 0x173   : > { %1397 = vmatmul.bf16.gmra.mxu0 %v14319_v41  ;;  %1495 = vmatmul.bf16.gmra.mxu2 %v14319_v41  ;;  %v13200_v41 = vld [vmem:[%s20718_s3 + $0x2f4] sm:$0xf]  ;;  %v10588_v33 = vld [vmem:[%s20718_s3 + $0x2c0] sm:$0xf] }
 0x174   : > { %1446 = vmatmul.bf16.gmra.mxu1 %v14321_v38  ;;  %1544 = vmatmul.bf16.gmra.mxu3 %v14321_v38  ;;  %v10617_v5 = vor.u32 %v13200_v41, %v10614_v11  ;;  %v13183_v38 = vld [vmem:[%s20718_s3 + $0x264] sm:$0xf0]  ;;  %v13197_v41 = vld [vmem:[%s20718_s3 + $0x2d4] sm:$0xf0]  ;;  %v13180_v11 = vld [vmem:[%s20718_s3 + $0x254] sm:$0xf] }
 0x175   : > { %v10541_v37 = vor.u32 %v13183_v38, %v10540_v46  ;;  %1808 = vmatpush.bf16.msrb.mxu1 %v10605_v6  ;;  %1857 = vmatpush.bf16.msrb.mxu2 %v10545_v9  ;;  %v13196_v38 = vld [vmem:[%s20718_s3 + $0x2d4] sm:$0xf]  ;;  %v10525_v6 = vor.u32 %v13179_v40, %v10524_v39  ;;  %v13195_v9 = vld [vmem:[%s20718_s3 + $0x2c4] sm:$0xf0]  ;;  %v10518_v39 = vld [vmem:[%s20718_s3 + $0x238] sm:$0xf0] }
 0x176   : > { %v1140_v23 = vpop.f32.mrf.mxu2  ;;  %1905 = vmatpush.bf16.msrb.mxu3 %v10617_v5  ;;  %v10534_v5 = vld [vmem:[%s20718_s3 + $0x258] sm:$0xf0]  ;;  %v10589_v61 = vor.u32 %v13195_v9, %v10588_v33 }
 0x177   : > { %v1189_v3 = vpop.f32.mrf.mxu3  ;;  %1759 = vmatpush.bf16.msrb.mxu0 %v10541_v37  ;;  %v10537_v46 = vor.u32 %v13180_v11, %v10534_v5 }
 0x178   : > { %v14603_v42 = vadd.f32 %v1189_v3, %v1140_v23  ;;  %v1044_v34 = vpop.f32.mrf.mxu0  ;;  %v10597_v23 = vor.u32 %v13197_v41, %v10596_v21  ;;  %v10601_v3 = vor.u32 %v13196_v38, %v10598_v20  ;;  %v13194_v21 = vld [vmem:[%s20718_s3 + $0x2c4] sm:$0xf]  ;;  %v10580_v38 = vld [vmem:[%s20718_s3 + $0x2b0] sm:$0xf] }
 0x179   : > { %v1093_v54 = vpop.f32.mrf.mxu1  ;;  %1858 = vmatpush.bf16.msrb.mxu2 %v10537_v46  ;;  %v13177_v46 = vld [vmem:[%s20718_s3 + $0x234] sm:$0xf0] }
 0x17a   : > { %v14611_v58 = vadd.f32 %v1093_v54, %v1044_v34  ;;  %1906 = vmatpush.bf16.msrb.mxu3 %v10609_v56  ;;  %1809 = vmatpush.bf16.msrb.mxu1 %v10597_v23  ;;  %v10516_v23 = vld [vmem:[%s20718_s3 + $0x230] sm:$0xf] }
 0x17b   : > { %1760 = vmatpush.bf16.msrb.mxu0 %v10533_v25  ;;  %v10590_v25 = vld [vmem:[%s20718_s3 + $0x2c8] sm:$0xf0]  ;;  %v10517_v20 = vor.u32 %v13177_v46, %v10516_v23 }
 0x17c   : > { %v10593_v11 = vor.u32 %v13194_v21, %v10590_v25  ;;  %v13174_v21 = vld [vmem:[%s20718_s3 + $0x224] sm:$0xf]  ;;  %v10510_v25 = vld [vmem:[%s20718_s3 + $0x228] sm:$0xf0] }
 0x17d   : > { %1859 = vmatpush.bf16.msrb.mxu2 %v10529_v1  ;;  %v13191_v1 = vld [vmem:[%s20718_s3 + $0x2a4] sm:$0xf0]  ;;  %v10513_v46 = vor.u32 %v13174_v21, %v10510_v25  ;;  %v10492_v25 = vld [vmem:[%s20718_s3 + $0x200] sm:$0xf] }
 0x17e   : > { %v1142_v37 = vpop.f32.mrf.mxu2  ;;  %1907 = vmatpush.bf16.msrb.mxu3 %v10601_v3  ;;  %1810 = vmatpush.bf16.msrb.mxu1 %v10589_v61  ;;  %v13193_v3 = vld [vmem:[%s20718_s3 + $0x2b4] sm:$0xf0]  ;;  %v10573_v23 = vor.u32 %v13191_v1, %v10572_v53 }
 0x17f   : > { %v1191_v34 = vpop.f32.mrf.mxu3  ;;  %1761 = vmatpush.bf16.msrb.mxu0 %v10525_v6  ;;  %v10581_v40 = vor.u32 %v13193_v3, %v10580_v38  ;;  %v13190_v38 = vld [vmem:[%s20718_s3 + $0x2a4] sm:$0xf] }
 0x180   : > { %v14655_v54 = vadd.f32 %v1191_v34, %v1142_v37  ;;  %v1047_v56 = vpop.f32.mrf.mxu0  ;;  %v13176_v37 = vld [vmem:[%s20718_s3 + $0x234] sm:$0xf]  ;;  %v10582_v34 = vld [vmem:[%s20718_s3 + $0x2b8] sm:$0xf0] }
 0x181   : > { %v1096_v41 = vpop.f32.mrf.mxu1  ;;  %v10521_v33 = vor.u32 %v13176_v37, %v10518_v39 }
 0x182   : > { %v14663_v5 = vadd.f32 %v1096_v41, %v1047_v56  ;;  %1908 = vmatpush.bf16.msrb.mxu3 %v10593_v11  ;;  %1811 = vmatpush.bf16.msrb.mxu1 %v10581_v40  ;;  %v10500_v40 = vld [vmem:[%s20718_s3 + $0x210] sm:$0xf] }
 0x183   : > { %1402 = vmatmul.bf16.gmra.mxu0 %v14427_v60  ;;  %1500 = vmatmul.bf16.gmra.mxu2 %v14427_v60  ;;  %v13192_v60 = vld [vmem:[%s20718_s3 + $0x2b4] sm:$0xf] }
 0x184   : > { %1451 = vmatmul.bf16.gmra.mxu1 %v14429_v0  ;;  %1549 = vmatmul.bf16.gmra.mxu3 %v14429_v0  ;;  %v10585_v6 = vor.u32 %v13192_v60, %v10582_v34  ;;  %v10508_v0 = vld [vmem:[%s20718_s3 + $0x220] sm:$0xf]  ;;  %v10564_v60 = vld [vmem:[%s20718_s3 + $0x290] sm:$0xf] }
 0x185   : > { %1762 = vmatpush.bf16.msrb.mxu0 %v10517_v20  ;;  %1860 = vmatpush.bf16.msrb.mxu2 %v10521_v33  ;;  %v10509_v61 = vor.u32 %v13175_v51, %v10508_v0  ;;  %v10574_v20 = vld [vmem:[%s20718_s3 + $0x2a8] sm:$0xf0]  ;;  %v13173_v33 = vld [vmem:[%s20718_s3 + $0x214] sm:$0xf0]  ;;  %v10502_v0 = vld [vmem:[%s20718_s3 + $0x218] sm:$0xf0] }
 0x186   : > { %v1145_v9 = vpop.f32.mrf.mxu2  ;;  %1909 = vmatpush.bf16.msrb.mxu3 %v10585_v6  ;;  %v10577_v37 = vor.u32 %v13190_v38, %v10574_v20  ;;  %1812 = vmatpush.bf16.msrb.mxu1 %v10573_v23  ;;  %v10501_v34 = vor.u32 %v13173_v33, %v10500_v40  ;;  %v13189_v6 = vld [vmem:[%s20718_s3 + $0x294] sm:$0xf0]  ;;  %v10556_v23 = vld [vmem:[%s20718_s3 + $0x280] sm:$0xf]  ;;  %v13187_v20 = vld [vmem:[%s20718_s3 + $0x284] sm:$0xf0] }
 0x187   : > { %v1194_v56 = vpop.f32.mrf.mxu3  ;;  %v10565_v51 = vor.u32 %v13189_v6, %v10564_v60  ;;  %v10557_v60 = vor.u32 %v13187_v20, %v10556_v23  ;;  %v13186_v6 = vld [vmem:[%s20718_s3 + $0x284] sm:$0xf] }
 0x188   : > { %v14711_v41 = vadd.f32 %v1194_v56, %v1145_v9  ;;  %v1049_v11 = vpop.f32.mrf.mxu0  ;;  %v13172_v9 = vld [vmem:[%s20718_s3 + $0x214] sm:$0xf] }
 0x189   : > { %v1098_v3 = vpop.f32.mrf.mxu1  ;;  %1763 = vmatpush.bf16.msrb.mxu0 %v10509_v61  ;;  %1861 = vmatpush.bf16.msrb.mxu2 %v10513_v46  ;;  %v10505_v53 = vor.u32 %v13172_v9, %v10502_v0  ;;  %v13188_v56 = vld [vmem:[%s20718_s3 + $0x294] sm:$0xf]  ;;  %v10566_v61 = vld [vmem:[%s20718_s3 + $0x298] sm:$0xf0]  ;;  %v10558_v9 = vld [vmem:[%s20718_s3 + $0x288] sm:$0xf0] }
 0x18a   : > { %v14719_v39 = vadd.f32 %v1098_v3, %v1049_v11  ;;  %1910 = vmatpush.bf16.msrb.mxu3 %v10577_v37  ;;  %v10569_v1 = vor.u32 %v13188_v56, %v10566_v61  ;;  %1813 = vmatpush.bf16.msrb.mxu1 %v10565_v51  ;;  %v13171_v11 = vld [vmem:[%s20718_s3 + $0x204] sm:$0xf0]  ;;  %v13170_v3 = vld [vmem:[%s20718_s3 + $0x204] sm:$0xf]  ;;  %v10494_v37 = vld [vmem:[%s20718_s3 + $0x208] sm:$0xf0]  ;;  %v10561_v51 = vor.u32 %v13186_v6, %v10558_v9 }
 0x18b   : > { %v10493_v38 = vor.u32 %v13171_v11, %v10492_v25 }
 0x18d   : > { %1764 = vmatpush.bf16.msrb.mxu0 %v10501_v34  ;;  %1862 = vmatpush.bf16.msrb.mxu2 %v10505_v53  ;;  %v10497_v34 = vor.u32 %v13170_v3, %v10494_v37 }
 0x18e   : > { %v1147_v21 = vpop.f32.mrf.mxu2  ;;  %1911 = vmatpush.bf16.msrb.mxu3 %v10569_v1  ;;  %1814 = vmatpush.bf16.msrb.mxu1 %v10557_v60 }
 0x18f   : > { %v1196_v46 = vpop.f32.mrf.mxu3 }
 0x190   : > { %v14763_v40 = vadd.f32 %v1196_v46, %v1147_v21  ;;  %v1052_v33 = vpop.f32.mrf.mxu0 }
 0x191   : > { %v1101_v0 = vpop.f32.mrf.mxu1  ;;  %1765 = vmatpush.bf16.msrb.mxu0 %v10493_v38  ;;  %1863 = vmatpush.bf16.msrb.mxu2 %v10497_v34 }
 0x192   : > { %v14771_v53 = vadd.f32 %v1101_v0, %v1052_v33  ;;  %1912 = vmatpush.bf16.msrb.mxu3 %v10561_v51 }
 0x193   : > { %1407 = vmatmul.bf16.gmra.mxu0 %v14487_v28  ;;  %1505 = vmatmul.bf16.gmra.mxu2 %v14487_v28 }
 0x194   : > { %1456 = vmatmul.bf16.gmra.mxu1 %v14489_v59  ;;  %1554 = vmatmul.bf16.gmra.mxu3 %v14489_v59 }
 0x196   : > { %v1150_v56 = vpop.f32.mrf.mxu2 }
 0x197   : > { %v1199_v61 = vpop.f32.mrf.mxu3 }
 0x198   : > { %v14777_v21 = vadd.f32 %v1199_v61, %v1150_v56  ;;  %v1054_v1 = vpop.f32.mrf.mxu0 }
 0x199   : > { %v1103_v25 = vpop.f32.mrf.mxu1 }
 0x19a   : > { %v14779_v11 = vadd.f32 %v1103_v25, %v1054_v1 }
 0x19e   : > { %v1152_v23 = vpop.f32.mrf.mxu2 }
 0x19f   : > { %v1201_v46 = vpop.f32.mrf.mxu3 }
 0x1a0   : > { %v14781_v38 = vadd.f32 %v1201_v46, %v1152_v23  ;;  %v1057_v20 = vpop.f32.mrf.mxu0 }
 0x1a1   : > { %v1106_v3 = vpop.f32.mrf.mxu1 }
 0x1a2   : > { %v14783_v28 = vadd.f32 %v1106_v3, %v1057_v20 }
 0x1a3   : > { %1412 = vmatmul.bf16.gmra.mxu0 %v14499_v12  ;;  %1510 = vmatmul.bf16.gmra.mxu2 %v14499_v12 }
 0x1a4   : > { %1461 = vmatmul.bf16.gmra.mxu1 %v14501_v14  ;;  %1559 = vmatmul.bf16.gmra.mxu3 %v14501_v14 }
 0x1a6   : > { %v1155_v59 = vpop.f32.mrf.mxu2 }
 0x1a7   : > { %v1204_v37 = vpop.f32.mrf.mxu3 }
 0x1a8   : > { %v14789_v33 = vadd.f32 %v1204_v37, %v1155_v59  ;;  %v1059_v60 = vpop.f32.mrf.mxu0 }
 0x1a9   : > { %v1108_v34 = vpop.f32.mrf.mxu1 }
 0x1aa   : > { %v14791_v6 = vadd.f32 %v1108_v34, %v1059_v60 }
 0x1ae   : > { %v1157_v9 = vpop.f32.mrf.mxu2 }
 0x1af   : > { %v1206_v0 = vpop.f32.mrf.mxu3 }
 0x1b0   : > { %v14793_v51 = vadd.f32 %v1206_v0, %v1157_v9  ;;  %v1378_v56 = vpop.f32.mrf.mxu0 }
 0x1b1   : > { %v1379_v61 = vadd.f32 %v1378_v56, %v14507_v24  ;;  %v1427_v12 = vpop.f32.mrf.mxu1 }
 0x1b2   : > { %20758 = vst [vmem:[#allocation2_spill] sm:$0xff] %v14793_v51 }
 0x1b3   : > { %v14796_v1 = vadd.f32 %v1427_v12, %v1379_v61  ;;  %1766 = vmatmul.bf16.vlgmr.msrb.gmra.mxu0 %v14227_v13  ;;  %1864 = vmatmul.bf16.vlgmr.msrb.gmra.mxu2 %v14227_v13 }
 0x1b4   : > { %1815 = vmatmul.bf16.vlgmr.msrb.gmra.mxu1 %v14229_v15  ;;  %1913 = vmatmul.bf16.vlgmr.msrb.gmra.mxu3 %v14229_v15 }
 0x1b6   : > { %v1476_v14 = vpop.f32.mrf.mxu2 }
 0x1b7   : > { %v1477_v25 = vadd.f32 %v1476_v14, %v14513_v30  ;;  %v1525_v23 = vpop.f32.mrf.mxu3 }
 0x1b8   : > { %v1380_v46 = vpop.f32.mrf.mxu0 }
 0x1b9   : > { %v14803_v20 = vadd.f32 %v1525_v23, %v1477_v25  ;;  %v1381_v24 = vadd.f32 %v1380_v46, %v14515_v16  ;;  %v1429_v3 = vpop.f32.mrf.mxu1 }
 0x1bb   : > { %v14806_v59 = vadd.f32 %v1429_v3, %v1381_v24 }
 0x1be   : > { %v1478_v37 = vpop.f32.mrf.mxu2 }
 0x1bf   : > { %v1479_v60 = vadd.f32 %v1478_v37, %v14517_v48  ;;  %v1527_v13 = vpop.f32.mrf.mxu3 }
 0x1c0   : > { %v1383_v34 = vpop.f32.mrf.mxu0 }
 0x1c1   : > { %v14809_v9 = vadd.f32 %v1527_v13, %v1479_v60  ;;  %v1384_v15 = vadd.f32 %v1383_v34, %v14519_v49  ;;  %v1432_v0 = vpop.f32.mrf.mxu1 }
 0x1c3   : > { %v14812_v30 = vadd.f32 %v1432_v0, %v1384_v15  ;;  %1771 = vmatmul.bf16.gmra.mxu0 %v14239_v27  ;;  %1869 = vmatmul.bf16.gmra.mxu2 %v14239_v27 }
 0x1c4   : > { %1820 = vmatmul.bf16.gmra.mxu1 %v14241_v31  ;;  %1918 = vmatmul.bf16.gmra.mxu3 %v14241_v31 }
 0x1c6   : > { %v1481_v16 = vpop.f32.mrf.mxu2 }
 0x1c7   : > { %v1482_v48 = vadd.f32 %v1481_v16, %v14525_v50  ;;  %v1530_v56 = vpop.f32.mrf.mxu3 }
 0x1c8   : > { %v1385_v61 = vpop.f32.mrf.mxu0 }
 0x1c9   : > { %v14819_v12 = vadd.f32 %v1530_v56, %v1482_v48  ;;  %v1386_v49 = vadd.f32 %v1385_v61, %v14527_v35  ;;  %v1434_v14 = vpop.f32.mrf.mxu1 }
 0x1cb   : > { %v14822_v25 = vadd.f32 %v1434_v14, %v1386_v49 }
 0x1ce   : > { %v1483_v23 = vpop.f32.mrf.mxu2 }
 0x1cf   : > { %v1484_v46 = vadd.f32 %v1483_v23, %v14529_v29  ;;  %v1532_v27 = vpop.f32.mrf.mxu3 }
 0x1d0   : > { %v1388_v24 = vpop.f32.mrf.mxu0 }
 0x1d1   : > { %v14825_v3 = vadd.f32 %v1532_v27, %v1484_v46  ;;  %v1389_v31 = vadd.f32 %v1388_v24, %v14531_v10  ;;  %v1437_v37 = vpop.f32.mrf.mxu1 }
 0x1d3   : > { %v14828_v50 = vadd.f32 %v1437_v37, %v1389_v31  ;;  %1776 = vmatmul.bf16.gmra.mxu0 %v14251_v43  ;;  %1874 = vmatmul.bf16.gmra.mxu2 %v14251_v43 }
 0x1d4   : > { %1825 = vmatmul.bf16.gmra.mxu1 %v14253_v45  ;;  %1923 = vmatmul.bf16.gmra.mxu3 %v14253_v45 }
 0x1d6   : > { %v1486_v35 = vpop.f32.mrf.mxu2 }
 0x1d7   : > { %v1487_v29 = vadd.f32 %v1486_v35, %v14537_v22  ;;  %v1535_v60 = vpop.f32.mrf.mxu3 }
 0x1d8   : > { %v1390_v13 = vpop.f32.mrf.mxu0 }
 0x1d9   : > { %v14835_v34 = vadd.f32 %v1535_v60, %v1487_v29  ;;  %v1391_v10 = vadd.f32 %v1390_v13, %v14539_v8  ;;  %v1439_v15 = vpop.f32.mrf.mxu1 }
 0x1db   : > { %v14838_v0 = vadd.f32 %v1439_v15, %v1391_v10 }
 0x1de   : > { %v1488_v16 = vpop.f32.mrf.mxu2 }
 0x1df   : > { %v1489_v48 = vadd.f32 %v1488_v16, %v14541_v18  ;;  %v1537_v43 = vpop.f32.mrf.mxu3 }
 0x1e0   : > { %v1393_v56 = vpop.f32.mrf.mxu0 }
 0x1e1   : > { %v14841_v61 = vadd.f32 %v1537_v43, %v1489_v48  ;;  %v1394_v45 = vadd.f32 %v1393_v56, %v14543_v7  ;;  %v1442_v49 = vpop.f32.mrf.mxu1 }
 0x1e3   : > { %v14844_v22 = vadd.f32 %v1442_v49, %v1394_v45  ;;  %1781 = vmatmul.bf16.gmra.mxu0 %v14263_v55  ;;  %1879 = vmatmul.bf16.gmra.mxu2 %v14263_v55 }
 0x1e4   : > { %1830 = vmatmul.bf16.gmra.mxu1 %v14265_v57  ;;  %1928 = vmatmul.bf16.gmra.mxu3 %v14265_v57 }
 0x1e6   : > { %v1491_v8 = vpop.f32.mrf.mxu2 }
 0x1e7   : > { %v1492_v18 = vadd.f32 %v1491_v8, %v14549_v26  ;;  %v1540_v14 = vpop.f32.mrf.mxu3 }
 0x1e8   : > { %v1395_v23 = vpop.f32.mrf.mxu0 }
 0x1e9   : > { %v14851_v46 = vadd.f32 %v1540_v14, %v1492_v18  ;;  %v1396_v7 = vadd.f32 %v1395_v23, %v14551_v36  ;;  %v1444_v27 = vpop.f32.mrf.mxu1 }
 0x1eb   : > { %v14854_v24 = vadd.f32 %v1444_v27, %v1396_v7 }
 0x1ee   : > { %v1493_v31 = vpop.f32.mrf.mxu2 }
 0x1ef   : > { %v1494_v37 = vadd.f32 %v1493_v31, %v14553_v44  ;;  %v1542_v55 = vpop.f32.mrf.mxu3 }
 0x1f0   : > { %v1398_v35 = vpop.f32.mrf.mxu0 }
 0x1f1   : > { %v14857_v29 = vadd.f32 %v1542_v55, %v1494_v37  ;;  %v1399_v57 = vadd.f32 %v1398_v35, %v14555_v52  ;;  %v1447_v60 = vpop.f32.mrf.mxu1 }
 0x1f3   : > { %v14860_v26 = vadd.f32 %v1447_v60, %v1399_v57  ;;  %1786 = vmatmul.bf16.gmra.mxu0 %v14356_v62  ;;  %1884 = vmatmul.bf16.gmra.mxu2 %v14356_v62 }
 0x1f4   : > { %1835 = vmatmul.bf16.gmra.mxu1 %v14367_v4  ;;  %1933 = vmatmul.bf16.gmra.mxu3 %v14367_v4 }
 0x1f6   : > { %v1496_v36 = vpop.f32.mrf.mxu2 }
 0x1f7   : > { %v1497_v44 = vadd.f32 %v1496_v36, %v14603_v42  ;;  %v1545_v13 = vpop.f32.mrf.mxu3 }
 0x1f8   : > { %v14867_v10 = vpop.f32.mrf.mxu0 }
 0x1f9   : > { %v14869_v15 = vadd.f32 %v1545_v13, %v1497_v44  ;;  %v14871_v52 = vpop.f32.mrf.mxu1 }
 0x1fe   : > { %v14873_v16 = vpop.f32.mrf.mxu2 }
 0x1ff   : > { %v14875_v48 = vpop.f32.mrf.mxu3 }
 0x200   : > { %v1403_v43 = vpop.f32.mrf.mxu0 }
 0x201   : > { %v1404_v62 = vadd.f32 %v1403_v43, %v14663_v5  ;;  %v1452_v56 = vpop.f32.mrf.mxu1 }
 0x203   : > { %v14878_v45 = vadd.f32 %v1452_v56, %v1404_v62  ;;  %1791 = vmatmul.bf16.gmra.mxu0 %v14464_v32  ;;  %1889 = vmatmul.bf16.gmra.mxu2 %v14464_v32 }
 0x204   : > { %1840 = vmatmul.bf16.gmra.mxu1 %v14475_v17  ;;  %1938 = vmatmul.bf16.gmra.mxu3 %v14475_v17 }
 0x206   : > { %v1501_v4 = vpop.f32.mrf.mxu2 }
 0x207   : > { %v1502_v42 = vadd.f32 %v1501_v4, %v14711_v41  ;;  %v1550_v49 = vpop.f32.mrf.mxu3 }
 0x208   : > { %v14885_v8 = vpop.f32.mrf.mxu0 }
 0x209   : > { %v14887_v18 = vadd.f32 %v1550_v49, %v1502_v42  ;;  %v14889_v5 = vpop.f32.mrf.mxu1 }
 0x20e   : > { %v14891_v14 = vpop.f32.mrf.mxu2 }
 0x20f   : > { %v14893_v23 = vpop.f32.mrf.mxu3 }
 0x210   : > { %v1408_v7 = vpop.f32.mrf.mxu0 }
 0x211   : > { %v1409_v32 = vadd.f32 %v1408_v7, %v14771_v53  ;;  %v1457_v27 = vpop.f32.mrf.mxu1 }
 0x213   : > { %v14896_v31 = vadd.f32 %v1457_v27, %v1409_v32  ;;  %1796 = vmatmul.bf16.gmra.mxu0 %v14491_v63  ;;  %1894 = vmatmul.bf16.gmra.mxu2 %v14491_v63 }
 0x214   : > { %1845 = vmatmul.bf16.gmra.mxu1 %v14493_v2  ;;  %1943 = vmatmul.bf16.gmra.mxu3 %v14493_v2 }
 0x216   : > { %v1506_v17 = vpop.f32.mrf.mxu2 }
 0x217   : > { %v1507_v41 = vadd.f32 %v1506_v17, %v14777_v21  ;;  %v1555_v37 = vpop.f32.mrf.mxu3 }
 0x218   : > { %v14903_v55 = vpop.f32.mrf.mxu0 }
 0x219   : > { %v14905_v35 = vadd.f32 %v1555_v37, %v1507_v41  ;;  %v14907_v53 = vpop.f32.mrf.mxu1 }
 0x21e   : > { %v14909_v57 = vpop.f32.mrf.mxu2 }
 0x21f   : > { %v14911_v60 = vpop.f32.mrf.mxu3 }
 0x220   : > { %v1413_v36 = vpop.f32.mrf.mxu0 }
 0x221   : > { %v1414_v63 = vadd.f32 %v1413_v36, %v14783_v28  ;;  %v1462_v44 = vpop.f32.mrf.mxu1 }
 0x223   : > { %v14914_v13 = vadd.f32 %v1462_v44, %v1414_v63  ;;  %1801 = vmatmul.bf16.gmra.mxu0 %v14503_v47  ;;  %1899 = vmatmul.bf16.gmra.mxu2 %v14503_v47 }
 0x224   : > { %1850 = vmatmul.bf16.gmra.mxu1 %v14505_v19  ;;  %1948 = vmatmul.bf16.gmra.mxu3 %v14505_v19  ;;  %v1986_v19 = vld [vmem:[%s20719_s4] sm:$0x3] }
 0x225   : > { %v14935_v17 = vperm.slane %v1986_v19, 0 }
 0x226   : > { %v1511_v2 = vpop.f32.mrf.mxu2 }
 0x227   : > { %v1512_v21 = vadd.f32 %v1511_v2, %v14789_v33  ;;  %v1560_v43 = vpop.f32.mrf.mxu3 }
 0x228   : > { %v14921_v62 = vpop.f32.mrf.mxu0 }
 0x229   : > { %v14923_v56 = vadd.f32 %v1560_v43, %v1512_v21  ;;  %v14925_v28 = vpop.f32.mrf.mxu1  ;;  %v14940_v43 = vperm.slane %v1986_v19, 1 }
 0x22b   : > { %20759 = vst [vmem:[#allocation3_spill] sm:$0xff] %v14923_v56 }
 0x22e   : > { %v14927_v4 = vpop.f32.mrf.mxu2 }
 0x22f   : > { %20760 = vst [vmem:[#allocation4_spill] sm:$0xff] %v14927_v4  ;;  %v14929_v42 = vpop.f32.mrf.mxu3 }
 0x230   : > { %20761 = vst [vmem:[#allocation5_spill] sm:$0xff] %v14929_v42  ;;  %v1767_v49 = vpop.f32.mrf.mxu0 }
 0x231   : > { %v1816_v47 = vpop.f32.mrf.mxu1 }
 0x232   : > { %v1817_v7 = vadd.f32 %v1816_v47, %v1767_v49 }
 0x234   : > { %v1954_v32 = vadd.f32 %v1817_v7, %v14796_v1 }
 0x236   : > { %v1865_v33 = vpop.f32.mrf.mxu2  ;;  %v1992_v2 = vadd.f32 %v14935_v17, %v1954_v32 }
 0x237   : > { %v1914_v27 = vpop.f32.mrf.mxu3 }
 0x238   : > { %v1915_v41 = vadd.f32 %v1914_v27, %v1865_v33  ;;  %v1769_v37 = vpop.f32.mrf.mxu0  ;;  %v2024_v7 = vmax.f32 %v1992_v2, 0.0 }
 0x239   : > { %v1818_v36 = vpop.f32.mrf.mxu1 }
 0x23a   : > { %v1955_v63 = vadd.f32 %v1915_v41, %v14803_v20  ;;  %v1819_v44 = vadd.f32 %v1818_v36, %v1769_v37 }
 0x23c   : > { %v1956_v21 = vadd.f32 %v1819_v44, %v14806_v59  ;;  %v1993_v27 = vadd.f32 %v14940_v43, %v1955_v63 }
 0x23e   : > { %v1994_v1 = vadd.f32 %v14935_v17, %v1956_v21  ;;  %v1867_v49 = vpop.f32.mrf.mxu2  ;;  %v2025_v19 = vmax.f32 %v1993_v27, 0.0 }
 0x23f   : > { %v1916_v47 = vpop.f32.mrf.mxu3 }
 0x240   : > { %v2026_v42 = vmax.f32 %v1994_v1, 0.0  ;;  %v1917_v56 = vadd.f32 %v1916_v47, %v1867_v49  ;;  %v1772_v4 = vpop.f32.mrf.mxu0 }
 0x241   : > { %v1821_v33 = vpop.f32.mrf.mxu1 }
 0x242   : > { %v1957_v20 = vadd.f32 %v1917_v56, %v14809_v9  ;;  %v1822_v41 = vadd.f32 %v1821_v33, %v1772_v4  ;;  %v14945_v37 = vpack.c.bf16 %v2026_v42, %v2024_v7 }
 0x244   : > { %v1995_v59 = vadd.f32 %v14940_v43, %v1957_v20  ;;  %v1958_v32 = vadd.f32 %v1822_v41, %v14812_v30 }
 0x246   : > { %v2027_v36 = vmax.f32 %v1995_v59, 0.0  ;;  %v1870_v44 = vpop.f32.mrf.mxu2  ;;  %v1996_v9 = vadd.f32 %v14935_v17, %v1958_v32 }
 0x247   : > { %v1919_v21 = vpop.f32.mrf.mxu3 }
 0x248   : > { %v1920_v2 = vadd.f32 %v1919_v21, %v1870_v44  ;;  %v1774_v1 = vpop.f32.mrf.mxu0  ;;  %v14949_v49 = vpack.c.bf16 %v2027_v36, %v2025_v19  ;;  %v2028_v7 = vmax.f32 %v1996_v9, 0.0 }
 0x249   : > { %v1823_v47 = vpop.f32.mrf.mxu1 }
 0x24a   : > { %v1959_v63 = vadd.f32 %v1920_v2, %v14819_v12  ;;  %v1824_v51 = vadd.f32 %v1823_v47, %v1774_v1 }
 0x24c   : > { %v1960_v56 = vadd.f32 %v1824_v51, %v14822_v25  ;;  %v1997_v59 = vadd.f32 %v14940_v43, %v1959_v63 }
 0x24e   : > { %v1998_v4 = vadd.f32 %v14935_v17, %v1960_v56  ;;  %v1872_v42 = vpop.f32.mrf.mxu2  ;;  %v2029_v25 = vmax.f32 %v1997_v59, 0.0 }
 0x24f   : > { %v1921_v30 = vpop.f32.mrf.mxu3 }
 0x250   : > { %v2030_v33 = vmax.f32 %v1998_v4, 0.0  ;;  %v1922_v27 = vadd.f32 %v1921_v30, %v1872_v42  ;;  %v1777_v20 = vpop.f32.mrf.mxu0 }
 0x251   : > { %v1826_v41 = vpop.f32.mrf.mxu1 }
 0x252   : > { %v1961_v19 = vadd.f32 %v1922_v27, %v14825_v3  ;;  %v1827_v36 = vadd.f32 %v1826_v41, %v1777_v20  ;;  %v14957_v12 = vpack.c.bf16 %v2030_v33, %v2028_v7 }
 0x254   : > { %v1999_v32 = vadd.f32 %v14940_v43, %v1961_v19  ;;  %v1962_v51 = vadd.f32 %v1827_v36, %v14828_v50 }
 0x256   : > { %v2031_v44 = vmax.f32 %v1999_v32, 0.0  ;;  %v1875_v21 = vpop.f32.mrf.mxu2  ;;  %v2000_v3 = vadd.f32 %v14935_v17, %v1962_v51 }
 0x257   : > { %v1924_v2 = vpop.f32.mrf.mxu3 }
 0x258   : > { %v1925_v1 = vadd.f32 %v1924_v2, %v1875_v21  ;;  %v1779_v47 = vpop.f32.mrf.mxu0  ;;  %v14961_v9 = vpack.c.bf16 %v2031_v44, %v2029_v25  ;;  %v2032_v33 = vmax.f32 %v2000_v3, 0.0 }
 0x259   : > { %v1828_v56 = vpop.f32.mrf.mxu1 }
 0x25a   : > { %v1963_v63 = vadd.f32 %v1925_v1, %v14835_v34  ;;  %v1829_v4 = vadd.f32 %v1828_v56, %v1779_v47 }
 0x25c   : > { %v1964_v42 = vadd.f32 %v1829_v4, %v14838_v0  ;;  %v2001_v19 = vadd.f32 %v14940_v43, %v1963_v63 }
 0x25e   : > { %v2002_v30 = vadd.f32 %v14935_v17, %v1964_v42  ;;  %v1877_v7 = vpop.f32.mrf.mxu2  ;;  %v2033_v25 = vmax.f32 %v2001_v19, 0.0 }
 0x25f   : > { %v1926_v50 = vpop.f32.mrf.mxu3 }
 0x260   : > { %v2034_v27 = vmax.f32 %v2002_v30, 0.0  ;;  %v1927_v20 = vadd.f32 %v1926_v50, %v1877_v7  ;;  %v1782_v41 = vpop.f32.mrf.mxu0 }
 0x261   : > { %v1831_v59 = vpop.f32.mrf.mxu1 }
 0x262   : > { %v1965_v36 = vadd.f32 %v1927_v20, %v14841_v61  ;;  %v1832_v32 = vadd.f32 %v1831_v59, %v1782_v41  ;;  %v14969_v34 = vpack.c.bf16 %v2034_v27, %v2032_v33 }
 0x264   : > { %v2003_v51 = vadd.f32 %v14940_v43, %v1965_v36  ;;  %v1966_v0 = vadd.f32 %v1832_v32, %v14844_v22 }
 0x266   : > { %v2035_v44 = vmax.f32 %v2003_v51, 0.0  ;;  %v1880_v21 = vpop.f32.mrf.mxu2  ;;  %v2004_v61 = vadd.f32 %v14935_v17, %v1966_v0  ;;  %v1401_v51 = vadd.f32 %v14867_v10, %v14611_v58 }
 0x267   : > { %v1929_v2 = vpop.f32.mrf.mxu3 }
 0x268   : > { %v1930_v1 = vadd.f32 %v1929_v2, %v1880_v21  ;;  %v1784_v47 = vpop.f32.mrf.mxu0  ;;  %v14973_v56 = vpack.c.bf16 %v2035_v44, %v2033_v25  ;;  %v2036_v50 = vmax.f32 %v2004_v61, 0.0 }
 0x269   : > { %v1833_v4 = vpop.f32.mrf.mxu1 }
 0x26a   : > { %v1967_v63 = vadd.f32 %v1930_v1, %v14851_v46  ;;  %v1834_v3 = vadd.f32 %v1833_v4, %v1784_v47 }
 0x26c   : > { %v1968_v42 = vadd.f32 %v1834_v3, %v14854_v24  ;;  %v2005_v59 = vadd.f32 %v14940_v43, %v1967_v63 }
 0x26e   : > { %v2006_v30 = vadd.f32 %v14935_v17, %v1968_v42  ;;  %v1882_v7 = vpop.f32.mrf.mxu2  ;;  %v2037_v0 = vmax.f32 %v2005_v59, 0.0  ;;  %v1406_v59 = vadd.f32 %v14885_v8, %v14719_v39 }
 0x26f   : > { %v1931_v22 = vpop.f32.mrf.mxu3 }
 0x270   : > { %v2038_v33 = vmax.f32 %v2006_v30, 0.0  ;;  %v1932_v27 = vadd.f32 %v1931_v22, %v1882_v7  ;;  %v1787_v20 = vpop.f32.mrf.mxu0 }
 0x271   : > { %v1836_v41 = vpop.f32.mrf.mxu1 }
 0x272   : > { %v1969_v19 = vadd.f32 %v1932_v27, %v14857_v29  ;;  %v1837_v36 = vadd.f32 %v1836_v41, %v1787_v20  ;;  %v14981_v46 = vpack.c.bf16 %v2038_v33, %v2036_v50  ;;  %v1450_v29 = vadd.f32 %v14871_v52, %v1401_v51 }
 0x274   : > { %v2007_v32 = vadd.f32 %v14940_v43, %v1969_v19  ;;  %v1970_v24 = vadd.f32 %v1837_v36, %v14860_v26  ;;  %v1499_v26 = vadd.f32 %v14873_v16, %v14655_v54 }
 0x276   : > { %v2039_v25 = vmax.f32 %v2007_v32, 0.0  ;;  %v1885_v44 = vpop.f32.mrf.mxu2  ;;  %v2008_v61 = vadd.f32 %v14935_v17, %v1970_v24  ;;  %v1548_v7 = vadd.f32 %v14875_v48, %v1499_v26 }
 0x277   : > { %v1934_v21 = vpop.f32.mrf.mxu3 }
 0x278   : > { %v1935_v2 = vadd.f32 %v1934_v21, %v1885_v44  ;;  %v1789_v1 = vpop.f32.mrf.mxu0  ;;  %v14987_v47 = vpack.c.bf16 %v2039_v25, %v2037_v0  ;;  %v2040_v22 = vmax.f32 %v2008_v61, 0.0  ;;  %v1455_v44 = vadd.f32 %v14889_v5, %v1406_v59 }
 0x279   : > { %v1838_v4 = vpop.f32.mrf.mxu1 }
 0x27a   : > { %v1971_v63 = vadd.f32 %v1935_v2, %v14869_v15  ;;  %v1839_v3 = vadd.f32 %v1838_v4, %v1789_v1  ;;  %v1504_v1 = vadd.f32 %v14891_v14, %v14763_v40 }
 0x27c   : > { %v1972_v58 = vadd.f32 %v1839_v3, %v1450_v29  ;;  %v2009_v15 = vadd.f32 %v14940_v43, %v1971_v63  ;;  %v1553_v3 = vadd.f32 %v14893_v23, %v1504_v1 }
 0x27e   : > { %v2010_v10 = vadd.f32 %v14935_v17, %v1972_v58  ;;  %v1887_v42 = vpop.f32.mrf.mxu2  ;;  %v2041_v19 = vmax.f32 %v2009_v15, 0.0 }
 0x27f   : > { %v1936_v30 = vpop.f32.mrf.mxu3 }
 0x280   : > { %v2042_v50 = vmax.f32 %v2010_v10, 0.0  ;;  %v1937_v33 = vadd.f32 %v1936_v30, %v1887_v42  ;;  %v1792_v27 = vpop.f32.mrf.mxu0 }
 0x281   : > { %v1841_v52 = vpop.f32.mrf.mxu1 }
 0x282   : > { %v1973_v20 = vadd.f32 %v1937_v33, %v1548_v7  ;;  %v14997_v41 = vpack.c.bf16 %v2042_v50, %v2040_v22  ;;  %v1842_v16 = vadd.f32 %v1841_v52, %v1792_v27 }
 0x284   : > { %v2011_v54 = vadd.f32 %v14940_v43, %v1973_v20  ;;  %v1974_v24 = vadd.f32 %v1842_v16, %v14878_v45 }
 0x286   : > { %v2043_v36 = vmax.f32 %v2011_v54, 0.0  ;;  %v1890_v32 = vpop.f32.mrf.mxu2  ;;  %v2012_v4 = vadd.f32 %v14935_v17, %v1974_v24 }
 0x287   : > { %v1939_v48 = vpop.f32.mrf.mxu3 }
 0x288   : > { %v1794_v51 = vpop.f32.mrf.mxu0  ;;  %v15003_v0 = vpack.c.bf16 %v2043_v36, %v2041_v19  ;;  %v1940_v21 = vadd.f32 %v1939_v48, %v1890_v32  ;;  %v2044_v26 = vmax.f32 %v2012_v4, 0.0  ;;  %v1509_v19 = vadd.f32 %v14909_v57, %v14781_v38 }
 0x289   : > { %v1843_v25 = vpop.f32.mrf.mxu1 }
 0x28a   : > { %v1844_v2 = vadd.f32 %v1843_v25, %v1794_v51  ;;  %v1975_v8 = vadd.f32 %v1940_v21, %v14887_v18  ;;  %v1411_v18 = vadd.f32 %v14903_v55, %v14779_v11  ;;  %v1558_v24 = vadd.f32 %v14911_v60, %v1509_v19 }
 0x28c   : > { %v1976_v39 = vadd.f32 %v1844_v2, %v1455_v44  ;;  %v2013_v42 = vadd.f32 %v14940_v43, %v1975_v8  ;;  %v1460_v54 = vadd.f32 %v14907_v53, %v1411_v18 }
 0x28e   : > { %v2014_v29 = vadd.f32 %v14935_v17, %v1976_v39  ;;  %v1892_v63 = vpop.f32.mrf.mxu2  ;;  %v2045_v22 = vmax.f32 %v2013_v42, 0.0  ;;  %v20763_v42 = vld [vmem:[#allocation4_spill] sm:$0xff] }
 0x28f   : > { %v1941_v45 = vpop.f32.mrf.mxu3 }
 0x290   : > { %v2046_v61 = vmax.f32 %v2014_v29, 0.0  ;;  %v1942_v58 = vadd.f32 %v1941_v45, %v1892_v63  ;;  %v1797_v5 = vpop.f32.mrf.mxu0 }
 0x291   : > { %v1846_v10 = vpop.f32.mrf.mxu1 }
 0x292   : > { %v1977_v30 = vadd.f32 %v1942_v58, %v1553_v3  ;;  %v15013_v40 = vpack.c.bf16 %v2046_v61, %v2044_v26  ;;  %v1847_v7 = vadd.f32 %v1846_v10, %v1797_v5  ;;  %v20762_v10 = vld [vmem:[#allocation2_spill] sm:$0xff] }
 0x294   : > { %v2015_v14 = vadd.f32 %v14940_v43, %v1977_v30  ;;  %v1978_v27 = vadd.f32 %v1847_v7, %v14896_v31  ;;  %v1514_v30 = vadd.f32 %v20763_v42, %v20762_v10  ;;  %v10724_v10 = vld [vmem:[%s20718_s3 + $0x450] sm:$0xf]  ;;  %v13245_v42 = vld [vmem:[%s20718_s3 + $0x454] sm:$0xf0] }
 0x296   : > { %v2047_v50 = vmax.f32 %v2015_v14, 0.0  ;;  %v1895_v33 = vpop.f32.mrf.mxu2  ;;  %v2016_v36 = vadd.f32 %v14935_v17, %v1978_v27 }
 0x297   : > { %v1944_v23 = vpop.f32.mrf.mxu3 }
 0x298   : > { %v1799_v52 = vpop.f32.mrf.mxu0  ;;  %v15019_v15 = vpack.c.bf16 %v2047_v50, %v2045_v22  ;;  %v1945_v16 = vadd.f32 %v1944_v23, %v1895_v33  ;;  %v2048_v51 = vmax.f32 %v2016_v36, 0.0  ;;  %v20765_v50 = vld [vmem:[#allocation5_spill] sm:$0xff]  ;;  %v13755_v36 = vld [vmem:[%s20717_s2] sm:$0xff] }
 0x299   : > { %v1848_v20 = vpop.f32.mrf.mxu1  ;;  %v1563_v33 = vadd.f32 %v20765_v50, %v1514_v30  ;;  %v13244_v30 = vld [vmem:[%s20718_s3 + $0x454] sm:$0xf]  ;;  %v10798_v50 = vld [vmem:[%s20718_s3 + $0x4e8] sm:$0xf0] }
 0x29a   : > { %v1849_v59 = vadd.f32 %v1848_v20, %v1799_v52  ;;  %v1979_v55 = vadd.f32 %v1945_v16, %v14905_v35  ;;  %v1416_v35 = vadd.f32 %v14921_v62, %v14791_v6  ;;  %v20764_v62 = vld [vmem:[#allocation3_spill] sm:$0xff] }
 0x29c   : > { %v1980_v11 = vadd.f32 %v1849_v59, %v1460_v54  ;;  %v2017_v2 = vadd.f32 %v14940_v43, %v1979_v55  ;;  %v1465_v61 = vadd.f32 %v14925_v28, %v1416_v35  ;;  %v13757_v55 = vld [vmem:[%s20717_s2 + $0x8] sm:$0xff] }
 0x29d   : > { %v13247_v35 = vld [vmem:[%s20718_s3 + $0x464] sm:$0xf0] }
 0x29e   : > { %v2018_v32 = vadd.f32 %v14935_v17, %v1980_v11  ;;  %v1897_v48 = vpop.f32.mrf.mxu2  ;;  %v2049_v39 = vmax.f32 %v2017_v2, 0.0  ;;  %v13756_v11 = vld [vmem:[%s20716_s1 + $0x8] sm:$0xff]  ;;  %v13762_v2 = vld [vmem:[%s20716_s1 + $0x20] sm:$0xff] }
 0x29f   : > { %v1946_v31 = vpop.f32.mrf.mxu3 }
 0x2a0   : > { %v2050_v25 = vmax.f32 %v2018_v32, 0.0  ;;  %v1947_v44 = vadd.f32 %v1946_v31, %v1897_v48  ;;  %v1802_v53 = vpop.f32.mrf.mxu0  ;;  %v13758_v32 = vld [vmem:[%s20716_s1 + $0x10] sm:$0xff]  ;;  %v13760_v31 = vld [vmem:[%s20716_s1 + $0x18] sm:$0xff] }
 0x2a1   : > { %v1851_v21 = vpop.f32.mrf.mxu1  ;;  %v13759_v48 = vld [vmem:[%s20717_s2 + $0x10] sm:$0xff] }
 0x2a2   : > { %v1981_v1 = vadd.f32 %v1947_v44, %v1558_v24  ;;  %v15029_v38 = vpack.c.bf16 %v2050_v25, %v2048_v51  ;;  %v1852_v4 = vadd.f32 %v1851_v21, %v1802_v53  ;;  %v13761_v24 = vld [vmem:[%s20717_s2 + $0x18] sm:$0xff]  ;;  %v10740_v51 = vld [vmem:[%s20718_s3 + $0x470] sm:$0xf]  ;;  %v13248_v44 = vld [vmem:[%s20718_s3 + $0x474] sm:$0xf] }
 0x2a3   : > { %v13249_v25 = vld [vmem:[%s20718_s3 + $0x474] sm:$0xf0]  ;;  %v10742_v21 = vld [vmem:[%s20718_s3 + $0x478] sm:$0xf0] }
 0x2a4   : > { %v2019_v57 = vadd.f32 %v14940_v43, %v1981_v1  ;;  %v1982_v63 = vadd.f32 %v1852_v4, %v14914_v13  ;;  %v10741_v53 = vor.u32 %v13249_v25, %v10740_v51  ;;  %v13763_v1 = vld [vmem:[%s20717_s2 + $0x20] sm:$0xff]  ;;  %v10710_v51 = vld [vmem:[%s20718_s3 + $0x438] sm:$0xf0]  ;;  %v13764_v25 = vld [vmem:[%s20716_s1 + $0x28] sm:$0xff] }
 0x2a5   : > { %v10732_v4 = vld [vmem:[%s20718_s3 + $0x460] sm:$0xf] }
 0x2a6   : > { %v2051_v8 = vmax.f32 %v2019_v57, 0.0  ;;  %v1900_v29 = vpop.f32.mrf.mxu2  ;;  %v2020_v14 = vadd.f32 %v14935_v17, %v1982_v63  ;;  %v10745_v57 = vor.u32 %v13248_v44, %v10742_v21  ;;  %v10804_v63 = vld [vmem:[%s20718_s3 + $0x4f0] sm:$0xf]  ;;  %v13765_v44 = vld [vmem:[%s20717_s2 + $0x28] sm:$0xff]  ;;  %v10780_v21 = vld [vmem:[%s20718_s3 + $0x4c0] sm:$0xf] }
 0x2a7   : > { %v1949_v60 = vpop.f32.mrf.mxu3 }
 0x2a8   : > { %v1804_v45 = vpop.f32.mrf.mxu0  ;;  %v15035_v3 = vpack.c.bf16 %v2051_v8, %v2049_v39  ;;  %v1950_v58 = vadd.f32 %v1949_v60, %v1900_v29  ;;  %v2052_v23 = vmax.f32 %v2020_v14, 0.0  ;;  %v13246_v39 = vld [vmem:[%s20718_s3 + $0x464] sm:$0xf]  ;;  %v10733_v8 = vor.u32 %v13247_v35, %v10732_v4  ;;  %v10734_v29 = vld [vmem:[%s20718_s3 + $0x468] sm:$0xf0] }
 0x2a9   : > { %v1853_v26 = vpop.f32.mrf.mxu1  ;;  %v10737_v60 = vor.u32 %v13246_v39, %v10734_v29  ;;  %v10725_v14 = vor.u32 %v13245_v42, %v10724_v10  ;;  %v10782_v4 = vld [vmem:[%s20718_s3 + $0x4c8] sm:$0xf0]  ;;  %v10700_v35 = vld [vmem:[%s20718_s3 + $0x420] sm:$0xf]  ;;  %v13239_v39 = vld [vmem:[%s20718_s3 + $0x424] sm:$0xf0] }
 0x2aa   : > { %v1854_v5 = vadd.f32 %v1853_v26, %v1804_v45  ;;  %v1983_v7 = vadd.f32 %v1950_v58, %v20764_v62  ;;  %v13265_v45 = vld [vmem:[%s20718_s3 + $0x4f4] sm:$0xf0]  ;;  %v13264_v26 = vld [vmem:[%s20718_s3 + $0x4f4] sm:$0xf]  ;;  %v10806_v58 = vld [vmem:[%s20718_s3 + $0x4f8] sm:$0xf0]  ;;  %v10701_v29 = vor.u32 %v13239_v39, %v10700_v35 }
 0x2ab   : > { %v10796_v62 = vld [vmem:[%s20718_s3 + $0x4e0] sm:$0xf]  ;;  %v10774_v10 = vld [vmem:[%s20718_s3 + $0x4b8] sm:$0xf0] }
 0x2ac   : > { %v1984_v6 = vadd.f32 %v1854_v5, %v1465_v61  ;;  %v2021_v28 = vadd.f32 %v14940_v43, %v1983_v7  ;;  %v10805_v61 = vor.u32 %v13265_v45, %v10804_v63  ;;  %v10809_v5 = vor.u32 %v13264_v26, %v10806_v58  ;;  %v13263_v7 = vld [vmem:[%s20718_s3 + $0x4e4] sm:$0xf0]  ;;  %v10702_v63 = vld [vmem:[%s20718_s3 + $0x428] sm:$0xf0]  ;;  %v10772_v26 = vld [vmem:[%s20718_s3 + $0x4b0] sm:$0xf] }
 0x2ad   : > { %v13256_v58 = vld [vmem:[%s20718_s3 + $0x4b4] sm:$0xf] }
 0x2ae   : > { %v2022_v18 = vadd.f32 %v14935_v17, %v1984_v6  ;;  %v1902_v22 = vpop.f32.mrf.mxu2  ;;  %v2053_v59 = vmax.f32 %v2021_v28, 0.0  ;;  %v10726_v6 = vld [vmem:[%s20718_s3 + $0x458] sm:$0xf0]  ;;  %v10718_v28 = vld [vmem:[%s20718_s3 + $0x448] sm:$0xf0]  ;;  %v10777_v42 = vor.u32 %v13256_v58, %v10774_v10 }
 0x2af   : > { %v1951_v13 = vpop.f32.mrf.mxu3 }
 0x2b0   : > { %v2054_v27 = vmax.f32 %v2022_v18, 0.0  ;;  %v1952_v52 = vadd.f32 %v1951_v13, %v1902_v22  ;;  %v10729_v18 = vor.u32 %v13244_v30, %v10726_v6  ;;  %v10797_v22 = vor.u32 %v13263_v7, %v10796_v62  ;;  %v13262_v13 = vld [vmem:[%s20718_s3 + $0x4e4] sm:$0xf]  ;;  %v10692_v30 = vld [vmem:[%s20718_s3 + $0x410] sm:$0xf] }
 0x2b1   : > { %v13236_v6 = vld [vmem:[%s20718_s3 + $0x414] sm:$0xf]  ;;  %v10694_v7 = vld [vmem:[%s20718_s3 + $0x418] sm:$0xf0] }
 0x2b2   : > { %v1985_v20 = vadd.f32 %v1952_v52, %v1563_v33  ;;  %v15045_v54 = vpack.c.bf16 %v2054_v27, %v2052_v23  ;;  %v10716_v33 = vld [vmem:[%s20718_s3 + $0x440] sm:$0xf]  ;;  %v10801_v23 = vor.u32 %v13262_v13, %v10798_v50  ;;  %v13243_v27 = vld [vmem:[%s20718_s3 + $0x444] sm:$0xf0]  ;;  %v13242_v52 = vld [vmem:[%s20718_s3 + $0x444] sm:$0xf]  ;;  %v10697_v13 = vor.u32 %v13236_v6, %v10694_v7 }
 0x2b4   : > { %v2023_v16 = vadd.f32 %v14940_v43, %v1985_v20  ;;  %2072 = vmatpush.bf16.msra.mxu0 %v15045_v54  ;;  %2186 = vmatpush.bf16.msra.mxu2 %v15045_v54  ;;  %v13754_v43 = vld [vmem:[%s20716_s1] sm:$0xff]  ;;  %v10717_v20 = vor.u32 %v13243_v27, %v10716_v33 }
 0x2b5   : > { %v13254_v33 = vld [vmem:[%s20718_s3 + $0x4a4] sm:$0xf] }
 0x2b6   : > { %v2055_v17 = vmax.f32 %v2023_v16, 0.0  ;;  %v10788_v16 = vld [vmem:[%s20718_s3 + $0x4d0] sm:$0xf] }
 0x2b8   : > { %2073 = vmatpush.bf16.msra.mxu0 %v15029_v38  ;;  %2187 = vmatpush.bf16.msra.mxu2 %v15029_v38  ;;  %v15052_v19 = vpack.c.bf16 %v2055_v17, %v2053_v59  ;;  %v13261_v59 = vld [vmem:[%s20718_s3 + $0x4d4] sm:$0xf0]  ;;  %v13260_v17 = vld [vmem:[%s20718_s3 + $0x4d4] sm:$0xf] }
 0x2ba   : > { %2121 = vmatpush.bf16.msra.mxu1 %v15052_v19  ;;  %2235 = vmatpush.bf16.msra.mxu3 %v15052_v19 }
 0x2bc   : > { %2074 = vmatpush.bf16.msra.mxu0 %v15013_v40  ;;  %2188 = vmatpush.bf16.msra.mxu2 %v15013_v40 }
 0x2be   : > { %2122 = vmatpush.bf16.msra.mxu1 %v15035_v3  ;;  %2236 = vmatpush.bf16.msra.mxu3 %v15035_v3 }
 0x2c0   : > { %2075 = vmatpush.bf16.msra.mxu0 %v14997_v41  ;;  %2189 = vmatpush.bf16.msra.mxu2 %v14997_v41 }
 0x2c2   : > { %2123 = vmatpush.bf16.msra.mxu1 %v15019_v15  ;;  %2237 = vmatpush.bf16.msra.mxu3 %v15019_v15 }
 0x2c4   : > { %2076 = vmatpush.bf16.msra.mxu0 %v14981_v46  ;;  %2190 = vmatpush.bf16.msra.mxu2 %v14981_v46 }
 0x2c6   : > { %2124 = vmatpush.bf16.msra.mxu1 %v15003_v0  ;;  %2238 = vmatpush.bf16.msra.mxu3 %v15003_v0 }
 0x2c8   : > { %2077 = vmatpush.bf16.msra.mxu0 %v14969_v34  ;;  %2191 = vmatpush.bf16.msra.mxu2 %v14969_v34 }
 0x2ca   : > { %2125 = vmatpush.bf16.msra.mxu1 %v14987_v47  ;;  %2239 = vmatpush.bf16.msra.mxu3 %v14987_v47 }
 0x2cc   : > { %2078 = vmatpush.bf16.msra.mxu0 %v14957_v12  ;;  %2192 = vmatpush.bf16.msra.mxu2 %v14957_v12 }
 0x2ce   : > { %2126 = vmatpush.bf16.msra.mxu1 %v14973_v56  ;;  %2240 = vmatpush.bf16.msra.mxu3 %v14973_v56 }
 0x2d0   : > { %2079 = vmatpush.bf16.msra.mxu0 %v14945_v37  ;;  %2193 = vmatpush.bf16.msra.mxu2 %v14945_v37 }
 0x2d2   : > { %2127 = vmatpush.bf16.msra.mxu1 %v14961_v9  ;;  %2241 = vmatpush.bf16.msra.mxu3 %v14961_v9 }
 0x2d3   : > { %2080 = vmatmul.bf16.vlgmr.msra.gmra.mxu0 %v13754_v43  ;;  %2194 = vmatmul.bf16.vlgmr.msra.gmra.mxu2 %v13755_v36 }
 0x2d4   : > { %2526 = vmatpush.bf16.msrb.mxu0 %v10741_v53  ;;  %2624 = vmatpush.bf16.msrb.mxu2 %v10745_v57 }
 0x2d6   : > { %2128 = vmatpush.bf16.msra.mxu1 %v14949_v49  ;;  %2242 = vmatpush.bf16.msra.mxu3 %v14949_v49 }
 0x2d8   : > { %2527 = vmatpush.bf16.msrb.mxu0 %v10733_v8  ;;  %2625 = vmatpush.bf16.msrb.mxu2 %v10737_v60  ;;  %v13238_v60 = vld [vmem:[%s20718_s3 + $0x424] sm:$0xf] }
 0x2d9   : > { %2129 = vmatmul.bf16.vlgmr.msra.gmra.mxu1 %v13754_v43  ;;  %2243 = vmatmul.bf16.vlgmr.msra.gmra.mxu3 %v13755_v36  ;;  %v10721_v43 = vor.u32 %v13242_v52, %v10718_v28  ;;  %v10789_v36 = vor.u32 %v13261_v59, %v10788_v16  ;;  %v10705_v45 = vor.u32 %v13238_v60, %v10702_v63  ;;  %v10684_v52 = vld [vmem:[%s20718_s3 + $0x400] sm:$0xf]  ;;  %v13235_v28 = vld [vmem:[%s20718_s3 + $0x404] sm:$0xf0]  ;;  %v10686_v59 = vld [vmem:[%s20718_s3 + $0x408] sm:$0xf0] }
 0x2da   : > { %2575 = vmatpush.bf16.msrb.mxu1 %v10805_v61  ;;  %2673 = vmatpush.bf16.msrb.mxu3 %v10809_v5  ;;  %v13257_v61 = vld [vmem:[%s20718_s3 + $0x4b4] sm:$0xf0]  ;;  %v10685_v16 = vor.u32 %v13235_v28, %v10684_v52 }
 0x2db   : > { %v10773_v5 = vor.u32 %v13257_v61, %v10772_v26 }
 0x2dc   : > { %2528 = vmatpush.bf16.msrb.mxu0 %v10725_v14  ;;  %2626 = vmatpush.bf16.msrb.mxu2 %v10729_v18  ;;  %v13237_v14 = vld [vmem:[%s20718_s3 + $0x414] sm:$0xf0]  ;;  %v10764_v18 = vld [vmem:[%s20718_s3 + $0x4a0] sm:$0xf] }
 0x2dd   : > { %v10693_v62 = vor.u32 %v13237_v14, %v10692_v30 }
 0x2de   : > { %2576 = vmatpush.bf16.msrb.mxu1 %v10797_v22  ;;  %2674 = vmatpush.bf16.msrb.mxu3 %v10801_v23  ;;  %v13255_v22 = vld [vmem:[%s20718_s3 + $0x4a4] sm:$0xf0]  ;;  %v10766_v23 = vld [vmem:[%s20718_s3 + $0x4a8] sm:$0xf0] }
 0x2df   : > { %v10765_v50 = vor.u32 %v13255_v22, %v10764_v18  ;;  %v10769_v27 = vor.u32 %v13254_v33, %v10766_v23 }
 0x2e0   : > { %2529 = vmatpush.bf16.msrb.mxu0 %v10717_v20  ;;  %2627 = vmatpush.bf16.msrb.mxu2 %v10721_v43  ;;  %v13234_v20 = vld [vmem:[%s20718_s3 + $0x404] sm:$0xf]  ;;  %v10756_v43 = vld [vmem:[%s20718_s3 + $0x490] sm:$0xf] }
 0x2e2   : > { %2577 = vmatpush.bf16.msrb.mxu1 %v10789_v36  ;;  %v13253_v36 = vld [vmem:[%s20718_s3 + $0x494] sm:$0xf0] }
 0x2e3   : > { %2085 = vmatmul.bf16.gmra.mxu0 %v13756_v11  ;;  %2199 = vmatmul.bf16.gmra.mxu2 %v13757_v55 }
 0x2e9   : > { %2134 = vmatmul.bf16.gmra.mxu1 %v13756_v11  ;;  %2248 = vmatmul.bf16.gmra.mxu3 %v13757_v55  ;;  %v10790_v11 = vld [vmem:[%s20718_s3 + $0x4d8] sm:$0xf0] }
 0x2ea   : > { %v10793_v55 = vor.u32 %v13260_v17, %v10790_v11  ;;  %v10689_v17 = vor.u32 %v13234_v20, %v10686_v59  ;;  %v13252_v11 = vld [vmem:[%s20718_s3 + $0x494] sm:$0xf] }
 0x2ec   : > { %2675 = vmatpush.bf16.msrb.mxu3 %v10793_v55  ;;  %v10757_v55 = vor.u32 %v13253_v36, %v10756_v43 }
 0x2f3   : > { %2090 = vmatmul.bf16.gmra.mxu0 %v13758_v32  ;;  %2204 = vmatmul.bf16.gmra.mxu2 %v13759_v48 }
 0x2f9   : > { %2139 = vmatmul.bf16.gmra.mxu1 %v13758_v32  ;;  %2253 = vmatmul.bf16.gmra.mxu3 %v13759_v48  ;;  %v10708_v32 = vld [vmem:[%s20718_s3 + $0x430] sm:$0xf]  ;;  %v13241_v48 = vld [vmem:[%s20718_s3 + $0x434] sm:$0xf0] }
 0x303   : > { %2095 = vmatmul.bf16.gmra.mxu0 %v13760_v31  ;;  %2209 = vmatmul.bf16.gmra.mxu2 %v13761_v24 }
 0x309   : > { %2144 = vmatmul.bf16.gmra.mxu1 %v13760_v31  ;;  %2258 = vmatmul.bf16.gmra.mxu3 %v13761_v24  ;;  %v13240_v31 = vld [vmem:[%s20718_s3 + $0x434] sm:$0xf]  ;;  %v10709_v24 = vor.u32 %v13241_v48, %v10708_v32  ;;  %v10758_v32 = vld [vmem:[%s20718_s3 + $0x498] sm:$0xf0] }
 0x30a   : > { %v10713_v53 = vor.u32 %v13240_v31, %v10710_v51  ;;  %v10761_v48 = vor.u32 %v13252_v11, %v10758_v32  ;;  %v13766_v31 = vld [vmem:[%s20716_s1 + $0x30] sm:$0xff]  ;;  %v10748_v51 = vld [vmem:[%s20718_s3 + $0x480] sm:$0xf] }
 0x30b   : > { %2530 = vmatpush.bf16.msrb.mxu0 %v10709_v24  ;;  %v13767_v24 = vld [vmem:[%s20717_s2 + $0x30] sm:$0xff] }
 0x30c   : > { %2628 = vmatpush.bf16.msrb.mxu2 %v10713_v53 }
 0x30f   : > { %2531 = vmatpush.bf16.msrb.mxu0 %v10701_v29 }
 0x310   : > { %2629 = vmatpush.bf16.msrb.mxu2 %v10705_v45 }
 0x313   : > { %2100 = vmatmul.bf16.gmra.mxu0 %v13762_v2  ;;  %2214 = vmatmul.bf16.gmra.mxu2 %v13763_v1 }
 0x314   : > { %2532 = vmatpush.bf16.msrb.mxu0 %v10693_v62  ;;  %2630 = vmatpush.bf16.msrb.mxu2 %v10697_v13 }
 0x318   : > { %2533 = vmatpush.bf16.msrb.mxu0 %v10685_v16  ;;  %2631 = vmatpush.bf16.msrb.mxu2 %v10689_v17 }
 0x319   : > { %2149 = vmatmul.bf16.gmra.mxu1 %v13762_v2  ;;  %2263 = vmatmul.bf16.gmra.mxu3 %v13763_v1  ;;  %v13259_v2 = vld [vmem:[%s20718_s3 + $0x4c4] sm:$0xf0]  ;;  %v13258_v1 = vld [vmem:[%s20718_s3 + $0x4c4] sm:$0xf] }
 0x31a   : > { %v10781_v57 = vor.u32 %v13259_v2, %v10780_v21  ;;  %v10785_v8 = vor.u32 %v13258_v1, %v10782_v4  ;;  %v10750_v21 = vld [vmem:[%s20718_s3 + $0x488] sm:$0xf0]  ;;  %v13768_v1 = vld [vmem:[%s20716_s1 + $0x38] sm:$0xff] }
 0x31c   : > { %2578 = vmatpush.bf16.msrb.mxu1 %v10781_v57  ;;  %2676 = vmatpush.bf16.msrb.mxu3 %v10785_v8  ;;  %v13769_v57 = vld [vmem:[%s20717_s2 + $0x38] sm:$0xff] }
 0x320   : > { %2579 = vmatpush.bf16.msrb.mxu1 %v10773_v5  ;;  %2677 = vmatpush.bf16.msrb.mxu3 %v10777_v42 }
 0x323   : > { %2105 = vmatmul.bf16.gmra.mxu0 %v13764_v25  ;;  %2219 = vmatmul.bf16.gmra.mxu2 %v13765_v44 }
 0x324   : > { %2580 = vmatpush.bf16.msrb.mxu1 %v10765_v50  ;;  %2678 = vmatpush.bf16.msrb.mxu3 %v10769_v27 }
 0x328   : > { %2581 = vmatpush.bf16.msrb.mxu1 %v10757_v55  ;;  %2679 = vmatpush.bf16.msrb.mxu3 %v10761_v48 }
 0x329   : > { %2154 = vmatmul.bf16.gmra.mxu1 %v13764_v25  ;;  %2268 = vmatmul.bf16.gmra.mxu3 %v13765_v44  ;;  %v13251_v25 = vld [vmem:[%s20718_s3 + $0x484] sm:$0xf0]  ;;  %v13250_v44 = vld [vmem:[%s20718_s3 + $0x484] sm:$0xf] }
 0x32a   : > { %v10749_v53 = vor.u32 %v13251_v25, %v10748_v51  ;;  %v10753_v2 = vor.u32 %v13250_v44, %v10750_v21  ;;  %v10868_v51 = vld [vmem:[%s20718_s3 + $0x370] sm:$0xf]  ;;  %v13217_v25 = vld [vmem:[%s20718_s3 + $0x374] sm:$0xf0] }
 0x32b   : > { %v10869_v44 = vor.u32 %v13217_v25, %v10868_v51  ;;  %v10846_v51 = vld [vmem:[%s20718_s3 + $0x348] sm:$0xf0] }
 0x32c   : > { %2582 = vmatpush.bf16.msrb.mxu1 %v10749_v53  ;;  %2680 = vmatpush.bf16.msrb.mxu3 %v10753_v2  ;;  %v10870_v53 = vld [vmem:[%s20718_s3 + $0x378] sm:$0xf0] }
 0x32d   : > { %2882 = vmatpush.bf16.msra.mxu0 %v10869_v44 }
 0x333   : > { %2110 = vmatmul.bf16.gmra.mxu0 %v13766_v31  ;;  %2224 = vmatmul.bf16.gmra.mxu2 %v13767_v24 }
 0x339   : > { %2159 = vmatmul.bf16.gmra.mxu1 %v13766_v31  ;;  %2273 = vmatmul.bf16.gmra.mxu3 %v13767_v24 }
 0x343   : > { %2115 = vmatmul.bf16.gmra.mxu0 %v13768_v1  ;;  %2229 = vmatmul.bf16.gmra.mxu2 %v13769_v57 }
 0x349   : > { %2164 = vmatmul.bf16.gmra.mxu1 %v13768_v1  ;;  %2278 = vmatmul.bf16.gmra.mxu3 %v13769_v57  ;;  %v10860_v57 = vld [vmem:[%s20718_s3 + $0x360] sm:$0xf] }
 0x350   : > { %v2081_v4 = vpop.f32.mrf.mxu0 }
 0x353   : > { %2534 = vmatmul.bf16.vlgmr.msrb.gmra.mxu0 %v14945_v37  ;;  %2632 = vmatmul.bf16.vlgmr.msrb.gmra.mxu2 %v14945_v37 }
 0x356   : > { %v2130_v35 = vpop.f32.mrf.mxu1  ;;  %v2195_v39 = vpop.f32.mrf.mxu2 }
 0x358   : > { %v2083_v8 = vpop.f32.mrf.mxu0 }
 0x359   : > { %v15324_v29 = vpack.c.bf16 %v2083_v8, %v2081_v4  ;;  %2583 = vmatmul.bf16.vlgmr.msrb.gmra.mxu1 %v14949_v49  ;;  %2681 = vmatmul.bf16.vlgmr.msrb.gmra.mxu3 %v14949_v49  ;;  %v13215_v4 = vld [vmem:[%s20718_s3 + $0x364] sm:$0xf0] }
 0x35a   : > { %v10861_v8 = vor.u32 %v13215_v4, %v10860_v57 }
 0x35c   : > { %v2244_v60 = vpop.f32.mrf.mxu3  ;;  %2883 = vmatpush.bf16.msra.mxu0 %v10861_v8  ;;  %v13209_v8 = vld [vmem:[%s20718_s3 + $0x334] sm:$0xf0] }
 0x35e   : > { %v2132_v63 = vpop.f32.mrf.mxu1  ;;  %v2197_v45 = vpop.f32.mrf.mxu2 }
 0x35f   : > { %v15328_v26 = vpack.c.bf16 %v2132_v63, %v2130_v35  ;;  %v15330_v61 = vpack.c.bf16 %v2197_v45, %v2195_v39  ;;  %v13214_v35 = vld [vmem:[%s20718_s3 + $0x364] sm:$0xf]  ;;  %v10932_v45 = vld [vmem:[%s20718_s3 + $0x3f0] sm:$0xf] }
 0x360   : > { %v2086_v58 = vpop.f32.mrf.mxu0 }
 0x363   : > { %2539 = vmatmul.bf16.gmra.mxu0 %v14957_v12  ;;  %2637 = vmatmul.bf16.gmra.mxu2 %v14957_v12 }
 0x364   : > { %v2246_v37 = vpop.f32.mrf.mxu3 }
 0x365   : > { %v15334_v5 = vpack.c.bf16 %v2246_v37, %v2244_v60  ;;  %v10862_v60 = vld [vmem:[%s20718_s3 + $0x368] sm:$0xf0]  ;;  %v13232_v37 = vld [vmem:[%s20718_s3 + $0x3f4] sm:$0xf] }
 0x366   : > { %v2135_v10 = vpop.f32.mrf.mxu1  ;;  %v2200_v42 = vpop.f32.mrf.mxu2  ;;  %v10865_v63 = vor.u32 %v13214_v35, %v10862_v60  ;;  %v10918_v35 = vld [vmem:[%s20718_s3 + $0x3d8] sm:$0xf0]  ;;  %v13208_v60 = vld [vmem:[%s20718_s3 + $0x334] sm:$0xf] }
 0x368   : > { %v2088_v30 = vpop.f32.mrf.mxu0 }
 0x369   : > { %v15336_v14 = vpack.c.bf16 %v2088_v30, %v2086_v58  ;;  %2588 = vmatmul.bf16.gmra.mxu1 %v14961_v9  ;;  %2686 = vmatmul.bf16.gmra.mxu3 %v14961_v9  ;;  %v13233_v58 = vld [vmem:[%s20718_s3 + $0x3f4] sm:$0xf0]  ;;  %v10934_v30 = vld [vmem:[%s20718_s3 + $0x3f8] sm:$0xf0] }
 0x36c   : > { %v2249_v49 = vpop.f32.mrf.mxu3 }
 0x36e   : > { %v2137_v6 = vpop.f32.mrf.mxu1  ;;  %v2202_v62 = vpop.f32.mrf.mxu2 }
 0x36f   : > { %v15340_v7 = vpack.c.bf16 %v2137_v6, %v2135_v10  ;;  %v15342_v18 = vpack.c.bf16 %v2202_v62, %v2200_v42  ;;  %v10933_v42 = vor.u32 %v13233_v58, %v10932_v45  ;;  %v10937_v6 = vor.u32 %v13232_v37, %v10934_v30  ;;  %v10852_v62 = vld [vmem:[%s20718_s3 + $0x350] sm:$0xf]  ;;  %v10838_v45 = vld [vmem:[%s20718_s3 + $0x338] sm:$0xf0]  ;;  %v10908_v37 = vld [vmem:[%s20718_s3 + $0x3c0] sm:$0xf] }
 0x370   : > { %v2091_v12 = vpop.f32.mrf.mxu0  ;;  %v10841_v58 = vor.u32 %v13208_v60, %v10838_v45  ;;  %v10812_v60 = vld [vmem:[%s20718_s3 + $0x300] sm:$0xf]  ;;  %v13202_v45 = vld [vmem:[%s20718_s3 + $0x304] sm:$0xf] }
 0x371   : > { %2931 = vmatpush.bf16.msra.mxu1 %v10933_v42  ;;  %3029 = vmatpush.bf16.msra.mxu3 %v10937_v6  ;;  %v13226_v42 = vld [vmem:[%s20718_s3 + $0x3c4] sm:$0xf] }
 0x373   : > { %2544 = vmatmul.bf16.gmra.mxu0 %v14969_v34  ;;  %2642 = vmatmul.bf16.gmra.mxu2 %v14969_v34 }
 0x374   : > { %v2251_v22 = vpop.f32.mrf.mxu3 }
 0x375   : > { %v15346_v13 = vpack.c.bf16 %v2251_v22, %v2249_v49  ;;  %v13212_v22 = vld [vmem:[%s20718_s3 + $0x354] sm:$0xf] }
 0x376   : > { %v2140_v50 = vpop.f32.mrf.mxu1  ;;  %v2205_v33 = vpop.f32.mrf.mxu2 }
 0x378   : > { %v2093_v23 = vpop.f32.mrf.mxu0 }
 0x379   : > { %v15348_v27 = vpack.c.bf16 %v2093_v23, %v2091_v12  ;;  %2593 = vmatmul.bf16.gmra.mxu1 %v14973_v56  ;;  %2691 = vmatmul.bf16.gmra.mxu3 %v14973_v56  ;;  %v13213_v12 = vld [vmem:[%s20718_s3 + $0x354] sm:$0xf0]  ;;  %v10924_v23 = vld [vmem:[%s20718_s3 + $0x3e0] sm:$0xf] }
 0x37c   : > { %v2254_v9 = vpop.f32.mrf.mxu3 }
 0x37e   : > { %v2142_v52 = vpop.f32.mrf.mxu1  ;;  %v2207_v28 = vpop.f32.mrf.mxu2 }
 0x37f   : > { %v15352_v20 = vpack.c.bf16 %v2142_v52, %v2140_v50  ;;  %v15354_v16 = vpack.c.bf16 %v2207_v28, %v2205_v33  ;;  %v10853_v50 = vor.u32 %v13213_v12, %v10852_v62  ;;  %v13230_v52 = vld [vmem:[%s20718_s3 + $0x3e4] sm:$0xf] }
 0x380   : > { %v2096_v34 = vpop.f32.mrf.mxu0 }
 0x381   : > { %2884 = vmatpush.bf16.msra.mxu0 %v10853_v50  ;;  %v13207_v50 = vld [vmem:[%s20718_s3 + $0x324] sm:$0xf0] }
 0x383   : > { %2549 = vmatmul.bf16.gmra.mxu0 %v14981_v46  ;;  %2647 = vmatmul.bf16.gmra.mxu2 %v14981_v46 }
 0x384   : > { %v2256_v59 = vpop.f32.mrf.mxu3 }
 0x385   : > { %v15358_v17 = vpack.c.bf16 %v2256_v59, %v2254_v9  ;;  %v13231_v9 = vld [vmem:[%s20718_s3 + $0x3e4] sm:$0xf0]  ;;  %v10926_v59 = vld [vmem:[%s20718_s3 + $0x3e8] sm:$0xf0] }
 0x386   : > { %v2145_v43 = vpop.f32.mrf.mxu1  ;;  %v2210_v36 = vpop.f32.mrf.mxu2 }
 0x388   : > { %v2098_v11 = vpop.f32.mrf.mxu0 }
 0x389   : > { %v15360_v55 = vpack.c.bf16 %v2098_v11, %v2096_v34  ;;  %2598 = vmatmul.bf16.gmra.mxu1 %v14987_v47  ;;  %2696 = vmatmul.bf16.gmra.mxu3 %v14987_v47  ;;  %v13216_v47 = vld [vmem:[%s20718_s3 + $0x374] sm:$0xf]  ;;  %v10925_v34 = vor.u32 %v13231_v9, %v10924_v23  ;;  %v13211_v11 = vld [vmem:[%s20718_s3 + $0x344] sm:$0xf0] }
 0x38a   : > { %v10873_v21 = vor.u32 %v13216_v47, %v10870_v53  ;;  %v10916_v53 = vld [vmem:[%s20718_s3 + $0x3d0] sm:$0xf] }
 0x38b   : > { %2932 = vmatpush.bf16.msra.mxu1 %v10925_v34  ;;  %v10900_v34 = vld [vmem:[%s20718_s3 + $0x3b0] sm:$0xf] }
 0x38c   : > { %v2259_v56 = vpop.f32.mrf.mxu3  ;;  %2980 = vmatpush.bf16.msra.mxu2 %v10873_v21  ;;  %v13229_v21 = vld [vmem:[%s20718_s3 + $0x3d4] sm:$0xf0] }
 0x38d   : > { %v10917_v4 = vor.u32 %v13229_v21, %v10916_v53 }
 0x38e   : > { %v2147_v32 = vpop.f32.mrf.mxu1  ;;  %v2212_v48 = vpop.f32.mrf.mxu2 }
 0x38f   : > { %v15364_v31 = vpack.c.bf16 %v2147_v32, %v2145_v43  ;;  %v15366_v24 = vpack.c.bf16 %v2212_v48, %v2210_v36  ;;  %v10929_v43 = vor.u32 %v13230_v52, %v10926_v59  ;;  %v10844_v36 = vld [vmem:[%s20718_s3 + $0x340] sm:$0xf]  ;;  %2933 = vmatpush.bf16.msra.mxu1 %v10917_v4  ;;  %v10830_v52 = vld [vmem:[%s20718_s3 + $0x328] sm:$0xf0]  ;;  %v13225_v59 = vld [vmem:[%s20718_s3 + $0x3b4] sm:$0xf0] }
 0x390   : > { %v2101_v46 = vpop.f32.mrf.mxu0  ;;  %2981 = vmatpush.bf16.msra.mxu2 %v10865_v63  ;;  %v13222_v4 = vld [vmem:[%s20718_s3 + $0x3a4] sm:$0xf] }
 0x391   : > { %3030 = vmatpush.bf16.msra.mxu3 %v10929_v43  ;;  %v13224_v43 = vld [vmem:[%s20718_s3 + $0x3b4] sm:$0xf] }
 0x393   : > { %2554 = vmatmul.bf16.gmra.mxu0 %v14997_v41  ;;  %2652 = vmatmul.bf16.gmra.mxu2 %v14997_v41 }
 0x394   : > { %v2261_v2 = vpop.f32.mrf.mxu3 }
 0x395   : > { %v15382_v1 = vpack.c.bf16 %v2261_v2, %v2259_v56  ;;  %v13210_v56 = vld [vmem:[%s20718_s3 + $0x344] sm:$0xf]  ;;  %v13228_v2 = vld [vmem:[%s20718_s3 + $0x3d4] sm:$0xf] }
 0x396   : > { %v2150_v39 = vpop.f32.mrf.mxu1  ;;  %v2215_v41 = vpop.f32.mrf.mxu2  ;;  %v10849_v44 = vor.u32 %v13210_v56, %v10846_v51  ;;  %v10902_v56 = vld [vmem:[%s20718_s3 + $0x3b8] sm:$0xf0]  ;;  %v13205_v51 = vld [vmem:[%s20718_s3 + $0x314] sm:$0xf0] }
 0x398   : > { %v2103_v10 = vpop.f32.mrf.mxu0 }
 0x399   : > { %v15408_v49 = vpack.c.bf16 %v2103_v10, %v2101_v46  ;;  %2603 = vmatmul.bf16.gmra.mxu1 %v15003_v0  ;;  %2701 = vmatmul.bf16.gmra.mxu3 %v15003_v0  ;;  %v10854_v0 = vld [vmem:[%s20718_s3 + $0x358] sm:$0xf0]  ;;  %v10845_v46 = vor.u32 %v13211_v11, %v10844_v36  ;;  %v13227_v10 = vld [vmem:[%s20718_s3 + $0x3c4] sm:$0xf0]  ;;  %v10901_v11 = vor.u32 %v13225_v59, %v10900_v34  ;;  %v13218_v34 = vld [vmem:[%s20718_s3 + $0x384] sm:$0xf] }
 0x39a   : > { %v10857_v33 = vor.u32 %v13212_v22, %v10854_v0  ;;  %v10909_v6 = vor.u32 %v13227_v10, %v10908_v37  ;;  %v10828_v22 = vld [vmem:[%s20718_s3 + $0x320] sm:$0xf]  ;;  %v13206_v0 = vld [vmem:[%s20718_s3 + $0x324] sm:$0xf] }
 0x39b   : > { %2885 = vmatpush.bf16.msra.mxu0 %v10845_v46  ;;  %v10829_v9 = vor.u32 %v13207_v50, %v10828_v22  ;;  %v10820_v46 = vld [vmem:[%s20718_s3 + $0x310] sm:$0xf]  ;;  %v13221_v22 = vld [vmem:[%s20718_s3 + $0x394] sm:$0xf0]  ;;  %v13220_v50 = vld [vmem:[%s20718_s3 + $0x394] sm:$0xf] }
 0x39c   : > { %v2264_v28 = vpop.f32.mrf.mxu3  ;;  %2982 = vmatpush.bf16.msra.mxu2 %v10857_v33  ;;  %2934 = vmatpush.bf16.msra.mxu1 %v10909_v6  ;;  %v10821_v53 = vor.u32 %v13205_v51, %v10820_v46 }
 0x39e   : > { %v2152_v32 = vpop.f32.mrf.mxu1  ;;  %v2217_v48 = vpop.f32.mrf.mxu2 }
 0x39f   : > { %v15448_v25 = vpack.c.bf16 %v2152_v32, %v2150_v39  ;;  %v15450_v47 = vpack.c.bf16 %v2217_v48, %v2215_v41  ;;  %v10921_v39 = vor.u32 %v13228_v2, %v10918_v35  ;;  %v10836_v41 = vld [vmem:[%s20718_s3 + $0x330] sm:$0xf]  ;;  %v10905_v48 = vor.u32 %v13224_v43, %v10902_v56  ;;  %v10892_v2 = vld [vmem:[%s20718_s3 + $0x3a0] sm:$0xf] }
 0x3a0   : > { %v2106_v57 = vpop.f32.mrf.mxu0  ;;  %2983 = vmatpush.bf16.msra.mxu2 %v10849_v44  ;;  %v10837_v63 = vor.u32 %v13209_v8, %v10836_v41  ;;  %v13204_v44 = vld [vmem:[%s20718_s3 + $0x314] sm:$0xf]  ;;  %2935 = vmatpush.bf16.msra.mxu1 %v10901_v11  ;;  %v10894_v41 = vld [vmem:[%s20718_s3 + $0x3a8] sm:$0xf0] }
 0x3a1   : > { %3031 = vmatpush.bf16.msra.mxu3 %v10921_v39  ;;  %v10897_v8 = vor.u32 %v13222_v4, %v10894_v41 }
 0x3a2   : > { %2886 = vmatpush.bf16.msra.mxu0 %v10837_v63  ;;  %v13203_v63 = vld [vmem:[%s20718_s3 + $0x304] sm:$0xf0] }
 0x3a3   : > { %2559 = vmatmul.bf16.gmra.mxu0 %v15013_v40  ;;  %2657 = vmatmul.bf16.gmra.mxu2 %v15013_v40  ;;  %v10910_v40 = vld [vmem:[%s20718_s3 + $0x3c8] sm:$0xf0]  ;;  %v10813_v10 = vor.u32 %v13203_v63, %v10812_v60 }
 0x3a4   : > { %v2266_v30 = vpop.f32.mrf.mxu3  ;;  %v10913_v12 = vor.u32 %v13226_v42, %v10910_v40  ;;  %2984 = vmatpush.bf16.msra.mxu2 %v10841_v58  ;;  %v10814_v42 = vld [vmem:[%s20718_s3 + $0x308] sm:$0xf0] }
 0x3a5   : > { %v15490_v62 = vpack.c.bf16 %v2266_v30, %v2264_v28  ;;  %v10833_v28 = vor.u32 %v13206_v0, %v10830_v52  ;;  %v10817_v40 = vor.u32 %v13202_v45, %v10814_v42  ;;  %v10876_v52 = vld [vmem:[%s20718_s3 + $0x380] sm:$0xf] }
 0x3a6   : > { %v2155_v33 = vpop.f32.mrf.mxu1  ;;  %v2220_v23 = vpop.f32.mrf.mxu2  ;;  %3032 = vmatpush.bf16.msra.mxu3 %v10913_v12  ;;  %2887 = vmatpush.bf16.msra.mxu0 %v10829_v9  ;;  %v10884_v12 = vld [vmem:[%s20718_s3 + $0x390] sm:$0xf] }
 0x3a8   : > { %v2108_v36 = vpop.f32.mrf.mxu0  ;;  %2985 = vmatpush.bf16.msra.mxu2 %v10833_v28  ;;  %v13219_v28 = vld [vmem:[%s20718_s3 + $0x384] sm:$0xf0] }
 0x3a9   : > { %v15516_v32 = vpack.c.bf16 %v2108_v36, %v2106_v57  ;;  %2608 = vmatmul.bf16.gmra.mxu1 %v15019_v15  ;;  %2706 = vmatmul.bf16.gmra.mxu3 %v15019_v15  ;;  %v10822_v15 = vld [vmem:[%s20718_s3 + $0x318] sm:$0xf0]  ;;  %v13223_v57 = vld [vmem:[%s20718_s3 + $0x3a4] sm:$0xf0]  ;;  %v10877_v43 = vor.u32 %v13219_v28, %v10876_v52  ;;  %v10878_v36 = vld [vmem:[%s20718_s3 + $0x388] sm:$0xf0] }
 0x3aa   : > { %v10825_v21 = vor.u32 %v13204_v44, %v10822_v15  ;;  %3033 = vmatpush.bf16.msra.mxu3 %v10905_v48  ;;  %2888 = vmatpush.bf16.msra.mxu0 %v10821_v53  ;;  %v10893_v39 = vor.u32 %v13223_v57, %v10892_v2  ;;  %v10881_v11 = vor.u32 %v13218_v34, %v10878_v36 }
 0x3ac   : > { %v2269_v35 = vpop.f32.mrf.mxu3  ;;  %2986 = vmatpush.bf16.msra.mxu2 %v10825_v21  ;;  %2936 = vmatpush.bf16.msra.mxu1 %v10893_v39 }
 0x3ae   : > { %v2157_v58 = vpop.f32.mrf.mxu1  ;;  %v2222_v37 = vpop.f32.mrf.mxu2  ;;  %3034 = vmatpush.bf16.msra.mxu3 %v10897_v8  ;;  %2889 = vmatpush.bf16.msra.mxu0 %v10813_v10 }
 0x3af   : > { %v15556_v30 = vpack.c.bf16 %v2157_v58, %v2155_v33  ;;  %v15558_v6 = vpack.c.bf16 %v2222_v37, %v2220_v23  ;;  %v10885_v33 = vor.u32 %v13221_v22, %v10884_v12  ;;  %v10886_v23 = vld [vmem:[%s20718_s3 + $0x398] sm:$0xf0] }
 0x3b0   : > { %v2111_v0 = vpop.f32.mrf.mxu0  ;;  %v10889_v9 = vor.u32 %v13220_v50, %v10886_v23  ;;  %2987 = vmatpush.bf16.msra.mxu2 %v10817_v40 }
 0x3b1   : > { %2937 = vmatpush.bf16.msra.mxu1 %v10885_v33 }
 0x3b2   : > { %3035 = vmatpush.bf16.msra.mxu3 %v10889_v9 }
 0x3b3   : > { %2564 = vmatmul.bf16.gmra.mxu0 %v15029_v38  ;;  %2662 = vmatmul.bf16.gmra.mxu2 %v15029_v38 }
 0x3b4   : > { %v2271_v59 = vpop.f32.mrf.mxu3 }
 0x3b5   : > { %v15586_v38 = vpack.c.bf16 %v2271_v59, %v2269_v35  ;;  %2938 = vmatpush.bf16.msra.mxu1 %v10877_v43 }
 0x3b6   : > { %v2160_v56 = vpop.f32.mrf.mxu1  ;;  %v2225_v48 = vpop.f32.mrf.mxu2  ;;  %3036 = vmatpush.bf16.msra.mxu3 %v10881_v11 }
 0x3b8   : > { %v2113_v46 = vpop.f32.mrf.mxu0 }
 0x3b9   : > { %v15588_v51 = vpack.c.bf16 %v2113_v46, %v2111_v0  ;;  %2613 = vmatmul.bf16.gmra.mxu1 %v15035_v3  ;;  %2711 = vmatmul.bf16.gmra.mxu3 %v15035_v3 }
 0x3bc   : > { %v2274_v44 = vpop.f32.mrf.mxu3 }
 0x3be   : > { %v2162_v53 = vpop.f32.mrf.mxu1  ;;  %v2227_v15 = vpop.f32.mrf.mxu2 }
 0x3bf   : > { %v15592_v21 = vpack.c.bf16 %v2162_v53, %v2160_v56  ;;  %v15594_v2 = vpack.c.bf16 %v2227_v15, %v2225_v48 }
 0x3c0   : > { %v2116_v57 = vpop.f32.mrf.mxu0 }
 0x3c3   : > { %2569 = vmatmul.bf16.gmra.mxu0 %v15045_v54  ;;  %2667 = vmatmul.bf16.gmra.mxu2 %v15045_v54 }
 0x3c4   : > { %v2276_v4 = vpop.f32.mrf.mxu3 }
 0x3c5   : > { %v15598_v35 = vpack.c.bf16 %v2276_v4, %v2274_v44 }
 0x3c6   : > { %v2165_v39 = vpop.f32.mrf.mxu1  ;;  %v2230_v41 = vpop.f32.mrf.mxu2 }
 0x3c8   : > { %v2118_v8 = vpop.f32.mrf.mxu0 }
 0x3c9   : > { %v15600_v60 = vpack.c.bf16 %v2118_v8, %v2116_v57  ;;  %2618 = vmatmul.bf16.gmra.mxu1 %v15052_v19  ;;  %2716 = vmatmul.bf16.gmra.mxu3 %v15052_v19 }
 0x3cc   : > { %v2279_v3 = vpop.f32.mrf.mxu3 }
 0x3ce   : > { %v2167_v63 = vpop.f32.mrf.mxu1  ;;  %v2232_v45 = vpop.f32.mrf.mxu2 }
 0x3cf   : > { %v15604_v58 = vpack.c.bf16 %v2167_v63, %v2165_v39  ;;  %v15606_v37 = vpack.c.bf16 %v2232_v45, %v2230_v41 }
 0x3d0   : > { %v2535_v54 = vpop.f32.mrf.mxu0 }
 0x3d3   : > { %2890 = vmatmul.bf16.vlgmr.msra.gmra.mxu0 %v15324_v29  ;;  %2988 = vmatmul.bf16.vlgmr.msra.gmra.mxu2 %v15324_v29 }
 0x3d4   : > { %v2281_v10 = vpop.f32.mrf.mxu3 }
 0x3d5   : > { %v15610_v42 = vpack.c.bf16 %v2281_v10, %v2279_v3 }
 0x3d6   : > { %v2584_v40 = vpop.f32.mrf.mxu1  ;;  %v2633_v12 = vpop.f32.mrf.mxu2 }
 0x3d7   : > { %v15612_v22 = vadd.f32 %v2584_v40, %v2535_v54 }
 0x3d8   : > { %v2537_v19 = vpop.f32.mrf.mxu0 }
 0x3d9   : > { %2939 = vmatmul.bf16.vlgmr.msra.gmra.mxu1 %v15328_v26  ;;  %3037 = vmatmul.bf16.vlgmr.msra.gmra.mxu3 %v15328_v26 }
 0x3dc   : > { %v2682_v50 = vpop.f32.mrf.mxu3 }
 0x3dd   : > { %v15616_v0 = vadd.f32 %v2682_v50, %v2633_v12 }
 0x3de   : > { %v2586_v33 = vpop.f32.mrf.mxu1  ;;  %v2635_v23 = vpop.f32.mrf.mxu2 }
 0x3df   : > { %v15618_v9 = vadd.f32 %v2586_v33, %v2537_v19 }
 0x3e0   : > { %v2540_v29 = vpop.f32.mrf.mxu0 }
 0x3e3   : > { %2895 = vmatmul.bf16.gmra.mxu0 %v15336_v14  ;;  %2993 = vmatmul.bf16.gmra.mxu2 %v15336_v14 }
 0x3e4   : > { %v2684_v52 = vpop.f32.mrf.mxu3 }
 0x3e5   : > { %v15622_v28 = vadd.f32 %v2684_v52, %v2635_v23  ;;  %v11028_v52 = vld [vmem:[%s20718_s3 + $0x570] sm:$0xf] }
 0x3e6   : > { %v2589_v34 = vpop.f32.mrf.mxu1  ;;  %v2638_v59 = vpop.f32.mrf.mxu2 }
 0x3e7   : > { %v15624_v43 = vadd.f32 %v2589_v34, %v2540_v29  ;;  %v13281_v34 = vld [vmem:[%s20718_s3 + $0x574] sm:$0xf0] }
 0x3e8   : > { %v2542_v26 = vpop.f32.mrf.mxu0 }
 0x3e9   : > { %2944 = vmatmul.bf16.gmra.mxu1 %v15340_v7  ;;  %3042 = vmatmul.bf16.gmra.mxu3 %v15340_v7 }
 0x3ec   : > { %v2687_v36 = vpop.f32.mrf.mxu3 }
 0x3ed   : > { %v15628_v11 = vadd.f32 %v2687_v36, %v2638_v59  ;;  %v11029_v59 = vor.u32 %v13281_v34, %v11028_v52  ;;  %v13276_v52 = vld [vmem:[%s20718_s3 + $0x554] sm:$0xf] }
 0x3ee   : > { %v2591_v56 = vpop.f32.mrf.mxu1  ;;  %v2640_v48 = vpop.f32.mrf.mxu2 }
 0x3ef   : > { %v15630_v46 = vadd.f32 %v2591_v56, %v2542_v26  ;;  %v11030_v26 = vld [vmem:[%s20718_s3 + $0x578] sm:$0xf0]  ;;  %3271 = vmatpush.bf16.msrb.mxu0 %v11029_v59  ;;  %v11084_v59 = vld [vmem:[%s20718_s3 + $0x5e0] sm:$0xf] }
 0x3f0   : > { %v2545_v14 = vpop.f32.mrf.mxu0 }
 0x3f3   : > { %2900 = vmatmul.bf16.gmra.mxu0 %v15348_v27  ;;  %2998 = vmatmul.bf16.gmra.mxu2 %v15348_v27 }
 0x3f4   : > { %v2689_v44 = vpop.f32.mrf.mxu3 }
 0x3f5   : > { %v15634_v53 = vadd.f32 %v2689_v44, %v2640_v48  ;;  %v13279_v44 = vld [vmem:[%s20718_s3 + $0x564] sm:$0xf0] }
 0x3f6   : > { %v2594_v15 = vpop.f32.mrf.mxu1  ;;  %v2643_v57 = vpop.f32.mrf.mxu2 }
 0x3f7   : > { %v15636_v4 = vadd.f32 %v2594_v15, %v2545_v14  ;;  %v11020_v14 = vld [vmem:[%s20718_s3 + $0x560] sm:$0xf]  ;;  %v13278_v15 = vld [vmem:[%s20718_s3 + $0x564] sm:$0xf] }
 0x3f8   : > { %v2547_v7 = vpop.f32.mrf.mxu0 }
 0x3f9   : > { %2949 = vmatmul.bf16.gmra.mxu1 %v15352_v20  ;;  %3047 = vmatmul.bf16.gmra.mxu3 %v15352_v20 }
 0x3fc   : > { %v2692_v39 = vpop.f32.mrf.mxu3 }
 0x3fd   : > { %v15640_v41 = vadd.f32 %v2692_v39, %v2643_v57  ;;  %v11022_v39 = vld [vmem:[%s20718_s3 + $0x568] sm:$0xf0] }
 0x3fe   : > { %v2596_v8 = vpop.f32.mrf.mxu1  ;;  %v2645_v3 = vpop.f32.mrf.mxu2 }
 0x3ff   : > { %v15642_v63 = vadd.f32 %v2596_v8, %v2547_v7  ;;  %v11021_v7 = vor.u32 %v13279_v44, %v11020_v14  ;;  %v11086_v44 = vld [vmem:[%s20718_s3 + $0x5e8] sm:$0xf0] }
 0x400   : > { %v2550_v27 = vpop.f32.mrf.mxu0 }
 0x401   : > { %3272 = vmatpush.bf16.msrb.mxu0 %v11021_v7  ;;  %v11004_v7 = vld [vmem:[%s20718_s3 + $0x540] sm:$0xf] }
 0x403   : > { %2905 = vmatmul.bf16.gmra.mxu0 %v15360_v55  ;;  %3003 = vmatmul.bf16.gmra.mxu2 %v15360_v55 }
 0x404   : > { %v2694_v45 = vpop.f32.mrf.mxu3 }
 0x405   : > { %v15646_v54 = vadd.f32 %v2694_v45, %v2645_v3  ;;  %v11025_v3 = vor.u32 %v13278_v15, %v11022_v39  ;;  %v13297_v45 = vld [vmem:[%s20718_s3 + $0x5f4] sm:$0xf0]  ;;  %v13275_v39 = vld [vmem:[%s20718_s3 + $0x544] sm:$0xf0] }
 0x406   : > { %v2599_v10 = vpop.f32.mrf.mxu1  ;;  %v2648_v40 = vpop.f32.mrf.mxu2 }
 0x407   : > { %v15648_v12 = vadd.f32 %v2599_v10, %v2550_v27  ;;  %v11092_v27 = vld [vmem:[%s20718_s3 + $0x5f0] sm:$0xf]  ;;  %v13296_v10 = vld [vmem:[%s20718_s3 + $0x5f4] sm:$0xf] }
 0x408   : > { %v2552_v20 = vpop.f32.mrf.mxu0 }
 0x409   : > { %2954 = vmatmul.bf16.gmra.mxu1 %v15364_v31  ;;  %3052 = vmatmul.bf16.gmra.mxu3 %v15364_v31  ;;  %v13280_v31 = vld [vmem:[%s20718_s3 + $0x574] sm:$0xf] }
 0x40a   : > { %v11033_v36 = vor.u32 %v13280_v31, %v11030_v26  ;;  %v13295_v26 = vld [vmem:[%s20718_s3 + $0x5e4] sm:$0xf0] }
 0x40b   : > { %v11085_v14 = vor.u32 %v13295_v26, %v11084_v59  ;;  %v13273_v59 = vld [vmem:[%s20718_s3 + $0x534] sm:$0xf0]  ;;  %v13272_v26 = vld [vmem:[%s20718_s3 + $0x534] sm:$0xf] }
 0x40c   : > { %v2697_v19 = vpop.f32.mrf.mxu3  ;;  %3369 = vmatpush.bf16.msrb.mxu2 %v11033_v36  ;;  %v13294_v36 = vld [vmem:[%s20718_s3 + $0x5e4] sm:$0xf] }
 0x40d   : > { %v15652_v50 = vadd.f32 %v2697_v19, %v2648_v40  ;;  %v11094_v19 = vld [vmem:[%s20718_s3 + $0x5f8] sm:$0xf0] }
 0x40e   : > { %v2601_v33 = vpop.f32.mrf.mxu1  ;;  %v2650_v23 = vpop.f32.mrf.mxu2 }
 0x40f   : > { %v15654_v29 = vadd.f32 %v2601_v33, %v2552_v20  ;;  %v11093_v20 = vor.u32 %v13297_v45, %v11092_v27  ;;  %v11097_v33 = vor.u32 %v13296_v10, %v11094_v19  ;;  %v11005_v10 = vor.u32 %v13275_v39, %v11004_v7  ;;  %v13290_v7 = vld [vmem:[%s20718_s3 + $0x5c4] sm:$0xf] }
 0x410   : > { %v2555_v55 = vpop.f32.mrf.mxu0  ;;  %3370 = vmatpush.bf16.msrb.mxu2 %v11025_v3  ;;  %v13274_v3 = vld [vmem:[%s20718_s3 + $0x544] sm:$0xf] }
 0x411   : > { %3320 = vmatpush.bf16.msrb.mxu1 %v11093_v20  ;;  %3418 = vmatpush.bf16.msrb.mxu3 %v11097_v33  ;;  %v11076_v33 = vld [vmem:[%s20718_s3 + $0x5d0] sm:$0xf] }
 0x413   : > { %2910 = vmatmul.bf16.gmra.mxu0 %v15408_v49  ;;  %3008 = vmatmul.bf16.gmra.mxu2 %v15408_v49 }
 0x414   : > { %v2699_v56 = vpop.f32.mrf.mxu3 }
 0x415   : > { %v15670_v48 = vadd.f32 %v2699_v56, %v2650_v23  ;;  %v11012_v23 = vld [vmem:[%s20718_s3 + $0x550] sm:$0xf]  ;;  %3321 = vmatpush.bf16.msrb.mxu1 %v11085_v14 }
 0x416   : > { %v2604_v57 = vpop.f32.mrf.mxu1  ;;  %v2653_v49 = vpop.f32.mrf.mxu2 }
 0x417   : > { %v15684_v8 = vadd.f32 %v2604_v57, %v2555_v55  ;;  %v13277_v55 = vld [vmem:[%s20718_s3 + $0x554] sm:$0xf0]  ;;  %v11089_v57 = vor.u32 %v13294_v36, %v11086_v44  ;;  %v11068_v44 = vld [vmem:[%s20718_s3 + $0x5c0] sm:$0xf] }
 0x418   : > { %v2557_v40 = vpop.f32.mrf.mxu0  ;;  %v11013_v34 = vor.u32 %v13277_v55, %v11012_v23  ;;  %v13293_v23 = vld [vmem:[%s20718_s3 + $0x5d4] sm:$0xf0]  ;;  %v13292_v55 = vld [vmem:[%s20718_s3 + $0x5d4] sm:$0xf] }
 0x419   : > { %2959 = vmatmul.bf16.gmra.mxu1 %v15448_v25  ;;  %3057 = vmatmul.bf16.gmra.mxu3 %v15448_v25  ;;  %v11014_v25 = vld [vmem:[%s20718_s3 + $0x558] sm:$0xf0] }
 0x41a   : > { %v11017_v31 = vor.u32 %v13276_v52, %v11014_v25  ;;  %3273 = vmatpush.bf16.msrb.mxu0 %v11013_v34  ;;  %3419 = vmatpush.bf16.msrb.mxu3 %v11089_v57  ;;  %v11077_v34 = vor.u32 %v13293_v23, %v11076_v33  ;;  %v13291_v57 = vld [vmem:[%s20718_s3 + $0x5c4] sm:$0xf0]  ;;  %v13270_v33 = vld [vmem:[%s20718_s3 + $0x524] sm:$0xf] }
 0x41c   : > { %v2702_v56 = vpop.f32.mrf.mxu3  ;;  %3371 = vmatpush.bf16.msrb.mxu2 %v11017_v31  ;;  %v10996_v31 = vld [vmem:[%s20718_s3 + $0x530] sm:$0xf]  ;;  %3322 = vmatpush.bf16.msrb.mxu1 %v11077_v34 }
 0x41d   : > { %v15724_v15 = vadd.f32 %v2702_v56, %v2653_v49  ;;  %v11006_v49 = vld [vmem:[%s20718_s3 + $0x548] sm:$0xf0]  ;;  %v10997_v36 = vor.u32 %v13273_v59, %v10996_v31  ;;  %v10998_v56 = vld [vmem:[%s20718_s3 + $0x538] sm:$0xf0]  ;;  %v11060_v31 = vld [vmem:[%s20718_s3 + $0x5b0] sm:$0xf] }
 0x41e   : > { %v2606_v27 = vpop.f32.mrf.mxu1  ;;  %v2655_v45 = vpop.f32.mrf.mxu2  ;;  %v11009_v19 = vor.u32 %v13274_v3, %v11006_v49  ;;  %3274 = vmatpush.bf16.msrb.mxu0 %v11005_v10  ;;  %v11001_v14 = vor.u32 %v13272_v26, %v10998_v56  ;;  %v11069_v3 = vor.u32 %v13291_v57, %v11068_v44  ;;  %v10988_v49 = vld [vmem:[%s20718_s3 + $0x520] sm:$0xf]  ;;  %v13289_v59 = vld [vmem:[%s20718_s3 + $0x5b4] sm:$0xf0]  ;;  %v13288_v26 = vld [vmem:[%s20718_s3 + $0x5b4] sm:$0xf] }
 0x41f   : > { %v15738_v20 = vadd.f32 %v2606_v27, %v2557_v40  ;;  %v11078_v40 = vld [vmem:[%s20718_s3 + $0x5d8] sm:$0xf0]  ;;  %v11061_v56 = vor.u32 %v13289_v59, %v11060_v31  ;;  %v10980_v44 = vld [vmem:[%s20718_s3 + $0x510] sm:$0xf]  ;;  %v13269_v57 = vld [vmem:[%s20718_s3 + $0x514] sm:$0xf0] }
 0x420   : > { %v2560_v52 = vpop.f32.mrf.mxu0  ;;  %v11081_v25 = vor.u32 %v13292_v55, %v11078_v40  ;;  %3372 = vmatpush.bf16.msrb.mxu2 %v11009_v19  ;;  %v13271_v19 = vld [vmem:[%s20718_s3 + $0x524] sm:$0xf0]  ;;  %3323 = vmatpush.bf16.msrb.mxu1 %v11069_v3  ;;  %v13266_v59 = vld [vmem:[%s20718_s3 + $0x504] sm:$0xf] }
 0x421   : > { %v10989_v34 = vor.u32 %v13271_v19, %v10988_v49  ;;  %v13286_v49 = vld [vmem:[%s20718_s3 + $0x5a4] sm:$0xf]  ;;  %v13267_v31 = vld [vmem:[%s20718_s3 + $0x504] sm:$0xf0] }
 0x422   : > { %3420 = vmatpush.bf16.msrb.mxu3 %v11081_v25  ;;  %3275 = vmatpush.bf16.msrb.mxu0 %v10997_v36 }
 0x423   : > { %2915 = vmatmul.bf16.gmra.mxu0 %v15516_v32  ;;  %3013 = vmatmul.bf16.gmra.mxu2 %v15516_v32  ;;  %v11070_v32 = vld [vmem:[%s20718_s3 + $0x5c8] sm:$0xf0] }
 0x424   : > { %v2704_v39 = vpop.f32.mrf.mxu3  ;;  %v11073_v10 = vor.u32 %v13290_v7, %v11070_v32  ;;  %3373 = vmatpush.bf16.msrb.mxu2 %v11001_v14  ;;  %v13268_v7 = vld [vmem:[%s20718_s3 + $0x514] sm:$0xf]  ;;  %3324 = vmatpush.bf16.msrb.mxu1 %v11061_v56  ;;  %v11052_v32 = vld [vmem:[%s20718_s3 + $0x5a0] sm:$0xf] }
 0x425   : > { %v15778_v27 = vadd.f32 %v2704_v39, %v2655_v45  ;;  %v10990_v45 = vld [vmem:[%s20718_s3 + $0x528] sm:$0xf0]  ;;  %v10981_v39 = vor.u32 %v13269_v57, %v10980_v44  ;;  %v11044_v57 = vld [vmem:[%s20718_s3 + $0x590] sm:$0xf] }
 0x426   : > { %v2609_v23 = vpop.f32.mrf.mxu1  ;;  %v2658_v55 = vpop.f32.mrf.mxu2  ;;  %v10993_v25 = vor.u32 %v13270_v33, %v10990_v45  ;;  %3421 = vmatpush.bf16.msrb.mxu3 %v11073_v10  ;;  %3276 = vmatpush.bf16.msrb.mxu0 %v10989_v34  ;;  %v13287_v10 = vld [vmem:[%s20718_s3 + $0x5a4] sm:$0xf0] }
 0x427   : > { %v15792_v40 = vadd.f32 %v2609_v23, %v2560_v52  ;;  %v11062_v52 = vld [vmem:[%s20718_s3 + $0x5b8] sm:$0xf0]  ;;  %v11053_v33 = vor.u32 %v13287_v10, %v11052_v32  ;;  %v11054_v23 = vld [vmem:[%s20718_s3 + $0x5a8] sm:$0xf0]  ;;  %v11036_v10 = vld [vmem:[%s20718_s3 + $0x580] sm:$0xf] }
 0x428   : > { %v2562_v36 = vpop.f32.mrf.mxu0  ;;  %v11065_v14 = vor.u32 %v13288_v26, %v11062_v52  ;;  %3374 = vmatpush.bf16.msrb.mxu2 %v10993_v25  ;;  %v11057_v45 = vor.u32 %v13286_v49, %v11054_v23  ;;  %v10972_v25 = vld [vmem:[%s20718_s3 + $0x500] sm:$0xf]  ;;  %v13283_v49 = vld [vmem:[%s20718_s3 + $0x584] sm:$0xf0] }
 0x429   : > { %2964 = vmatmul.bf16.gmra.mxu1 %v15556_v30  ;;  %3062 = vmatmul.bf16.gmra.mxu3 %v15556_v30  ;;  %v10982_v30 = vld [vmem:[%s20718_s3 + $0x518] sm:$0xf0]  ;;  %v10973_v52 = vor.u32 %v13267_v31, %v10972_v25  ;;  %v11037_v23 = vor.u32 %v13283_v49, %v11036_v10 }
 0x42a   : > { %v10985_v3 = vor.u32 %v13268_v7, %v10982_v30  ;;  %3422 = vmatpush.bf16.msrb.mxu3 %v11065_v14  ;;  %3277 = vmatpush.bf16.msrb.mxu0 %v10981_v39  ;;  %v13285_v7 = vld [vmem:[%s20718_s3 + $0x594] sm:$0xf0]  ;;  %v13284_v39 = vld [vmem:[%s20718_s3 + $0x594] sm:$0xf] }
 0x42b   : > { %3325 = vmatpush.bf16.msrb.mxu1 %v11053_v33 }
 0x42c   : > { %v2707_v19 = vpop.f32.mrf.mxu3  ;;  %3375 = vmatpush.bf16.msrb.mxu2 %v10985_v3  ;;  %v11045_v3 = vor.u32 %v13285_v7, %v11044_v57 }
 0x42d   : > { %v15832_v34 = vadd.f32 %v2707_v19, %v2658_v55  ;;  %v10974_v55 = vld [vmem:[%s20718_s3 + $0x508] sm:$0xf0]  ;;  %v13282_v19 = vld [vmem:[%s20718_s3 + $0x584] sm:$0xf] }
 0x42e   : > { %v2611_v26 = vpop.f32.mrf.mxu1  ;;  %v2660_v56 = vpop.f32.mrf.mxu2  ;;  %v10977_v44 = vor.u32 %v13266_v59, %v10974_v55  ;;  %3423 = vmatpush.bf16.msrb.mxu3 %v11057_v45  ;;  %3278 = vmatpush.bf16.msrb.mxu0 %v10973_v52  ;;  %v11038_v45 = vld [vmem:[%s20718_s3 + $0x588] sm:$0xf0] }
 0x42f   : > { %v15846_v14 = vadd.f32 %v2611_v26, %v2562_v36  ;;  %v11046_v36 = vld [vmem:[%s20718_s3 + $0x598] sm:$0xf0]  ;;  %3326 = vmatpush.bf16.msrb.mxu1 %v11045_v3  ;;  %v11041_v25 = vor.u32 %v13282_v19, %v11038_v45 }
 0x430   : > { %v2565_v30 = vpop.f32.mrf.mxu0  ;;  %v11049_v32 = vor.u32 %v13284_v39, %v11046_v36  ;;  %3376 = vmatpush.bf16.msrb.mxu2 %v10977_v44 }
 0x432   : > { %3424 = vmatpush.bf16.msrb.mxu3 %v11049_v32 }
 0x433   : > { %2920 = vmatmul.bf16.gmra.mxu0 %v15588_v51  ;;  %3018 = vmatmul.bf16.gmra.mxu2 %v15588_v51 }
 0x434   : > { %v2709_v33 = vpop.f32.mrf.mxu3  ;;  %3327 = vmatpush.bf16.msrb.mxu1 %v11037_v23 }
 0x435   : > { %v15874_v51 = vadd.f32 %v2709_v33, %v2660_v56 }
 0x436   : > { %v2614_v31 = vpop.f32.mrf.mxu1  ;;  %v2663_v59 = vpop.f32.mrf.mxu2  ;;  %3425 = vmatpush.bf16.msrb.mxu3 %v11041_v25 }
 0x437   : > { %v15876_v26 = vadd.f32 %v2614_v31, %v2565_v30 }
 0x438   : > { %v2567_v52 = vpop.f32.mrf.mxu0 }
 0x439   : > { %2969 = vmatmul.bf16.gmra.mxu1 %v15592_v21  ;;  %3067 = vmatmul.bf16.gmra.mxu3 %v15592_v21 }
 0x43c   : > { %v2712_v55 = vpop.f32.mrf.mxu3 }
 0x43d   : > { %v15880_v44 = vadd.f32 %v2712_v55, %v2663_v59 }
 0x43e   : > { %v2616_v57 = vpop.f32.mrf.mxu1  ;;  %v2665_v7 = vpop.f32.mrf.mxu2 }
 0x43f   : > { %v15882_v39 = vadd.f32 %v2616_v57, %v2567_v52 }
 0x440   : > { %v2570_v56 = vpop.f32.mrf.mxu0 }
 0x443   : > { %2925 = vmatmul.bf16.gmra.mxu0 %v15600_v60  ;;  %3023 = vmatmul.bf16.gmra.mxu2 %v15600_v60 }
 0x444   : > { %v2714_v30 = vpop.f32.mrf.mxu3 }
 0x445   : > { %v15886_v3 = vadd.f32 %v2714_v30, %v2665_v7 }
 0x446   : > { %v2619_v36 = vpop.f32.mrf.mxu1  ;;  %v2668_v32 = vpop.f32.mrf.mxu2 }
 0x447   : > { %v15888_v10 = vadd.f32 %v2619_v36, %v2570_v56 }
 0x448   : > { %v2572_v21 = vpop.f32.mrf.mxu0 }
 0x449   : > { %2974 = vmatmul.bf16.gmra.mxu1 %v15604_v58  ;;  %3072 = vmatmul.bf16.gmra.mxu3 %v15604_v58 }
 0x44c   : > { %v2717_v49 = vpop.f32.mrf.mxu3 }
 0x44d   : > { %v15892_v19 = vadd.f32 %v2717_v49, %v2668_v32 }
 0x44e   : > { %v2621_v33 = vpop.f32.mrf.mxu1  ;;  %v2670_v23 = vpop.f32.mrf.mxu2 }
 0x44f   : > { %v15894_v45 = vadd.f32 %v2621_v33, %v2572_v21 }
 0x450   : > { %v2891_v60 = vpop.f32.mrf.mxu0 }
 0x451   : > { %v2892_v25 = vadd.f32 %v2891_v60, %v15612_v22 }
 0x453   : > { %3279 = vmatmul.bf16.vlgmr.msrb.gmra.mxu0 %v15330_v61  ;;  %3377 = vmatmul.bf16.vlgmr.msrb.gmra.mxu2 %v15330_v61 }
 0x454   : > { %v2719_v31 = vpop.f32.mrf.mxu3 }
 0x455   : > { %v15899_v59 = vadd.f32 %v2719_v31, %v2670_v23 }
 0x456   : > { %v2940_v52 = vpop.f32.mrf.mxu1  ;;  %v2989_v55 = vpop.f32.mrf.mxu2 }
 0x457   : > { %20766 = vst [vmem:[#allocation2_spill] sm:$0xff] %v15899_v59  ;;  %v15901_v58 = vadd.f32 %v2940_v52, %v2892_v25  ;;  %v2990_v57 = vadd.f32 %v2989_v55, %v15616_v0 }
 0x458   : > { %v2893_v7 = vpop.f32.mrf.mxu0 }
 0x459   : > { %v2894_v56 = vadd.f32 %v2893_v7, %v15618_v9  ;;  %3328 = vmatmul.bf16.vlgmr.msrb.gmra.mxu1 %v15334_v5  ;;  %3426 = vmatmul.bf16.vlgmr.msrb.gmra.mxu3 %v15334_v5 }
 0x45c   : > { %v3038_v22 = vpop.f32.mrf.mxu3 }
 0x45d   : > { %v15907_v30 = vadd.f32 %v3038_v22, %v2990_v57 }
 0x45e   : > { %v2942_v61 = vpop.f32.mrf.mxu1  ;;  %v2991_v36 = vpop.f32.mrf.mxu2 }
 0x45f   : > { %v15909_v32 = vadd.f32 %v2942_v61, %v2894_v56  ;;  %v2992_v21 = vadd.f32 %v2991_v36, %v15622_v28 }
 0x460   : > { %v2896_v49 = vpop.f32.mrf.mxu0 }
 0x461   : > { %v2897_v33 = vadd.f32 %v2896_v49, %v15624_v43 }
 0x463   : > { %3284 = vmatmul.bf16.gmra.mxu0 %v15342_v18  ;;  %3382 = vmatmul.bf16.gmra.mxu2 %v15342_v18 }
 0x464   : > { %v3040_v0 = vpop.f32.mrf.mxu3 }
 0x465   : > { %v15915_v9 = vadd.f32 %v3040_v0, %v2992_v21 }
 0x466   : > { %v2945_v5 = vpop.f32.mrf.mxu1  ;;  %v2994_v23 = vpop.f32.mrf.mxu2 }
 0x467   : > { %v15917_v60 = vadd.f32 %v2945_v5, %v2897_v33  ;;  %v2995_v25 = vadd.f32 %v2994_v23, %v15628_v11 }
 0x468   : > { %v2898_v31 = vpop.f32.mrf.mxu0 }
 0x469   : > { %v2899_v52 = vadd.f32 %v2898_v31, %v15630_v46  ;;  %3333 = vmatmul.bf16.gmra.mxu1 %v15346_v13  ;;  %3431 = vmatmul.bf16.gmra.mxu3 %v15346_v13 }
 0x46c   : > { %v3043_v28 = vpop.f32.mrf.mxu3 }
 0x46d   : > { %v15923_v43 = vadd.f32 %v3043_v28, %v2995_v25 }
 0x46e   : > { %v2947_v18 = vpop.f32.mrf.mxu1  ;;  %v2996_v55 = vpop.f32.mrf.mxu2 }
 0x46f   : > { %v15925_v57 = vadd.f32 %v2947_v18, %v2899_v52  ;;  %v2997_v7 = vadd.f32 %v2996_v55, %v15634_v53 }
 0x470   : > { %v2901_v56 = vpop.f32.mrf.mxu0 }
 0x471   : > { %v2902_v22 = vadd.f32 %v2901_v56, %v15636_v4 }
 0x473   : > { %3289 = vmatmul.bf16.gmra.mxu0 %v15354_v16  ;;  %3387 = vmatmul.bf16.gmra.mxu2 %v15354_v16 }
 0x474   : > { %v3045_v11 = vpop.f32.mrf.mxu3 }
 0x475   : > { %v15931_v46 = vadd.f32 %v3045_v11, %v2997_v7 }
 0x476   : > { %v2950_v13 = vpop.f32.mrf.mxu1  ;;  %v2999_v61 = vpop.f32.mrf.mxu2 }
 0x477   : > { %v15933_v36 = vadd.f32 %v2950_v13, %v2902_v22  ;;  %v3000_v21 = vadd.f32 %v2999_v61, %v15640_v41 }
 0x478   : > { %v2903_v49 = vpop.f32.mrf.mxu0 }
 0x479   : > { %v2904_v33 = vadd.f32 %v2903_v49, %v15642_v63  ;;  %3338 = vmatmul.bf16.gmra.mxu1 %v15358_v17  ;;  %3436 = vmatmul.bf16.gmra.mxu3 %v15358_v17 }
 0x47c   : > { %v3048_v53 = vpop.f32.mrf.mxu3 }
 0x47d   : > { %v15939_v4 = vadd.f32 %v3048_v53, %v3000_v21 }
 0x47e   : > { %v2952_v16 = vpop.f32.mrf.mxu1  ;;  %v3001_v0 = vpop.f32.mrf.mxu2 }
 0x47f   : > { %v15941_v5 = vadd.f32 %v2952_v16, %v2904_v33  ;;  %v3002_v23 = vadd.f32 %v3001_v0, %v15646_v54 }
 0x480   : > { %v2906_v25 = vpop.f32.mrf.mxu0 }
 0x481   : > { %v2907_v31 = vadd.f32 %v2906_v25, %v15648_v12 }
 0x483   : > { %3294 = vmatmul.bf16.gmra.mxu0 %v15366_v24  ;;  %3392 = vmatmul.bf16.gmra.mxu2 %v15366_v24 }
 0x484   : > { %v3050_v41 = vpop.f32.mrf.mxu3 }
 0x485   : > { %v15947_v63 = vadd.f32 %v3050_v41, %v3002_v23 }
 0x486   : > { %v2955_v17 = vpop.f32.mrf.mxu1  ;;  %v3004_v52 = vpop.f32.mrf.mxu2 }
 0x487   : > { %v15949_v28 = vadd.f32 %v2955_v17, %v2907_v31  ;;  %v3005_v18 = vadd.f32 %v3004_v52, %v15652_v50 }
 0x488   : > { %v2908_v55 = vpop.f32.mrf.mxu0 }
 0x489   : > { %v2909_v7 = vadd.f32 %v2908_v55, %v15654_v29  ;;  %3343 = vmatmul.bf16.gmra.mxu1 %v15382_v1  ;;  %3441 = vmatmul.bf16.gmra.mxu3 %v15382_v1 }
 0x48c   : > { %v3053_v54 = vpop.f32.mrf.mxu3 }
 0x48d   : > { %v15955_v12 = vadd.f32 %v3053_v54, %v3005_v18 }
 0x48e   : > { %v2957_v24 = vpop.f32.mrf.mxu1  ;;  %v3006_v56 = vpop.f32.mrf.mxu2 }
 0x48f   : > { %v15957_v22 = vadd.f32 %v2957_v24, %v2909_v7  ;;  %v3007_v11 = vadd.f32 %v3006_v56, %v15670_v48 }
 0x490   : > { %v2911_v13 = vpop.f32.mrf.mxu0 }
 0x491   : > { %v2912_v61 = vadd.f32 %v2911_v13, %v15684_v8 }
 0x493   : > { %3299 = vmatmul.bf16.gmra.mxu0 %v15450_v47  ;;  %3397 = vmatmul.bf16.gmra.mxu2 %v15450_v47 }
 0x494   : > { %v3055_v50 = vpop.f32.mrf.mxu3 }
 0x495   : > { %v15963_v29 = vadd.f32 %v3055_v50, %v3007_v11 }
 0x496   : > { %v2960_v1 = vpop.f32.mrf.mxu1  ;;  %v3009_v21 = vpop.f32.mrf.mxu2 }
 0x497   : > { %v15965_v49 = vadd.f32 %v2960_v1, %v2912_v61  ;;  %v3010_v33 = vadd.f32 %v3009_v21, %v15724_v15 }
 0x498   : > { %v15968_v53 = vpop.f32.mrf.mxu0 }
 0x499   : > { %3348 = vmatmul.bf16.gmra.mxu1 %v15490_v62  ;;  %3446 = vmatmul.bf16.gmra.mxu3 %v15490_v62 }
 0x49c   : > { %v3058_v48 = vpop.f32.mrf.mxu3 }
 0x49d   : > { %v15972_v8 = vadd.f32 %v3058_v48, %v3010_v33 }
 0x49e   : > { %v15974_v16 = vpop.f32.mrf.mxu1  ;;  %v15976_v47 = vpop.f32.mrf.mxu2 }
 0x4a0   : > { %v2916_v0 = vpop.f32.mrf.mxu0 }
 0x4a1   : > { %v2917_v23 = vadd.f32 %v2916_v0, %v15792_v40 }
 0x4a3   : > { %3304 = vmatmul.bf16.gmra.mxu0 %v15558_v6  ;;  %3402 = vmatmul.bf16.gmra.mxu2 %v15558_v6 }
 0x4a4   : > { %v15981_v15 = vpop.f32.mrf.mxu3 }
 0x4a6   : > { %v2965_v25 = vpop.f32.mrf.mxu1  ;;  %v3014_v31 = vpop.f32.mrf.mxu2 }
 0x4a7   : > { %v15983_v41 = vadd.f32 %v2965_v25, %v2917_v23  ;;  %v3015_v62 = vadd.f32 %v3014_v31, %v15832_v34 }
 0x4a8   : > { %v15986_v17 = vpop.f32.mrf.mxu0 }
 0x4a9   : > { %3353 = vmatmul.bf16.gmra.mxu1 %v15586_v38  ;;  %3451 = vmatmul.bf16.gmra.mxu3 %v15586_v38 }
 0x4ac   : > { %v3063_v52 = vpop.f32.mrf.mxu3 }
 0x4ad   : > { %v15990_v40 = vadd.f32 %v3063_v52, %v3015_v62 }
 0x4ae   : > { %v15992_v18 = vpop.f32.mrf.mxu1  ;;  %v15994_v6 = vpop.f32.mrf.mxu2 }
 0x4b0   : > { %v2921_v55 = vpop.f32.mrf.mxu0 }
 0x4b1   : > { %v2922_v7 = vadd.f32 %v2921_v55, %v15876_v26 }
 0x4b3   : > { %3309 = vmatmul.bf16.gmra.mxu0 %v15594_v2  ;;  %3407 = vmatmul.bf16.gmra.mxu2 %v15594_v2 }
 0x4b4   : > { %v15999_v34 = vpop.f32.mrf.mxu3 }
 0x4b6   : > { %v2970_v54 = vpop.f32.mrf.mxu1  ;;  %v3019_v24 = vpop.f32.mrf.mxu2 }
 0x4b7   : > { %v16001_v56 = vadd.f32 %v2970_v54, %v2922_v7  ;;  %v3020_v38 = vadd.f32 %v3019_v24, %v15880_v44 }
 0x4b8   : > { %v16004_v11 = vpop.f32.mrf.mxu0 }
 0x4b9   : > { %3358 = vmatmul.bf16.gmra.mxu1 %v15598_v35  ;;  %3456 = vmatmul.bf16.gmra.mxu3 %v15598_v35 }
 0x4bc   : > { %v3068_v13 = vpop.f32.mrf.mxu3 }
 0x4bd   : > { %v16008_v26 = vadd.f32 %v3068_v13, %v3020_v38 }
 0x4be   : > { %v16010_v61 = vpop.f32.mrf.mxu1  ;;  %v16012_v2 = vpop.f32.mrf.mxu2 }
 0x4c0   : > { %v2926_v50 = vpop.f32.mrf.mxu0 }
 0x4c1   : > { %v2927_v1 = vadd.f32 %v2926_v50, %v15888_v10 }
 0x4c3   : > { %3314 = vmatmul.bf16.gmra.mxu0 %v15606_v37  ;;  %3412 = vmatmul.bf16.gmra.mxu2 %v15606_v37 }
 0x4c4   : > { %v16017_v44 = vpop.f32.mrf.mxu3 }
 0x4c6   : > { %v2975_v21 = vpop.f32.mrf.mxu1  ;;  %v3024_v33 = vpop.f32.mrf.mxu2 }
 0x4c7   : > { %v16019_v48 = vadd.f32 %v2975_v21, %v2927_v1  ;;  %v3025_v35 = vadd.f32 %v3024_v33, %v15892_v19 }
 0x4c8   : > { %v16022_v0 = vpop.f32.mrf.mxu0 }
 0x4c9   : > { %3363 = vmatmul.bf16.gmra.mxu1 %v15610_v42  ;;  %3461 = vmatmul.bf16.gmra.mxu3 %v15610_v42  ;;  %v11098_v42 = vld [vmem:[%s20719_s4 + $0x2] sm:$0x3] }
 0x4ca   : > { %v16038_v38 = vperm.slane %v11098_v42, 0 }
 0x4cc   : > { %v3073_v23 = vpop.f32.mrf.mxu3 }
 0x4cd   : > { %v16026_v10 = vadd.f32 %v3073_v23, %v3025_v35 }
 0x4ce   : > { %v16028_v25 = vpop.f32.mrf.mxu1  ;;  %v16030_v37 = vpop.f32.mrf.mxu2 }
 0x4cf   : > { %20767 = vst [vmem:[#allocation4_spill] sm:$0xff] %v16026_v10 }
 0x4d0   : > { %20768 = vst [vmem:[#allocation3_spill] sm:$0xff] %v16028_v25  ;;  %v3280_v31 = vpop.f32.mrf.mxu0 }
 0x4d1   : > { %20769 = vst [vmem:[#allocation5_spill] sm:$0xff] %v16030_v37 }
 0x4d4   : > { %v16032_v62 = vpop.f32.mrf.mxu3 }
 0x4d5   : > { %20770 = vst [vmem:[#allocation6_spill] sm:$0xff] %v16032_v62 }
 0x4d6   : > { %v3329_v52 = vpop.f32.mrf.mxu1  ;;  %v3378_v55 = vpop.f32.mrf.mxu2 }
 0x4d7   : > { %v3330_v7 = vadd.f32 %v3329_v52, %v3280_v31  ;;  %v16043_v52 = vperm.slane %v11098_v42, 1 }
 0x4d8   : > { %v3282_v19 = vpop.f32.mrf.mxu0 }
 0x4d9   : > { %v3467_v54 = vadd.f32 %v3330_v7, %v15901_v58 }
 0x4db   : > { %v3506_v23 = vadd.f32 %v16038_v38, %v3467_v54 }
 0x4dc   : > { %v3427_v24 = vpop.f32.mrf.mxu3 }
 0x4dd   : > { %v3428_v13 = vadd.f32 %v3427_v24, %v3378_v55  ;;  %v3538_v62 = vmax.f32 %v3506_v23, 0.0 }
 0x4de   : > { %v3331_v50 = vpop.f32.mrf.mxu1  ;;  %v3380_v1 = vpop.f32.mrf.mxu2 }
 0x4df   : > { %v3468_v21 = vadd.f32 %v3428_v13, %v15907_v30  ;;  %v3332_v33 = vadd.f32 %v3331_v50, %v3282_v19 }
 0x4e0   : > { %v3285_v35 = vpop.f32.mrf.mxu0 }
 0x4e1   : > { %v3469_v31 = vadd.f32 %v3332_v33, %v15909_v32  ;;  %v3507_v24 = vadd.f32 %v16043_v52, %v3468_v21 }
 0x4e3   : > { %v3508_v58 = vadd.f32 %v16038_v38, %v3469_v31  ;;  %v3539_v50 = vmax.f32 %v3507_v24, 0.0 }
 0x4e4   : > { %v3429_v7 = vpop.f32.mrf.mxu3 }
 0x4e5   : > { %v3540_v10 = vmax.f32 %v3508_v58, 0.0  ;;  %v3430_v37 = vadd.f32 %v3429_v7, %v3380_v1 }
 0x4e6   : > { %v3334_v59 = vpop.f32.mrf.mxu1  ;;  %v3383_v55 = vpop.f32.mrf.mxu2 }
 0x4e7   : > { %v3470_v30 = vadd.f32 %v3430_v37, %v15915_v9  ;;  %v3335_v19 = vadd.f32 %v3334_v59, %v3285_v35  ;;  %v16048_v13 = vpack.c.bf16 %v3540_v10, %v3538_v62 }
 0x4e8   : > { %v3287_v54 = vpop.f32.mrf.mxu0 }
 0x4e9   : > { %v3509_v32 = vadd.f32 %v16043_v52, %v3470_v30  ;;  %v3471_v42 = vadd.f32 %v3335_v19, %v15917_v60 }
 0x4eb   : > { %v3541_v33 = vmax.f32 %v3509_v32, 0.0  ;;  %v3510_v59 = vadd.f32 %v16038_v38, %v3471_v42 }
 0x4ec   : > { %v3432_v31 = vpop.f32.mrf.mxu3 }
 0x4ed   : > { %v3433_v23 = vadd.f32 %v3432_v31, %v3383_v55  ;;  %v16052_v58 = vpack.c.bf16 %v3541_v33, %v3539_v50  ;;  %v3542_v60 = vmax.f32 %v3510_v59, 0.0 }
 0x4ee   : > { %v3336_v1 = vpop.f32.mrf.mxu1  ;;  %v3385_v7 = vpop.f32.mrf.mxu2 }
 0x4ef   : > { %v3472_v21 = vadd.f32 %v3433_v23, %v15923_v43  ;;  %v3337_v25 = vadd.f32 %v3336_v1, %v3287_v54 }
 0x4f0   : > { %v3290_v9 = vpop.f32.mrf.mxu0 }
 0x4f1   : > { %v3473_v10 = vadd.f32 %v3337_v25, %v15925_v57  ;;  %v3511_v19 = vadd.f32 %v16043_v52, %v3472_v21 }
 0x4f3   : > { %v3512_v37 = vadd.f32 %v16038_v38, %v3473_v10  ;;  %v3543_v25 = vmax.f32 %v3511_v19, 0.0 }
 0x4f4   : > { %v3434_v62 = vpop.f32.mrf.mxu3 }
 0x4f5   : > { %v3544_v35 = vmax.f32 %v3512_v37, 0.0  ;;  %v3435_v24 = vadd.f32 %v3434_v62, %v3385_v7 }
 0x4f6   : > { %v3339_v30 = vpop.f32.mrf.mxu1  ;;  %v3388_v55 = vpop.f32.mrf.mxu2 }
 0x4f7   : > { %v3474_v32 = vadd.f32 %v3435_v24, %v15931_v46  ;;  %v3340_v50 = vadd.f32 %v3339_v30, %v3290_v9  ;;  %v16060_v43 = vpack.c.bf16 %v3544_v35, %v3542_v60 }
 0x4f8   : > { %v3292_v54 = vpop.f32.mrf.mxu0 }
 0x4f9   : > { %v3513_v42 = vadd.f32 %v16043_v52, %v3474_v32  ;;  %v3475_v57 = vadd.f32 %v3340_v50, %v15933_v36 }
 0x4fb   : > { %v3545_v33 = vmax.f32 %v3513_v42, 0.0  ;;  %v3514_v9 = vadd.f32 %v16038_v38, %v3475_v57 }
 0x4fc   : > { %v3437_v31 = vpop.f32.mrf.mxu3 }
 0x4fd   : > { %v3438_v23 = vadd.f32 %v3437_v31, %v3388_v55  ;;  %v16064_v1 = vpack.c.bf16 %v3545_v33, %v3543_v25  ;;  %v3546_v36 = vmax.f32 %v3514_v9, 0.0 }
 0x4fe   : > { %v3341_v7 = vpop.f32.mrf.mxu1  ;;  %v3390_v59 = vpop.f32.mrf.mxu2 }
 0x4ff   : > { %v3476_v21 = vadd.f32 %v3438_v23, %v15939_v4  ;;  %v3342_v10 = vadd.f32 %v3341_v7, %v3292_v54 }
 0x500   : > { %v3295_v46 = vpop.f32.mrf.mxu0 }
 0x501   : > { %v3477_v37 = vadd.f32 %v3342_v10, %v15941_v5  ;;  %v3515_v19 = vadd.f32 %v16043_v52, %v3476_v21 }
 0x503   : > { %v3516_v62 = vadd.f32 %v16038_v38, %v3477_v37  ;;  %v3547_v57 = vmax.f32 %v3515_v19, 0.0 }
 0x504   : > { %v3439_v60 = vpop.f32.mrf.mxu3 }
 0x505   : > { %v3548_v35 = vmax.f32 %v3516_v62, 0.0  ;;  %v3440_v24 = vadd.f32 %v3439_v60, %v3390_v59 }
 0x506   : > { %v3344_v30 = vpop.f32.mrf.mxu1  ;;  %v3393_v55 = vpop.f32.mrf.mxu2 }
 0x507   : > { %v3478_v32 = vadd.f32 %v3440_v24, %v15947_v63  ;;  %v3345_v50 = vadd.f32 %v3344_v30, %v3295_v46  ;;  %v16072_v4 = vpack.c.bf16 %v3548_v35, %v3546_v36 }
 0x508   : > { %v3297_v54 = vpop.f32.mrf.mxu0 }
 0x509   : > { %v3517_v42 = vadd.f32 %v16043_v52, %v3478_v32  ;;  %v3479_v5 = vadd.f32 %v3345_v50, %v15949_v28 }
 0x50b   : > { %v3549_v25 = vmax.f32 %v3517_v42, 0.0  ;;  %v3518_v46 = vadd.f32 %v16038_v38, %v3479_v5 }
 0x50c   : > { %v3442_v33 = vpop.f32.mrf.mxu3 }
 0x50d   : > { %v3443_v31 = vadd.f32 %v3442_v33, %v3393_v55  ;;  %v16076_v23 = vpack.c.bf16 %v3549_v25, %v3547_v57  ;;  %v3550_v28 = vmax.f32 %v3518_v46, 0.0  ;;  %v2914_v57 = vadd.f32 %v15968_v53, %v15738_v20 }
 0x50e   : > { %v3346_v7 = vpop.f32.mrf.mxu1  ;;  %v3395_v59 = vpop.f32.mrf.mxu2  ;;  %v3012_v46 = vadd.f32 %v15976_v47, %v15778_v27 }
 0x50f   : > { %v3480_v21 = vadd.f32 %v3443_v31, %v15955_v12  ;;  %v3347_v10 = vadd.f32 %v3346_v7, %v3297_v54 }
 0x510   : > { %v3300_v63 = vpop.f32.mrf.mxu0  ;;  %v3061_v53 = vadd.f32 %v15981_v15, %v3012_v46  ;;  %v2919_v15 = vadd.f32 %v15986_v17, %v15846_v14 }
 0x511   : > { %v3481_v9 = vadd.f32 %v3347_v10, %v15957_v22  ;;  %v3519_v30 = vadd.f32 %v16043_v52, %v3480_v21 }
 0x513   : > { %v3520_v37 = vadd.f32 %v16038_v38, %v3481_v9  ;;  %v3551_v54 = vmax.f32 %v3519_v30, 0.0 }
 0x514   : > { %v3444_v62 = vpop.f32.mrf.mxu3 }
 0x515   : > { %v3552_v60 = vmax.f32 %v3520_v37, 0.0  ;;  %v3445_v36 = vadd.f32 %v3444_v62, %v3395_v59 }
 0x516   : > { %v3349_v35 = vpop.f32.mrf.mxu1  ;;  %v3398_v24 = vpop.f32.mrf.mxu2 }
 0x517   : > { %v3482_v55 = vadd.f32 %v3445_v36, %v15963_v29  ;;  %v3350_v19 = vadd.f32 %v3349_v35, %v3300_v63  ;;  %v16084_v12 = vpack.c.bf16 %v3552_v60, %v3550_v28  ;;  %v2963_v29 = vadd.f32 %v15974_v16, %v2914_v57 }
 0x518   : > { %v3302_v32 = vpop.f32.mrf.mxu0 }
 0x519   : > { %v3521_v50 = vadd.f32 %v16043_v52, %v3482_v55  ;;  %v3483_v22 = vadd.f32 %v3350_v19, %v15965_v49 }
 0x51b   : > { %v3553_v42 = vmax.f32 %v3521_v50, 0.0  ;;  %v3522_v63 = vadd.f32 %v16038_v38, %v3483_v22 }
 0x51c   : > { %v3447_v5 = vpop.f32.mrf.mxu3 }
 0x51d   : > { %v3448_v25 = vadd.f32 %v3447_v5, %v3398_v24  ;;  %v16090_v33 = vpack.c.bf16 %v3553_v42, %v3551_v54  ;;  %v3554_v37 = vmax.f32 %v3522_v63, 0.0  ;;  %v2968_v42 = vadd.f32 %v15992_v18, %v2919_v15 }
 0x51e   : > { %v3351_v31 = vpop.f32.mrf.mxu1  ;;  %v3400_v7 = vpop.f32.mrf.mxu2 }
 0x51f   : > { %v3484_v59 = vadd.f32 %v3448_v25, %v15972_v8  ;;  %v3352_v21 = vadd.f32 %v3351_v31, %v3302_v32 }
 0x520   : > { %v3305_v10 = vpop.f32.mrf.mxu0 }
 0x521   : > { %v3485_v49 = vadd.f32 %v3352_v21, %v2963_v29  ;;  %v3523_v8 = vadd.f32 %v16043_v52, %v3484_v59  ;;  %v3017_v29 = vadd.f32 %v15994_v6, %v15874_v51 }
 0x523   : > { %v3524_v9 = vadd.f32 %v16038_v38, %v3485_v49  ;;  %v3555_v27 = vmax.f32 %v3523_v8, 0.0  ;;  %v3066_v17 = vadd.f32 %v15999_v34, %v3017_v29  ;;  %v2924_v34 = vadd.f32 %v16004_v11, %v15882_v39 }
 0x524   : > { %v3449_v20 = vpop.f32.mrf.mxu3  ;;  %v2929_v29 = vadd.f32 %v16022_v0, %v15894_v45 }
 0x525   : > { %v3556_v62 = vmax.f32 %v3524_v9, 0.0  ;;  %v3450_v28 = vadd.f32 %v3449_v20, %v3400_v7  ;;  %v2973_v8 = vadd.f32 %v16010_v61, %v2924_v34 }
 0x526   : > { %v3354_v60 = vpop.f32.mrf.mxu1  ;;  %v3403_v16 = vpop.f32.mrf.mxu2 }
 0x527   : > { %v3486_v36 = vadd.f32 %v3450_v28, %v3061_v53  ;;  %v16100_v35 = vpack.c.bf16 %v3556_v62, %v3554_v37  ;;  %v3355_v55 = vadd.f32 %v3354_v60, %v3305_v10 }
 0x528   : > { %v3307_v24 = vpop.f32.mrf.mxu0 }
 0x529   : > { %v3525_v30 = vadd.f32 %v16043_v52, %v3486_v36  ;;  %v3487_v32 = vadd.f32 %v3355_v55, %v15983_v41 }
 0x52b   : > { %v3557_v47 = vmax.f32 %v3525_v30, 0.0  ;;  %v3526_v31 = vadd.f32 %v16038_v38, %v3487_v32 }
 0x52c   : > { %v3452_v19 = vpop.f32.mrf.mxu3 }
 0x52d   : > { %v16106_v50 = vpack.c.bf16 %v3557_v47, %v3555_v27  ;;  %v3453_v5 = vadd.f32 %v3452_v19, %v3403_v16  ;;  %v3558_v21 = vmax.f32 %v3526_v31, 0.0  ;;  %v3022_v47 = vadd.f32 %v16012_v2, %v15886_v3 }
 0x52e   : > { %v3356_v22 = vpop.f32.mrf.mxu1  ;;  %v3405_v54 = vpop.f32.mrf.mxu2 }
 0x52f   : > { %v3357_v57 = vadd.f32 %v3356_v22, %v3307_v24  ;;  %v3488_v59 = vadd.f32 %v3453_v5, %v15990_v40  ;;  %v3071_v15 = vadd.f32 %v16017_v44, %v3022_v47  ;;  %v13772_v47 = vld [vmem:[%s20716_s1 + $0x8] sm:$0xff] }
 0x530   : > { %v3310_v25 = vpop.f32.mrf.mxu0 }
 0x531   : > { %v3489_v7 = vadd.f32 %v3357_v57, %v2968_v42  ;;  %v3527_v46 = vadd.f32 %v16043_v52, %v3488_v59 }
 0x533   : > { %v3528_v14 = vadd.f32 %v16038_v38, %v3489_v7  ;;  %v3559_v40 = vmax.f32 %v3527_v46, 0.0  ;;  %v20772_v46 = vld [vmem:[#allocation2_spill] sm:$0xff] }
 0x534   : > { %v3454_v41 = vpop.f32.mrf.mxu3 }
 0x535   : > { %v3560_v10 = vmax.f32 %v3528_v14, 0.0  ;;  %v3455_v63 = vadd.f32 %v3454_v41, %v3405_v54 }
 0x536   : > { %v3359_v18 = vpop.f32.mrf.mxu1  ;;  %v3408_v49 = vpop.f32.mrf.mxu2 }
 0x537   : > { %v3490_v9 = vadd.f32 %v3455_v63, %v3066_v17  ;;  %v16116_v20 = vpack.c.bf16 %v3560_v10, %v3558_v21  ;;  %v3360_v51 = vadd.f32 %v3359_v18, %v3310_v25  ;;  %v20771_v17 = vld [vmem:[#allocation3_spill] sm:$0xff] }
 0x538   : > { %v3312_v6 = vpop.f32.mrf.mxu0  ;;  %v2978_v21 = vadd.f32 %v20771_v17, %v2929_v29  ;;  %v11215_v29 = vld [vmem:[%s20718_s3 + $0x768] sm:$0xf0]  ;;  %v13360_v17 = vld [vmem:[%s20718_s3 + $0x7f4] sm:$0xf] }
 0x539   : > { %v3529_v53 = vadd.f32 %v16043_v52, %v3490_v9  ;;  %v3491_v28 = vadd.f32 %v3360_v51, %v16001_v56  ;;  %v20773_v9 = vld [vmem:[#allocation5_spill] sm:$0xff]  ;;  %v20774_v51 = vld [vmem:[#allocation4_spill] sm:$0xff] }
 0x53b   : > { %v3561_v37 = vmax.f32 %v3529_v53, 0.0  ;;  %v3530_v55 = vadd.f32 %v16038_v38, %v3491_v28  ;;  %v3027_v53 = vadd.f32 %v20773_v9, %v20772_v46  ;;  %v13340_v46 = vld [vmem:[%s20718_s3 + $0x754] sm:$0xf] }
 0x53c   : > { %v3457_v62 = vpop.f32.mrf.mxu3 }
 0x53d   : > { %v16122_v60 = vpack.c.bf16 %v3561_v37, %v3559_v40  ;;  %v3458_v36 = vadd.f32 %v3457_v62, %v3408_v49  ;;  %v3562_v32 = vmax.f32 %v3530_v55, 0.0  ;;  %v20775_v40 = vld [vmem:[#allocation6_spill] sm:$0xff] }
 0x53e   : > { %v3361_v16 = vpop.f32.mrf.mxu1  ;;  %v3410_v30 = vpop.f32.mrf.mxu2  ;;  %v3076_v37 = vadd.f32 %v20775_v40, %v3027_v53  ;;  %v11207_v53 = vld [vmem:[%s20718_s3 + $0x758] sm:$0xf0]  ;;  %v11279_v40 = vld [vmem:[%s20718_s3 + $0x7e8] sm:$0xf0] }
 0x53f   : > { %v3362_v24 = vadd.f32 %v3361_v16, %v3312_v6  ;;  %v3492_v19 = vadd.f32 %v3458_v36, %v16008_v26 }
 0x540   : > { %v3315_v11 = vpop.f32.mrf.mxu0 }
 0x541   : > { %v3493_v27 = vadd.f32 %v3362_v24, %v2973_v8  ;;  %v3531_v42 = vadd.f32 %v16043_v52, %v3492_v19  ;;  %v13773_v19 = vld [vmem:[%s20717_s2 + $0x8] sm:$0xff] }
 0x543   : > { %v3532_v39 = vadd.f32 %v16038_v38, %v3493_v27  ;;  %v3563_v26 = vmax.f32 %v3531_v42, 0.0  ;;  %v13771_v27 = vld [vmem:[%s20717_s2] sm:$0xff]  ;;  %v11223_v42 = vld [vmem:[%s20718_s3 + $0x778] sm:$0xf0] }
 0x544   : > { %v3459_v56 = vpop.f32.mrf.mxu3 }
 0x545   : > { %v3564_v22 = vmax.f32 %v3532_v39, 0.0  ;;  %v3460_v61 = vadd.f32 %v3459_v56, %v3410_v30  ;;  %v13774_v39 = vld [vmem:[%s20716_s1 + $0x10] sm:$0xff]  ;;  %v13776_v56 = vld [vmem:[%s20716_s1 + $0x18] sm:$0xff] }
 0x546   : > { %v3364_v54 = vpop.f32.mrf.mxu1  ;;  %v3413_v2 = vpop.f32.mrf.mxu2 }
 0x547   : > { %v3494_v5 = vadd.f32 %v3460_v61, %v3071_v15  ;;  %v16132_v57 = vpack.c.bf16 %v3564_v22, %v3562_v32  ;;  %v3365_v3 = vadd.f32 %v3364_v54, %v3315_v11  ;;  %v13775_v11 = vld [vmem:[%s20717_s2 + $0x10] sm:$0xff]  ;;  %v13777_v15 = vld [vmem:[%s20717_s2 + $0x18] sm:$0xff] }
 0x548   : > { %v3317_v14 = vpop.f32.mrf.mxu0  ;;  %v11221_v32 = vld [vmem:[%s20718_s3 + $0x770] sm:$0xf]  ;;  %v13345_v22 = vld [vmem:[%s20718_s3 + $0x774] sm:$0xf0]  ;;  %v13344_v61 = vld [vmem:[%s20718_s3 + $0x774] sm:$0xf] }
 0x549   : > { %v3533_v25 = vadd.f32 %v16043_v52, %v3494_v5  ;;  %v3495_v44 = vadd.f32 %v3365_v3, %v16019_v48  ;;  %v11222_v54 = vor.u32 %v13345_v22, %v11221_v32  ;;  %v13778_v5 = vld [vmem:[%s20716_s1 + $0x20] sm:$0xff]  ;;  %v11226_v3 = vor.u32 %v13344_v61, %v11223_v42  ;;  %v11191_v32 = vld [vmem:[%s20718_s3 + $0x738] sm:$0xf0]  ;;  %v13780_v22 = vld [vmem:[%s20716_s1 + $0x28] sm:$0xff] }
 0x54a   : > { %v13781_v61 = vld [vmem:[%s20717_s2 + $0x28] sm:$0xff]  ;;  %v11261_v42 = vld [vmem:[%s20718_s3 + $0x7c0] sm:$0xf] }
 0x54b   : > { %v3565_v31 = vmax.f32 %v3533_v25, 0.0  ;;  %v3534_v18 = vadd.f32 %v16038_v38, %v3495_v44  ;;  %v13779_v25 = vld [vmem:[%s20717_s2 + $0x20] sm:$0xff] }
 0x54c   : > { %v3462_v7 = vpop.f32.mrf.mxu3 }
 0x54d   : > { %v16138_v59 = vpack.c.bf16 %v3565_v31, %v3563_v26  ;;  %v3463_v10 = vadd.f32 %v3462_v7, %v3413_v2  ;;  %v3566_v62 = vmax.f32 %v3534_v18, 0.0  ;;  %v11213_v2 = vld [vmem:[%s20718_s3 + $0x760] sm:$0xf]  ;;  %v13343_v26 = vld [vmem:[%s20718_s3 + $0x764] sm:$0xf0] }
 0x54e   : > { %v3366_v41 = vpop.f32.mrf.mxu1  ;;  %v3415_v0 = vpop.f32.mrf.mxu2  ;;  %v13342_v31 = vld [vmem:[%s20718_s3 + $0x764] sm:$0xf]  ;;  %v11214_v7 = vor.u32 %v13343_v26, %v11213_v2  ;;  %v11205_v18 = vld [vmem:[%s20718_s3 + $0x750] sm:$0xf]  ;;  %v11263_v2 = vld [vmem:[%s20718_s3 + $0x7c8] sm:$0xf0] }
 0x54f   : > { %v3367_v63 = vadd.f32 %v3366_v41, %v3317_v14  ;;  %v3496_v6 = vadd.f32 %v3463_v10, %v20774_v51  ;;  %v11218_v44 = vor.u32 %v13342_v31, %v11215_v29  ;;  %v11285_v14 = vld [vmem:[%s20718_s3 + $0x7f0] sm:$0xf]  ;;  %v13361_v41 = vld [vmem:[%s20718_s3 + $0x7f4] sm:$0xf0]  ;;  %v11287_v10 = vld [vmem:[%s20718_s3 + $0x7f8] sm:$0xf0] }
 0x550   : > { %v11277_v51 = vld [vmem:[%s20718_s3 + $0x7e0] sm:$0xf]  ;;  %v13335_v31 = vld [vmem:[%s20718_s3 + $0x724] sm:$0xf0] }
 0x551   : > { %v3497_v49 = vadd.f32 %v3367_v63, %v2978_v21  ;;  %v3535_v16 = vadd.f32 %v16043_v52, %v3496_v6  ;;  %v11286_v21 = vor.u32 %v13361_v41, %v11285_v14  ;;  %v11290_v63 = vor.u32 %v13360_v17, %v11287_v10  ;;  %v13359_v6 = vld [vmem:[%s20718_s3 + $0x7e4] sm:$0xf0]  ;;  %v11181_v26 = vld [vmem:[%s20718_s3 + $0x720] sm:$0xf]  ;;  %v11183_v14 = vld [vmem:[%s20718_s3 + $0x728] sm:$0xf0] }
 0x552   : > { %v11182_v29 = vor.u32 %v13335_v31, %v11181_v26  ;;  %v11253_v17 = vld [vmem:[%s20718_s3 + $0x7b0] sm:$0xf]  ;;  %v13352_v10 = vld [vmem:[%s20718_s3 + $0x7b4] sm:$0xf] }
 0x553   : > { %v3536_v45 = vadd.f32 %v16038_v38, %v3497_v49  ;;  %v3567_v30 = vmax.f32 %v3535_v16, 0.0  ;;  %v13341_v49 = vld [vmem:[%s20718_s3 + $0x754] sm:$0xf0]  ;;  %v11199_v16 = vld [vmem:[%s20718_s3 + $0x748] sm:$0xf0] }
 0x554   : > { %v3464_v48 = vpop.f32.mrf.mxu3  ;;  %v11206_v9 = vor.u32 %v13341_v49, %v11205_v18  ;;  %v11255_v18 = vld [vmem:[%s20718_s3 + $0x7b8] sm:$0xf0] }
 0x555   : > { %v3568_v34 = vmax.f32 %v3536_v45, 0.0  ;;  %v3465_v28 = vadd.f32 %v3464_v48, %v3415_v0  ;;  %v11210_v45 = vor.u32 %v13340_v46, %v11207_v53  ;;  %v11278_v0 = vor.u32 %v13359_v6, %v11277_v51  ;;  %v13358_v48 = vld [vmem:[%s20718_s3 + $0x7e4] sm:$0xf]  ;;  %v11173_v46 = vld [vmem:[%s20718_s3 + $0x710] sm:$0xf] }
 0x556   : > { %v11258_v49 = vor.u32 %v13352_v10, %v11255_v18  ;;  %v13332_v53 = vld [vmem:[%s20718_s3 + $0x714] sm:$0xf]  ;;  %v11175_v6 = vld [vmem:[%s20718_s3 + $0x718] sm:$0xf0] }
 0x557   : > { %v3498_v8 = vadd.f32 %v3465_v28, %v3076_v37  ;;  %v16148_v36 = vpack.c.bf16 %v3568_v34, %v3566_v62  ;;  %v11197_v37 = vld [vmem:[%s20718_s3 + $0x740] sm:$0xf]  ;;  %v11282_v62 = vor.u32 %v13358_v48, %v11279_v40  ;;  %v13339_v34 = vld [vmem:[%s20718_s3 + $0x744] sm:$0xf0]  ;;  %v13338_v28 = vld [vmem:[%s20718_s3 + $0x744] sm:$0xf]  ;;  %v11178_v48 = vor.u32 %v13332_v53, %v11175_v6 }
 0x559   : > { %v3537_v24 = vadd.f32 %v16043_v52, %v3498_v8  ;;  %3586 = vmatpush.bf16.msra.mxu0 %v16148_v36  ;;  %3700 = vmatpush.bf16.msra.mxu2 %v16148_v36  ;;  %v13770_v52 = vld [vmem:[%s20716_s1] sm:$0xff]  ;;  %v11198_v8 = vor.u32 %v13339_v34, %v11197_v37 }
 0x55a   : > { %v13350_v37 = vld [vmem:[%s20718_s3 + $0x7a4] sm:$0xf] }
 0x55b   : > { %v3569_v38 = vmax.f32 %v3537_v24, 0.0  ;;  %v11269_v24 = vld [vmem:[%s20718_s3 + $0x7d0] sm:$0xf] }
 0x55d   : > { %3587 = vmatpush.bf16.msra.mxu0 %v16132_v57  ;;  %3701 = vmatpush.bf16.msra.mxu2 %v16132_v57  ;;  %v16155_v55 = vpack.c.bf16 %v3569_v38, %v3567_v30  ;;  %v13357_v30 = vld [vmem:[%s20718_s3 + $0x7d4] sm:$0xf0]  ;;  %v13356_v38 = vld [vmem:[%s20718_s3 + $0x7d4] sm:$0xf] }
 0x55f   : > { %3635 = vmatpush.bf16.msra.mxu1 %v16155_v55  ;;  %3749 = vmatpush.bf16.msra.mxu3 %v16155_v55 }
 0x561   : > { %3588 = vmatpush.bf16.msra.mxu0 %v16116_v20  ;;  %3702 = vmatpush.bf16.msra.mxu2 %v16116_v20 }
 0x563   : > { %3636 = vmatpush.bf16.msra.mxu1 %v16138_v59  ;;  %3750 = vmatpush.bf16.msra.mxu3 %v16138_v59 }
 0x565   : > { %3589 = vmatpush.bf16.msra.mxu0 %v16100_v35  ;;  %3703 = vmatpush.bf16.msra.mxu2 %v16100_v35 }
 0x567   : > { %3637 = vmatpush.bf16.msra.mxu1 %v16122_v60  ;;  %3751 = vmatpush.bf16.msra.mxu3 %v16122_v60 }
 0x569   : > { %3590 = vmatpush.bf16.msra.mxu0 %v16084_v12  ;;  %3704 = vmatpush.bf16.msra.mxu2 %v16084_v12 }
 0x56b   : > { %3638 = vmatpush.bf16.msra.mxu1 %v16106_v50  ;;  %3752 = vmatpush.bf16.msra.mxu3 %v16106_v50 }
 0x56d   : > { %3591 = vmatpush.bf16.msra.mxu0 %v16072_v4  ;;  %3705 = vmatpush.bf16.msra.mxu2 %v16072_v4 }
 0x56f   : > { %3639 = vmatpush.bf16.msra.mxu1 %v16090_v33  ;;  %3753 = vmatpush.bf16.msra.mxu3 %v16090_v33 }
 0x571   : > { %3592 = vmatpush.bf16.msra.mxu0 %v16060_v43  ;;  %3706 = vmatpush.bf16.msra.mxu2 %v16060_v43 }
 0x573   : > { %3640 = vmatpush.bf16.msra.mxu1 %v16076_v23  ;;  %3754 = vmatpush.bf16.msra.mxu3 %v16076_v23 }
 0x575   : > { %3593 = vmatpush.bf16.msra.mxu0 %v16048_v13  ;;  %3707 = vmatpush.bf16.msra.mxu2 %v16048_v13 }
 0x577   : > { %3641 = vmatpush.bf16.msra.mxu1 %v16064_v1  ;;  %3755 = vmatpush.bf16.msra.mxu3 %v16064_v1 }
 0x578   : > { %3594 = vmatmul.bf16.vlgmr.msra.gmra.mxu0 %v13770_v52  ;;  %3708 = vmatmul.bf16.vlgmr.msra.gmra.mxu2 %v13771_v27 }
 0x579   : > { %4040 = vmatpush.bf16.msrb.mxu0 %v11222_v54  ;;  %4138 = vmatpush.bf16.msrb.mxu2 %v11226_v3 }
 0x57b   : > { %3642 = vmatpush.bf16.msra.mxu1 %v16052_v58  ;;  %3756 = vmatpush.bf16.msra.mxu3 %v16052_v58 }
 0x57d   : > { %4041 = vmatpush.bf16.msrb.mxu0 %v11214_v7  ;;  %4139 = vmatpush.bf16.msrb.mxu2 %v11218_v44  ;;  %v13334_v44 = vld [vmem:[%s20718_s3 + $0x724] sm:$0xf] }
 0x57e   : > { %3643 = vmatmul.bf16.vlgmr.msra.gmra.mxu1 %v13770_v52  ;;  %3757 = vmatmul.bf16.vlgmr.msra.gmra.mxu3 %v13771_v27  ;;  %v11202_v52 = vor.u32 %v13338_v28, %v11199_v16  ;;  %v11270_v27 = vor.u32 %v13357_v30, %v11269_v24  ;;  %v11186_v41 = vor.u32 %v13334_v44, %v11183_v14  ;;  %v11165_v28 = vld [vmem:[%s20718_s3 + $0x700] sm:$0xf]  ;;  %v13331_v16 = vld [vmem:[%s20718_s3 + $0x704] sm:$0xf0]  ;;  %v11167_v30 = vld [vmem:[%s20718_s3 + $0x708] sm:$0xf0] }
 0x57f   : > { %4089 = vmatpush.bf16.msrb.mxu1 %v11286_v21  ;;  %4187 = vmatpush.bf16.msrb.mxu3 %v11290_v63  ;;  %v13353_v21 = vld [vmem:[%s20718_s3 + $0x7b4] sm:$0xf0]  ;;  %v11166_v24 = vor.u32 %v13331_v16, %v11165_v28 }
 0x580   : > { %v11254_v63 = vor.u32 %v13353_v21, %v11253_v17 }
 0x581   : > { %4042 = vmatpush.bf16.msrb.mxu0 %v11206_v9  ;;  %4140 = vmatpush.bf16.msrb.mxu2 %v11210_v45  ;;  %v13333_v9 = vld [vmem:[%s20718_s3 + $0x714] sm:$0xf0]  ;;  %v11245_v45 = vld [vmem:[%s20718_s3 + $0x7a0] sm:$0xf] }
 0x582   : > { %v11174_v51 = vor.u32 %v13333_v9, %v11173_v46 }
 0x583   : > { %4090 = vmatpush.bf16.msrb.mxu1 %v11278_v0  ;;  %4188 = vmatpush.bf16.msrb.mxu3 %v11282_v62  ;;  %v13351_v0 = vld [vmem:[%s20718_s3 + $0x7a4] sm:$0xf0]  ;;  %v11247_v62 = vld [vmem:[%s20718_s3 + $0x7a8] sm:$0xf0] }
 0x584   : > { %v11246_v40 = vor.u32 %v13351_v0, %v11245_v45  ;;  %v11250_v34 = vor.u32 %v13350_v37, %v11247_v62 }
 0x585   : > { %4043 = vmatpush.bf16.msrb.mxu0 %v11198_v8  ;;  %4141 = vmatpush.bf16.msrb.mxu2 %v11202_v52  ;;  %v13330_v8 = vld [vmem:[%s20718_s3 + $0x704] sm:$0xf]  ;;  %v11237_v52 = vld [vmem:[%s20718_s3 + $0x790] sm:$0xf] }
 0x587   : > { %4091 = vmatpush.bf16.msrb.mxu1 %v11270_v27  ;;  %v13349_v27 = vld [vmem:[%s20718_s3 + $0x794] sm:$0xf0] }
 0x588   : > { %3599 = vmatmul.bf16.gmra.mxu0 %v13772_v47  ;;  %3713 = vmatmul.bf16.gmra.mxu2 %v13773_v19 }
 0x58e   : > { %3648 = vmatmul.bf16.gmra.mxu1 %v13772_v47  ;;  %3762 = vmatmul.bf16.gmra.mxu3 %v13773_v19  ;;  %v11271_v47 = vld [vmem:[%s20718_s3 + $0x7d8] sm:$0xf0] }
 0x58f   : > { %v11274_v19 = vor.u32 %v13356_v38, %v11271_v47  ;;  %v11170_v38 = vor.u32 %v13330_v8, %v11167_v30  ;;  %v13348_v47 = vld [vmem:[%s20718_s3 + $0x794] sm:$0xf] }
 0x591   : > { %4189 = vmatpush.bf16.msrb.mxu3 %v11274_v19  ;;  %v11238_v19 = vor.u32 %v13349_v27, %v11237_v52 }
 0x598   : > { %3604 = vmatmul.bf16.gmra.mxu0 %v13774_v39  ;;  %3718 = vmatmul.bf16.gmra.mxu2 %v13775_v11 }
 0x59e   : > { %3653 = vmatmul.bf16.gmra.mxu1 %v13774_v39  ;;  %3767 = vmatmul.bf16.gmra.mxu3 %v13775_v11  ;;  %v11189_v39 = vld [vmem:[%s20718_s3 + $0x730] sm:$0xf]  ;;  %v13337_v11 = vld [vmem:[%s20718_s3 + $0x734] sm:$0xf0] }
 0x5a8   : > { %3609 = vmatmul.bf16.gmra.mxu0 %v13776_v56  ;;  %3723 = vmatmul.bf16.gmra.mxu2 %v13777_v15 }
 0x5ae   : > { %3658 = vmatmul.bf16.gmra.mxu1 %v13776_v56  ;;  %3772 = vmatmul.bf16.gmra.mxu3 %v13777_v15  ;;  %v13336_v56 = vld [vmem:[%s20718_s3 + $0x734] sm:$0xf]  ;;  %v11190_v15 = vor.u32 %v13337_v11, %v11189_v39  ;;  %v11239_v39 = vld [vmem:[%s20718_s3 + $0x798] sm:$0xf0] }
 0x5af   : > { %v11194_v54 = vor.u32 %v13336_v56, %v11191_v32  ;;  %v11242_v11 = vor.u32 %v13348_v47, %v11239_v39  ;;  %v13782_v56 = vld [vmem:[%s20716_s1 + $0x30] sm:$0xff]  ;;  %v11229_v32 = vld [vmem:[%s20718_s3 + $0x780] sm:$0xf] }
 0x5b0   : > { %4044 = vmatpush.bf16.msrb.mxu0 %v11190_v15  ;;  %v13783_v15 = vld [vmem:[%s20717_s2 + $0x30] sm:$0xff] }
 0x5b1   : > { %4142 = vmatpush.bf16.msrb.mxu2 %v11194_v54 }
 0x5b4   : > { %4045 = vmatpush.bf16.msrb.mxu0 %v11182_v29 }
 0x5b5   : > { %4143 = vmatpush.bf16.msrb.mxu2 %v11186_v41 }
 0x5b8   : > { %3614 = vmatmul.bf16.gmra.mxu0 %v13778_v5  ;;  %3728 = vmatmul.bf16.gmra.mxu2 %v13779_v25 }
 0x5b9   : > { %4046 = vmatpush.bf16.msrb.mxu0 %v11174_v51  ;;  %4144 = vmatpush.bf16.msrb.mxu2 %v11178_v48 }
 0x5bd   : > { %4047 = vmatpush.bf16.msrb.mxu0 %v11166_v24  ;;  %4145 = vmatpush.bf16.msrb.mxu2 %v11170_v38 }
 0x5be   : > { %3663 = vmatmul.bf16.gmra.mxu1 %v13778_v5  ;;  %3777 = vmatmul.bf16.gmra.mxu3 %v13779_v25  ;;  %v13355_v5 = vld [vmem:[%s20718_s3 + $0x7c4] sm:$0xf0]  ;;  %v13354_v25 = vld [vmem:[%s20718_s3 + $0x7c4] sm:$0xf] }
 0x5bf   : > { %v11262_v3 = vor.u32 %v13355_v5, %v11261_v42  ;;  %v11266_v7 = vor.u32 %v13354_v25, %v11263_v2  ;;  %v11231_v42 = vld [vmem:[%s20718_s3 + $0x788] sm:$0xf0]  ;;  %v13784_v25 = vld [vmem:[%s20716_s1 + $0x38] sm:$0xff] }
 0x5c1   : > { %4092 = vmatpush.bf16.msrb.mxu1 %v11262_v3  ;;  %4190 = vmatpush.bf16.msrb.mxu3 %v11266_v7  ;;  %v13785_v3 = vld [vmem:[%s20717_s2 + $0x38] sm:$0xff] }
 0x5c5   : > { %4093 = vmatpush.bf16.msrb.mxu1 %v11254_v63  ;;  %4191 = vmatpush.bf16.msrb.mxu3 %v11258_v49 }
 0x5c8   : > { %3619 = vmatmul.bf16.gmra.mxu0 %v13780_v22  ;;  %3733 = vmatmul.bf16.gmra.mxu2 %v13781_v61 }
 0x5c9   : > { %4094 = vmatpush.bf16.msrb.mxu1 %v11246_v40  ;;  %4192 = vmatpush.bf16.msrb.mxu3 %v11250_v34 }
 0x5cd   : > { %4095 = vmatpush.bf16.msrb.mxu1 %v11238_v19  ;;  %4193 = vmatpush.bf16.msrb.mxu3 %v11242_v11 }
 0x5ce   : > { %3668 = vmatmul.bf16.gmra.mxu1 %v13780_v22  ;;  %3782 = vmatmul.bf16.gmra.mxu3 %v13781_v61  ;;  %v13347_v22 = vld [vmem:[%s20718_s3 + $0x784] sm:$0xf0]  ;;  %v13346_v61 = vld [vmem:[%s20718_s3 + $0x784] sm:$0xf] }
 0x5cf   : > { %v11230_v54 = vor.u32 %v13347_v22, %v11229_v32  ;;  %v11234_v5 = vor.u32 %v13346_v61, %v11231_v42  ;;  %v11349_v32 = vld [vmem:[%s20718_s3 + $0x670] sm:$0xf]  ;;  %v13313_v22 = vld [vmem:[%s20718_s3 + $0x674] sm:$0xf0] }
 0x5d0   : > { %v11350_v61 = vor.u32 %v13313_v22, %v11349_v32  ;;  %v11327_v32 = vld [vmem:[%s20718_s3 + $0x648] sm:$0xf0] }
 0x5d1   : > { %4096 = vmatpush.bf16.msrb.mxu1 %v11230_v54  ;;  %4194 = vmatpush.bf16.msrb.mxu3 %v11234_v5  ;;  %v11351_v54 = vld [vmem:[%s20718_s3 + $0x678] sm:$0xf0] }
 0x5d2   : > { %4396 = vmatpush.bf16.msra.mxu0 %v11350_v61 }
 0x5d8   : > { %3624 = vmatmul.bf16.gmra.mxu0 %v13782_v56  ;;  %3738 = vmatmul.bf16.gmra.mxu2 %v13783_v15 }
 0x5de   : > { %3673 = vmatmul.bf16.gmra.mxu1 %v13782_v56  ;;  %3787 = vmatmul.bf16.gmra.mxu3 %v13783_v15 }
 0x5e8   : > { %3629 = vmatmul.bf16.gmra.mxu0 %v13784_v25  ;;  %3743 = vmatmul.bf16.gmra.mxu2 %v13785_v3 }
 0x5ee   : > { %3678 = vmatmul.bf16.gmra.mxu1 %v13784_v25  ;;  %3792 = vmatmul.bf16.gmra.mxu3 %v13785_v3  ;;  %v11341_v3 = vld [vmem:[%s20718_s3 + $0x660] sm:$0xf] }
 0x5f5   : > { %v3595_v2 = vpop.f32.mrf.mxu0 }
 0x5f8   : > { %4048 = vmatmul.bf16.vlgmr.msrb.gmra.mxu0 %v16048_v13  ;;  %4146 = vmatmul.bf16.vlgmr.msrb.gmra.mxu2 %v16048_v13 }
 0x5fb   : > { %v3644_v26 = vpop.f32.mrf.mxu1  ;;  %v3709_v31 = vpop.f32.mrf.mxu2 }
 0x5fd   : > { %v3597_v7 = vpop.f32.mrf.mxu0 }
 0x5fe   : > { %v16427_v29 = vpack.c.bf16 %v3597_v7, %v3595_v2  ;;  %4097 = vmatmul.bf16.vlgmr.msrb.gmra.mxu1 %v16052_v58  ;;  %4195 = vmatmul.bf16.vlgmr.msrb.gmra.mxu3 %v16052_v58  ;;  %v13311_v2 = vld [vmem:[%s20718_s3 + $0x664] sm:$0xf0] }
 0x5ff   : > { %v11342_v7 = vor.u32 %v13311_v2, %v11341_v3 }
 0x601   : > { %v3758_v44 = vpop.f32.mrf.mxu3  ;;  %4397 = vmatpush.bf16.msra.mxu0 %v11342_v7  ;;  %v13305_v7 = vld [vmem:[%s20718_s3 + $0x634] sm:$0xf0] }
 0x603   : > { %v3646_v14 = vpop.f32.mrf.mxu1  ;;  %v3711_v41 = vpop.f32.mrf.mxu2 }
 0x604   : > { %v16431_v17 = vpack.c.bf16 %v3646_v14, %v3644_v26  ;;  %v16433_v21 = vpack.c.bf16 %v3711_v41, %v3709_v31  ;;  %v13310_v26 = vld [vmem:[%s20718_s3 + $0x664] sm:$0xf]  ;;  %v11413_v41 = vld [vmem:[%s20718_s3 + $0x6f0] sm:$0xf] }
 0x605   : > { %v3600_v10 = vpop.f32.mrf.mxu0 }
 0x608   : > { %4053 = vmatmul.bf16.gmra.mxu0 %v16060_v43  ;;  %4151 = vmatmul.bf16.gmra.mxu2 %v16060_v43 }
 0x609   : > { %v3760_v13 = vpop.f32.mrf.mxu3 }
 0x60a   : > { %v16437_v63 = vpack.c.bf16 %v3760_v13, %v3758_v44  ;;  %v11343_v44 = vld [vmem:[%s20718_s3 + $0x668] sm:$0xf0]  ;;  %v13328_v13 = vld [vmem:[%s20718_s3 + $0x6f4] sm:$0xf] }
 0x60b   : > { %v3649_v18 = vpop.f32.mrf.mxu1  ;;  %v3714_v49 = vpop.f32.mrf.mxu2  ;;  %v11346_v14 = vor.u32 %v13310_v26, %v11343_v44  ;;  %v11399_v26 = vld [vmem:[%s20718_s3 + $0x6d8] sm:$0xf0]  ;;  %v13304_v44 = vld [vmem:[%s20718_s3 + $0x634] sm:$0xf] }
 0x60d   : > { %v3602_v46 = vpop.f32.mrf.mxu0 }
 0x60e   : > { %v16439_v9 = vpack.c.bf16 %v3602_v46, %v3600_v10  ;;  %4102 = vmatmul.bf16.gmra.mxu1 %v16064_v1  ;;  %4200 = vmatmul.bf16.gmra.mxu3 %v16064_v1  ;;  %v13329_v10 = vld [vmem:[%s20718_s3 + $0x6f4] sm:$0xf0]  ;;  %v11415_v46 = vld [vmem:[%s20718_s3 + $0x6f8] sm:$0xf0] }
 0x611   : > { %v3763_v58 = vpop.f32.mrf.mxu3 }
 0x613   : > { %v3651_v53 = vpop.f32.mrf.mxu1  ;;  %v3716_v51 = vpop.f32.mrf.mxu2 }
 0x614   : > { %v16443_v6 = vpack.c.bf16 %v3651_v53, %v3649_v18  ;;  %v16445_v45 = vpack.c.bf16 %v3716_v51, %v3714_v49  ;;  %v11414_v49 = vor.u32 %v13329_v10, %v11413_v41  ;;  %v11418_v53 = vor.u32 %v13328_v13, %v11415_v46  ;;  %v11333_v51 = vld [vmem:[%s20718_s3 + $0x650] sm:$0xf]  ;;  %v11319_v41 = vld [vmem:[%s20718_s3 + $0x638] sm:$0xf0]  ;;  %v11389_v13 = vld [vmem:[%s20718_s3 + $0x6c0] sm:$0xf] }
 0x615   : > { %v3605_v43 = vpop.f32.mrf.mxu0  ;;  %v11322_v10 = vor.u32 %v13304_v44, %v11319_v41  ;;  %v11293_v44 = vld [vmem:[%s20718_s3 + $0x600] sm:$0xf]  ;;  %v13298_v41 = vld [vmem:[%s20718_s3 + $0x604] sm:$0xf] }
 0x616   : > { %4445 = vmatpush.bf16.msra.mxu1 %v11414_v49  ;;  %4543 = vmatpush.bf16.msra.mxu3 %v11418_v53  ;;  %v13322_v49 = vld [vmem:[%s20718_s3 + $0x6c4] sm:$0xf] }
 0x618   : > { %4058 = vmatmul.bf16.gmra.mxu0 %v16072_v4  ;;  %4156 = vmatmul.bf16.gmra.mxu2 %v16072_v4 }
 0x619   : > { %v3765_v0 = vpop.f32.mrf.mxu3 }
 0x61a   : > { %v16449_v48 = vpack.c.bf16 %v3765_v0, %v3763_v58  ;;  %v13308_v0 = vld [vmem:[%s20718_s3 + $0x654] sm:$0xf] }
 0x61b   : > { %v3654_v40 = vpop.f32.mrf.mxu1  ;;  %v3719_v37 = vpop.f32.mrf.mxu2 }
 0x61d   : > { %v3607_v62 = vpop.f32.mrf.mxu0 }
 0x61e   : > { %v16451_v34 = vpack.c.bf16 %v3607_v62, %v3605_v43  ;;  %4107 = vmatmul.bf16.gmra.mxu1 %v16076_v23  ;;  %4205 = vmatmul.bf16.gmra.mxu3 %v16076_v23  ;;  %v13309_v43 = vld [vmem:[%s20718_s3 + $0x654] sm:$0xf0]  ;;  %v11405_v62 = vld [vmem:[%s20718_s3 + $0x6e0] sm:$0xf] }
 0x621   : > { %v3768_v1 = vpop.f32.mrf.mxu3 }
 0x623   : > { %v3656_v28 = vpop.f32.mrf.mxu1  ;;  %v3721_v16 = vpop.f32.mrf.mxu2 }
 0x624   : > { %v16455_v8 = vpack.c.bf16 %v3656_v28, %v3654_v40  ;;  %v16457_v24 = vpack.c.bf16 %v3721_v16, %v3719_v37  ;;  %v11334_v40 = vor.u32 %v13309_v43, %v11333_v51  ;;  %v13326_v28 = vld [vmem:[%s20718_s3 + $0x6e4] sm:$0xf] }
 0x625   : > { %v3610_v4 = vpop.f32.mrf.mxu0 }
 0x626   : > { %4398 = vmatpush.bf16.msra.mxu0 %v11334_v40  ;;  %v13303_v40 = vld [vmem:[%s20718_s3 + $0x624] sm:$0xf0] }
 0x628   : > { %4063 = vmatmul.bf16.gmra.mxu0 %v16084_v12  ;;  %4161 = vmatmul.bf16.gmra.mxu2 %v16084_v12 }
 0x629   : > { %v3770_v30 = vpop.f32.mrf.mxu3 }
 0x62a   : > { %v16461_v38 = vpack.c.bf16 %v3770_v30, %v3768_v1  ;;  %v13327_v1 = vld [vmem:[%s20718_s3 + $0x6e4] sm:$0xf0]  ;;  %v11407_v30 = vld [vmem:[%s20718_s3 + $0x6e8] sm:$0xf0] }
 0x62b   : > { %v3659_v52 = vpop.f32.mrf.mxu1  ;;  %v3724_v27 = vpop.f32.mrf.mxu2 }
 0x62d   : > { %v3612_v47 = vpop.f32.mrf.mxu0 }
 0x62e   : > { %v16463_v19 = vpack.c.bf16 %v3612_v47, %v3610_v4  ;;  %4112 = vmatmul.bf16.gmra.mxu1 %v16090_v33  ;;  %4210 = vmatmul.bf16.gmra.mxu3 %v16090_v33  ;;  %v13312_v33 = vld [vmem:[%s20718_s3 + $0x674] sm:$0xf]  ;;  %v11406_v4 = vor.u32 %v13327_v1, %v11405_v62  ;;  %v13307_v47 = vld [vmem:[%s20718_s3 + $0x644] sm:$0xf0] }
 0x62f   : > { %v11354_v42 = vor.u32 %v13312_v33, %v11351_v54  ;;  %v11397_v54 = vld [vmem:[%s20718_s3 + $0x6d0] sm:$0xf] }
 0x630   : > { %4446 = vmatpush.bf16.msra.mxu1 %v11406_v4  ;;  %v11381_v4 = vld [vmem:[%s20718_s3 + $0x6b0] sm:$0xf] }
 0x631   : > { %v3773_v23 = vpop.f32.mrf.mxu3  ;;  %4494 = vmatpush.bf16.msra.mxu2 %v11354_v42  ;;  %v13325_v42 = vld [vmem:[%s20718_s3 + $0x6d4] sm:$0xf0] }
 0x632   : > { %v11398_v2 = vor.u32 %v13325_v42, %v11397_v54 }
 0x633   : > { %v3661_v39 = vpop.f32.mrf.mxu1  ;;  %v3726_v11 = vpop.f32.mrf.mxu2 }
 0x634   : > { %v16467_v56 = vpack.c.bf16 %v3661_v39, %v3659_v52  ;;  %v16469_v15 = vpack.c.bf16 %v3726_v11, %v3724_v27  ;;  %v11410_v52 = vor.u32 %v13326_v28, %v11407_v30  ;;  %v11325_v27 = vld [vmem:[%s20718_s3 + $0x640] sm:$0xf]  ;;  %4447 = vmatpush.bf16.msra.mxu1 %v11398_v2  ;;  %v11311_v28 = vld [vmem:[%s20718_s3 + $0x628] sm:$0xf0]  ;;  %v13321_v30 = vld [vmem:[%s20718_s3 + $0x6b4] sm:$0xf0] }
 0x635   : > { %v3615_v12 = vpop.f32.mrf.mxu0  ;;  %4495 = vmatpush.bf16.msra.mxu2 %v11346_v14  ;;  %v13318_v2 = vld [vmem:[%s20718_s3 + $0x6a4] sm:$0xf] }
 0x636   : > { %4544 = vmatpush.bf16.msra.mxu3 %v11410_v52  ;;  %v13320_v52 = vld [vmem:[%s20718_s3 + $0x6b4] sm:$0xf] }
 0x638   : > { %4068 = vmatmul.bf16.gmra.mxu0 %v16100_v35  ;;  %4166 = vmatmul.bf16.gmra.mxu2 %v16100_v35 }
 0x639   : > { %v3775_v5 = vpop.f32.mrf.mxu3 }
 0x63a   : > { %v16485_v25 = vpack.c.bf16 %v3775_v5, %v3773_v23  ;;  %v13306_v23 = vld [vmem:[%s20718_s3 + $0x644] sm:$0xf]  ;;  %v13324_v5 = vld [vmem:[%s20718_s3 + $0x6d4] sm:$0xf] }
 0x63b   : > { %v3664_v31 = vpop.f32.mrf.mxu1  ;;  %v3729_v35 = vpop.f32.mrf.mxu2  ;;  %v11330_v61 = vor.u32 %v13306_v23, %v11327_v32  ;;  %v11383_v23 = vld [vmem:[%s20718_s3 + $0x6b8] sm:$0xf0]  ;;  %v13301_v32 = vld [vmem:[%s20718_s3 + $0x614] sm:$0xf0] }
 0x63d   : > { %v3617_v18 = vpop.f32.mrf.mxu0 }
 0x63e   : > { %v16511_v58 = vpack.c.bf16 %v3617_v18, %v3615_v12  ;;  %4117 = vmatmul.bf16.gmra.mxu1 %v16106_v50  ;;  %4215 = vmatmul.bf16.gmra.mxu3 %v16106_v50  ;;  %v11335_v50 = vld [vmem:[%s20718_s3 + $0x658] sm:$0xf0]  ;;  %v11326_v12 = vor.u32 %v13307_v47, %v11325_v27  ;;  %v13323_v18 = vld [vmem:[%s20718_s3 + $0x6c4] sm:$0xf0]  ;;  %v11382_v47 = vor.u32 %v13321_v30, %v11381_v4  ;;  %v13314_v4 = vld [vmem:[%s20718_s3 + $0x684] sm:$0xf] }
 0x63f   : > { %v11338_v37 = vor.u32 %v13308_v0, %v11335_v50  ;;  %v11390_v53 = vor.u32 %v13323_v18, %v11389_v13  ;;  %v11309_v0 = vld [vmem:[%s20718_s3 + $0x620] sm:$0xf]  ;;  %v13302_v50 = vld [vmem:[%s20718_s3 + $0x624] sm:$0xf] }
 0x640   : > { %4399 = vmatpush.bf16.msra.mxu0 %v11326_v12  ;;  %v11310_v1 = vor.u32 %v13303_v40, %v11309_v0  ;;  %v11301_v12 = vld [vmem:[%s20718_s3 + $0x610] sm:$0xf]  ;;  %v13317_v0 = vld [vmem:[%s20718_s3 + $0x694] sm:$0xf0]  ;;  %v13316_v40 = vld [vmem:[%s20718_s3 + $0x694] sm:$0xf] }
 0x641   : > { %v3778_v16 = vpop.f32.mrf.mxu3  ;;  %4496 = vmatpush.bf16.msra.mxu2 %v11338_v37  ;;  %4448 = vmatpush.bf16.msra.mxu1 %v11390_v53  ;;  %v11302_v54 = vor.u32 %v13301_v32, %v11301_v12 }
 0x643   : > { %v3666_v39 = vpop.f32.mrf.mxu1  ;;  %v3731_v11 = vpop.f32.mrf.mxu2 }
 0x644   : > { %v16551_v22 = vpack.c.bf16 %v3666_v39, %v3664_v31  ;;  %v16553_v33 = vpack.c.bf16 %v3731_v11, %v3729_v35  ;;  %v11402_v31 = vor.u32 %v13324_v5, %v11399_v26  ;;  %v11317_v35 = vld [vmem:[%s20718_s3 + $0x630] sm:$0xf]  ;;  %v11386_v11 = vor.u32 %v13320_v52, %v11383_v23  ;;  %v11373_v5 = vld [vmem:[%s20718_s3 + $0x6a0] sm:$0xf] }
 0x645   : > { %v3620_v3 = vpop.f32.mrf.mxu0  ;;  %4497 = vmatpush.bf16.msra.mxu2 %v11330_v61  ;;  %v11318_v14 = vor.u32 %v13305_v7, %v11317_v35  ;;  %v13300_v61 = vld [vmem:[%s20718_s3 + $0x614] sm:$0xf]  ;;  %4449 = vmatpush.bf16.msra.mxu1 %v11382_v47  ;;  %v11375_v35 = vld [vmem:[%s20718_s3 + $0x6a8] sm:$0xf0] }
 0x646   : > { %4545 = vmatpush.bf16.msra.mxu3 %v11402_v31  ;;  %v11378_v7 = vor.u32 %v13318_v2, %v11375_v35 }
 0x647   : > { %4400 = vmatpush.bf16.msra.mxu0 %v11318_v14  ;;  %v13299_v14 = vld [vmem:[%s20718_s3 + $0x604] sm:$0xf0] }
 0x648   : > { %4073 = vmatmul.bf16.gmra.mxu0 %v16116_v20  ;;  %4171 = vmatmul.bf16.gmra.mxu2 %v16116_v20  ;;  %v11391_v20 = vld [vmem:[%s20718_s3 + $0x6c8] sm:$0xf0]  ;;  %v11294_v18 = vor.u32 %v13299_v14, %v11293_v44 }
 0x649   : > { %v3780_v46 = vpop.f32.mrf.mxu3  ;;  %v11394_v43 = vor.u32 %v13322_v49, %v11391_v20  ;;  %4498 = vmatpush.bf16.msra.mxu2 %v11322_v10  ;;  %v11295_v49 = vld [vmem:[%s20718_s3 + $0x608] sm:$0xf0] }
 0x64a   : > { %v16593_v51 = vpack.c.bf16 %v3780_v46, %v3778_v16  ;;  %v11314_v16 = vor.u32 %v13302_v50, %v11311_v28  ;;  %v11298_v20 = vor.u32 %v13298_v41, %v11295_v49  ;;  %v11357_v28 = vld [vmem:[%s20718_s3 + $0x680] sm:$0xf] }
 0x64b   : > { %v3669_v37 = vpop.f32.mrf.mxu1  ;;  %v3734_v62 = vpop.f32.mrf.mxu2  ;;  %4546 = vmatpush.bf16.msra.mxu3 %v11394_v43  ;;  %4401 = vmatpush.bf16.msra.mxu0 %v11310_v1  ;;  %v11365_v43 = vld [vmem:[%s20718_s3 + $0x690] sm:$0xf] }
 0x64d   : > { %v3622_v27 = vpop.f32.mrf.mxu0  ;;  %4499 = vmatpush.bf16.msra.mxu2 %v11314_v16  ;;  %v13315_v16 = vld [vmem:[%s20718_s3 + $0x684] sm:$0xf0] }
 0x64e   : > { %v16619_v39 = vpack.c.bf16 %v3622_v27, %v3620_v3  ;;  %4122 = vmatmul.bf16.gmra.mxu1 %v16122_v60  ;;  %4220 = vmatmul.bf16.gmra.mxu3 %v16122_v60  ;;  %v11303_v60 = vld [vmem:[%s20718_s3 + $0x618] sm:$0xf0]  ;;  %v13319_v3 = vld [vmem:[%s20718_s3 + $0x6a4] sm:$0xf0]  ;;  %v11358_v52 = vor.u32 %v13315_v16, %v11357_v28  ;;  %v11359_v27 = vld [vmem:[%s20718_s3 + $0x688] sm:$0xf0] }
 0x64f   : > { %v11306_v42 = vor.u32 %v13300_v61, %v11303_v60  ;;  %4547 = vmatpush.bf16.msra.mxu3 %v11386_v11  ;;  %4402 = vmatpush.bf16.msra.mxu0 %v11302_v54  ;;  %v11374_v31 = vor.u32 %v13319_v3, %v11373_v5  ;;  %v11362_v47 = vor.u32 %v13314_v4, %v11359_v27 }
 0x651   : > { %v3783_v26 = vpop.f32.mrf.mxu3  ;;  %4500 = vmatpush.bf16.msra.mxu2 %v11306_v42  ;;  %4450 = vmatpush.bf16.msra.mxu1 %v11374_v31 }
 0x653   : > { %v3671_v10 = vpop.f32.mrf.mxu1  ;;  %v3736_v13 = vpop.f32.mrf.mxu2  ;;  %4548 = vmatpush.bf16.msra.mxu3 %v11378_v7  ;;  %4403 = vmatpush.bf16.msra.mxu0 %v11294_v18 }
 0x654   : > { %v16659_v46 = vpack.c.bf16 %v3671_v10, %v3669_v37  ;;  %v16661_v53 = vpack.c.bf16 %v3736_v13, %v3734_v62  ;;  %v11366_v37 = vor.u32 %v13317_v0, %v11365_v43  ;;  %v11367_v62 = vld [vmem:[%s20718_s3 + $0x698] sm:$0xf0] }
 0x655   : > { %v3625_v50 = vpop.f32.mrf.mxu0  ;;  %v11370_v1 = vor.u32 %v13316_v40, %v11367_v62  ;;  %4501 = vmatpush.bf16.msra.mxu2 %v11298_v20 }
 0x656   : > { %4451 = vmatpush.bf16.msra.mxu1 %v11366_v37 }
 0x657   : > { %4549 = vmatpush.bf16.msra.mxu3 %v11370_v1 }
 0x658   : > { %4078 = vmatmul.bf16.gmra.mxu0 %v16132_v57  ;;  %4176 = vmatmul.bf16.gmra.mxu2 %v16132_v57 }
 0x659   : > { %v3785_v30 = vpop.f32.mrf.mxu3 }
 0x65a   : > { %v16689_v57 = vpack.c.bf16 %v3785_v30, %v3783_v26  ;;  %4452 = vmatpush.bf16.msra.mxu1 %v11358_v52 }
 0x65b   : > { %v3674_v23 = vpop.f32.mrf.mxu1  ;;  %v3739_v11 = vpop.f32.mrf.mxu2  ;;  %4550 = vmatpush.bf16.msra.mxu3 %v11362_v47 }
 0x65d   : > { %v3627_v12 = vpop.f32.mrf.mxu0 }
 0x65e   : > { %v16691_v32 = vpack.c.bf16 %v3627_v12, %v3625_v50  ;;  %4127 = vmatmul.bf16.gmra.mxu1 %v16138_v59  ;;  %4225 = vmatmul.bf16.gmra.mxu3 %v16138_v59 }
 0x661   : > { %v3788_v61 = vpop.f32.mrf.mxu3 }
 0x663   : > { %v3676_v54 = vpop.f32.mrf.mxu1  ;;  %v3741_v60 = vpop.f32.mrf.mxu2 }
 0x664   : > { %v16695_v42 = vpack.c.bf16 %v3676_v54, %v3674_v23  ;;  %v16697_v5 = vpack.c.bf16 %v3741_v60, %v3739_v11 }
 0x665   : > { %v3630_v3 = vpop.f32.mrf.mxu0 }
 0x668   : > { %4083 = vmatmul.bf16.gmra.mxu0 %v16148_v36  ;;  %4181 = vmatmul.bf16.gmra.mxu2 %v16148_v36 }
 0x669   : > { %v3790_v2 = vpop.f32.mrf.mxu3 }
 0x66a   : > { %v16701_v26 = vpack.c.bf16 %v3790_v2, %v3788_v61 }
 0x66b   : > { %v3679_v31 = vpop.f32.mrf.mxu1  ;;  %v3744_v35 = vpop.f32.mrf.mxu2 }
 0x66d   : > { %v3632_v7 = vpop.f32.mrf.mxu0 }
 0x66e   : > { %v16703_v44 = vpack.c.bf16 %v3632_v7, %v3630_v3  ;;  %4132 = vmatmul.bf16.gmra.mxu1 %v16155_v55  ;;  %4230 = vmatmul.bf16.gmra.mxu3 %v16155_v55 }
 0x671   : > { %v3793_v59 = vpop.f32.mrf.mxu3 }
 0x673   : > { %v3681_v14 = vpop.f32.mrf.mxu1  ;;  %v3746_v41 = vpop.f32.mrf.mxu2 }
 0x674   : > { %v16707_v10 = vpack.c.bf16 %v3681_v14, %v3679_v31  ;;  %v16709_v13 = vpack.c.bf16 %v3746_v41, %v3744_v35 }
 0x675   : > { %v4049_v36 = vpop.f32.mrf.mxu0 }
 0x678   : > { %4404 = vmatmul.bf16.vlgmr.msra.gmra.mxu0 %v16427_v29  ;;  %4502 = vmatmul.bf16.vlgmr.msra.gmra.mxu2 %v16427_v29 }
 0x679   : > { %v3795_v18 = vpop.f32.mrf.mxu3 }
 0x67a   : > { %v16713_v49 = vpack.c.bf16 %v3795_v18, %v3793_v59 }
 0x67b   : > { %v4098_v20 = vpop.f32.mrf.mxu1  ;;  %v4147_v43 = vpop.f32.mrf.mxu2 }
 0x67c   : > { %v16715_v0 = vadd.f32 %v4098_v20, %v4049_v36 }
 0x67d   : > { %v4051_v55 = vpop.f32.mrf.mxu0 }
 0x67e   : > { %4453 = vmatmul.bf16.vlgmr.msra.gmra.mxu1 %v16431_v17  ;;  %4551 = vmatmul.bf16.vlgmr.msra.gmra.mxu3 %v16431_v17 }
 0x681   : > { %v4196_v40 = vpop.f32.mrf.mxu3 }
 0x682   : > { %v16719_v50 = vadd.f32 %v4196_v40, %v4147_v43 }
 0x683   : > { %v4100_v37 = vpop.f32.mrf.mxu1  ;;  %v4149_v62 = vpop.f32.mrf.mxu2 }
 0x684   : > { %v16721_v1 = vadd.f32 %v4100_v37, %v4051_v55 }
 0x685   : > { %v4054_v29 = vpop.f32.mrf.mxu0 }
 0x688   : > { %4409 = vmatmul.bf16.gmra.mxu0 %v16439_v9  ;;  %4507 = vmatmul.bf16.gmra.mxu2 %v16439_v9 }
 0x689   : > { %v4198_v28 = vpop.f32.mrf.mxu3 }
 0x68a   : > { %v16725_v16 = vadd.f32 %v4198_v28, %v4149_v62  ;;  %v11509_v28 = vld [vmem:[%s20718_s3 + $0x870] sm:$0xf] }
 0x68b   : > { %v4103_v4 = vpop.f32.mrf.mxu1  ;;  %v4152_v30 = vpop.f32.mrf.mxu2 }
 0x68c   : > { %v16727_v52 = vadd.f32 %v4103_v4, %v4054_v29  ;;  %v13377_v4 = vld [vmem:[%s20718_s3 + $0x874] sm:$0xf0] }
 0x68d   : > { %v4056_v17 = vpop.f32.mrf.mxu0 }
 0x68e   : > { %4458 = vmatmul.bf16.gmra.mxu1 %v16443_v6  ;;  %4556 = vmatmul.bf16.gmra.mxu3 %v16443_v6 }
 0x691   : > { %v4201_v27 = vpop.f32.mrf.mxu3 }
 0x692   : > { %v16731_v47 = vadd.f32 %v4201_v27, %v4152_v30  ;;  %v11510_v30 = vor.u32 %v13377_v4, %v11509_v28  ;;  %v13372_v28 = vld [vmem:[%s20718_s3 + $0x854] sm:$0xf] }
 0x693   : > { %v4105_v23 = vpop.f32.mrf.mxu1  ;;  %v4154_v11 = vpop.f32.mrf.mxu2 }
 0x694   : > { %v16733_v12 = vadd.f32 %v4105_v23, %v4056_v17  ;;  %v11511_v17 = vld [vmem:[%s20718_s3 + $0x878] sm:$0xf0]  ;;  %4785 = vmatpush.bf16.msrb.mxu0 %v11510_v30  ;;  %v11565_v30 = vld [vmem:[%s20718_s3 + $0x8e0] sm:$0xf] }
 0x695   : > { %v4059_v9 = vpop.f32.mrf.mxu0 }
 0x698   : > { %4414 = vmatmul.bf16.gmra.mxu0 %v16451_v34  ;;  %4512 = vmatmul.bf16.gmra.mxu2 %v16451_v34 }
 0x699   : > { %v4203_v61 = vpop.f32.mrf.mxu3 }
 0x69a   : > { %v16737_v54 = vadd.f32 %v4203_v61, %v4154_v11  ;;  %v13375_v61 = vld [vmem:[%s20718_s3 + $0x864] sm:$0xf0] }
 0x69b   : > { %v4108_v60 = vpop.f32.mrf.mxu1  ;;  %v4157_v3 = vpop.f32.mrf.mxu2 }
 0x69c   : > { %v16739_v2 = vadd.f32 %v4108_v60, %v4059_v9  ;;  %v11501_v9 = vld [vmem:[%s20718_s3 + $0x860] sm:$0xf]  ;;  %v13374_v60 = vld [vmem:[%s20718_s3 + $0x864] sm:$0xf] }
 0x69d   : > { %v4061_v6 = vpop.f32.mrf.mxu0 }
 0x69e   : > { %4463 = vmatmul.bf16.gmra.mxu1 %v16455_v8  ;;  %4561 = vmatmul.bf16.gmra.mxu3 %v16455_v8 }
 0x6a1   : > { %v4206_v31 = vpop.f32.mrf.mxu3 }
 0x6a2   : > { %v16743_v35 = vadd.f32 %v4206_v31, %v4157_v3  ;;  %v11503_v31 = vld [vmem:[%s20718_s3 + $0x868] sm:$0xf0] }
 0x6a3   : > { %v4110_v7 = vpop.f32.mrf.mxu1  ;;  %v4159_v59 = vpop.f32.mrf.mxu2 }
 0x6a4   : > { %v16745_v14 = vadd.f32 %v4110_v7, %v4061_v6  ;;  %v11502_v6 = vor.u32 %v13375_v61, %v11501_v9  ;;  %v11567_v61 = vld [vmem:[%s20718_s3 + $0x8e8] sm:$0xf0] }
 0x6a5   : > { %v4064_v34 = vpop.f32.mrf.mxu0 }
 0x6a6   : > { %4786 = vmatpush.bf16.msrb.mxu0 %v11502_v6  ;;  %v11485_v6 = vld [vmem:[%s20718_s3 + $0x840] sm:$0xf] }
 0x6a8   : > { %4419 = vmatmul.bf16.gmra.mxu0 %v16463_v19  ;;  %4517 = vmatmul.bf16.gmra.mxu2 %v16463_v19 }
 0x6a9   : > { %v4208_v41 = vpop.f32.mrf.mxu3 }
 0x6aa   : > { %v16749_v36 = vadd.f32 %v4208_v41, %v4159_v59  ;;  %v11506_v59 = vor.u32 %v13374_v60, %v11503_v31  ;;  %v13393_v41 = vld [vmem:[%s20718_s3 + $0x8f4] sm:$0xf0]  ;;  %v13371_v31 = vld [vmem:[%s20718_s3 + $0x844] sm:$0xf0] }
 0x6ab   : > { %v4113_v18 = vpop.f32.mrf.mxu1  ;;  %v4162_v20 = vpop.f32.mrf.mxu2 }
 0x6ac   : > { %v16751_v43 = vadd.f32 %v4113_v18, %v4064_v34  ;;  %v11573_v34 = vld [vmem:[%s20718_s3 + $0x8f0] sm:$0xf]  ;;  %v13392_v18 = vld [vmem:[%s20718_s3 + $0x8f4] sm:$0xf] }
 0x6ad   : > { %v4066_v8 = vpop.f32.mrf.mxu0 }
 0x6ae   : > { %4468 = vmatmul.bf16.gmra.mxu1 %v16467_v56  ;;  %4566 = vmatmul.bf16.gmra.mxu3 %v16467_v56  ;;  %v13376_v56 = vld [vmem:[%s20718_s3 + $0x874] sm:$0xf] }
 0x6af   : > { %v11514_v27 = vor.u32 %v13376_v56, %v11511_v17  ;;  %v13391_v17 = vld [vmem:[%s20718_s3 + $0x8e4] sm:$0xf0] }
 0x6b0   : > { %v11566_v9 = vor.u32 %v13391_v17, %v11565_v30  ;;  %v13369_v30 = vld [vmem:[%s20718_s3 + $0x834] sm:$0xf0]  ;;  %v13368_v17 = vld [vmem:[%s20718_s3 + $0x834] sm:$0xf] }
 0x6b1   : > { %v4211_v55 = vpop.f32.mrf.mxu3  ;;  %4883 = vmatpush.bf16.msrb.mxu2 %v11514_v27  ;;  %v13390_v27 = vld [vmem:[%s20718_s3 + $0x8e4] sm:$0xf] }
 0x6b2   : > { %v16755_v40 = vadd.f32 %v4211_v55, %v4162_v20  ;;  %v11575_v55 = vld [vmem:[%s20718_s3 + $0x8f8] sm:$0xf0] }
 0x6b3   : > { %v4115_v37 = vpop.f32.mrf.mxu1  ;;  %v4164_v62 = vpop.f32.mrf.mxu2 }
 0x6b4   : > { %v16757_v29 = vadd.f32 %v4115_v37, %v4066_v8  ;;  %v11574_v8 = vor.u32 %v13393_v41, %v11573_v34  ;;  %v11578_v37 = vor.u32 %v13392_v18, %v11575_v55  ;;  %v11486_v18 = vor.u32 %v13371_v31, %v11485_v6  ;;  %v13386_v6 = vld [vmem:[%s20718_s3 + $0x8c4] sm:$0xf] }
 0x6b5   : > { %v4069_v19 = vpop.f32.mrf.mxu0  ;;  %4884 = vmatpush.bf16.msrb.mxu2 %v11506_v59  ;;  %v13370_v59 = vld [vmem:[%s20718_s3 + $0x844] sm:$0xf] }
 0x6b6   : > { %4834 = vmatpush.bf16.msrb.mxu1 %v11574_v8  ;;  %4932 = vmatpush.bf16.msrb.mxu3 %v11578_v37  ;;  %v11557_v37 = vld [vmem:[%s20718_s3 + $0x8d0] sm:$0xf] }
 0x6b8   : > { %4424 = vmatmul.bf16.gmra.mxu0 %v16511_v58  ;;  %4522 = vmatmul.bf16.gmra.mxu2 %v16511_v58 }
 0x6b9   : > { %v4213_v23 = vpop.f32.mrf.mxu3 }
 0x6ba   : > { %v16773_v11 = vadd.f32 %v4213_v23, %v4164_v62  ;;  %v11493_v62 = vld [vmem:[%s20718_s3 + $0x850] sm:$0xf]  ;;  %4835 = vmatpush.bf16.msrb.mxu1 %v11566_v9 }
 0x6bb   : > { %v4118_v3 = vpop.f32.mrf.mxu1  ;;  %v4167_v58 = vpop.f32.mrf.mxu2 }
 0x6bc   : > { %v16787_v7 = vadd.f32 %v4118_v3, %v4069_v19  ;;  %v13373_v19 = vld [vmem:[%s20718_s3 + $0x854] sm:$0xf0]  ;;  %v11570_v3 = vor.u32 %v13390_v27, %v11567_v61  ;;  %v11549_v61 = vld [vmem:[%s20718_s3 + $0x8c0] sm:$0xf] }
 0x6bd   : > { %v4071_v20 = vpop.f32.mrf.mxu0  ;;  %v11494_v4 = vor.u32 %v13373_v19, %v11493_v62  ;;  %v13389_v62 = vld [vmem:[%s20718_s3 + $0x8d4] sm:$0xf0]  ;;  %v13388_v19 = vld [vmem:[%s20718_s3 + $0x8d4] sm:$0xf] }
 0x6be   : > { %4473 = vmatmul.bf16.gmra.mxu1 %v16551_v22  ;;  %4571 = vmatmul.bf16.gmra.mxu3 %v16551_v22  ;;  %v11495_v22 = vld [vmem:[%s20718_s3 + $0x858] sm:$0xf0] }
 0x6bf   : > { %v11498_v56 = vor.u32 %v13372_v28, %v11495_v22  ;;  %4787 = vmatpush.bf16.msrb.mxu0 %v11494_v4  ;;  %4933 = vmatpush.bf16.msrb.mxu3 %v11570_v3  ;;  %v11558_v4 = vor.u32 %v13389_v62, %v11557_v37  ;;  %v13387_v3 = vld [vmem:[%s20718_s3 + $0x8c4] sm:$0xf0]  ;;  %v13366_v37 = vld [vmem:[%s20718_s3 + $0x824] sm:$0xf] }
 0x6c1   : > { %v4216_v23 = vpop.f32.mrf.mxu3  ;;  %4885 = vmatpush.bf16.msrb.mxu2 %v11498_v56  ;;  %v11477_v56 = vld [vmem:[%s20718_s3 + $0x830] sm:$0xf]  ;;  %4836 = vmatpush.bf16.msrb.mxu1 %v11558_v4 }
 0x6c2   : > { %v16827_v60 = vadd.f32 %v4216_v23, %v4167_v58  ;;  %v11487_v58 = vld [vmem:[%s20718_s3 + $0x848] sm:$0xf0]  ;;  %v11478_v27 = vor.u32 %v13369_v30, %v11477_v56  ;;  %v11479_v23 = vld [vmem:[%s20718_s3 + $0x838] sm:$0xf0]  ;;  %v11541_v56 = vld [vmem:[%s20718_s3 + $0x8b0] sm:$0xf] }
 0x6c3   : > { %v4120_v34 = vpop.f32.mrf.mxu1  ;;  %v4169_v41 = vpop.f32.mrf.mxu2  ;;  %v11490_v55 = vor.u32 %v13370_v59, %v11487_v58  ;;  %4788 = vmatpush.bf16.msrb.mxu0 %v11486_v18  ;;  %v11482_v9 = vor.u32 %v13368_v17, %v11479_v23  ;;  %v11550_v59 = vor.u32 %v13387_v3, %v11549_v61  ;;  %v11469_v58 = vld [vmem:[%s20718_s3 + $0x820] sm:$0xf]  ;;  %v13385_v30 = vld [vmem:[%s20718_s3 + $0x8b4] sm:$0xf0]  ;;  %v13384_v17 = vld [vmem:[%s20718_s3 + $0x8b4] sm:$0xf] }
 0x6c4   : > { %v16841_v8 = vadd.f32 %v4120_v34, %v4071_v20  ;;  %v11559_v20 = vld [vmem:[%s20718_s3 + $0x8d8] sm:$0xf0]  ;;  %v11542_v23 = vor.u32 %v13385_v30, %v11541_v56  ;;  %v11461_v61 = vld [vmem:[%s20718_s3 + $0x810] sm:$0xf]  ;;  %v13365_v3 = vld [vmem:[%s20718_s3 + $0x814] sm:$0xf0] }
 0x6c5   : > { %v4074_v28 = vpop.f32.mrf.mxu0  ;;  %v11562_v22 = vor.u32 %v13388_v19, %v11559_v20  ;;  %4886 = vmatpush.bf16.msrb.mxu2 %v11490_v55  ;;  %v13367_v55 = vld [vmem:[%s20718_s3 + $0x824] sm:$0xf0]  ;;  %4837 = vmatpush.bf16.msrb.mxu1 %v11550_v59  ;;  %v13362_v30 = vld [vmem:[%s20718_s3 + $0x804] sm:$0xf] }
 0x6c6   : > { %v11470_v4 = vor.u32 %v13367_v55, %v11469_v58  ;;  %v13382_v58 = vld [vmem:[%s20718_s3 + $0x8a4] sm:$0xf]  ;;  %v13363_v56 = vld [vmem:[%s20718_s3 + $0x804] sm:$0xf0] }
 0x6c7   : > { %4934 = vmatpush.bf16.msrb.mxu3 %v11562_v22  ;;  %4789 = vmatpush.bf16.msrb.mxu0 %v11478_v27 }
 0x6c8   : > { %4429 = vmatmul.bf16.gmra.mxu0 %v16619_v39  ;;  %4527 = vmatmul.bf16.gmra.mxu2 %v16619_v39  ;;  %v11551_v39 = vld [vmem:[%s20718_s3 + $0x8c8] sm:$0xf0] }
 0x6c9   : > { %v4218_v31 = vpop.f32.mrf.mxu3  ;;  %v11554_v18 = vor.u32 %v13386_v6, %v11551_v39  ;;  %4887 = vmatpush.bf16.msrb.mxu2 %v11482_v9  ;;  %v13364_v6 = vld [vmem:[%s20718_s3 + $0x814] sm:$0xf]  ;;  %4838 = vmatpush.bf16.msrb.mxu1 %v11542_v23  ;;  %v11533_v39 = vld [vmem:[%s20718_s3 + $0x8a0] sm:$0xf] }
 0x6ca   : > { %v16881_v34 = vadd.f32 %v4218_v31, %v4169_v41  ;;  %v11471_v41 = vld [vmem:[%s20718_s3 + $0x828] sm:$0xf0]  ;;  %v11462_v31 = vor.u32 %v13365_v3, %v11461_v61  ;;  %v11525_v3 = vld [vmem:[%s20718_s3 + $0x890] sm:$0xf] }
 0x6cb   : > { %v4123_v62 = vpop.f32.mrf.mxu1  ;;  %v4172_v19 = vpop.f32.mrf.mxu2  ;;  %v11474_v22 = vor.u32 %v13366_v37, %v11471_v41  ;;  %4935 = vmatpush.bf16.msrb.mxu3 %v11554_v18  ;;  %4790 = vmatpush.bf16.msrb.mxu0 %v11470_v4  ;;  %v13383_v18 = vld [vmem:[%s20718_s3 + $0x8a4] sm:$0xf0] }
 0x6cc   : > { %v16895_v20 = vadd.f32 %v4123_v62, %v4074_v28  ;;  %v11543_v28 = vld [vmem:[%s20718_s3 + $0x8b8] sm:$0xf0]  ;;  %v11534_v37 = vor.u32 %v13383_v18, %v11533_v39  ;;  %v11535_v62 = vld [vmem:[%s20718_s3 + $0x8a8] sm:$0xf0]  ;;  %v11517_v18 = vld [vmem:[%s20718_s3 + $0x880] sm:$0xf] }
 0x6cd   : > { %v4076_v27 = vpop.f32.mrf.mxu0  ;;  %v11546_v9 = vor.u32 %v13384_v17, %v11543_v28  ;;  %4888 = vmatpush.bf16.msrb.mxu2 %v11474_v22  ;;  %v11538_v41 = vor.u32 %v13382_v58, %v11535_v62  ;;  %v11453_v22 = vld [vmem:[%s20718_s3 + $0x800] sm:$0xf]  ;;  %v13379_v58 = vld [vmem:[%s20718_s3 + $0x884] sm:$0xf0] }
 0x6ce   : > { %4478 = vmatmul.bf16.gmra.mxu1 %v16659_v46  ;;  %4576 = vmatmul.bf16.gmra.mxu3 %v16659_v46  ;;  %v11463_v46 = vld [vmem:[%s20718_s3 + $0x818] sm:$0xf0]  ;;  %v11454_v28 = vor.u32 %v13363_v56, %v11453_v22  ;;  %v11518_v62 = vor.u32 %v13379_v58, %v11517_v18 }
 0x6cf   : > { %v11466_v59 = vor.u32 %v13364_v6, %v11463_v46  ;;  %4936 = vmatpush.bf16.msrb.mxu3 %v11546_v9  ;;  %4791 = vmatpush.bf16.msrb.mxu0 %v11462_v31  ;;  %v13381_v6 = vld [vmem:[%s20718_s3 + $0x894] sm:$0xf0]  ;;  %v13380_v31 = vld [vmem:[%s20718_s3 + $0x894] sm:$0xf] }
 0x6d0   : > { %4839 = vmatpush.bf16.msrb.mxu1 %v11534_v37 }
 0x6d1   : > { %v4221_v55 = vpop.f32.mrf.mxu3  ;;  %4889 = vmatpush.bf16.msrb.mxu2 %v11466_v59  ;;  %v11526_v59 = vor.u32 %v13381_v6, %v11525_v3 }
 0x6d2   : > { %v16935_v4 = vadd.f32 %v4221_v55, %v4172_v19  ;;  %v11455_v19 = vld [vmem:[%s20718_s3 + $0x808] sm:$0xf0]  ;;  %v13378_v55 = vld [vmem:[%s20718_s3 + $0x884] sm:$0xf] }
 0x6d3   : > { %v4125_v17 = vpop.f32.mrf.mxu1  ;;  %v4174_v23 = vpop.f32.mrf.mxu2  ;;  %v11458_v61 = vor.u32 %v13362_v30, %v11455_v19  ;;  %4937 = vmatpush.bf16.msrb.mxu3 %v11538_v41  ;;  %4792 = vmatpush.bf16.msrb.mxu0 %v11454_v28  ;;  %v11519_v41 = vld [vmem:[%s20718_s3 + $0x888] sm:$0xf0] }
 0x6d4   : > { %v16949_v9 = vadd.f32 %v4125_v17, %v4076_v27  ;;  %v11527_v27 = vld [vmem:[%s20718_s3 + $0x898] sm:$0xf0]  ;;  %4840 = vmatpush.bf16.msrb.mxu1 %v11526_v59  ;;  %v11522_v22 = vor.u32 %v13378_v55, %v11519_v41 }
 0x6d5   : > { %v4079_v46 = vpop.f32.mrf.mxu0  ;;  %v11530_v39 = vor.u32 %v13380_v31, %v11527_v27  ;;  %4890 = vmatpush.bf16.msrb.mxu2 %v11458_v61 }
 0x6d7   : > { %4938 = vmatpush.bf16.msrb.mxu3 %v11530_v39 }
 0x6d8   : > { %4434 = vmatmul.bf16.gmra.mxu0 %v16691_v32  ;;  %4532 = vmatmul.bf16.gmra.mxu2 %v16691_v32 }
 0x6d9   : > { %v4223_v37 = vpop.f32.mrf.mxu3  ;;  %4841 = vmatpush.bf16.msrb.mxu1 %v11518_v62 }
 0x6da   : > { %v16977_v32 = vadd.f32 %v4223_v37, %v4174_v23 }
 0x6db   : > { %v4128_v56 = vpop.f32.mrf.mxu1  ;;  %v4177_v30 = vpop.f32.mrf.mxu2  ;;  %4939 = vmatpush.bf16.msrb.mxu3 %v11522_v22 }
 0x6dc   : > { %v16979_v17 = vadd.f32 %v4128_v56, %v4079_v46 }
 0x6dd   : > { %v4081_v28 = vpop.f32.mrf.mxu0 }
 0x6de   : > { %4483 = vmatmul.bf16.gmra.mxu1 %v16695_v42  ;;  %4581 = vmatmul.bf16.gmra.mxu3 %v16695_v42 }
 0x6e1   : > { %v4226_v19 = vpop.f32.mrf.mxu3 }
 0x6e2   : > { %v16983_v61 = vadd.f32 %v4226_v19, %v4177_v30 }
 0x6e3   : > { %v4130_v3 = vpop.f32.mrf.mxu1  ;;  %v4179_v6 = vpop.f32.mrf.mxu2 }
 0x6e4   : > { %v16985_v31 = vadd.f32 %v4130_v3, %v4081_v28 }
 0x6e5   : > { %v4084_v23 = vpop.f32.mrf.mxu0 }
 0x6e8   : > { %4439 = vmatmul.bf16.gmra.mxu0 %v16703_v44  ;;  %4537 = vmatmul.bf16.gmra.mxu2 %v16703_v44 }
 0x6e9   : > { %v4228_v46 = vpop.f32.mrf.mxu3 }
 0x6ea   : > { %v16989_v59 = vadd.f32 %v4228_v46, %v4179_v6 }
 0x6eb   : > { %v4133_v27 = vpop.f32.mrf.mxu1  ;;  %v4182_v39 = vpop.f32.mrf.mxu2 }
 0x6ec   : > { %v16991_v18 = vadd.f32 %v4133_v27, %v4084_v23 }
 0x6ed   : > { %v4086_v42 = vpop.f32.mrf.mxu0 }
 0x6ee   : > { %4488 = vmatmul.bf16.gmra.mxu1 %v16707_v10  ;;  %4586 = vmatmul.bf16.gmra.mxu3 %v16707_v10 }
 0x6f1   : > { %v4231_v58 = vpop.f32.mrf.mxu3 }
 0x6f2   : > { %v16995_v55 = vadd.f32 %v4231_v58, %v4182_v39 }
 0x6f3   : > { %v4135_v37 = vpop.f32.mrf.mxu1  ;;  %v4184_v62 = vpop.f32.mrf.mxu2 }
 0x6f4   : > { %v16997_v41 = vadd.f32 %v4135_v37, %v4086_v42 }
 0x6f5   : > { %v4405_v44 = vpop.f32.mrf.mxu0 }
 0x6f6   : > { %v4406_v22 = vadd.f32 %v4405_v44, %v16715_v0 }
 0x6f8   : > { %4793 = vmatmul.bf16.vlgmr.msrb.gmra.mxu0 %v16433_v21  ;;  %4891 = vmatmul.bf16.vlgmr.msrb.gmra.mxu2 %v16433_v21 }
 0x6f9   : > { %v4233_v56 = vpop.f32.mrf.mxu3 }
 0x6fa   : > { %v17002_v30 = vadd.f32 %v4233_v56, %v4184_v62 }
 0x6fb   : > { %v4454_v28 = vpop.f32.mrf.mxu1  ;;  %v4503_v19 = vpop.f32.mrf.mxu2 }
 0x6fc   : > { %20776 = vst [vmem:[#allocation3_spill] sm:$0xff] %v17002_v30  ;;  %v17004_v10 = vadd.f32 %v4454_v28, %v4406_v22  ;;  %v4504_v3 = vadd.f32 %v4503_v19, %v16719_v50 }
 0x6fd   : > { %v4407_v6 = vpop.f32.mrf.mxu0 }
 0x6fe   : > { %v4408_v23 = vadd.f32 %v4407_v6, %v16721_v1  ;;  %4842 = vmatmul.bf16.vlgmr.msrb.gmra.mxu1 %v16437_v63  ;;  %4940 = vmatmul.bf16.vlgmr.msrb.gmra.mxu3 %v16437_v63 }
 0x701   : > { %v4552_v0 = vpop.f32.mrf.mxu3 }
 0x702   : > { %v17010_v46 = vadd.f32 %v4552_v0, %v4504_v3 }
 0x703   : > { %v4456_v21 = vpop.f32.mrf.mxu1  ;;  %v4505_v27 = vpop.f32.mrf.mxu2 }
 0x704   : > { %v17012_v39 = vadd.f32 %v4456_v21, %v4408_v23  ;;  %v4506_v42 = vadd.f32 %v4505_v27, %v16725_v16 }
 0x705   : > { %v4410_v58 = vpop.f32.mrf.mxu0 }
 0x706   : > { %v4411_v37 = vadd.f32 %v4410_v58, %v16727_v52 }
 0x708   : > { %4798 = vmatmul.bf16.gmra.mxu0 %v16445_v45  ;;  %4896 = vmatmul.bf16.gmra.mxu2 %v16445_v45 }
 0x709   : > { %v4554_v50 = vpop.f32.mrf.mxu3 }
 0x70a   : > { %v17018_v1 = vadd.f32 %v4554_v50, %v4506_v42 }
 0x70b   : > { %v4459_v63 = vpop.f32.mrf.mxu1  ;;  %v4508_v62 = vpop.f32.mrf.mxu2 }
 0x70c   : > { %v17020_v44 = vadd.f32 %v4459_v63, %v4411_v37  ;;  %v4509_v22 = vadd.f32 %v4508_v62, %v16731_v47 }
 0x70d   : > { %v4412_v56 = vpop.f32.mrf.mxu0 }
 0x70e   : > { %v4413_v28 = vadd.f32 %v4412_v56, %v16733_v12  ;;  %4847 = vmatmul.bf16.gmra.mxu1 %v16449_v48  ;;  %4945 = vmatmul.bf16.gmra.mxu3 %v16449_v48 }
 0x711   : > { %v4557_v16 = vpop.f32.mrf.mxu3 }
 0x712   : > { %v17026_v52 = vadd.f32 %v4557_v16, %v4509_v22 }
 0x713   : > { %v4461_v45 = vpop.f32.mrf.mxu1  ;;  %v4510_v19 = vpop.f32.mrf.mxu2 }
 0x714   : > { %v17028_v3 = vadd.f32 %v4461_v45, %v4413_v28  ;;  %v4511_v6 = vadd.f32 %v4510_v19, %v16737_v54 }
 0x715   : > { %v4415_v23 = vpop.f32.mrf.mxu0 }
 0x716   : > { %v4416_v0 = vadd.f32 %v4415_v23, %v16739_v2 }
 0x718   : > { %4803 = vmatmul.bf16.gmra.mxu0 %v16457_v24  ;;  %4901 = vmatmul.bf16.gmra.mxu2 %v16457_v24 }
 0x719   : > { %v4559_v47 = vpop.f32.mrf.mxu3 }
 0x71a   : > { %v17034_v12 = vadd.f32 %v4559_v47, %v4511_v6 }
 0x71b   : > { %v4464_v48 = vpop.f32.mrf.mxu1  ;;  %v4513_v21 = vpop.f32.mrf.mxu2 }
 0x71c   : > { %v17036_v27 = vadd.f32 %v4464_v48, %v4416_v0  ;;  %v4514_v42 = vadd.f32 %v4513_v21, %v16743_v35 }
 0x71d   : > { %v4417_v58 = vpop.f32.mrf.mxu0 }
 0x71e   : > { %v4418_v37 = vadd.f32 %v4417_v58, %v16745_v14  ;;  %4852 = vmatmul.bf16.gmra.mxu1 %v16461_v38  ;;  %4950 = vmatmul.bf16.gmra.mxu3 %v16461_v38 }
 0x721   : > { %v4562_v54 = vpop.f32.mrf.mxu3 }
 0x722   : > { %v17042_v2 = vadd.f32 %v4562_v54, %v4514_v42 }
 0x723   : > { %v4466_v24 = vpop.f32.mrf.mxu1  ;;  %v4515_v50 = vpop.f32.mrf.mxu2 }
 0x724   : > { %v17044_v63 = vadd.f32 %v4466_v24, %v4418_v37  ;;  %v4516_v62 = vadd.f32 %v4515_v50, %v16749_v36 }
 0x725   : > { %v4420_v22 = vpop.f32.mrf.mxu0 }
 0x726   : > { %v4421_v56 = vadd.f32 %v4420_v22, %v16751_v43 }
 0x728   : > { %4808 = vmatmul.bf16.gmra.mxu0 %v16469_v15  ;;  %4906 = vmatmul.bf16.gmra.mxu2 %v16469_v15 }
 0x729   : > { %v4564_v35 = vpop.f32.mrf.mxu3 }
 0x72a   : > { %v17050_v14 = vadd.f32 %v4564_v35, %v4516_v62 }
 0x72b   : > { %v4469_v38 = vpop.f32.mrf.mxu1  ;;  %v4518_v28 = vpop.f32.mrf.mxu2 }
 0x72c   : > { %v17052_v16 = vadd.f32 %v4469_v38, %v4421_v56  ;;  %v4519_v45 = vadd.f32 %v4518_v28, %v16755_v40 }
 0x72d   : > { %v4422_v19 = vpop.f32.mrf.mxu0 }
 0x72e   : > { %v4423_v6 = vadd.f32 %v4422_v19, %v16757_v29  ;;  %4857 = vmatmul.bf16.gmra.mxu1 %v16485_v25  ;;  %4955 = vmatmul.bf16.gmra.mxu3 %v16485_v25 }
 0x731   : > { %v4567_v36 = vpop.f32.mrf.mxu3 }
 0x732   : > { %v17058_v43 = vadd.f32 %v4567_v36, %v4519_v45 }
 0x733   : > { %v4471_v15 = vpop.f32.mrf.mxu1  ;;  %v4520_v23 = vpop.f32.mrf.mxu2 }
 0x734   : > { %v17060_v0 = vadd.f32 %v4471_v15, %v4423_v6  ;;  %v4521_v47 = vadd.f32 %v4520_v23, %v16773_v11 }
 0x735   : > { %v4425_v48 = vpop.f32.mrf.mxu0 }
 0x736   : > { %v4426_v21 = vadd.f32 %v4425_v48, %v16787_v7 }
 0x738   : > { %4813 = vmatmul.bf16.gmra.mxu0 %v16553_v33  ;;  %4911 = vmatmul.bf16.gmra.mxu2 %v16553_v33 }
 0x739   : > { %v4569_v40 = vpop.f32.mrf.mxu3 }
 0x73a   : > { %v17066_v29 = vadd.f32 %v4569_v40, %v4521_v47 }
 0x73b   : > { %v4474_v25 = vpop.f32.mrf.mxu1  ;;  %v4523_v42 = vpop.f32.mrf.mxu2 }
 0x73c   : > { %v17068_v58 = vadd.f32 %v4474_v25, %v4426_v21  ;;  %v4524_v37 = vadd.f32 %v4523_v42, %v16827_v60 }
 0x73d   : > { %v17071_v54 = vpop.f32.mrf.mxu0 }
 0x73e   : > { %4862 = vmatmul.bf16.gmra.mxu1 %v16593_v51  ;;  %4960 = vmatmul.bf16.gmra.mxu3 %v16593_v51 }
 0x741   : > { %v4572_v11 = vpop.f32.mrf.mxu3 }
 0x742   : > { %v17075_v7 = vadd.f32 %v4572_v11, %v4524_v37 }
 0x743   : > { %v17077_v24 = vpop.f32.mrf.mxu1  ;;  %v17079_v33 = vpop.f32.mrf.mxu2 }
 0x745   : > { %v4430_v50 = vpop.f32.mrf.mxu0 }
 0x746   : > { %v4431_v62 = vadd.f32 %v4430_v50, %v16895_v20 }
 0x748   : > { %4818 = vmatmul.bf16.gmra.mxu0 %v16661_v53  ;;  %4916 = vmatmul.bf16.gmra.mxu2 %v16661_v53 }
 0x749   : > { %v17084_v60 = vpop.f32.mrf.mxu3 }
 0x74b   : > { %v4479_v22 = vpop.f32.mrf.mxu1  ;;  %v4528_v56 = vpop.f32.mrf.mxu2 }
 0x74c   : > { %v17086_v35 = vadd.f32 %v4479_v22, %v4431_v62  ;;  %v4529_v51 = vadd.f32 %v4528_v56, %v16935_v4 }
 0x74d   : > { %v17089_v38 = vpop.f32.mrf.mxu0 }
 0x74e   : > { %4867 = vmatmul.bf16.gmra.mxu1 %v16689_v57  ;;  %4965 = vmatmul.bf16.gmra.mxu3 %v16689_v57 }
 0x751   : > { %v4577_v28 = vpop.f32.mrf.mxu3 }
 0x752   : > { %v17093_v20 = vadd.f32 %v4577_v28, %v4529_v51 }
 0x753   : > { %v17095_v45 = vpop.f32.mrf.mxu1  ;;  %v17097_v53 = vpop.f32.mrf.mxu2 }
 0x755   : > { %v4435_v19 = vpop.f32.mrf.mxu0 }
 0x756   : > { %v4436_v6 = vadd.f32 %v4435_v19, %v16979_v17 }
 0x758   : > { %4823 = vmatmul.bf16.gmra.mxu0 %v16697_v5  ;;  %4921 = vmatmul.bf16.gmra.mxu2 %v16697_v5 }
 0x759   : > { %v17102_v4 = vpop.f32.mrf.mxu3 }
 0x75b   : > { %v4484_v36 = vpop.f32.mrf.mxu1  ;;  %v4533_v15 = vpop.f32.mrf.mxu2 }
 0x75c   : > { %v17104_v23 = vadd.f32 %v4484_v36, %v4436_v6  ;;  %v4534_v57 = vadd.f32 %v4533_v15, %v16983_v61 }
 0x75d   : > { %v17107_v47 = vpop.f32.mrf.mxu0 }
 0x75e   : > { %4872 = vmatmul.bf16.gmra.mxu1 %v16701_v26  ;;  %4970 = vmatmul.bf16.gmra.mxu3 %v16701_v26 }
 0x761   : > { %v4582_v48 = vpop.f32.mrf.mxu3 }
 0x762   : > { %v17111_v17 = vadd.f32 %v4582_v48, %v4534_v57 }
 0x763   : > { %v17113_v21 = vpop.f32.mrf.mxu1  ;;  %v17115_v5 = vpop.f32.mrf.mxu2 }
 0x765   : > { %v4440_v40 = vpop.f32.mrf.mxu0 }
 0x766   : > { %v4441_v25 = vadd.f32 %v4440_v40, %v16991_v18 }
 0x768   : > { %4828 = vmatmul.bf16.gmra.mxu0 %v16709_v13  ;;  %4926 = vmatmul.bf16.gmra.mxu2 %v16709_v13 }
 0x769   : > { %v17120_v61 = vpop.f32.mrf.mxu3 }
 0x76b   : > { %v4489_v42 = vpop.f32.mrf.mxu1  ;;  %v4538_v37 = vpop.f32.mrf.mxu2 }
 0x76c   : > { %v17122_v11 = vadd.f32 %v4489_v42, %v4441_v25  ;;  %v4539_v26 = vadd.f32 %v4538_v37, %v16995_v55 }
 0x76d   : > { %v17125_v50 = vpop.f32.mrf.mxu0 }
 0x76e   : > { %4877 = vmatmul.bf16.gmra.mxu1 %v16713_v49  ;;  %4975 = vmatmul.bf16.gmra.mxu3 %v16713_v49  ;;  %v11579_v49 = vld [vmem:[%s20719_s4 + $0x4] sm:$0x3] }
 0x76f   : > { %v17141_v57 = vperm.slane %v11579_v49, 0 }
 0x771   : > { %v4587_v62 = vpop.f32.mrf.mxu3 }
 0x772   : > { %v17129_v18 = vadd.f32 %v4587_v62, %v4539_v26 }
 0x773   : > { %v17131_v22 = vpop.f32.mrf.mxu1  ;;  %v17133_v13 = vpop.f32.mrf.mxu2 }
 0x774   : > { %20777 = vst [vmem:[#allocation2_spill] sm:$0xff] %v17129_v18 }
 0x775   : > { %20778 = vst [vmem:[#allocation5_spill] sm:$0xff] %v17131_v22  ;;  %v4794_v56 = vpop.f32.mrf.mxu0 }
 0x776   : > { %20779 = vst [vmem:[#allocation4_spill] sm:$0xff] %v17133_v13 }
 0x779   : > { %v17135_v51 = vpop.f32.mrf.mxu3 }
 0x77a   : > { %20780 = vst [vmem:[#allocation6_spill] sm:$0xff] %v17135_v51 }
 0x77b   : > { %v4843_v28 = vpop.f32.mrf.mxu1  ;;  %v4892_v19 = vpop.f32.mrf.mxu2 }
 0x77c   : > { %v4844_v6 = vadd.f32 %v4843_v28, %v4794_v56  ;;  %v17146_v28 = vperm.slane %v11579_v49, 1 }
 0x77d   : > { %v4796_v55 = vpop.f32.mrf.mxu0 }
 0x77e   : > { %v4981_v36 = vadd.f32 %v4844_v6, %v17004_v10 }
 0x780   : > { %v5020_v62 = vadd.f32 %v17141_v57, %v4981_v36 }
 0x781   : > { %v4941_v15 = vpop.f32.mrf.mxu3 }
 0x782   : > { %v4942_v48 = vadd.f32 %v4941_v15, %v4892_v19  ;;  %v5052_v51 = vmax.f32 %v5020_v62, 0.0 }
 0x783   : > { %v4845_v40 = vpop.f32.mrf.mxu1  ;;  %v4894_v25 = vpop.f32.mrf.mxu2 }
 0x784   : > { %v4982_v42 = vadd.f32 %v4942_v48, %v17010_v46  ;;  %v4846_v37 = vadd.f32 %v4845_v40, %v4796_v55 }
 0x785   : > { %v4799_v26 = vpop.f32.mrf.mxu0 }
 0x786   : > { %v4983_v56 = vadd.f32 %v4846_v37, %v17012_v39  ;;  %v5021_v15 = vadd.f32 %v17146_v28, %v4982_v42 }
 0x788   : > { %v5022_v10 = vadd.f32 %v17141_v57, %v4983_v56  ;;  %v5053_v40 = vmax.f32 %v5021_v15, 0.0 }
 0x789   : > { %v4943_v6 = vpop.f32.mrf.mxu3 }
 0x78a   : > { %v5054_v18 = vmax.f32 %v5022_v10, 0.0  ;;  %v4944_v13 = vadd.f32 %v4943_v6, %v4894_v25 }
 0x78b   : > { %v4848_v30 = vpop.f32.mrf.mxu1  ;;  %v4897_v19 = vpop.f32.mrf.mxu2 }
 0x78c   : > { %v4984_v46 = vadd.f32 %v4944_v13, %v17018_v1  ;;  %v4849_v55 = vadd.f32 %v4848_v30, %v4799_v26  ;;  %v17151_v48 = vpack.c.bf16 %v5054_v18, %v5052_v51 }
 0x78d   : > { %v4801_v36 = vpop.f32.mrf.mxu0 }
 0x78e   : > { %v5023_v39 = vadd.f32 %v17146_v28, %v4984_v46  ;;  %v4985_v49 = vadd.f32 %v4849_v55, %v17020_v44 }
 0x790   : > { %v5055_v37 = vmax.f32 %v5023_v39, 0.0  ;;  %v5024_v30 = vadd.f32 %v17141_v57, %v4985_v49 }
 0x791   : > { %v4946_v56 = vpop.f32.mrf.mxu3 }
 0x792   : > { %v4947_v62 = vadd.f32 %v4946_v56, %v4897_v19  ;;  %v17155_v10 = vpack.c.bf16 %v5055_v37, %v5053_v40  ;;  %v5056_v44 = vmax.f32 %v5024_v30, 0.0 }
 0x793   : > { %v4850_v25 = vpop.f32.mrf.mxu1  ;;  %v4899_v6 = vpop.f32.mrf.mxu2 }
 0x794   : > { %v4986_v42 = vadd.f32 %v4947_v62, %v17026_v52  ;;  %v4851_v22 = vadd.f32 %v4850_v25, %v4801_v36 }
 0x795   : > { %v4804_v1 = vpop.f32.mrf.mxu0 }
 0x796   : > { %v4987_v18 = vadd.f32 %v4851_v22, %v17028_v3  ;;  %v5025_v55 = vadd.f32 %v17146_v28, %v4986_v42 }
 0x798   : > { %v5026_v13 = vadd.f32 %v17141_v57, %v4987_v18  ;;  %v5057_v22 = vmax.f32 %v5025_v55, 0.0 }
 0x799   : > { %v4948_v51 = vpop.f32.mrf.mxu3 }
 0x79a   : > { %v5058_v26 = vmax.f32 %v5026_v13, 0.0  ;;  %v4949_v15 = vadd.f32 %v4948_v51, %v4899_v6 }
 0x79b   : > { %v4853_v46 = vpop.f32.mrf.mxu1  ;;  %v4902_v19 = vpop.f32.mrf.mxu2 }
 0x79c   : > { %v4988_v39 = vadd.f32 %v4949_v15, %v17034_v12  ;;  %v4854_v40 = vadd.f32 %v4853_v46, %v4804_v1  ;;  %v17163_v52 = vpack.c.bf16 %v5058_v26, %v5056_v44 }
 0x79d   : > { %v4806_v36 = vpop.f32.mrf.mxu0 }
 0x79e   : > { %v5027_v49 = vadd.f32 %v17146_v28, %v4988_v39  ;;  %v4989_v3 = vadd.f32 %v4854_v40, %v17036_v27 }
 0x7a0   : > { %v5059_v37 = vmax.f32 %v5027_v49, 0.0  ;;  %v5028_v1 = vadd.f32 %v17141_v57, %v4989_v3 }
 0x7a1   : > { %v4951_v56 = vpop.f32.mrf.mxu3 }
 0x7a2   : > { %v4952_v62 = vadd.f32 %v4951_v56, %v4902_v19  ;;  %v17167_v25 = vpack.c.bf16 %v5059_v37, %v5057_v22  ;;  %v5060_v27 = vmax.f32 %v5028_v1, 0.0 }
 0x7a3   : > { %v4855_v6 = vpop.f32.mrf.mxu1  ;;  %v4904_v30 = vpop.f32.mrf.mxu2 }
 0x7a4   : > { %v4990_v42 = vadd.f32 %v4952_v62, %v17042_v2  ;;  %v4856_v18 = vadd.f32 %v4855_v6, %v4806_v36 }
 0x7a5   : > { %v4809_v12 = vpop.f32.mrf.mxu0 }
 0x7a6   : > { %v4991_v13 = vadd.f32 %v4856_v18, %v17044_v63  ;;  %v5029_v55 = vadd.f32 %v17146_v28, %v4990_v42 }
 0x7a8   : > { %v5030_v51 = vadd.f32 %v17141_v57, %v4991_v13  ;;  %v5061_v3 = vmax.f32 %v5029_v55, 0.0 }
 0x7a9   : > { %v4953_v44 = vpop.f32.mrf.mxu3 }
 0x7aa   : > { %v5062_v26 = vmax.f32 %v5030_v51, 0.0  ;;  %v4954_v15 = vadd.f32 %v4953_v44, %v4904_v30 }
 0x7ab   : > { %v4858_v46 = vpop.f32.mrf.mxu1  ;;  %v4907_v19 = vpop.f32.mrf.mxu2 }
 0x7ac   : > { %v4992_v39 = vadd.f32 %v4954_v15, %v17050_v14  ;;  %v4859_v40 = vadd.f32 %v4858_v46, %v4809_v12  ;;  %v17175_v2 = vpack.c.bf16 %v5062_v26, %v5060_v27 }
 0x7ad   : > { %v4811_v36 = vpop.f32.mrf.mxu0 }
 0x7ae   : > { %v5031_v49 = vadd.f32 %v17146_v28, %v4992_v39  ;;  %v4993_v63 = vadd.f32 %v4859_v40, %v17052_v16 }
 0x7b0   : > { %v5063_v22 = vmax.f32 %v5031_v49, 0.0  ;;  %v5032_v12 = vadd.f32 %v17141_v57, %v4993_v63 }
 0x7b1   : > { %v4956_v37 = vpop.f32.mrf.mxu3 }
 0x7b2   : > { %v4957_v56 = vadd.f32 %v4956_v37, %v4907_v19  ;;  %v17179_v62 = vpack.c.bf16 %v5063_v22, %v5061_v3  ;;  %v5064_v16 = vmax.f32 %v5032_v12, 0.0  ;;  %v4428_v3 = vadd.f32 %v17071_v54, %v16841_v8 }
 0x7b3   : > { %v4860_v6 = vpop.f32.mrf.mxu1  ;;  %v4909_v30 = vpop.f32.mrf.mxu2  ;;  %v4526_v12 = vadd.f32 %v17079_v33, %v16881_v34 }
 0x7b4   : > { %v4994_v42 = vadd.f32 %v4957_v56, %v17058_v43  ;;  %v4861_v18 = vadd.f32 %v4860_v6, %v4811_v36 }
 0x7b5   : > { %v4814_v14 = vpop.f32.mrf.mxu0  ;;  %v4575_v54 = vadd.f32 %v17084_v60, %v4526_v12  ;;  %v4433_v60 = vadd.f32 %v17089_v38, %v16949_v9 }
 0x7b6   : > { %v4995_v1 = vadd.f32 %v4861_v18, %v17060_v0  ;;  %v5033_v46 = vadd.f32 %v17146_v28, %v4994_v42 }
 0x7b8   : > { %v5034_v13 = vadd.f32 %v17141_v57, %v4995_v1  ;;  %v5065_v36 = vmax.f32 %v5033_v46, 0.0 }
 0x7b9   : > { %v4958_v51 = vpop.f32.mrf.mxu3 }
 0x7ba   : > { %v5066_v44 = vmax.f32 %v5034_v13, 0.0  ;;  %v4959_v27 = vadd.f32 %v4958_v51, %v4909_v30 }
 0x7bb   : > { %v4863_v26 = vpop.f32.mrf.mxu1  ;;  %v4912_v15 = vpop.f32.mrf.mxu2 }
 0x7bc   : > { %v4996_v19 = vadd.f32 %v4959_v27, %v17066_v29  ;;  %v4864_v55 = vadd.f32 %v4863_v26, %v4814_v14  ;;  %v17187_v43 = vpack.c.bf16 %v5066_v44, %v5064_v16  ;;  %v4477_v29 = vadd.f32 %v17077_v24, %v4428_v3 }
 0x7bd   : > { %v4816_v39 = vpop.f32.mrf.mxu0 }
 0x7be   : > { %v5035_v40 = vadd.f32 %v17146_v28, %v4996_v19  ;;  %v4997_v0 = vadd.f32 %v4864_v55, %v17068_v58 }
 0x7c0   : > { %v5067_v49 = vmax.f32 %v5035_v40, 0.0  ;;  %v5036_v14 = vadd.f32 %v17141_v57, %v4997_v0 }
 0x7c1   : > { %v4961_v63 = vpop.f32.mrf.mxu3 }
 0x7c2   : > { %v4962_v22 = vadd.f32 %v4961_v63, %v4912_v15  ;;  %v17193_v37 = vpack.c.bf16 %v5067_v49, %v5065_v36  ;;  %v5068_v13 = vmax.f32 %v5036_v14, 0.0  ;;  %v4482_v49 = vadd.f32 %v17095_v45, %v4433_v60 }
 0x7c3   : > { %v4865_v56 = vpop.f32.mrf.mxu1  ;;  %v4914_v6 = vpop.f32.mrf.mxu2 }
 0x7c4   : > { %v4998_v30 = vadd.f32 %v4962_v22, %v17075_v7  ;;  %v4866_v42 = vadd.f32 %v4865_v56, %v4816_v39 }
 0x7c5   : > { %v4819_v18 = vpop.f32.mrf.mxu0 }
 0x7c6   : > { %v4999_v58 = vadd.f32 %v4866_v42, %v4477_v29  ;;  %v5037_v7 = vadd.f32 %v17146_v28, %v4998_v30  ;;  %v4531_v29 = vadd.f32 %v17097_v53, %v16977_v32 }
 0x7c8   : > { %v5038_v1 = vadd.f32 %v17141_v57, %v4999_v58  ;;  %v5069_v34 = vmax.f32 %v5037_v7, 0.0  ;;  %v4580_v38 = vadd.f32 %v17102_v4, %v4531_v29  ;;  %v4438_v4 = vadd.f32 %v17107_v47, %v16985_v31 }
 0x7c9   : > { %v4963_v8 = vpop.f32.mrf.mxu3  ;;  %v4443_v29 = vadd.f32 %v17125_v50, %v16997_v41 }
 0x7ca   : > { %v5070_v51 = vmax.f32 %v5038_v1, 0.0  ;;  %v4964_v16 = vadd.f32 %v4963_v8, %v4914_v6  ;;  %v4487_v7 = vadd.f32 %v17113_v21, %v4438_v4 }
 0x7cb   : > { %v4868_v44 = vpop.f32.mrf.mxu1  ;;  %v4917_v24 = vpop.f32.mrf.mxu2 }
 0x7cc   : > { %v5000_v27 = vadd.f32 %v4964_v16, %v4575_v54  ;;  %v17203_v26 = vpack.c.bf16 %v5070_v51, %v5068_v13  ;;  %v4869_v19 = vadd.f32 %v4868_v44, %v4819_v18 }
 0x7cd   : > { %v4821_v15 = vpop.f32.mrf.mxu0 }
 0x7ce   : > { %v5039_v46 = vadd.f32 %v17146_v28, %v5000_v27  ;;  %v5001_v39 = vadd.f32 %v4869_v19, %v17086_v35 }
 0x7d0   : > { %v5071_v33 = vmax.f32 %v5039_v46, 0.0  ;;  %v5040_v56 = vadd.f32 %v17141_v57, %v5001_v39 }
 0x7d1   : > { %v4966_v55 = vpop.f32.mrf.mxu3 }
 0x7d2   : > { %v17209_v40 = vpack.c.bf16 %v5071_v33, %v5069_v34  ;;  %v4967_v63 = vadd.f32 %v4966_v55, %v4917_v24  ;;  %v5072_v42 = vmax.f32 %v5040_v56, 0.0  ;;  %v4536_v33 = vadd.f32 %v17115_v5, %v16989_v59 }
 0x7d3   : > { %v4870_v0 = vpop.f32.mrf.mxu1  ;;  %v4919_v36 = vpop.f32.mrf.mxu2 }
 0x7d4   : > { %v4871_v3 = vadd.f32 %v4870_v0, %v4821_v15  ;;  %v5002_v30 = vadd.f32 %v4967_v63, %v17093_v20  ;;  %v4585_v60 = vadd.f32 %v17120_v61, %v4536_v33  ;;  %v13788_v33 = vld [vmem:[%s20716_s1 + $0x8] sm:$0xff] }
 0x7d5   : > { %v4824_v22 = vpop.f32.mrf.mxu0 }
 0x7d6   : > { %v5003_v6 = vadd.f32 %v4871_v3, %v4482_v49  ;;  %v5041_v12 = vadd.f32 %v17146_v28, %v5002_v30 }
 0x7d8   : > { %v5042_v9 = vadd.f32 %v17141_v57, %v5003_v6  ;;  %v5073_v20 = vmax.f32 %v5041_v12, 0.0  ;;  %v20782_v12 = vld [vmem:[#allocation3_spill] sm:$0xff] }
 0x7d9   : > { %v4968_v35 = vpop.f32.mrf.mxu3 }
 0x7da   : > { %v5074_v18 = vmax.f32 %v5042_v9, 0.0  ;;  %v4969_v14 = vadd.f32 %v4968_v35, %v4919_v36 }
 0x7db   : > { %v4873_v45 = vpop.f32.mrf.mxu1  ;;  %v4922_v58 = vpop.f32.mrf.mxu2 }
 0x7dc   : > { %v5004_v1 = vadd.f32 %v4969_v14, %v4580_v38  ;;  %v17219_v8 = vpack.c.bf16 %v5074_v18, %v5072_v42  ;;  %v4874_v32 = vadd.f32 %v4873_v45, %v4824_v22  ;;  %v20781_v38 = vld [vmem:[#allocation5_spill] sm:$0xff] }
 0x7dd   : > { %v4826_v53 = vpop.f32.mrf.mxu0  ;;  %v4492_v42 = vadd.f32 %v20781_v38, %v4443_v29  ;;  %v11696_v29 = vld [vmem:[%s20718_s3 + $0xa68] sm:$0xf0]  ;;  %v13456_v38 = vld [vmem:[%s20718_s3 + $0xaf4] sm:$0xf] }
 0x7de   : > { %v5043_v54 = vadd.f32 %v17146_v28, %v5004_v1  ;;  %v5005_v16 = vadd.f32 %v4874_v32, %v17104_v23  ;;  %v20783_v1 = vld [vmem:[#allocation4_spill] sm:$0xff]  ;;  %v20784_v32 = vld [vmem:[#allocation2_spill] sm:$0xff] }
 0x7e0   : > { %v5075_v13 = vmax.f32 %v5043_v54, 0.0  ;;  %v5044_v19 = vadd.f32 %v17141_v57, %v5005_v16  ;;  %v4541_v54 = vadd.f32 %v20783_v1, %v20782_v12  ;;  %v13436_v12 = vld [vmem:[%s20718_s3 + $0xa54] sm:$0xf] }
 0x7e1   : > { %v4971_v51 = vpop.f32.mrf.mxu3 }
 0x7e2   : > { %v17225_v44 = vpack.c.bf16 %v5075_v13, %v5073_v20  ;;  %v4972_v27 = vadd.f32 %v4971_v51, %v4922_v58  ;;  %v5076_v39 = vmax.f32 %v5044_v19, 0.0  ;;  %v20785_v20 = vld [vmem:[#allocation6_spill] sm:$0xff] }
 0x7e3   : > { %v4875_v24 = vpop.f32.mrf.mxu1  ;;  %v4924_v46 = vpop.f32.mrf.mxu2  ;;  %v4590_v13 = vadd.f32 %v20785_v20, %v4541_v54  ;;  %v11688_v54 = vld [vmem:[%s20718_s3 + $0xa58] sm:$0xf0]  ;;  %v11760_v20 = vld [vmem:[%s20718_s3 + $0xae8] sm:$0xf0] }
 0x7e4   : > { %v4876_v15 = vadd.f32 %v4875_v24, %v4826_v53  ;;  %v5006_v55 = vadd.f32 %v4972_v27, %v17111_v17 }
 0x7e5   : > { %v4829_v47 = vpop.f32.mrf.mxu0 }
 0x7e6   : > { %v5007_v34 = vadd.f32 %v4876_v15, %v4487_v7  ;;  %v5045_v49 = vadd.f32 %v17146_v28, %v5006_v55  ;;  %v13789_v55 = vld [vmem:[%s20717_s2 + $0x8] sm:$0xff] }
 0x7e8   : > { %v5046_v31 = vadd.f32 %v17141_v57, %v5007_v34  ;;  %v5077_v17 = vmax.f32 %v5045_v49, 0.0  ;;  %v13787_v34 = vld [vmem:[%s20717_s2] sm:$0xff]  ;;  %v11704_v49 = vld [vmem:[%s20718_s3 + $0xa78] sm:$0xf0] }
 0x7e9   : > { %v4973_v23 = vpop.f32.mrf.mxu3 }
 0x7ea   : > { %v5078_v0 = vmax.f32 %v5046_v31, 0.0  ;;  %v4974_v21 = vadd.f32 %v4973_v23, %v4924_v46  ;;  %v13790_v31 = vld [vmem:[%s20716_s1 + $0x10] sm:$0xff]  ;;  %v13792_v23 = vld [vmem:[%s20716_s1 + $0x18] sm:$0xff] }
 0x7eb   : > { %v4878_v36 = vpop.f32.mrf.mxu1  ;;  %v4927_v5 = vpop.f32.mrf.mxu2 }
 0x7ec   : > { %v5008_v63 = vadd.f32 %v4974_v21, %v4585_v60  ;;  %v17235_v3 = vpack.c.bf16 %v5078_v0, %v5076_v39  ;;  %v4879_v59 = vadd.f32 %v4878_v36, %v4829_v47  ;;  %v13791_v47 = vld [vmem:[%s20717_s2 + $0x10] sm:$0xff]  ;;  %v13793_v60 = vld [vmem:[%s20717_s2 + $0x18] sm:$0xff] }
 0x7ed   : > { %v4831_v9 = vpop.f32.mrf.mxu0  ;;  %v11702_v39 = vld [vmem:[%s20718_s3 + $0xa70] sm:$0xf]  ;;  %v13441_v0 = vld [vmem:[%s20718_s3 + $0xa74] sm:$0xf0]  ;;  %v13440_v21 = vld [vmem:[%s20718_s3 + $0xa74] sm:$0xf] }
 0x7ee   : > { %v5047_v22 = vadd.f32 %v17146_v28, %v5008_v63  ;;  %v5009_v61 = vadd.f32 %v4879_v59, %v17122_v11  ;;  %v11703_v36 = vor.u32 %v13441_v0, %v11702_v39  ;;  %v13794_v63 = vld [vmem:[%s20716_s1 + $0x20] sm:$0xff]  ;;  %v11707_v59 = vor.u32 %v13440_v21, %v11704_v49  ;;  %v11672_v39 = vld [vmem:[%s20718_s3 + $0xa38] sm:$0xf0]  ;;  %v13796_v0 = vld [vmem:[%s20716_s1 + $0x28] sm:$0xff] }
 0x7ef   : > { %v13797_v21 = vld [vmem:[%s20717_s2 + $0x28] sm:$0xff]  ;;  %v11742_v49 = vld [vmem:[%s20718_s3 + $0xac0] sm:$0xf] }
 0x7f0   : > { %v5079_v56 = vmax.f32 %v5047_v22, 0.0  ;;  %v5048_v45 = vadd.f32 %v17141_v57, %v5009_v61  ;;  %v13795_v22 = vld [vmem:[%s20717_s2 + $0x20] sm:$0xff] }
 0x7f1   : > { %v4976_v6 = vpop.f32.mrf.mxu3 }
 0x7f2   : > { %v17241_v30 = vpack.c.bf16 %v5079_v56, %v5077_v17  ;;  %v4977_v18 = vadd.f32 %v4976_v6, %v4927_v5  ;;  %v5080_v51 = vmax.f32 %v5048_v45, 0.0  ;;  %v11694_v5 = vld [vmem:[%s20718_s3 + $0xa60] sm:$0xf]  ;;  %v13439_v17 = vld [vmem:[%s20718_s3 + $0xa64] sm:$0xf0] }
 0x7f3   : > { %v4880_v35 = vpop.f32.mrf.mxu1  ;;  %v4929_v50 = vpop.f32.mrf.mxu2  ;;  %v13438_v56 = vld [vmem:[%s20718_s3 + $0xa64] sm:$0xf]  ;;  %v11695_v6 = vor.u32 %v13439_v17, %v11694_v5  ;;  %v11686_v45 = vld [vmem:[%s20718_s3 + $0xa50] sm:$0xf]  ;;  %v11744_v5 = vld [vmem:[%s20718_s3 + $0xac8] sm:$0xf0] }
 0x7f4   : > { %v4881_v14 = vadd.f32 %v4880_v35, %v4831_v9  ;;  %v5010_v53 = vadd.f32 %v4977_v18, %v20784_v32  ;;  %v11699_v61 = vor.u32 %v13438_v56, %v11696_v29  ;;  %v11766_v9 = vld [vmem:[%s20718_s3 + $0xaf0] sm:$0xf]  ;;  %v13457_v35 = vld [vmem:[%s20718_s3 + $0xaf4] sm:$0xf0]  ;;  %v11768_v18 = vld [vmem:[%s20718_s3 + $0xaf8] sm:$0xf0] }
 0x7f5   : > { %v11758_v32 = vld [vmem:[%s20718_s3 + $0xae0] sm:$0xf]  ;;  %v13431_v56 = vld [vmem:[%s20718_s3 + $0xa24] sm:$0xf0] }
 0x7f6   : > { %v5011_v58 = vadd.f32 %v4881_v14, %v4492_v42  ;;  %v5049_v24 = vadd.f32 %v17146_v28, %v5010_v53  ;;  %v11767_v42 = vor.u32 %v13457_v35, %v11766_v9  ;;  %v11771_v14 = vor.u32 %v13456_v38, %v11768_v18  ;;  %v13455_v53 = vld [vmem:[%s20718_s3 + $0xae4] sm:$0xf0]  ;;  %v11662_v17 = vld [vmem:[%s20718_s3 + $0xa20] sm:$0xf]  ;;  %v11664_v9 = vld [vmem:[%s20718_s3 + $0xa28] sm:$0xf0] }
 0x7f7   : > { %v11663_v29 = vor.u32 %v13431_v56, %v11662_v17  ;;  %v11734_v38 = vld [vmem:[%s20718_s3 + $0xab0] sm:$0xf]  ;;  %v13448_v18 = vld [vmem:[%s20718_s3 + $0xab4] sm:$0xf] }
 0x7f8   : > { %v5050_v41 = vadd.f32 %v17141_v57, %v5011_v58  ;;  %v5081_v46 = vmax.f32 %v5049_v24, 0.0  ;;  %v13437_v58 = vld [vmem:[%s20718_s3 + $0xa54] sm:$0xf0]  ;;  %v11680_v24 = vld [vmem:[%s20718_s3 + $0xa48] sm:$0xf0] }
 0x7f9   : > { %v4978_v11 = vpop.f32.mrf.mxu3  ;;  %v11687_v1 = vor.u32 %v13437_v58, %v11686_v45  ;;  %v11736_v45 = vld [vmem:[%s20718_s3 + $0xab8] sm:$0xf0] }
 0x7fa   : > { %v5082_v4 = vmax.f32 %v5050_v41, 0.0  ;;  %v4979_v16 = vadd.f32 %v4978_v11, %v4929_v50  ;;  %v11691_v41 = vor.u32 %v13436_v12, %v11688_v54  ;;  %v11759_v50 = vor.u32 %v13455_v53, %v11758_v32  ;;  %v13454_v11 = vld [vmem:[%s20718_s3 + $0xae4] sm:$0xf]  ;;  %v11654_v12 = vld [vmem:[%s20718_s3 + $0xa10] sm:$0xf] }
 0x7fb   : > { %v11739_v58 = vor.u32 %v13448_v18, %v11736_v45  ;;  %v13428_v54 = vld [vmem:[%s20718_s3 + $0xa14] sm:$0xf]  ;;  %v11656_v53 = vld [vmem:[%s20718_s3 + $0xa18] sm:$0xf0] }
 0x7fc   : > { %v5012_v7 = vadd.f32 %v4979_v16, %v4590_v13  ;;  %v17251_v27 = vpack.c.bf16 %v5082_v4, %v5080_v51  ;;  %v11678_v13 = vld [vmem:[%s20718_s3 + $0xa40] sm:$0xf]  ;;  %v11763_v51 = vor.u32 %v13454_v11, %v11760_v20  ;;  %v13435_v4 = vld [vmem:[%s20718_s3 + $0xa44] sm:$0xf0]  ;;  %v13434_v16 = vld [vmem:[%s20718_s3 + $0xa44] sm:$0xf]  ;;  %v11659_v11 = vor.u32 %v13428_v54, %v11656_v53 }
 0x7fe   : > { %v5051_v15 = vadd.f32 %v17146_v28, %v5012_v7  ;;  %5100 = vmatpush.bf16.msra.mxu0 %v17251_v27  ;;  %5214 = vmatpush.bf16.msra.mxu2 %v17251_v27  ;;  %v13786_v28 = vld [vmem:[%s20716_s1] sm:$0xff]  ;;  %v11679_v7 = vor.u32 %v13435_v4, %v11678_v13 }
 0x7ff   : > { %v13446_v13 = vld [vmem:[%s20718_s3 + $0xaa4] sm:$0xf] }
 0x800   : > { %v5083_v57 = vmax.f32 %v5051_v15, 0.0  ;;  %v11750_v15 = vld [vmem:[%s20718_s3 + $0xad0] sm:$0xf] }
 0x802   : > { %5101 = vmatpush.bf16.msra.mxu0 %v17235_v3  ;;  %5215 = vmatpush.bf16.msra.mxu2 %v17235_v3  ;;  %v17258_v19 = vpack.c.bf16 %v5083_v57, %v5081_v46  ;;  %v13453_v46 = vld [vmem:[%s20718_s3 + $0xad4] sm:$0xf0]  ;;  %v13452_v57 = vld [vmem:[%s20718_s3 + $0xad4] sm:$0xf] }
 0x804   : > { %5149 = vmatpush.bf16.msra.mxu1 %v17258_v19  ;;  %5263 = vmatpush.bf16.msra.mxu3 %v17258_v19 }
 0x806   : > { %5102 = vmatpush.bf16.msra.mxu0 %v17219_v8  ;;  %5216 = vmatpush.bf16.msra.mxu2 %v17219_v8 }
 0x808   : > { %5150 = vmatpush.bf16.msra.mxu1 %v17241_v30  ;;  %5264 = vmatpush.bf16.msra.mxu3 %v17241_v30 }
 0x80a   : > { %5103 = vmatpush.bf16.msra.mxu0 %v17203_v26  ;;  %5217 = vmatpush.bf16.msra.mxu2 %v17203_v26 }
 0x80c   : > { %5151 = vmatpush.bf16.msra.mxu1 %v17225_v44  ;;  %5265 = vmatpush.bf16.msra.mxu3 %v17225_v44 }
 0x80e   : > { %5104 = vmatpush.bf16.msra.mxu0 %v17187_v43  ;;  %5218 = vmatpush.bf16.msra.mxu2 %v17187_v43 }
 0x810   : > { %5152 = vmatpush.bf16.msra.mxu1 %v17209_v40  ;;  %5266 = vmatpush.bf16.msra.mxu3 %v17209_v40 }
 0x812   : > { %5105 = vmatpush.bf16.msra.mxu0 %v17175_v2  ;;  %5219 = vmatpush.bf16.msra.mxu2 %v17175_v2 }
 0x814   : > { %5153 = vmatpush.bf16.msra.mxu1 %v17193_v37  ;;  %5267 = vmatpush.bf16.msra.mxu3 %v17193_v37 }
 0x816   : > { %5106 = vmatpush.bf16.msra.mxu0 %v17163_v52  ;;  %5220 = vmatpush.bf16.msra.mxu2 %v17163_v52 }
 0x818   : > { %5154 = vmatpush.bf16.msra.mxu1 %v17179_v62  ;;  %5268 = vmatpush.bf16.msra.mxu3 %v17179_v62 }
 0x81a   : > { %5107 = vmatpush.bf16.msra.mxu0 %v17151_v48  ;;  %5221 = vmatpush.bf16.msra.mxu2 %v17151_v48 }
 0x81c   : > { %5155 = vmatpush.bf16.msra.mxu1 %v17167_v25  ;;  %5269 = vmatpush.bf16.msra.mxu3 %v17167_v25 }
 0x81d   : > { %5108 = vmatmul.bf16.vlgmr.msra.gmra.mxu0 %v13786_v28  ;;  %5222 = vmatmul.bf16.vlgmr.msra.gmra.mxu2 %v13787_v34 }
 0x81e   : > { %5554 = vmatpush.bf16.msrb.mxu0 %v11703_v36  ;;  %5652 = vmatpush.bf16.msrb.mxu2 %v11707_v59 }
 0x820   : > { %5156 = vmatpush.bf16.msra.mxu1 %v17155_v10  ;;  %5270 = vmatpush.bf16.msra.mxu3 %v17155_v10 }
 0x822   : > { %5555 = vmatpush.bf16.msrb.mxu0 %v11695_v6  ;;  %5653 = vmatpush.bf16.msrb.mxu2 %v11699_v61  ;;  %v13430_v61 = vld [vmem:[%s20718_s3 + $0xa24] sm:$0xf] }
 0x823   : > { %5157 = vmatmul.bf16.vlgmr.msra.gmra.mxu1 %v13786_v28  ;;  %5271 = vmatmul.bf16.vlgmr.msra.gmra.mxu3 %v13787_v34  ;;  %v11683_v28 = vor.u32 %v13434_v16, %v11680_v24  ;;  %v11751_v34 = vor.u32 %v13453_v46, %v11750_v15  ;;  %v11667_v35 = vor.u32 %v13430_v61, %v11664_v9  ;;  %v11646_v16 = vld [vmem:[%s20718_s3 + $0xa00] sm:$0xf]  ;;  %v13427_v24 = vld [vmem:[%s20718_s3 + $0xa04] sm:$0xf0]  ;;  %v11648_v46 = vld [vmem:[%s20718_s3 + $0xa08] sm:$0xf0] }
 0x824   : > { %5603 = vmatpush.bf16.msrb.mxu1 %v11767_v42  ;;  %5701 = vmatpush.bf16.msrb.mxu3 %v11771_v14  ;;  %v13449_v42 = vld [vmem:[%s20718_s3 + $0xab4] sm:$0xf0]  ;;  %v11647_v15 = vor.u32 %v13427_v24, %v11646_v16 }
 0x825   : > { %v11735_v14 = vor.u32 %v13449_v42, %v11734_v38 }
 0x826   : > { %5556 = vmatpush.bf16.msrb.mxu0 %v11687_v1  ;;  %5654 = vmatpush.bf16.msrb.mxu2 %v11691_v41  ;;  %v13429_v1 = vld [vmem:[%s20718_s3 + $0xa14] sm:$0xf0]  ;;  %v11726_v41 = vld [vmem:[%s20718_s3 + $0xaa0] sm:$0xf] }
 0x827   : > { %v11655_v32 = vor.u32 %v13429_v1, %v11654_v12 }
 0x828   : > { %5604 = vmatpush.bf16.msrb.mxu1 %v11759_v50  ;;  %5702 = vmatpush.bf16.msrb.mxu3 %v11763_v51  ;;  %v13447_v50 = vld [vmem:[%s20718_s3 + $0xaa4] sm:$0xf0]  ;;  %v11728_v51 = vld [vmem:[%s20718_s3 + $0xaa8] sm:$0xf0] }
 0x829   : > { %v11727_v20 = vor.u32 %v13447_v50, %v11726_v41  ;;  %v11731_v4 = vor.u32 %v13446_v13, %v11728_v51 }
 0x82a   : > { %5557 = vmatpush.bf16.msrb.mxu0 %v11679_v7  ;;  %5655 = vmatpush.bf16.msrb.mxu2 %v11683_v28  ;;  %v13426_v7 = vld [vmem:[%s20718_s3 + $0xa04] sm:$0xf]  ;;  %v11718_v28 = vld [vmem:[%s20718_s3 + $0xa90] sm:$0xf] }
 0x82c   : > { %5605 = vmatpush.bf16.msrb.mxu1 %v11751_v34  ;;  %v13445_v34 = vld [vmem:[%s20718_s3 + $0xa94] sm:$0xf0] }
 0x82d   : > { %5113 = vmatmul.bf16.gmra.mxu0 %v13788_v33  ;;  %5227 = vmatmul.bf16.gmra.mxu2 %v13789_v55 }
 0x833   : > { %5162 = vmatmul.bf16.gmra.mxu1 %v13788_v33  ;;  %5276 = vmatmul.bf16.gmra.mxu3 %v13789_v55  ;;  %v11752_v33 = vld [vmem:[%s20718_s3 + $0xad8] sm:$0xf0] }
 0x834   : > { %v11755_v55 = vor.u32 %v13452_v57, %v11752_v33  ;;  %v11651_v57 = vor.u32 %v13426_v7, %v11648_v46  ;;  %v13444_v33 = vld [vmem:[%s20718_s3 + $0xa94] sm:$0xf] }
 0x836   : > { %5703 = vmatpush.bf16.msrb.mxu3 %v11755_v55  ;;  %v11719_v55 = vor.u32 %v13445_v34, %v11718_v28 }
 0x83d   : > { %5118 = vmatmul.bf16.gmra.mxu0 %v13790_v31  ;;  %5232 = vmatmul.bf16.gmra.mxu2 %v13791_v47 }
 0x843   : > { %5167 = vmatmul.bf16.gmra.mxu1 %v13790_v31  ;;  %5281 = vmatmul.bf16.gmra.mxu3 %v13791_v47  ;;  %v11670_v31 = vld [vmem:[%s20718_s3 + $0xa30] sm:$0xf]  ;;  %v13433_v47 = vld [vmem:[%s20718_s3 + $0xa34] sm:$0xf0] }
 0x84d   : > { %5123 = vmatmul.bf16.gmra.mxu0 %v13792_v23  ;;  %5237 = vmatmul.bf16.gmra.mxu2 %v13793_v60 }
 0x853   : > { %5172 = vmatmul.bf16.gmra.mxu1 %v13792_v23  ;;  %5286 = vmatmul.bf16.gmra.mxu3 %v13793_v60  ;;  %v13432_v23 = vld [vmem:[%s20718_s3 + $0xa34] sm:$0xf]  ;;  %v11671_v60 = vor.u32 %v13433_v47, %v11670_v31  ;;  %v11720_v31 = vld [vmem:[%s20718_s3 + $0xa98] sm:$0xf0] }
 0x854   : > { %v11675_v36 = vor.u32 %v13432_v23, %v11672_v39  ;;  %v11723_v47 = vor.u32 %v13444_v33, %v11720_v31  ;;  %v13798_v23 = vld [vmem:[%s20716_s1 + $0x30] sm:$0xff]  ;;  %v11710_v39 = vld [vmem:[%s20718_s3 + $0xa80] sm:$0xf] }
 0x855   : > { %5558 = vmatpush.bf16.msrb.mxu0 %v11671_v60  ;;  %v13799_v60 = vld [vmem:[%s20717_s2 + $0x30] sm:$0xff] }
 0x856   : > { %5656 = vmatpush.bf16.msrb.mxu2 %v11675_v36 }
 0x859   : > { %5559 = vmatpush.bf16.msrb.mxu0 %v11663_v29 }
 0x85a   : > { %5657 = vmatpush.bf16.msrb.mxu2 %v11667_v35 }
 0x85d   : > { %5128 = vmatmul.bf16.gmra.mxu0 %v13794_v63  ;;  %5242 = vmatmul.bf16.gmra.mxu2 %v13795_v22 }
 0x85e   : > { %5560 = vmatpush.bf16.msrb.mxu0 %v11655_v32  ;;  %5658 = vmatpush.bf16.msrb.mxu2 %v11659_v11 }
 0x862   : > { %5561 = vmatpush.bf16.msrb.mxu0 %v11647_v15  ;;  %5659 = vmatpush.bf16.msrb.mxu2 %v11651_v57 }
 0x863   : > { %5177 = vmatmul.bf16.gmra.mxu1 %v13794_v63  ;;  %5291 = vmatmul.bf16.gmra.mxu3 %v13795_v22  ;;  %v13451_v63 = vld [vmem:[%s20718_s3 + $0xac4] sm:$0xf0]  ;;  %v13450_v22 = vld [vmem:[%s20718_s3 + $0xac4] sm:$0xf] }
 0x864   : > { %v11743_v59 = vor.u32 %v13451_v63, %v11742_v49  ;;  %v11747_v6 = vor.u32 %v13450_v22, %v11744_v5  ;;  %v11712_v49 = vld [vmem:[%s20718_s3 + $0xa88] sm:$0xf0]  ;;  %v13800_v22 = vld [vmem:[%s20716_s1 + $0x38] sm:$0xff] }
 0x866   : > { %5606 = vmatpush.bf16.msrb.mxu1 %v11743_v59  ;;  %5704 = vmatpush.bf16.msrb.mxu3 %v11747_v6  ;;  %v13801_v59 = vld [vmem:[%s20717_s2 + $0x38] sm:$0xff] }
 0x86a   : > { %5607 = vmatpush.bf16.msrb.mxu1 %v11735_v14  ;;  %5705 = vmatpush.bf16.msrb.mxu3 %v11739_v58 }
 0x86d   : > { %5133 = vmatmul.bf16.gmra.mxu0 %v13796_v0  ;;  %5247 = vmatmul.bf16.gmra.mxu2 %v13797_v21 }
 0x86e   : > { %5608 = vmatpush.bf16.msrb.mxu1 %v11727_v20  ;;  %5706 = vmatpush.bf16.msrb.mxu3 %v11731_v4 }
 0x872   : > { %5609 = vmatpush.bf16.msrb.mxu1 %v11719_v55  ;;  %5707 = vmatpush.bf16.msrb.mxu3 %v11723_v47 }
 0x873   : > { %5182 = vmatmul.bf16.gmra.mxu1 %v13796_v0  ;;  %5296 = vmatmul.bf16.gmra.mxu3 %v13797_v21  ;;  %v13443_v0 = vld [vmem:[%s20718_s3 + $0xa84] sm:$0xf0]  ;;  %v13442_v21 = vld [vmem:[%s20718_s3 + $0xa84] sm:$0xf] }
 0x874   : > { %v11711_v36 = vor.u32 %v13443_v0, %v11710_v39  ;;  %v11715_v63 = vor.u32 %v13442_v21, %v11712_v49  ;;  %v11830_v39 = vld [vmem:[%s20718_s3 + $0x970] sm:$0xf]  ;;  %v13409_v0 = vld [vmem:[%s20718_s3 + $0x974] sm:$0xf0] }
 0x875   : > { %v11831_v21 = vor.u32 %v13409_v0, %v11830_v39  ;;  %v11808_v39 = vld [vmem:[%s20718_s3 + $0x948] sm:$0xf0] }
 0x876   : > { %5610 = vmatpush.bf16.msrb.mxu1 %v11711_v36  ;;  %5708 = vmatpush.bf16.msrb.mxu3 %v11715_v63  ;;  %v11832_v36 = vld [vmem:[%s20718_s3 + $0x978] sm:$0xf0] }
 0x877   : > { %5910 = vmatpush.bf16.msra.mxu0 %v11831_v21 }
 0x87d   : > { %5138 = vmatmul.bf16.gmra.mxu0 %v13798_v23  ;;  %5252 = vmatmul.bf16.gmra.mxu2 %v13799_v60 }
 0x883   : > { %5187 = vmatmul.bf16.gmra.mxu1 %v13798_v23  ;;  %5301 = vmatmul.bf16.gmra.mxu3 %v13799_v60 }
 0x88d   : > { %5143 = vmatmul.bf16.gmra.mxu0 %v13800_v22  ;;  %5257 = vmatmul.bf16.gmra.mxu2 %v13801_v59 }
 0x893   : > { %5192 = vmatmul.bf16.gmra.mxu1 %v13800_v22  ;;  %5306 = vmatmul.bf16.gmra.mxu3 %v13801_v59  ;;  %v11822_v59 = vld [vmem:[%s20718_s3 + $0x960] sm:$0xf] }
 0x89a   : > { %v5109_v5 = vpop.f32.mrf.mxu0 }
 0x89d   : > { %5562 = vmatmul.bf16.vlgmr.msrb.gmra.mxu0 %v17151_v48  ;;  %5660 = vmatmul.bf16.vlgmr.msrb.gmra.mxu2 %v17151_v48 }
 0x8a0   : > { %v5158_v17 = vpop.f32.mrf.mxu1  ;;  %v5223_v56 = vpop.f32.mrf.mxu2 }
 0x8a2   : > { %v5111_v6 = vpop.f32.mrf.mxu0 }
 0x8a3   : > { %v17530_v29 = vpack.c.bf16 %v5111_v6, %v5109_v5  ;;  %5611 = vmatmul.bf16.vlgmr.msrb.gmra.mxu1 %v17155_v10  ;;  %5709 = vmatmul.bf16.vlgmr.msrb.gmra.mxu3 %v17155_v10  ;;  %v13407_v5 = vld [vmem:[%s20718_s3 + $0x964] sm:$0xf0] }
 0x8a4   : > { %v11823_v6 = vor.u32 %v13407_v5, %v11822_v59 }
 0x8a6   : > { %v5272_v61 = vpop.f32.mrf.mxu3  ;;  %5911 = vmatpush.bf16.msra.mxu0 %v11823_v6  ;;  %v13401_v6 = vld [vmem:[%s20718_s3 + $0x934] sm:$0xf0] }
 0x8a8   : > { %v5160_v9 = vpop.f32.mrf.mxu1  ;;  %v5225_v35 = vpop.f32.mrf.mxu2 }
 0x8a9   : > { %v17534_v38 = vpack.c.bf16 %v5160_v9, %v5158_v17  ;;  %v17536_v42 = vpack.c.bf16 %v5225_v35, %v5223_v56  ;;  %v13406_v17 = vld [vmem:[%s20718_s3 + $0x964] sm:$0xf]  ;;  %v11894_v35 = vld [vmem:[%s20718_s3 + $0x9f0] sm:$0xf] }
 0x8aa   : > { %v5114_v18 = vpop.f32.mrf.mxu0 }
 0x8ad   : > { %5567 = vmatmul.bf16.gmra.mxu0 %v17163_v52  ;;  %5665 = vmatmul.bf16.gmra.mxu2 %v17163_v52 }
 0x8ae   : > { %v5274_v48 = vpop.f32.mrf.mxu3 }
 0x8af   : > { %v17540_v14 = vpack.c.bf16 %v5274_v48, %v5272_v61  ;;  %v11824_v61 = vld [vmem:[%s20718_s3 + $0x968] sm:$0xf0]  ;;  %v13424_v48 = vld [vmem:[%s20718_s3 + $0x9f4] sm:$0xf] }
 0x8b0   : > { %v5163_v45 = vpop.f32.mrf.mxu1  ;;  %v5228_v58 = vpop.f32.mrf.mxu2  ;;  %v11827_v9 = vor.u32 %v13406_v17, %v11824_v61  ;;  %v11880_v17 = vld [vmem:[%s20718_s3 + $0x9d8] sm:$0xf0]  ;;  %v13400_v61 = vld [vmem:[%s20718_s3 + $0x934] sm:$0xf] }
 0x8b2   : > { %v5116_v12 = vpop.f32.mrf.mxu0 }
 0x8b3   : > { %v17542_v1 = vpack.c.bf16 %v5116_v12, %v5114_v18  ;;  %5616 = vmatmul.bf16.gmra.mxu1 %v17167_v25  ;;  %5714 = vmatmul.bf16.gmra.mxu3 %v17167_v25  ;;  %v13425_v18 = vld [vmem:[%s20718_s3 + $0x9f4] sm:$0xf0]  ;;  %v11896_v12 = vld [vmem:[%s20718_s3 + $0x9f8] sm:$0xf0] }
 0x8b6   : > { %v5277_v10 = vpop.f32.mrf.mxu3 }
 0x8b8   : > { %v5165_v54 = vpop.f32.mrf.mxu1  ;;  %v5230_v32 = vpop.f32.mrf.mxu2 }
 0x8b9   : > { %v17546_v53 = vpack.c.bf16 %v5165_v54, %v5163_v45  ;;  %v17548_v41 = vpack.c.bf16 %v5230_v32, %v5228_v58  ;;  %v11895_v58 = vor.u32 %v13425_v18, %v11894_v35  ;;  %v11899_v54 = vor.u32 %v13424_v48, %v11896_v12  ;;  %v11814_v32 = vld [vmem:[%s20718_s3 + $0x950] sm:$0xf]  ;;  %v11800_v35 = vld [vmem:[%s20718_s3 + $0x938] sm:$0xf0]  ;;  %v11870_v48 = vld [vmem:[%s20718_s3 + $0x9c0] sm:$0xf] }
 0x8ba   : > { %v5119_v52 = vpop.f32.mrf.mxu0  ;;  %v11803_v18 = vor.u32 %v13400_v61, %v11800_v35  ;;  %v11774_v61 = vld [vmem:[%s20718_s3 + $0x900] sm:$0xf]  ;;  %v13394_v35 = vld [vmem:[%s20718_s3 + $0x904] sm:$0xf] }
 0x8bb   : > { %5959 = vmatpush.bf16.msra.mxu1 %v11895_v58  ;;  %6057 = vmatpush.bf16.msra.mxu3 %v11899_v54  ;;  %v13418_v58 = vld [vmem:[%s20718_s3 + $0x9c4] sm:$0xf] }
 0x8bd   : > { %5572 = vmatmul.bf16.gmra.mxu0 %v17175_v2  ;;  %5670 = vmatmul.bf16.gmra.mxu2 %v17175_v2 }
 0x8be   : > { %v5279_v50 = vpop.f32.mrf.mxu3 }
 0x8bf   : > { %v17552_v11 = vpack.c.bf16 %v5279_v50, %v5277_v10  ;;  %v13404_v50 = vld [vmem:[%s20718_s3 + $0x954] sm:$0xf] }
 0x8c0   : > { %v5168_v20 = vpop.f32.mrf.mxu1  ;;  %v5233_v13 = vpop.f32.mrf.mxu2 }
 0x8c2   : > { %v5121_v51 = vpop.f32.mrf.mxu0 }
 0x8c3   : > { %v17554_v4 = vpack.c.bf16 %v5121_v51, %v5119_v52  ;;  %5621 = vmatmul.bf16.gmra.mxu1 %v17179_v62  ;;  %5719 = vmatmul.bf16.gmra.mxu3 %v17179_v62  ;;  %v13405_v52 = vld [vmem:[%s20718_s3 + $0x954] sm:$0xf0]  ;;  %v11886_v51 = vld [vmem:[%s20718_s3 + $0x9e0] sm:$0xf] }
 0x8c6   : > { %v5282_v25 = vpop.f32.mrf.mxu3 }
 0x8c8   : > { %v5170_v16 = vpop.f32.mrf.mxu1  ;;  %v5235_v24 = vpop.f32.mrf.mxu2 }
 0x8c9   : > { %v17558_v7 = vpack.c.bf16 %v5170_v16, %v5168_v20  ;;  %v17560_v15 = vpack.c.bf16 %v5235_v24, %v5233_v13  ;;  %v11815_v20 = vor.u32 %v13405_v52, %v11814_v32  ;;  %v13422_v16 = vld [vmem:[%s20718_s3 + $0x9e4] sm:$0xf] }
 0x8ca   : > { %v5124_v2 = vpop.f32.mrf.mxu0 }
 0x8cb   : > { %5912 = vmatpush.bf16.msra.mxu0 %v11815_v20  ;;  %v13399_v20 = vld [vmem:[%s20718_s3 + $0x924] sm:$0xf0] }
 0x8cd   : > { %5577 = vmatmul.bf16.gmra.mxu0 %v17187_v43  ;;  %5675 = vmatmul.bf16.gmra.mxu2 %v17187_v43 }
 0x8ce   : > { %v5284_v46 = vpop.f32.mrf.mxu3 }
 0x8cf   : > { %v17564_v57 = vpack.c.bf16 %v5284_v46, %v5282_v25  ;;  %v13423_v25 = vld [vmem:[%s20718_s3 + $0x9e4] sm:$0xf0]  ;;  %v11888_v46 = vld [vmem:[%s20718_s3 + $0x9e8] sm:$0xf0] }
 0x8d0   : > { %v5173_v28 = vpop.f32.mrf.mxu1  ;;  %v5238_v34 = vpop.f32.mrf.mxu2 }
 0x8d2   : > { %v5126_v33 = vpop.f32.mrf.mxu0 }
 0x8d3   : > { %v17566_v55 = vpack.c.bf16 %v5126_v33, %v5124_v2  ;;  %5626 = vmatmul.bf16.gmra.mxu1 %v17193_v37  ;;  %5724 = vmatmul.bf16.gmra.mxu3 %v17193_v37  ;;  %v13408_v37 = vld [vmem:[%s20718_s3 + $0x974] sm:$0xf]  ;;  %v11887_v2 = vor.u32 %v13423_v25, %v11886_v51  ;;  %v13403_v33 = vld [vmem:[%s20718_s3 + $0x944] sm:$0xf0] }
 0x8d4   : > { %v11835_v49 = vor.u32 %v13408_v37, %v11832_v36  ;;  %v11878_v36 = vld [vmem:[%s20718_s3 + $0x9d0] sm:$0xf] }
 0x8d5   : > { %5960 = vmatpush.bf16.msra.mxu1 %v11887_v2  ;;  %v11862_v2 = vld [vmem:[%s20718_s3 + $0x9b0] sm:$0xf] }
 0x8d6   : > { %v5287_v62 = vpop.f32.mrf.mxu3  ;;  %6008 = vmatpush.bf16.msra.mxu2 %v11835_v49  ;;  %v13421_v49 = vld [vmem:[%s20718_s3 + $0x9d4] sm:$0xf0] }
 0x8d7   : > { %v11879_v5 = vor.u32 %v13421_v49, %v11878_v36 }
 0x8d8   : > { %v5175_v31 = vpop.f32.mrf.mxu1  ;;  %v5240_v47 = vpop.f32.mrf.mxu2 }
 0x8d9   : > { %v17570_v23 = vpack.c.bf16 %v5175_v31, %v5173_v28  ;;  %v17572_v60 = vpack.c.bf16 %v5240_v47, %v5238_v34  ;;  %v11891_v28 = vor.u32 %v13422_v16, %v11888_v46  ;;  %v11806_v34 = vld [vmem:[%s20718_s3 + $0x940] sm:$0xf]  ;;  %5961 = vmatpush.bf16.msra.mxu1 %v11879_v5  ;;  %v11792_v16 = vld [vmem:[%s20718_s3 + $0x928] sm:$0xf0]  ;;  %v13417_v46 = vld [vmem:[%s20718_s3 + $0x9b4] sm:$0xf0] }
 0x8da   : > { %v5129_v43 = vpop.f32.mrf.mxu0  ;;  %6009 = vmatpush.bf16.msra.mxu2 %v11827_v9  ;;  %v13414_v5 = vld [vmem:[%s20718_s3 + $0x9a4] sm:$0xf] }
 0x8db   : > { %6058 = vmatpush.bf16.msra.mxu3 %v11891_v28  ;;  %v13416_v28 = vld [vmem:[%s20718_s3 + $0x9b4] sm:$0xf] }
 0x8dd   : > { %5582 = vmatmul.bf16.gmra.mxu0 %v17203_v26  ;;  %5680 = vmatmul.bf16.gmra.mxu2 %v17203_v26 }
 0x8de   : > { %v5289_v63 = vpop.f32.mrf.mxu3 }
 0x8df   : > { %v17588_v22 = vpack.c.bf16 %v5289_v63, %v5287_v62  ;;  %v13402_v62 = vld [vmem:[%s20718_s3 + $0x944] sm:$0xf]  ;;  %v13420_v63 = vld [vmem:[%s20718_s3 + $0x9d4] sm:$0xf] }
 0x8e0   : > { %v5178_v56 = vpop.f32.mrf.mxu1  ;;  %v5243_v26 = vpop.f32.mrf.mxu2  ;;  %v11811_v21 = vor.u32 %v13402_v62, %v11808_v39  ;;  %v11864_v62 = vld [vmem:[%s20718_s3 + $0x9b8] sm:$0xf0]  ;;  %v13397_v39 = vld [vmem:[%s20718_s3 + $0x914] sm:$0xf0] }
 0x8e2   : > { %v5131_v45 = vpop.f32.mrf.mxu0 }
 0x8e3   : > { %v17614_v10 = vpack.c.bf16 %v5131_v45, %v5129_v43  ;;  %5631 = vmatmul.bf16.gmra.mxu1 %v17209_v40  ;;  %5729 = vmatmul.bf16.gmra.mxu3 %v17209_v40  ;;  %v11816_v40 = vld [vmem:[%s20718_s3 + $0x958] sm:$0xf0]  ;;  %v11807_v43 = vor.u32 %v13403_v33, %v11806_v34  ;;  %v13419_v45 = vld [vmem:[%s20718_s3 + $0x9c4] sm:$0xf0]  ;;  %v11863_v33 = vor.u32 %v13417_v46, %v11862_v2  ;;  %v13410_v2 = vld [vmem:[%s20718_s3 + $0x984] sm:$0xf] }
 0x8e4   : > { %v11819_v13 = vor.u32 %v13404_v50, %v11816_v40  ;;  %v11871_v54 = vor.u32 %v13419_v45, %v11870_v48  ;;  %v11790_v50 = vld [vmem:[%s20718_s3 + $0x920] sm:$0xf]  ;;  %v13398_v40 = vld [vmem:[%s20718_s3 + $0x924] sm:$0xf] }
 0x8e5   : > { %5913 = vmatpush.bf16.msra.mxu0 %v11807_v43  ;;  %v11791_v25 = vor.u32 %v13399_v20, %v11790_v50  ;;  %v11782_v43 = vld [vmem:[%s20718_s3 + $0x910] sm:$0xf]  ;;  %v13413_v50 = vld [vmem:[%s20718_s3 + $0x994] sm:$0xf0]  ;;  %v13412_v20 = vld [vmem:[%s20718_s3 + $0x994] sm:$0xf] }
 0x8e6   : > { %v5292_v24 = vpop.f32.mrf.mxu3  ;;  %6010 = vmatpush.bf16.msra.mxu2 %v11819_v13  ;;  %5962 = vmatpush.bf16.msra.mxu1 %v11871_v54  ;;  %v11783_v36 = vor.u32 %v13397_v39, %v11782_v43 }
 0x8e8   : > { %v5180_v31 = vpop.f32.mrf.mxu1  ;;  %v5245_v47 = vpop.f32.mrf.mxu2 }
 0x8e9   : > { %v17654_v0 = vpack.c.bf16 %v5180_v31, %v5178_v56  ;;  %v17656_v37 = vpack.c.bf16 %v5245_v47, %v5243_v26  ;;  %v11883_v56 = vor.u32 %v13420_v63, %v11880_v17  ;;  %v11798_v26 = vld [vmem:[%s20718_s3 + $0x930] sm:$0xf]  ;;  %v11867_v47 = vor.u32 %v13416_v28, %v11864_v62  ;;  %v11854_v63 = vld [vmem:[%s20718_s3 + $0x9a0] sm:$0xf] }
 0x8ea   : > { %v5134_v59 = vpop.f32.mrf.mxu0  ;;  %6011 = vmatpush.bf16.msra.mxu2 %v11811_v21  ;;  %v11799_v9 = vor.u32 %v13401_v6, %v11798_v26  ;;  %v13396_v21 = vld [vmem:[%s20718_s3 + $0x914] sm:$0xf]  ;;  %5963 = vmatpush.bf16.msra.mxu1 %v11863_v33  ;;  %v11856_v26 = vld [vmem:[%s20718_s3 + $0x9a8] sm:$0xf0] }
 0x8eb   : > { %6059 = vmatpush.bf16.msra.mxu3 %v11883_v56  ;;  %v11859_v6 = vor.u32 %v13414_v5, %v11856_v26 }
 0x8ec   : > { %5914 = vmatpush.bf16.msra.mxu0 %v11799_v9  ;;  %v13395_v9 = vld [vmem:[%s20718_s3 + $0x904] sm:$0xf0] }
 0x8ed   : > { %5587 = vmatmul.bf16.gmra.mxu0 %v17219_v8  ;;  %5685 = vmatmul.bf16.gmra.mxu2 %v17219_v8  ;;  %v11872_v8 = vld [vmem:[%s20718_s3 + $0x9c8] sm:$0xf0]  ;;  %v11775_v45 = vor.u32 %v13395_v9, %v11774_v61 }
 0x8ee   : > { %v5294_v12 = vpop.f32.mrf.mxu3  ;;  %v11875_v52 = vor.u32 %v13418_v58, %v11872_v8  ;;  %6012 = vmatpush.bf16.msra.mxu2 %v11803_v18  ;;  %v11776_v58 = vld [vmem:[%s20718_s3 + $0x908] sm:$0xf0] }
 0x8ef   : > { %v17696_v32 = vpack.c.bf16 %v5294_v12, %v5292_v24  ;;  %v11795_v24 = vor.u32 %v13398_v40, %v11792_v16  ;;  %v11779_v8 = vor.u32 %v13394_v35, %v11776_v58  ;;  %v11838_v16 = vld [vmem:[%s20718_s3 + $0x980] sm:$0xf] }
 0x8f0   : > { %v5183_v13 = vpop.f32.mrf.mxu1  ;;  %v5248_v51 = vpop.f32.mrf.mxu2  ;;  %6060 = vmatpush.bf16.msra.mxu3 %v11875_v52  ;;  %5915 = vmatpush.bf16.msra.mxu0 %v11791_v25  ;;  %v11846_v52 = vld [vmem:[%s20718_s3 + $0x990] sm:$0xf] }
 0x8f2   : > { %v5136_v34 = vpop.f32.mrf.mxu0  ;;  %6013 = vmatpush.bf16.msra.mxu2 %v11795_v24  ;;  %v13411_v24 = vld [vmem:[%s20718_s3 + $0x984] sm:$0xf0] }
 0x8f3   : > { %v17722_v31 = vpack.c.bf16 %v5136_v34, %v5134_v59  ;;  %5636 = vmatmul.bf16.gmra.mxu1 %v17225_v44  ;;  %5734 = vmatmul.bf16.gmra.mxu3 %v17225_v44  ;;  %v11784_v44 = vld [vmem:[%s20718_s3 + $0x918] sm:$0xf0]  ;;  %v13415_v59 = vld [vmem:[%s20718_s3 + $0x9a4] sm:$0xf0]  ;;  %v11839_v28 = vor.u32 %v13411_v24, %v11838_v16  ;;  %v11840_v34 = vld [vmem:[%s20718_s3 + $0x988] sm:$0xf0] }
 0x8f4   : > { %v11787_v49 = vor.u32 %v13396_v21, %v11784_v44  ;;  %6061 = vmatpush.bf16.msra.mxu3 %v11867_v47  ;;  %5916 = vmatpush.bf16.msra.mxu0 %v11783_v36  ;;  %v11855_v56 = vor.u32 %v13415_v59, %v11854_v63  ;;  %v11843_v33 = vor.u32 %v13410_v2, %v11840_v34 }
 0x8f6   : > { %v5297_v17 = vpop.f32.mrf.mxu3  ;;  %6014 = vmatpush.bf16.msra.mxu2 %v11787_v49  ;;  %5964 = vmatpush.bf16.msra.mxu1 %v11855_v56 }
 0x8f8   : > { %v5185_v18 = vpop.f32.mrf.mxu1  ;;  %v5250_v48 = vpop.f32.mrf.mxu2  ;;  %6062 = vmatpush.bf16.msra.mxu3 %v11859_v6  ;;  %5917 = vmatpush.bf16.msra.mxu0 %v11775_v45 }
 0x8f9   : > { %v17762_v12 = vpack.c.bf16 %v5185_v18, %v5183_v13  ;;  %v17764_v54 = vpack.c.bf16 %v5250_v48, %v5248_v51  ;;  %v11847_v13 = vor.u32 %v13413_v50, %v11846_v52  ;;  %v11848_v51 = vld [vmem:[%s20718_s3 + $0x998] sm:$0xf0] }
 0x8fa   : > { %v5139_v40 = vpop.f32.mrf.mxu0  ;;  %v11851_v25 = vor.u32 %v13412_v20, %v11848_v51  ;;  %6015 = vmatpush.bf16.msra.mxu2 %v11779_v8 }
 0x8fb   : > { %5965 = vmatpush.bf16.msra.mxu1 %v11847_v13 }
 0x8fc   : > { %6063 = vmatpush.bf16.msra.mxu3 %v11851_v25 }
 0x8fd   : > { %5592 = vmatmul.bf16.gmra.mxu0 %v17235_v3  ;;  %5690 = vmatmul.bf16.gmra.mxu2 %v17235_v3 }
 0x8fe   : > { %v5299_v46 = vpop.f32.mrf.mxu3 }
 0x8ff   : > { %v17792_v3 = vpack.c.bf16 %v5299_v46, %v5297_v17  ;;  %5966 = vmatpush.bf16.msra.mxu1 %v11839_v28 }
 0x900   : > { %v5188_v62 = vpop.f32.mrf.mxu1  ;;  %v5253_v47 = vpop.f32.mrf.mxu2  ;;  %6064 = vmatpush.bf16.msra.mxu3 %v11843_v33 }
 0x902   : > { %v5141_v43 = vpop.f32.mrf.mxu0 }
 0x903   : > { %v17794_v39 = vpack.c.bf16 %v5141_v43, %v5139_v40  ;;  %5641 = vmatmul.bf16.gmra.mxu1 %v17241_v30  ;;  %5739 = vmatmul.bf16.gmra.mxu3 %v17241_v30 }
 0x906   : > { %v5302_v21 = vpop.f32.mrf.mxu3 }
 0x908   : > { %v5190_v36 = vpop.f32.mrf.mxu1  ;;  %v5255_v44 = vpop.f32.mrf.mxu2 }
 0x909   : > { %v17798_v49 = vpack.c.bf16 %v5190_v36, %v5188_v62  ;;  %v17800_v63 = vpack.c.bf16 %v5255_v44, %v5253_v47 }
 0x90a   : > { %v5144_v59 = vpop.f32.mrf.mxu0 }
 0x90d   : > { %5597 = vmatmul.bf16.gmra.mxu0 %v17251_v27  ;;  %5695 = vmatmul.bf16.gmra.mxu2 %v17251_v27 }
 0x90e   : > { %v5304_v5 = vpop.f32.mrf.mxu3 }
 0x90f   : > { %v17804_v17 = vpack.c.bf16 %v5304_v5, %v5302_v21 }
 0x910   : > { %v5193_v56 = vpop.f32.mrf.mxu1  ;;  %v5258_v26 = vpop.f32.mrf.mxu2 }
 0x912   : > { %v5146_v6 = vpop.f32.mrf.mxu0 }
 0x913   : > { %v17806_v61 = vpack.c.bf16 %v5146_v6, %v5144_v59  ;;  %5646 = vmatmul.bf16.gmra.mxu1 %v17258_v19  ;;  %5744 = vmatmul.bf16.gmra.mxu3 %v17258_v19 }
 0x916   : > { %v5307_v30 = vpop.f32.mrf.mxu3 }
 0x918   : > { %v5195_v9 = vpop.f32.mrf.mxu1  ;;  %v5260_v35 = vpop.f32.mrf.mxu2 }
 0x919   : > { %v17810_v18 = vpack.c.bf16 %v5195_v9, %v5193_v56  ;;  %v17812_v48 = vpack.c.bf16 %v5260_v35, %v5258_v26 }
 0x91a   : > { %v5563_v27 = vpop.f32.mrf.mxu0 }
 0x91d   : > { %5918 = vmatmul.bf16.vlgmr.msra.gmra.mxu0 %v17530_v29  ;;  %6016 = vmatmul.bf16.vlgmr.msra.gmra.mxu2 %v17530_v29 }
 0x91e   : > { %v5309_v45 = vpop.f32.mrf.mxu3 }
 0x91f   : > { %v17816_v58 = vpack.c.bf16 %v5309_v45, %v5307_v30 }
 0x920   : > { %v5612_v8 = vpop.f32.mrf.mxu1  ;;  %v5661_v52 = vpop.f32.mrf.mxu2 }
 0x921   : > { %v17818_v50 = vadd.f32 %v5612_v8, %v5563_v27 }
 0x922   : > { %v5565_v19 = vpop.f32.mrf.mxu0 }
 0x923   : > { %5967 = vmatmul.bf16.vlgmr.msra.gmra.mxu1 %v17534_v38  ;;  %6065 = vmatmul.bf16.vlgmr.msra.gmra.mxu3 %v17534_v38 }
 0x926   : > { %v5710_v20 = vpop.f32.mrf.mxu3 }
 0x927   : > { %v17822_v40 = vadd.f32 %v5710_v20, %v5661_v52 }
 0x928   : > { %v5614_v13 = vpop.f32.mrf.mxu1  ;;  %v5663_v51 = vpop.f32.mrf.mxu2 }
 0x929   : > { %v17824_v25 = vadd.f32 %v5614_v13, %v5565_v19 }
 0x92a   : > { %v5568_v29 = vpop.f32.mrf.mxu0 }
 0x92d   : > { %5923 = vmatmul.bf16.gmra.mxu0 %v17542_v1  ;;  %6021 = vmatmul.bf16.gmra.mxu2 %v17542_v1 }
 0x92e   : > { %v5712_v16 = vpop.f32.mrf.mxu3 }
 0x92f   : > { %v17828_v24 = vadd.f32 %v5712_v16, %v5663_v51  ;;  %v11990_v16 = vld [vmem:[%s20718_s3 + $0xb70] sm:$0xf] }
 0x930   : > { %v5617_v2 = vpop.f32.mrf.mxu1  ;;  %v5666_v46 = vpop.f32.mrf.mxu2 }
 0x931   : > { %v17830_v28 = vadd.f32 %v5617_v2, %v5568_v29  ;;  %v13473_v2 = vld [vmem:[%s20718_s3 + $0xb74] sm:$0xf0] }
 0x932   : > { %v5570_v38 = vpop.f32.mrf.mxu0 }
 0x933   : > { %5972 = vmatmul.bf16.gmra.mxu1 %v17546_v53  ;;  %6070 = vmatmul.bf16.gmra.mxu3 %v17546_v53 }
 0x936   : > { %v5715_v34 = vpop.f32.mrf.mxu3 }
 0x937   : > { %v17834_v33 = vadd.f32 %v5715_v34, %v5666_v46  ;;  %v11991_v46 = vor.u32 %v13473_v2, %v11990_v16  ;;  %v13468_v16 = vld [vmem:[%s20718_s3 + $0xb54] sm:$0xf] }
 0x938   : > { %v5619_v62 = vpop.f32.mrf.mxu1  ;;  %v5668_v47 = vpop.f32.mrf.mxu2 }
 0x939   : > { %v17836_v43 = vadd.f32 %v5619_v62, %v5570_v38  ;;  %v11992_v38 = vld [vmem:[%s20718_s3 + $0xb78] sm:$0xf0]  ;;  %6299 = vmatpush.bf16.msrb.mxu0 %v11991_v46  ;;  %v12046_v46 = vld [vmem:[%s20718_s3 + $0xbe0] sm:$0xf] }
 0x93a   : > { %v5573_v1 = vpop.f32.mrf.mxu0 }
 0x93d   : > { %5928 = vmatmul.bf16.gmra.mxu0 %v17554_v4  ;;  %6026 = vmatmul.bf16.gmra.mxu2 %v17554_v4 }
 0x93e   : > { %v5717_v21 = vpop.f32.mrf.mxu3 }
 0x93f   : > { %v17840_v36 = vadd.f32 %v5717_v21, %v5668_v47  ;;  %v13471_v21 = vld [vmem:[%s20718_s3 + $0xb64] sm:$0xf0] }
 0x940   : > { %v5622_v44 = vpop.f32.mrf.mxu1  ;;  %v5671_v59 = vpop.f32.mrf.mxu2 }
 0x941   : > { %v17842_v5 = vadd.f32 %v5622_v44, %v5573_v1  ;;  %v11982_v1 = vld [vmem:[%s20718_s3 + $0xb60] sm:$0xf]  ;;  %v13470_v44 = vld [vmem:[%s20718_s3 + $0xb64] sm:$0xf] }
 0x942   : > { %v5575_v53 = vpop.f32.mrf.mxu0 }
 0x943   : > { %5977 = vmatmul.bf16.gmra.mxu1 %v17558_v7  ;;  %6075 = vmatmul.bf16.gmra.mxu3 %v17558_v7 }
 0x946   : > { %v5720_v56 = vpop.f32.mrf.mxu3 }
 0x947   : > { %v17846_v26 = vadd.f32 %v5720_v56, %v5671_v59  ;;  %v11984_v56 = vld [vmem:[%s20718_s3 + $0xb68] sm:$0xf0] }
 0x948   : > { %v5624_v6 = vpop.f32.mrf.mxu1  ;;  %v5673_v30 = vpop.f32.mrf.mxu2 }
 0x949   : > { %v17848_v9 = vadd.f32 %v5624_v6, %v5575_v53  ;;  %v11983_v53 = vor.u32 %v13471_v21, %v11982_v1  ;;  %v12048_v21 = vld [vmem:[%s20718_s3 + $0xbe8] sm:$0xf0] }
 0x94a   : > { %v5578_v4 = vpop.f32.mrf.mxu0 }
 0x94b   : > { %6300 = vmatpush.bf16.msrb.mxu0 %v11983_v53  ;;  %v11966_v53 = vld [vmem:[%s20718_s3 + $0xb40] sm:$0xf] }
 0x94d   : > { %5933 = vmatmul.bf16.gmra.mxu0 %v17566_v55  ;;  %6031 = vmatmul.bf16.gmra.mxu2 %v17566_v55 }
 0x94e   : > { %v5722_v35 = vpop.f32.mrf.mxu3 }
 0x94f   : > { %v17852_v27 = vadd.f32 %v5722_v35, %v5673_v30  ;;  %v11987_v30 = vor.u32 %v13470_v44, %v11984_v56  ;;  %v13489_v35 = vld [vmem:[%s20718_s3 + $0xbf4] sm:$0xf0]  ;;  %v13467_v56 = vld [vmem:[%s20718_s3 + $0xb44] sm:$0xf0] }
 0x950   : > { %v5627_v45 = vpop.f32.mrf.mxu1  ;;  %v5676_v8 = vpop.f32.mrf.mxu2 }
 0x951   : > { %v17854_v52 = vadd.f32 %v5627_v45, %v5578_v4  ;;  %v12054_v4 = vld [vmem:[%s20718_s3 + $0xbf0] sm:$0xf]  ;;  %v13488_v45 = vld [vmem:[%s20718_s3 + $0xbf4] sm:$0xf] }
 0x952   : > { %v5580_v7 = vpop.f32.mrf.mxu0 }
 0x953   : > { %5982 = vmatmul.bf16.gmra.mxu1 %v17570_v23  ;;  %6080 = vmatmul.bf16.gmra.mxu3 %v17570_v23  ;;  %v13472_v23 = vld [vmem:[%s20718_s3 + $0xb74] sm:$0xf] }
 0x954   : > { %v11995_v34 = vor.u32 %v13472_v23, %v11992_v38  ;;  %v13487_v38 = vld [vmem:[%s20718_s3 + $0xbe4] sm:$0xf0] }
 0x955   : > { %v12047_v1 = vor.u32 %v13487_v38, %v12046_v46  ;;  %v13465_v46 = vld [vmem:[%s20718_s3 + $0xb34] sm:$0xf0]  ;;  %v13464_v38 = vld [vmem:[%s20718_s3 + $0xb34] sm:$0xf] }
 0x956   : > { %v5725_v19 = vpop.f32.mrf.mxu3  ;;  %6397 = vmatpush.bf16.msrb.mxu2 %v11995_v34  ;;  %v13486_v34 = vld [vmem:[%s20718_s3 + $0xbe4] sm:$0xf] }
 0x957   : > { %v17858_v20 = vadd.f32 %v5725_v19, %v5676_v8  ;;  %v12056_v19 = vld [vmem:[%s20718_s3 + $0xbf8] sm:$0xf0] }
 0x958   : > { %v5629_v13 = vpop.f32.mrf.mxu1  ;;  %v5678_v51 = vpop.f32.mrf.mxu2 }
 0x959   : > { %v17860_v29 = vadd.f32 %v5629_v13, %v5580_v7  ;;  %v12055_v7 = vor.u32 %v13489_v35, %v12054_v4  ;;  %v12059_v13 = vor.u32 %v13488_v45, %v12056_v19  ;;  %v11967_v45 = vor.u32 %v13467_v56, %v11966_v53  ;;  %v13482_v53 = vld [vmem:[%s20718_s3 + $0xbc4] sm:$0xf] }
 0x95a   : > { %v5583_v55 = vpop.f32.mrf.mxu0  ;;  %6398 = vmatpush.bf16.msrb.mxu2 %v11987_v30  ;;  %v13466_v30 = vld [vmem:[%s20718_s3 + $0xb44] sm:$0xf] }
 0x95b   : > { %6348 = vmatpush.bf16.msrb.mxu1 %v12055_v7  ;;  %6446 = vmatpush.bf16.msrb.mxu3 %v12059_v13  ;;  %v12038_v13 = vld [vmem:[%s20718_s3 + $0xbd0] sm:$0xf] }
 0x95d   : > { %5938 = vmatmul.bf16.gmra.mxu0 %v17614_v10  ;;  %6036 = vmatmul.bf16.gmra.mxu2 %v17614_v10 }
 0x95e   : > { %v5727_v62 = vpop.f32.mrf.mxu3 }
 0x95f   : > { %v17876_v47 = vadd.f32 %v5727_v62, %v5678_v51  ;;  %v11974_v51 = vld [vmem:[%s20718_s3 + $0xb50] sm:$0xf]  ;;  %6349 = vmatpush.bf16.msrb.mxu1 %v12047_v1 }
 0x960   : > { %v5632_v59 = vpop.f32.mrf.mxu1  ;;  %v5681_v10 = vpop.f32.mrf.mxu2 }
 0x961   : > { %v17890_v6 = vadd.f32 %v5632_v59, %v5583_v55  ;;  %v13469_v55 = vld [vmem:[%s20718_s3 + $0xb54] sm:$0xf0]  ;;  %v12051_v59 = vor.u32 %v13486_v34, %v12048_v21  ;;  %v12030_v21 = vld [vmem:[%s20718_s3 + $0xbc0] sm:$0xf] }
 0x962   : > { %v5585_v8 = vpop.f32.mrf.mxu0  ;;  %v11975_v2 = vor.u32 %v13469_v55, %v11974_v51  ;;  %v13485_v51 = vld [vmem:[%s20718_s3 + $0xbd4] sm:$0xf0]  ;;  %v13484_v55 = vld [vmem:[%s20718_s3 + $0xbd4] sm:$0xf] }
 0x963   : > { %5987 = vmatmul.bf16.gmra.mxu1 %v17654_v0  ;;  %6085 = vmatmul.bf16.gmra.mxu3 %v17654_v0  ;;  %v11976_v0 = vld [vmem:[%s20718_s3 + $0xb58] sm:$0xf0] }
 0x964   : > { %v11979_v23 = vor.u32 %v13468_v16, %v11976_v0  ;;  %6301 = vmatpush.bf16.msrb.mxu0 %v11975_v2  ;;  %6447 = vmatpush.bf16.msrb.mxu3 %v12051_v59  ;;  %v12039_v2 = vor.u32 %v13485_v51, %v12038_v13  ;;  %v13483_v59 = vld [vmem:[%s20718_s3 + $0xbc4] sm:$0xf0]  ;;  %v13462_v13 = vld [vmem:[%s20718_s3 + $0xb24] sm:$0xf] }
 0x966   : > { %v5730_v62 = vpop.f32.mrf.mxu3  ;;  %6399 = vmatpush.bf16.msrb.mxu2 %v11979_v23  ;;  %v11958_v23 = vld [vmem:[%s20718_s3 + $0xb30] sm:$0xf]  ;;  %6350 = vmatpush.bf16.msrb.mxu1 %v12039_v2 }
 0x967   : > { %v17930_v44 = vadd.f32 %v5730_v62, %v5681_v10  ;;  %v11968_v10 = vld [vmem:[%s20718_s3 + $0xb48] sm:$0xf0]  ;;  %v11959_v34 = vor.u32 %v13465_v46, %v11958_v23  ;;  %v11960_v62 = vld [vmem:[%s20718_s3 + $0xb38] sm:$0xf0]  ;;  %v12022_v23 = vld [vmem:[%s20718_s3 + $0xbb0] sm:$0xf] }
 0x968   : > { %v5634_v4 = vpop.f32.mrf.mxu1  ;;  %v5683_v35 = vpop.f32.mrf.mxu2  ;;  %v11971_v19 = vor.u32 %v13466_v30, %v11968_v10  ;;  %6302 = vmatpush.bf16.msrb.mxu0 %v11967_v45  ;;  %v11963_v1 = vor.u32 %v13464_v38, %v11960_v62  ;;  %v12031_v30 = vor.u32 %v13483_v59, %v12030_v21  ;;  %v11950_v10 = vld [vmem:[%s20718_s3 + $0xb20] sm:$0xf]  ;;  %v13481_v46 = vld [vmem:[%s20718_s3 + $0xbb4] sm:$0xf0]  ;;  %v13480_v38 = vld [vmem:[%s20718_s3 + $0xbb4] sm:$0xf] }
 0x969   : > { %v17944_v7 = vadd.f32 %v5634_v4, %v5585_v8  ;;  %v12040_v8 = vld [vmem:[%s20718_s3 + $0xbd8] sm:$0xf0]  ;;  %v12023_v62 = vor.u32 %v13481_v46, %v12022_v23  ;;  %v11942_v21 = vld [vmem:[%s20718_s3 + $0xb10] sm:$0xf]  ;;  %v13461_v59 = vld [vmem:[%s20718_s3 + $0xb14] sm:$0xf0] }
 0x96a   : > { %v5588_v16 = vpop.f32.mrf.mxu0  ;;  %v12043_v0 = vor.u32 %v13484_v55, %v12040_v8  ;;  %6400 = vmatpush.bf16.msrb.mxu2 %v11971_v19  ;;  %v13463_v19 = vld [vmem:[%s20718_s3 + $0xb24] sm:$0xf0]  ;;  %6351 = vmatpush.bf16.msrb.mxu1 %v12031_v30  ;;  %v13458_v46 = vld [vmem:[%s20718_s3 + $0xb04] sm:$0xf] }
 0x96b   : > { %v11951_v2 = vor.u32 %v13463_v19, %v11950_v10  ;;  %v13478_v10 = vld [vmem:[%s20718_s3 + $0xba4] sm:$0xf]  ;;  %v13459_v23 = vld [vmem:[%s20718_s3 + $0xb04] sm:$0xf0] }
 0x96c   : > { %6448 = vmatpush.bf16.msrb.mxu3 %v12043_v0  ;;  %6303 = vmatpush.bf16.msrb.mxu0 %v11959_v34 }
 0x96d   : > { %5943 = vmatmul.bf16.gmra.mxu0 %v17722_v31  ;;  %6041 = vmatmul.bf16.gmra.mxu2 %v17722_v31  ;;  %v12032_v31 = vld [vmem:[%s20718_s3 + $0xbc8] sm:$0xf0] }
 0x96e   : > { %v5732_v56 = vpop.f32.mrf.mxu3  ;;  %v12035_v45 = vor.u32 %v13482_v53, %v12032_v31  ;;  %6401 = vmatpush.bf16.msrb.mxu2 %v11963_v1  ;;  %v13460_v53 = vld [vmem:[%s20718_s3 + $0xb14] sm:$0xf]  ;;  %6352 = vmatpush.bf16.msrb.mxu1 %v12023_v62  ;;  %v12014_v31 = vld [vmem:[%s20718_s3 + $0xba0] sm:$0xf] }
 0x96f   : > { %v17984_v4 = vadd.f32 %v5732_v56, %v5683_v35  ;;  %v11952_v35 = vld [vmem:[%s20718_s3 + $0xb28] sm:$0xf0]  ;;  %v11943_v56 = vor.u32 %v13461_v59, %v11942_v21  ;;  %v12006_v59 = vld [vmem:[%s20718_s3 + $0xb90] sm:$0xf] }
 0x970   : > { %v5637_v51 = vpop.f32.mrf.mxu1  ;;  %v5686_v55 = vpop.f32.mrf.mxu2  ;;  %v11955_v0 = vor.u32 %v13462_v13, %v11952_v35  ;;  %6449 = vmatpush.bf16.msrb.mxu3 %v12035_v45  ;;  %6304 = vmatpush.bf16.msrb.mxu0 %v11951_v2  ;;  %v13479_v45 = vld [vmem:[%s20718_s3 + $0xba4] sm:$0xf0] }
 0x971   : > { %v17998_v8 = vadd.f32 %v5637_v51, %v5588_v16  ;;  %v12024_v16 = vld [vmem:[%s20718_s3 + $0xbb8] sm:$0xf0]  ;;  %v12015_v13 = vor.u32 %v13479_v45, %v12014_v31  ;;  %v12016_v51 = vld [vmem:[%s20718_s3 + $0xba8] sm:$0xf0]  ;;  %v11998_v45 = vld [vmem:[%s20718_s3 + $0xb80] sm:$0xf] }
 0x972   : > { %v5590_v34 = vpop.f32.mrf.mxu0  ;;  %v12027_v1 = vor.u32 %v13480_v38, %v12024_v16  ;;  %6402 = vmatpush.bf16.msrb.mxu2 %v11955_v0  ;;  %v12019_v35 = vor.u32 %v13478_v10, %v12016_v51  ;;  %v11934_v0 = vld [vmem:[%s20718_s3 + $0xb00] sm:$0xf]  ;;  %v13475_v10 = vld [vmem:[%s20718_s3 + $0xb84] sm:$0xf0] }
 0x973   : > { %5992 = vmatmul.bf16.gmra.mxu1 %v17762_v12  ;;  %6090 = vmatmul.bf16.gmra.mxu3 %v17762_v12  ;;  %v11944_v12 = vld [vmem:[%s20718_s3 + $0xb18] sm:$0xf0]  ;;  %v11935_v16 = vor.u32 %v13459_v23, %v11934_v0  ;;  %v11999_v51 = vor.u32 %v13475_v10, %v11998_v45 }
 0x974   : > { %v11947_v30 = vor.u32 %v13460_v53, %v11944_v12  ;;  %6450 = vmatpush.bf16.msrb.mxu3 %v12027_v1  ;;  %6305 = vmatpush.bf16.msrb.mxu0 %v11943_v56  ;;  %v13477_v53 = vld [vmem:[%s20718_s3 + $0xb94] sm:$0xf0]  ;;  %v13476_v56 = vld [vmem:[%s20718_s3 + $0xb94] sm:$0xf] }
 0x975   : > { %6353 = vmatpush.bf16.msrb.mxu1 %v12015_v13 }
 0x976   : > { %v5735_v19 = vpop.f32.mrf.mxu3  ;;  %6403 = vmatpush.bf16.msrb.mxu2 %v11947_v30  ;;  %v12007_v30 = vor.u32 %v13477_v53, %v12006_v59 }
 0x977   : > { %v18038_v2 = vadd.f32 %v5735_v19, %v5686_v55  ;;  %v11936_v55 = vld [vmem:[%s20718_s3 + $0xb08] sm:$0xf0]  ;;  %v13474_v19 = vld [vmem:[%s20718_s3 + $0xb84] sm:$0xf] }
 0x978   : > { %v5639_v38 = vpop.f32.mrf.mxu1  ;;  %v5688_v62 = vpop.f32.mrf.mxu2  ;;  %v11939_v21 = vor.u32 %v13458_v46, %v11936_v55  ;;  %6451 = vmatpush.bf16.msrb.mxu3 %v12019_v35  ;;  %6306 = vmatpush.bf16.msrb.mxu0 %v11935_v16  ;;  %v12000_v35 = vld [vmem:[%s20718_s3 + $0xb88] sm:$0xf0] }
 0x979   : > { %v18052_v1 = vadd.f32 %v5639_v38, %v5590_v34  ;;  %v12008_v34 = vld [vmem:[%s20718_s3 + $0xb98] sm:$0xf0]  ;;  %6354 = vmatpush.bf16.msrb.mxu1 %v12007_v30  ;;  %v12003_v0 = vor.u32 %v13474_v19, %v12000_v35 }
 0x97a   : > { %v5593_v12 = vpop.f32.mrf.mxu0  ;;  %v12011_v31 = vor.u32 %v13476_v56, %v12008_v34  ;;  %6404 = vmatpush.bf16.msrb.mxu2 %v11939_v21 }
 0x97c   : > { %6452 = vmatpush.bf16.msrb.mxu3 %v12011_v31 }
 0x97d   : > { %5948 = vmatmul.bf16.gmra.mxu0 %v17794_v39  ;;  %6046 = vmatmul.bf16.gmra.mxu2 %v17794_v39 }
 0x97e   : > { %v5737_v13 = vpop.f32.mrf.mxu3  ;;  %6355 = vmatpush.bf16.msrb.mxu1 %v11999_v51 }
 0x97f   : > { %v18080_v39 = vadd.f32 %v5737_v13, %v5688_v62 }
 0x980   : > { %v5642_v23 = vpop.f32.mrf.mxu1  ;;  %v5691_v46 = vpop.f32.mrf.mxu2  ;;  %6453 = vmatpush.bf16.msrb.mxu3 %v12003_v0 }
 0x981   : > { %v18082_v38 = vadd.f32 %v5642_v23, %v5593_v12 }
 0x982   : > { %v5595_v16 = vpop.f32.mrf.mxu0 }
 0x983   : > { %5997 = vmatmul.bf16.gmra.mxu1 %v17798_v49  ;;  %6095 = vmatmul.bf16.gmra.mxu3 %v17798_v49 }
 0x986   : > { %v5740_v55 = vpop.f32.mrf.mxu3 }
 0x987   : > { %v18086_v21 = vadd.f32 %v5740_v55, %v5691_v46 }
 0x988   : > { %v5644_v59 = vpop.f32.mrf.mxu1  ;;  %v5693_v53 = vpop.f32.mrf.mxu2 }
 0x989   : > { %v18088_v56 = vadd.f32 %v5644_v59, %v5595_v16 }
 0x98a   : > { %v5598_v62 = vpop.f32.mrf.mxu0 }
 0x98d   : > { %5953 = vmatmul.bf16.gmra.mxu0 %v17806_v61  ;;  %6051 = vmatmul.bf16.gmra.mxu2 %v17806_v61 }
 0x98e   : > { %v5742_v12 = vpop.f32.mrf.mxu3 }
 0x98f   : > { %v18092_v30 = vadd.f32 %v5742_v12, %v5693_v53 }
 0x990   : > { %v5647_v34 = vpop.f32.mrf.mxu1  ;;  %v5696_v31 = vpop.f32.mrf.mxu2 }
 0x991   : > { %v18094_v45 = vadd.f32 %v5647_v34, %v5598_v62 }
 0x992   : > { %v5600_v49 = vpop.f32.mrf.mxu0 }
 0x993   : > { %6002 = vmatmul.bf16.gmra.mxu1 %v17810_v18  ;;  %6100 = vmatmul.bf16.gmra.mxu3 %v17810_v18 }
 0x996   : > { %v5745_v10 = vpop.f32.mrf.mxu3 }
 0x997   : > { %v18098_v19 = vadd.f32 %v5745_v10, %v5696_v31 }
 0x998   : > { %v5649_v13 = vpop.f32.mrf.mxu1  ;;  %v5698_v51 = vpop.f32.mrf.mxu2 }
 0x999   : > { %v18100_v35 = vadd.f32 %v5649_v13, %v5600_v49 }
 0x99a   : > { %v5919_v61 = vpop.f32.mrf.mxu0 }
 0x99b   : > { %v5920_v0 = vadd.f32 %v5919_v61, %v17818_v50 }
 0x99d   : > { %6307 = vmatmul.bf16.vlgmr.msrb.gmra.mxu0 %v17536_v42  ;;  %6405 = vmatmul.bf16.vlgmr.msrb.gmra.mxu2 %v17536_v42 }
 0x99e   : > { %v5747_v23 = vpop.f32.mrf.mxu3 }
 0x99f   : > { %v18105_v46 = vadd.f32 %v5747_v23, %v5698_v51 }
 0x9a0   : > { %v5968_v16 = vpop.f32.mrf.mxu1  ;;  %v6017_v55 = vpop.f32.mrf.mxu2 }
 0x9a1   : > { %20786 = vst [vmem:[#allocation5_spill] sm:$0xff] %v18105_v46  ;;  %v18107_v18 = vadd.f32 %v5968_v16, %v5920_v0  ;;  %v6018_v59 = vadd.f32 %v6017_v55, %v17822_v40 }
 0x9a2   : > { %v5921_v53 = vpop.f32.mrf.mxu0 }
 0x9a3   : > { %v5922_v62 = vadd.f32 %v5921_v53, %v17824_v25  ;;  %6356 = vmatmul.bf16.vlgmr.msrb.gmra.mxu1 %v17540_v14  ;;  %6454 = vmatmul.bf16.vlgmr.msrb.gmra.mxu3 %v17540_v14 }
 0x9a6   : > { %v6066_v50 = vpop.f32.mrf.mxu3 }
 0x9a7   : > { %v18113_v12 = vadd.f32 %v6066_v50, %v6018_v59 }
 0x9a8   : > { %v5970_v42 = vpop.f32.mrf.mxu1  ;;  %v6019_v34 = vpop.f32.mrf.mxu2 }
 0x9a9   : > { %v18115_v31 = vadd.f32 %v5970_v42, %v5922_v62  ;;  %v6020_v49 = vadd.f32 %v6019_v34, %v17828_v24 }
 0x9aa   : > { %v5924_v10 = vpop.f32.mrf.mxu0 }
 0x9ab   : > { %v5925_v13 = vadd.f32 %v5924_v10, %v17830_v28 }
 0x9ad   : > { %6312 = vmatmul.bf16.gmra.mxu0 %v17548_v41  ;;  %6410 = vmatmul.bf16.gmra.mxu2 %v17548_v41 }
 0x9ae   : > { %v6068_v40 = vpop.f32.mrf.mxu3 }
 0x9af   : > { %v18121_v25 = vadd.f32 %v6068_v40, %v6020_v49 }
 0x9b0   : > { %v5973_v14 = vpop.f32.mrf.mxu1  ;;  %v6022_v51 = vpop.f32.mrf.mxu2 }
 0x9b1   : > { %v18123_v61 = vadd.f32 %v5973_v14, %v5925_v13  ;;  %v6023_v0 = vadd.f32 %v6022_v51, %v17834_v33 }
 0x9b2   : > { %v5926_v23 = vpop.f32.mrf.mxu0 }
 0x9b3   : > { %v5927_v16 = vadd.f32 %v5926_v23, %v17836_v43  ;;  %6361 = vmatmul.bf16.gmra.mxu1 %v17552_v11  ;;  %6459 = vmatmul.bf16.gmra.mxu3 %v17552_v11 }
 0x9b6   : > { %v6071_v24 = vpop.f32.mrf.mxu3 }
 0x9b7   : > { %v18129_v28 = vadd.f32 %v6071_v24, %v6023_v0 }
 0x9b8   : > { %v5975_v41 = vpop.f32.mrf.mxu1  ;;  %v6024_v55 = vpop.f32.mrf.mxu2 }
 0x9b9   : > { %v18131_v59 = vadd.f32 %v5975_v41, %v5927_v16  ;;  %v6025_v53 = vadd.f32 %v6024_v55, %v17840_v36 }
 0x9ba   : > { %v5929_v62 = vpop.f32.mrf.mxu0 }
 0x9bb   : > { %v5930_v50 = vadd.f32 %v5929_v62, %v17842_v5 }
 0x9bd   : > { %6317 = vmatmul.bf16.gmra.mxu0 %v17560_v15  ;;  %6415 = vmatmul.bf16.gmra.mxu2 %v17560_v15 }
 0x9be   : > { %v6073_v33 = vpop.f32.mrf.mxu3 }
 0x9bf   : > { %v18137_v43 = vadd.f32 %v6073_v33, %v6025_v53 }
 0x9c0   : > { %v5978_v11 = vpop.f32.mrf.mxu1  ;;  %v6027_v42 = vpop.f32.mrf.mxu2 }
 0x9c1   : > { %v18139_v34 = vadd.f32 %v5978_v11, %v5930_v50  ;;  %v6028_v49 = vadd.f32 %v6027_v42, %v17846_v26 }
 0x9c2   : > { %v5931_v10 = vpop.f32.mrf.mxu0 }
 0x9c3   : > { %v5932_v13 = vadd.f32 %v5931_v10, %v17848_v9  ;;  %6366 = vmatmul.bf16.gmra.mxu1 %v17564_v57  ;;  %6464 = vmatmul.bf16.gmra.mxu3 %v17564_v57 }
 0x9c6   : > { %v6076_v36 = vpop.f32.mrf.mxu3 }
 0x9c7   : > { %v18145_v5 = vadd.f32 %v6076_v36, %v6028_v49 }
 0x9c8   : > { %v5980_v15 = vpop.f32.mrf.mxu1  ;;  %v6029_v40 = vpop.f32.mrf.mxu2 }
 0x9c9   : > { %v18147_v14 = vadd.f32 %v5980_v15, %v5932_v13  ;;  %v6030_v51 = vadd.f32 %v6029_v40, %v17852_v27 }
 0x9ca   : > { %v5934_v0 = vpop.f32.mrf.mxu0 }
 0x9cb   : > { %v5935_v23 = vadd.f32 %v5934_v0, %v17854_v52 }
 0x9cd   : > { %6322 = vmatmul.bf16.gmra.mxu0 %v17572_v60  ;;  %6420 = vmatmul.bf16.gmra.mxu2 %v17572_v60 }
 0x9ce   : > { %v6078_v26 = vpop.f32.mrf.mxu3 }
 0x9cf   : > { %v18153_v9 = vadd.f32 %v6078_v26, %v6030_v51 }
 0x9d0   : > { %v5983_v57 = vpop.f32.mrf.mxu1  ;;  %v6032_v16 = vpop.f32.mrf.mxu2 }
 0x9d1   : > { %v18155_v24 = vadd.f32 %v5983_v57, %v5935_v23  ;;  %v6033_v41 = vadd.f32 %v6032_v16, %v17858_v20  ;;  %v12287_v57 = vld [vmem:[%s20720_s5 + $0x1c0] sm:$0xf] }
 0x9d2   : > { %v5936_v55 = vpop.f32.mrf.mxu0 }
 0x9d3   : > { %v5937_v53 = vadd.f32 %v5936_v55, %v17860_v29  ;;  %6371 = vmatmul.bf16.gmra.mxu1 %v17588_v22  ;;  %6469 = vmatmul.bf16.gmra.mxu3 %v17588_v22  ;;  %v12289_v55 = vld [vmem:[%s20720_s5 + $0x1e0] sm:$0xf0] }
 0x9d6   : > { %v6081_v27 = vpop.f32.mrf.mxu3 }
 0x9d7   : > { %v18161_v52 = vadd.f32 %v6081_v27, %v6033_v41  ;;  %v13542_v27 = vld [vmem:[%s20720_s5 + $0x19c] sm:$0xf0] }
 0x9d8   : > { %v5985_v60 = vpop.f32.mrf.mxu1  ;;  %v6034_v62 = vpop.f32.mrf.mxu2 }
 0x9d9   : > { %v18163_v50 = vadd.f32 %v5985_v60, %v5937_v53  ;;  %v6035_v33 = vadd.f32 %v6034_v62, %v17876_v47  ;;  %v12255_v53 = vld [vmem:[%s20720_s5 + $0x180] sm:$0xf]  ;;  %v13538_v60 = vld [vmem:[%s20720_s5 + $0x184] sm:$0xf] }
 0x9da   : > { %v5939_v11 = vpop.f32.mrf.mxu0 }
 0x9db   : > { %v5940_v42 = vadd.f32 %v5939_v11, %v17890_v6 }
 0x9dd   : > { %6327 = vmatmul.bf16.gmra.mxu0 %v17656_v37  ;;  %6425 = vmatmul.bf16.gmra.mxu2 %v17656_v37 }
 0x9de   : > { %v6083_v20 = vpop.f32.mrf.mxu3 }
 0x9df   : > { %v18169_v29 = vadd.f32 %v6083_v20, %v6035_v33  ;;  %v12256_v33 = vor.u32 %v13542_v27, %v12255_v53  ;;  %v12543_v20 = vld [vmem:[%s20720_s5 + $0x3c0] sm:$0xf] }
 0x9e0   : > { %v5988_v22 = vpop.f32.mrf.mxu1  ;;  %v6037_v49 = vpop.f32.mrf.mxu2  ;;  %v12511_v53 = vld [vmem:[%s20720_s5 + $0x380] sm:$0xf] }
 0x9e1   : > { %v18171_v10 = vadd.f32 %v5988_v22, %v5940_v42  ;;  %v6038_v13 = vadd.f32 %v6037_v49, %v17930_v44  ;;  %v13614_v22 = vld [vmem:[%s20720_s5 + $0x3dc] sm:$0xf0]  ;;  %v13610_v49 = vld [vmem:[%s20720_s5 + $0x3c4] sm:$0xf] }
 0x9e2   : > { %v18174_v36 = vpop.f32.mrf.mxu0  ;;  %v13606_v27 = vld [vmem:[%s20720_s5 + $0x39c] sm:$0xf0] }
 0x9e3   : > { %6376 = vmatmul.bf16.gmra.mxu1 %v17696_v32  ;;  %6474 = vmatmul.bf16.gmra.mxu3 %v17696_v32 }
 0x9e6   : > { %v6086_v47 = vpop.f32.mrf.mxu3 }
 0x9e7   : > { %v18178_v6 = vadd.f32 %v6086_v47, %v6038_v13 }
 0x9e8   : > { %v18180_v15 = vpop.f32.mrf.mxu1  ;;  %v18182_v37 = vpop.f32.mrf.mxu2 }
 0x9ea   : > { %v5944_v40 = vpop.f32.mrf.mxu0 }
 0x9eb   : > { %v5945_v51 = vadd.f32 %v5944_v40, %v17998_v8  ;;  %v13550_v8 = vld [vmem:[%s20720_s5 + $0x1dc] sm:$0xf0]  ;;  %v12544_v40 = vor.u32 %v13614_v22, %v12543_v20  ;;  %v13522_v20 = vld [vmem:[%s20720_s5 + $0x104] sm:$0xf] }
 0x9ec   : > { %v12288_v41 = vor.u32 %v13550_v8, %v12287_v57  ;;  %v13530_v57 = vld [vmem:[%s20720_s5 + $0x144] sm:$0xf] }
 0x9ed   : > { %6332 = vmatmul.bf16.gmra.mxu0 %v17764_v54  ;;  %6430 = vmatmul.bf16.gmra.mxu2 %v17764_v54  ;;  %v13546_v54 = vld [vmem:[%s20720_s5 + $0x1c4] sm:$0xf] }
 0x9ee   : > { %v18187_v44 = vpop.f32.mrf.mxu3  ;;  %7432 = vmatpush.bf16.msra.mxu0 %v12288_v41  ;;  %7481 = vmatpush.bf16.msra.mxu1 %v12544_v40  ;;  %v12225_v41 = vld [vmem:[%s20720_s5 + $0x160] sm:$0xf0] }
 0x9f0   : > { %v5993_v0 = vpop.f32.mrf.mxu1  ;;  %v6042_v23 = vpop.f32.mrf.mxu2 }
 0x9f1   : > { %v18189_v26 = vadd.f32 %v5993_v0, %v5945_v51  ;;  %v6043_v32 = vadd.f32 %v6042_v23, %v18038_v2  ;;  %v12292_v2 = vor.u32 %v13546_v54, %v12289_v55  ;;  %v12545_v51 = vld [vmem:[%s20720_s5 + $0x3e0] sm:$0xf0]  ;;  %v12223_v23 = vld [vmem:[%s20720_s5 + $0x140] sm:$0xf] }
 0x9f2   : > { %v18201_v16 = vpop.f32.mrf.mxu0  ;;  %7433 = vmatpush.bf16.msra.mxu0 %v12256_v33  ;;  %v12548_v0 = vor.u32 %v13610_v49, %v12545_v51  ;;  %v12479_v51 = vld [vmem:[%s20720_s5 + $0x340] sm:$0xf] }
 0x9f3   : > { %6381 = vmatmul.bf16.gmra.mxu1 %v17792_v3  ;;  %6479 = vmatmul.bf16.gmra.mxu3 %v17792_v3  ;;  %v12257_v3 = vld [vmem:[%s20720_s5 + $0x1a0] sm:$0xf0] }
 0x9f4   : > { %7530 = vmatpush.bf16.msra.mxu2 %v12292_v2  ;;  %v12260_v42 = vor.u32 %v13538_v60, %v12257_v3  ;;  %7579 = vmatpush.bf16.msra.mxu3 %v12548_v0  ;;  %v12228_v2 = vor.u32 %v13530_v57, %v12225_v41  ;;  %v13602_v60 = vld [vmem:[%s20720_s5 + $0x384] sm:$0xf]  ;;  %v12191_v3 = vld [vmem:[%s20720_s5 + $0x100] sm:$0xf] }
 0x9f5   : > { %v13598_v0 = vld [vmem:[%s20720_s5 + $0x35c] sm:$0xf0] }
 0x9f6   : > { %v6091_v62 = vpop.f32.mrf.mxu3 }
 0x9f7   : > { %v18220_v11 = vadd.f32 %v6091_v62, %v6043_v32  ;;  %v13534_v32 = vld [vmem:[%s20720_s5 + $0x15c] sm:$0xf0]  ;;  %v12512_v62 = vor.u32 %v13606_v27, %v12511_v53 }
 0x9f8   : > { %v18231_v13 = vpop.f32.mrf.mxu1  ;;  %v18233_v47 = vpop.f32.mrf.mxu2  ;;  %7531 = vmatpush.bf16.msra.mxu2 %v12260_v42  ;;  %v12224_v54 = vor.u32 %v13534_v32, %v12223_v23  ;;  %v13526_v42 = vld [vmem:[%s20720_s5 + $0x11c] sm:$0xf0]  ;;  %v13594_v23 = vld [vmem:[%s20720_s5 + $0x344] sm:$0xf] }
 0x9f9   : > { %7482 = vmatpush.bf16.msra.mxu1 %v12512_v62  ;;  %v12192_v49 = vor.u32 %v13526_v42, %v12191_v3  ;;  %v12159_v27 = vld [vmem:[%s20720_s5 + $0xc0] sm:$0xf]  ;;  %v13514_v62 = vld [vmem:[%s20720_s5 + $0xc4] sm:$0xf] }
 0x9fa   : > { %v5949_v8 = vpop.f32.mrf.mxu0  ;;  %7434 = vmatpush.bf16.msra.mxu0 %v12224_v54  ;;  %v12481_v54 = vld [vmem:[%s20720_s5 + $0x360] sm:$0xf0]  ;;  %v12447_v3 = vld [vmem:[%s20720_s5 + $0x300] sm:$0xf] }
 0x9fb   : > { %v5950_v55 = vadd.f32 %v5949_v8, %v18082_v38  ;;  %v12513_v38 = vld [vmem:[%s20720_s5 + $0x3a0] sm:$0xf0]  ;;  %v12480_v8 = vor.u32 %v13598_v0, %v12479_v51  ;;  %v12484_v53 = vor.u32 %v13594_v23, %v12481_v54  ;;  %v13590_v42 = vld [vmem:[%s20720_s5 + $0x31c] sm:$0xf0] }
 0x9fc   : > { %v12516_v33 = vor.u32 %v13602_v60, %v12513_v38  ;;  %7532 = vmatpush.bf16.msra.mxu2 %v12228_v2  ;;  %v13518_v60 = vld [vmem:[%s20720_s5 + $0xdc] sm:$0xf0]  ;;  %v13506_v0 = vld [vmem:[%s20720_s5 + $0x84] sm:$0xf] }
 0x9fd   : > { %6337 = vmatmul.bf16.gmra.mxu0 %v17800_v63  ;;  %6435 = vmatmul.bf16.gmra.mxu2 %v17800_v63  ;;  %v12193_v63 = vld [vmem:[%s20720_s5 + $0x120] sm:$0xf0]  ;;  %v13510_v51 = vld [vmem:[%s20720_s5 + $0x9c] sm:$0xf0] }
 0x9fe   : > { %v18274_v22 = vpop.f32.mrf.mxu3  ;;  %7580 = vmatpush.bf16.msra.mxu3 %v12516_v33  ;;  %v12196_v40 = vor.u32 %v13522_v20, %v12193_v63  ;;  %7435 = vmatpush.bf16.msra.mxu0 %v12192_v49  ;;  %v12448_v20 = vor.u32 %v13590_v42, %v12447_v3  ;;  %v13586_v49 = vld [vmem:[%s20720_s5 + $0x304] sm:$0xf]  ;;  %v12095_v3 = vld [vmem:[%s20720_s5 + $0x40] sm:$0xf] }
 0x9ff   : > { %7483 = vmatpush.bf16.msra.mxu1 %v12480_v8  ;;  %v13502_v42 = vld [vmem:[%s20720_s5 + $0x5c] sm:$0xf0] }
 0xa00   : > { %v5998_v32 = vpop.f32.mrf.mxu1  ;;  %v6047_v57 = vpop.f32.mrf.mxu2  ;;  %7533 = vmatpush.bf16.msra.mxu2 %v12196_v40  ;;  %v12127_v40 = vld [vmem:[%s20720_s5 + $0x80] sm:$0xf] }
 0xa01   : > { %v18291_v41 = vadd.f32 %v5998_v32, %v5950_v55  ;;  %v6048_v2 = vadd.f32 %v6047_v57, %v18086_v21  ;;  %v12160_v55 = vor.u32 %v13518_v60, %v12159_v27  ;;  %v12161_v21 = vld [vmem:[%s20720_s5 + $0xe0] sm:$0xf0]  ;;  %v12128_v32 = vor.u32 %v13510_v51, %v12127_v40  ;;  %v13582_v27 = vld [vmem:[%s20720_s5 + $0x2dc] sm:$0xf0] }
 0xa02   : > { %v18303_v38 = vpop.f32.mrf.mxu0  ;;  %v12164_v33 = vor.u32 %v13514_v62, %v12161_v21  ;;  %7581 = vmatpush.bf16.msra.mxu3 %v12484_v53  ;;  %v12129_v57 = vld [vmem:[%s20720_s5 + $0xa0] sm:$0xf0]  ;;  %v12415_v53 = vld [vmem:[%s20720_s5 + $0x2c0] sm:$0xf] }
 0xa03   : > { %6386 = vmatmul.bf16.gmra.mxu1 %v17804_v17  ;;  %6484 = vmatmul.bf16.gmra.mxu3 %v17804_v17  ;;  %v12449_v17 = vld [vmem:[%s20720_s5 + $0x320] sm:$0xf0]  ;;  %v12132_v54 = vor.u32 %v13506_v0, %v12129_v57  ;;  %v12383_v0 = vld [vmem:[%s20720_s5 + $0x280] sm:$0xf] }
 0xa04   : > { %7436 = vmatpush.bf16.msra.mxu0 %v12160_v55  ;;  %v12452_v63 = vor.u32 %v13586_v49, %v12449_v17  ;;  %7534 = vmatpush.bf16.msra.mxu2 %v12164_v33  ;;  %v13578_v60 = vld [vmem:[%s20720_s5 + $0x2c4] sm:$0xf]  ;;  %v12096_v49 = vor.u32 %v13502_v42, %v12095_v3  ;;  %v12351_v3 = vld [vmem:[%s20720_s5 + $0x240] sm:$0xf] }
 0xa05   : > { %7484 = vmatpush.bf16.msra.mxu1 %v12448_v20  ;;  %v12417_v21 = vld [vmem:[%s20720_s5 + $0x2e0] sm:$0xf0]  ;;  %v13566_v42 = vld [vmem:[%s20720_s5 + $0x25c] sm:$0xf0] }
 0xa06   : > { %v6096_v23 = vpop.f32.mrf.mxu3  ;;  %7582 = vmatpush.bf16.msra.mxu3 %v12452_v63  ;;  %v12420_v33 = vor.u32 %v13578_v60, %v12417_v21  ;;  %v13498_v17 = vld [vmem:[%s20720_s5 + $0x44] sm:$0xf] }
 0xa07   : > { %v18334_v8 = vadd.f32 %v6096_v23, %v6048_v2  ;;  %v12416_v2 = vor.u32 %v13582_v27, %v12415_v53  ;;  %v12097_v63 = vld [vmem:[%s20720_s5 + $0x60] sm:$0xf0]  ;;  %v13574_v23 = vld [vmem:[%s20720_s5 + $0x29c] sm:$0xf0] }
 0xa08   : > { %v18345_v62 = vpop.f32.mrf.mxu1  ;;  %v18347_v55 = vpop.f32.mrf.mxu2  ;;  %7437 = vmatpush.bf16.msra.mxu0 %v12128_v32  ;;  %7535 = vmatpush.bf16.msra.mxu2 %v12132_v54  ;;  %v12100_v51 = vor.u32 %v13498_v17, %v12097_v63  ;;  %v13570_v32 = vld [vmem:[%s20720_s5 + $0x284] sm:$0xf]  ;;  %v12384_v57 = vor.u32 %v13574_v23, %v12383_v0  ;;  %v12063_v53 = vld [vmem:[%s20720_s5] sm:$0xf]  ;;  %v12352_v63 = vor.u32 %v13566_v42, %v12351_v3 }
 0xa09   : > { %7485 = vmatpush.bf16.msra.mxu1 %v12416_v2  ;;  %v13494_v27 = vld [vmem:[%s20720_s5 + $0x1c] sm:$0xf0]  ;;  %v13490_v60 = vld [vmem:[%s20720_s5 + $0x4] sm:$0xf] }
 0xa0a   : > { %v5954_v20 = vpop.f32.mrf.mxu0  ;;  %7583 = vmatpush.bf16.msra.mxu3 %v12420_v33  ;;  %v12064_v21 = vor.u32 %v13494_v27, %v12063_v53  ;;  %v12321_v53 = vld [vmem:[%s20720_s5 + $0x220] sm:$0xf0] }
 0xa0b   : > { %v5955_v40 = vadd.f32 %v5954_v20, %v18094_v45  ;;  %v12385_v45 = vld [vmem:[%s20720_s5 + $0x2a0] sm:$0xf0] }
 0xa0c   : > { %7438 = vmatpush.bf16.msra.mxu0 %v12096_v49  ;;  %v12388_v54 = vor.u32 %v13570_v32, %v12385_v45  ;;  %7536 = vmatpush.bf16.msra.mxu2 %v12100_v51  ;;  %v13562_v20 = vld [vmem:[%s20720_s5 + $0x244] sm:$0xf]  ;;  %v12319_v45 = vld [vmem:[%s20720_s5 + $0x200] sm:$0xf] }
 0xa0d   : > { %6342 = vmatmul.bf16.gmra.mxu0 %v17812_v48  ;;  %6440 = vmatmul.bf16.gmra.mxu2 %v17812_v48  ;;  %v12065_v48 = vld [vmem:[%s20720_s5 + $0x20] sm:$0xf0] }
 0xa0e   : > { %v18388_v2 = vpop.f32.mrf.mxu3  ;;  %7486 = vmatpush.bf16.msra.mxu1 %v12384_v57  ;;  %v12068_v33 = vor.u32 %v13490_v60, %v12065_v48  ;;  %7584 = vmatpush.bf16.msra.mxu3 %v12388_v54  ;;  %v12353_v51 = vld [vmem:[%s20720_s5 + $0x260] sm:$0xf0] }
 0xa0f   : > { %v12356_v32 = vor.u32 %v13562_v20, %v12353_v51  ;;  %v12060_v42 = vld [vmem:[%s20719_s4 + $0x6] sm:$0x3] }
 0xa10   : > { %v6003_v49 = vpop.f32.mrf.mxu1  ;;  %v6052_v17 = vpop.f32.mrf.mxu2  ;;  %7439 = vmatpush.bf16.msra.mxu0 %v12064_v21  ;;  %7537 = vmatpush.bf16.msra.mxu2 %v12068_v33 }
 0xa11   : > { %v18405_v0 = vadd.f32 %v6003_v49, %v5955_v40  ;;  %v6053_v23 = vadd.f32 %v6052_v17, %v18098_v19  ;;  %v13558_v40 = vld [vmem:[%s20720_s5 + $0x21c] sm:$0xf0]  ;;  %v13554_v19 = vld [vmem:[%s20720_s5 + $0x204] sm:$0xf] }
 0xa12   : > { %v18408_v57 = vpop.f32.mrf.mxu0  ;;  %7487 = vmatpush.bf16.msra.mxu1 %v12352_v63  ;;  %7585 = vmatpush.bf16.msra.mxu3 %v12356_v32  ;;  %v12320_v54 = vor.u32 %v13558_v40, %v12319_v45  ;;  %v12324_v27 = vor.u32 %v13554_v19, %v12321_v53  ;;  %v18435_v63 = vperm.slane %v12060_v42, 0 }
 0xa13   : > { %6391 = vmatmul.bf16.gmra.mxu1 %v17816_v58  ;;  %6489 = vmatmul.bf16.gmra.mxu3 %v17816_v58 }
 0xa16   : > { %v6101_v58 = vpop.f32.mrf.mxu3  ;;  %7488 = vmatpush.bf16.msra.mxu1 %v12320_v54  ;;  %7586 = vmatpush.bf16.msra.mxu3 %v12324_v27  ;;  %v18445_v54 = vperm.slane %v12060_v42, 1 }
 0xa17   : > { %v18424_v60 = vadd.f32 %v6101_v58, %v6053_v23 }
 0xa18   : > { %v18426_v21 = vpop.f32.mrf.mxu1  ;;  %v18428_v48 = vpop.f32.mrf.mxu2 }
 0xa19   : > { %20787 = vst [vmem:[#allocation3_spill] sm:$0xff] %v18428_v48 }
 0xa1a   : > { %v6308_v33 = vpop.f32.mrf.mxu0 }
 0xa1e   : > { %v18430_v3 = vpop.f32.mrf.mxu3 }
 0xa1f   : > { %20788 = vst [vmem:[#allocation4_spill] sm:$0xff] %v18430_v3 }
 0xa20   : > { %v6357_v20 = vpop.f32.mrf.mxu1  ;;  %v6406_v49 = vpop.f32.mrf.mxu2 }
 0xa21   : > { %v6358_v17 = vadd.f32 %v6357_v20, %v6308_v33 }
 0xa22   : > { %v6310_v51 = vpop.f32.mrf.mxu0 }
 0xa23   : > { %v6495_v23 = vadd.f32 %v6358_v17, %v18107_v18 }
 0xa25   : > { %v6534_v32 = vadd.f32 %v18435_v63, %v6495_v23 }
 0xa26   : > { %v6455_v45 = vpop.f32.mrf.mxu3 }
 0xa27   : > { %v6566_v40 = vmax.f32 %v6534_v32, 0.0  ;;  %v6456_v19 = vadd.f32 %v6455_v45, %v6406_v49 }
 0xa28   : > { %v6359_v53 = vpop.f32.mrf.mxu1  ;;  %v6408_v27 = vpop.f32.mrf.mxu2 }
 0xa29   : > { %6598 = vst [vmem:[%s18443_s22] sm:$0xff] %v6566_v40  ;;  %v6496_v18 = vadd.f32 %v6456_v19, %v18113_v12  ;;  %v6360_v58 = vadd.f32 %v6359_v53, %v6310_v51 }
 0xa2a   : > { %v6313_v33 = vpop.f32.mrf.mxu0 }
 0xa2b   : > { %v6535_v20 = vadd.f32 %v18445_v54, %v6496_v18  ;;  %v6497_v17 = vadd.f32 %v6360_v58, %v18115_v31 }
 0xa2d   : > { %v6567_v23 = vmax.f32 %v6535_v20, 0.0  ;;  %v6536_v3 = vadd.f32 %v18435_v63, %v6497_v17 }
 0xa2e   : > { %v6457_v48 = vpop.f32.mrf.mxu3 }
 0xa2f   : > { %6599 = vst [vmem:[%s18443_s22 + $0x8] sm:$0xff] %v6567_v23  ;;  %v6568_v49 = vmax.f32 %v6536_v3, 0.0  ;;  %v6458_v42 = vadd.f32 %v6457_v48, %v6408_v27 }
 0xa30   : > { %v6362_v32 = vpop.f32.mrf.mxu1  ;;  %v6411_v45 = vpop.f32.mrf.mxu2 }
 0xa31   : > { %6600 = vst [vmem:[%s18443_s22 + $0x10] sm:$0xff] %v6568_v49  ;;  %v18454_v46 = vpack.c.bf16 %v6568_v49, %v6566_v40  ;;  %v6498_v12 = vadd.f32 %v6458_v42, %v18121_v25  ;;  %v6363_v51 = vadd.f32 %v6362_v32, %v6313_v33 }
 0xa32   : > { %v6315_v19 = vpop.f32.mrf.mxu0 }
 0xa33   : > { %v6537_v31 = vadd.f32 %v18445_v54, %v6498_v12  ;;  %v6499_v53 = vadd.f32 %v6363_v51, %v18123_v61  ;;  %7440 = vmatmul.bf16.vlgmr.msra.gmra.mxu0 %v18454_v46  ;;  %7538 = vmatmul.bf16.vlgmr.msra.gmra.mxu2 %v18454_v46 }
 0xa35   : > { %v6569_v3 = vmax.f32 %v6537_v31, 0.0  ;;  %v6538_v48 = vadd.f32 %v18435_v63, %v6499_v53 }
 0xa36   : > { %v6460_v27 = vpop.f32.mrf.mxu3 }
 0xa37   : > { %6601 = vst [vmem:[%s18443_s22 + $0x18] sm:$0xff] %v6569_v3  ;;  %v18463_v40 = vpack.c.bf16 %v6569_v3, %v6567_v23  ;;  %v6570_v25 = vmax.f32 %v6538_v48, 0.0  ;;  %v6461_v18 = vadd.f32 %v6460_v27, %v6411_v45 }
 0xa38   : > { %v6364_v58 = vpop.f32.mrf.mxu1  ;;  %v6413_v33 = vpop.f32.mrf.mxu2 }
 0xa39   : > { %6602 = vst [vmem:[%s18443_s22 + $0x20] sm:$0xff] %v6570_v25  ;;  %v6500_v61 = vadd.f32 %v6461_v18, %v18129_v28  ;;  %v6365_v20 = vadd.f32 %v6364_v58, %v6315_v19  ;;  %7489 = vmatmul.bf16.vlgmr.msra.gmra.mxu1 %v18463_v40  ;;  %7587 = vmatmul.bf16.vlgmr.msra.gmra.mxu3 %v18463_v40 }
 0xa3a   : > { %v6318_v17 = vpop.f32.mrf.mxu0 }
 0xa3b   : > { %v6539_v49 = vadd.f32 %v18445_v54, %v6500_v61  ;;  %v6501_v23 = vadd.f32 %v6365_v20, %v18131_v59 }
 0xa3d   : > { %v6571_v42 = vmax.f32 %v6539_v49, 0.0  ;;  %v6540_v32 = vadd.f32 %v18435_v63, %v6501_v23 }
 0xa3e   : > { %v6462_v45 = vpop.f32.mrf.mxu3 }
 0xa3f   : > { %6603 = vst [vmem:[%s18443_s22 + $0x28] sm:$0xff] %v6571_v42  ;;  %v6572_v12 = vmax.f32 %v6540_v32, 0.0  ;;  %v6463_v51 = vadd.f32 %v6462_v45, %v6413_v33 }
 0xa40   : > { %v6367_v31 = vpop.f32.mrf.mxu1  ;;  %v6416_v28 = vpop.f32.mrf.mxu2 }
 0xa41   : > { %6604 = vst [vmem:[%s18443_s22 + $0x30] sm:$0xff] %v6572_v12  ;;  %v18474_v19 = vpack.c.bf16 %v6572_v12, %v6570_v25  ;;  %v6502_v53 = vadd.f32 %v6463_v51, %v18137_v43  ;;  %v6368_v3 = vadd.f32 %v6367_v31, %v6318_v17 }
 0xa42   : > { %v6320_v48 = vpop.f32.mrf.mxu0 }
 0xa43   : > { %v6541_v59 = vadd.f32 %v18445_v54, %v6502_v53  ;;  %v6503_v27 = vadd.f32 %v6368_v3, %v18139_v34  ;;  %7445 = vmatmul.bf16.gmra.mxu0 %v18474_v19  ;;  %7543 = vmatmul.bf16.gmra.mxu2 %v18474_v19 }
 0xa45   : > { %v6573_v18 = vmax.f32 %v6541_v59, 0.0  ;;  %v6542_v58 = vadd.f32 %v18435_v63, %v6503_v27 }
 0xa46   : > { %v6465_v33 = vpop.f32.mrf.mxu3 }
 0xa47   : > { %6605 = vst [vmem:[%s18443_s22 + $0x38] sm:$0xff] %v6573_v18  ;;  %v18483_v25 = vpack.c.bf16 %v6573_v18, %v6571_v42  ;;  %v6574_v43 = vmax.f32 %v6542_v58, 0.0  ;;  %v6466_v61 = vadd.f32 %v6465_v33, %v6416_v28 }
 0xa48   : > { %v6369_v20 = vpop.f32.mrf.mxu1  ;;  %v6418_v17 = vpop.f32.mrf.mxu2 }
 0xa49   : > { %6606 = vst [vmem:[%s18443_s22 + $0x40] sm:$0xff] %v6574_v43  ;;  %v6504_v34 = vadd.f32 %v6466_v61, %v18145_v5  ;;  %v6370_v49 = vadd.f32 %v6369_v20, %v6320_v48  ;;  %7494 = vmatmul.bf16.gmra.mxu1 %v18483_v25  ;;  %7592 = vmatmul.bf16.gmra.mxu3 %v18483_v25 }
 0xa4a   : > { %v6323_v23 = vpop.f32.mrf.mxu0 }
 0xa4b   : > { %v6543_v32 = vadd.f32 %v18445_v54, %v6504_v34  ;;  %v6505_v42 = vadd.f32 %v6370_v49, %v18147_v14 }
 0xa4d   : > { %v6575_v45 = vmax.f32 %v6543_v32, 0.0  ;;  %v6544_v12 = vadd.f32 %v18435_v63, %v6505_v42 }
 0xa4e   : > { %v6467_v51 = vpop.f32.mrf.mxu3 }
 0xa4f   : > { %6607 = vst [vmem:[%s18443_s22 + $0x48] sm:$0xff] %v6575_v45  ;;  %v6576_v31 = vmax.f32 %v6544_v12, 0.0  ;;  %v6468_v28 = vadd.f32 %v6467_v51, %v6418_v17 }
 0xa50   : > { %v6372_v53 = vpop.f32.mrf.mxu1  ;;  %v6421_v5 = vpop.f32.mrf.mxu2 }
 0xa51   : > { %6608 = vst [vmem:[%s18443_s22 + $0x50] sm:$0xff] %v6576_v31  ;;  %v18494_v3 = vpack.c.bf16 %v6576_v31, %v6574_v43  ;;  %v6506_v48 = vadd.f32 %v6468_v28, %v18153_v9  ;;  %v6373_v59 = vadd.f32 %v6372_v53, %v6323_v23 }
 0xa52   : > { %v6325_v27 = vpop.f32.mrf.mxu0 }
 0xa53   : > { %v6545_v14 = vadd.f32 %v18445_v54, %v6506_v48  ;;  %v6507_v18 = vadd.f32 %v6373_v59, %v18155_v24  ;;  %7450 = vmatmul.bf16.gmra.mxu0 %v18494_v3  ;;  %7548 = vmatmul.bf16.gmra.mxu2 %v18494_v3 }
 0xa55   : > { %v6577_v58 = vmax.f32 %v6545_v14, 0.0  ;;  %v6546_v33 = vadd.f32 %v18435_v63, %v6507_v18 }
 0xa56   : > { %v6470_v61 = vpop.f32.mrf.mxu3 }
 0xa57   : > { %6609 = vst [vmem:[%s18443_s22 + $0x58] sm:$0xff] %v6577_v58  ;;  %v18503_v43 = vpack.c.bf16 %v6577_v58, %v6575_v45  ;;  %v6578_v9 = vmax.f32 %v6546_v33, 0.0  ;;  %v6471_v20 = vadd.f32 %v6470_v61, %v6421_v5  ;;  %v5942_v61 = vadd.f32 %v18174_v36, %v17944_v7 }
 0xa58   : > { %v6374_v17 = vpop.f32.mrf.mxu1  ;;  %v6423_v34 = vpop.f32.mrf.mxu2 }
 0xa59   : > { %6610 = vst [vmem:[%s18443_s22 + $0x60] sm:$0xff] %v6578_v9  ;;  %v6508_v24 = vadd.f32 %v6471_v20, %v18161_v52  ;;  %v6375_v49 = vadd.f32 %v6374_v17, %v6325_v27  ;;  %7499 = vmatmul.bf16.gmra.mxu1 %v18503_v43  ;;  %7597 = vmatmul.bf16.gmra.mxu3 %v18503_v43 }
 0xa5a   : > { %v6328_v23 = vpop.f32.mrf.mxu0 }
 0xa5b   : > { %v6547_v32 = vadd.f32 %v18445_v54, %v6508_v24  ;;  %v6509_v42 = vadd.f32 %v6375_v49, %v18163_v50 }
 0xa5d   : > { %v6579_v45 = vmax.f32 %v6547_v32, 0.0  ;;  %v6548_v12 = vadd.f32 %v18435_v63, %v6509_v42  ;;  %v6040_v32 = vadd.f32 %v18182_v37, %v17984_v4  ;;  %v12295_v4 = vld [vmem:[%s20720_s5 + $0x1c8] sm:$0xf] }
 0xa5e   : > { %v6472_v51 = vpop.f32.mrf.mxu3  ;;  %v13551_v37 = vld [vmem:[%s20720_s5 + $0x1e4] sm:$0xf0] }
 0xa5f   : > { %6611 = vst [vmem:[%s18443_s22 + $0x68] sm:$0xff] %v6579_v45  ;;  %v6580_v31 = vmax.f32 %v6548_v12, 0.0  ;;  %v6473_v28 = vadd.f32 %v6472_v51, %v6423_v34  ;;  %v6089_v12 = vadd.f32 %v18187_v44, %v6040_v32  ;;  %v12296_v44 = vor.u32 %v13551_v37, %v12295_v4  ;;  %v12233_v37 = vld [vmem:[%s20720_s5 + $0x168] sm:$0xf0] }
 0xa60   : > { %v6377_v53 = vpop.f32.mrf.mxu1  ;;  %v6426_v52 = vpop.f32.mrf.mxu2 }
 0xa61   : > { %6612 = vst [vmem:[%s18443_s22 + $0x70] sm:$0xff] %v6580_v31  ;;  %v18514_v5 = vpack.c.bf16 %v6580_v31, %v6578_v9  ;;  %v6510_v48 = vadd.f32 %v6473_v28, %v18169_v29  ;;  %v6378_v59 = vadd.f32 %v6377_v53, %v6328_v23  ;;  %7628 = vmatpush.bf16.msrb.mxu0 %v12296_v44 }
 0xa62   : > { %v6330_v27 = vpop.f32.mrf.mxu0 }
 0xa63   : > { %v6549_v50 = vadd.f32 %v18445_v54, %v6510_v48  ;;  %v6511_v14 = vadd.f32 %v6378_v59, %v18171_v10  ;;  %7455 = vmatmul.bf16.gmra.mxu0 %v18514_v5  ;;  %7553 = vmatmul.bf16.gmra.mxu2 %v18514_v5  ;;  %v5991_v10 = vadd.f32 %v18180_v15, %v5942_v61 }
 0xa65   : > { %v6581_v18 = vmax.f32 %v6549_v50, 0.0  ;;  %v6550_v58 = vadd.f32 %v18435_v63, %v6511_v14  ;;  %v12297_v50 = vld [vmem:[%s20720_s5 + $0x1e8] sm:$0xf0] }
 0xa66   : > { %v6475_v33 = vpop.f32.mrf.mxu3 }
 0xa67   : > { %6613 = vst [vmem:[%s18443_s22 + $0x78] sm:$0xff] %v6581_v18  ;;  %v18525_v29 = vpack.c.bf16 %v6581_v18, %v6579_v45  ;;  %v6582_v9 = vmax.f32 %v6550_v58, 0.0  ;;  %v6476_v20 = vadd.f32 %v6475_v33, %v6426_v52 }
 0xa68   : > { %v6379_v17 = vpop.f32.mrf.mxu1  ;;  %v6428_v34 = vpop.f32.mrf.mxu2 }
 0xa69   : > { %6614 = vst [vmem:[%s18443_s22 + $0x80] sm:$0xff] %v6582_v9  ;;  %v6512_v24 = vadd.f32 %v6476_v20, %v18178_v6  ;;  %v6380_v49 = vadd.f32 %v6379_v17, %v6330_v27  ;;  %7504 = vmatmul.bf16.gmra.mxu1 %v18525_v29  ;;  %7602 = vmatmul.bf16.gmra.mxu3 %v18525_v29  ;;  %v13547_v27 = vld [vmem:[%s20720_s5 + $0x1cc] sm:$0xf]  ;;  %v13543_v20 = vld [vmem:[%s20720_s5 + $0x1a4] sm:$0xf0] }
 0xa6a   : > { %v6333_v7 = vpop.f32.mrf.mxu0  ;;  %v12300_v58 = vor.u32 %v13547_v27, %v12297_v50  ;;  %v12519_v50 = vld [vmem:[%s20720_s5 + $0x388] sm:$0xf] }
 0xa6b   : > { %v6551_v36 = vadd.f32 %v18445_v54, %v6512_v24  ;;  %v6513_v23 = vadd.f32 %v6380_v49, %v5991_v10  ;;  %v13539_v10 = vld [vmem:[%s20720_s5 + $0x18c] sm:$0xf] }
 0xa6c   : > { %7726 = vmatpush.bf16.msrb.mxu2 %v12300_v58  ;;  %v12265_v24 = vld [vmem:[%s20720_s5 + $0x1a8] sm:$0xf0] }
 0xa6d   : > { %v6583_v42 = vmax.f32 %v6551_v36, 0.0  ;;  %v6552_v45 = vadd.f32 %v18435_v63, %v6513_v23  ;;  %v12268_v23 = vor.u32 %v13539_v10, %v12265_v24  ;;  %v13527_v10 = vld [vmem:[%s20720_s5 + $0x124] sm:$0xf0] }
 0xa6e   : > { %v6477_v15 = vpop.f32.mrf.mxu3 }
 0xa6f   : > { %6615 = vst [vmem:[%s18443_s22 + $0x88] sm:$0xff] %v6583_v42  ;;  %v6584_v6 = vmax.f32 %v6552_v45, 0.0  ;;  %v6478_v51 = vadd.f32 %v6477_v15, %v6428_v34 }
 0xa70   : > { %v6382_v31 = vpop.f32.mrf.mxu1  ;;  %v6431_v28 = vpop.f32.mrf.mxu2  ;;  %7727 = vmatpush.bf16.msrb.mxu2 %v12268_v23 }
 0xa71   : > { %6616 = vst [vmem:[%s18443_s22 + $0x90] sm:$0xff] %v6584_v6  ;;  %v18539_v53 = vpack.c.bf16 %v6584_v6, %v6582_v9  ;;  %v6514_v52 = vadd.f32 %v6478_v51, %v6089_v12  ;;  %v6383_v48 = vadd.f32 %v6382_v31, %v6333_v7  ;;  %v12263_v9 = vld [vmem:[%s20720_s5 + $0x188] sm:$0xf]  ;;  %v12553_v6 = vld [vmem:[%s20720_s5 + $0x3e8] sm:$0xf0] }
 0xa72   : > { %v6335_v59 = vpop.f32.mrf.mxu0  ;;  %v12264_v34 = vor.u32 %v13543_v20, %v12263_v9  ;;  %v6045_v9 = vadd.f32 %v18233_v47, %v18080_v39  ;;  %v13523_v39 = vld [vmem:[%s20720_s5 + $0x10c] sm:$0xf] }
 0xa73   : > { %v6553_v14 = vadd.f32 %v18445_v54, %v6514_v52  ;;  %v6515_v18 = vadd.f32 %v6383_v48, %v18189_v26  ;;  %7460 = vmatmul.bf16.gmra.mxu0 %v18539_v53  ;;  %7558 = vmatmul.bf16.gmra.mxu2 %v18539_v53  ;;  %v5947_v26 = vadd.f32 %v18201_v16, %v18052_v1  ;;  %v12551_v1 = vld [vmem:[%s20720_s5 + $0x3c8] sm:$0xf]  ;;  %v12201_v47 = vld [vmem:[%s20720_s5 + $0x128] sm:$0xf0] }
 0xa74   : > { %v13615_v16 = vld [vmem:[%s20720_s5 + $0x3e4] sm:$0xf0]  ;;  %7629 = vmatpush.bf16.msrb.mxu0 %v12264_v34  ;;  %v6094_v23 = vadd.f32 %v18274_v22, %v6045_v9  ;;  %v13595_v22 = vld [vmem:[%s20720_s5 + $0x34c] sm:$0xf] }
 0xa75   : > { %v6585_v33 = vmax.f32 %v6553_v14, 0.0  ;;  %v18558_v61 = vadd.f32 %v18435_v63, %v6515_v18  ;;  %v5996_v32 = vadd.f32 %v18231_v13, %v5947_v26  ;;  %v12552_v12 = vor.u32 %v13615_v16, %v12551_v1  ;;  %v13535_v52 = vld [vmem:[%s20720_s5 + $0x164] sm:$0xf0]  ;;  %v13603_v18 = vld [vmem:[%s20720_s5 + $0x38c] sm:$0xf] }
 0xa76   : > { %v6480_v17 = vpop.f32.mrf.mxu3  ;;  %v13607_v14 = vld [vmem:[%s20720_s5 + $0x3a4] sm:$0xf0] }
 0xa77   : > { %6617 = vst [vmem:[%s18443_s22 + $0x98] sm:$0xff] %v6585_v33  ;;  %v18575_v49 = vpack.c.bf16 %v6585_v33, %v6583_v42  ;;  %v6586_v7 = vmax.f32 %v18558_v61, 0.0  ;;  %v6481_v36 = vadd.f32 %v6480_v17, %v6431_v28  ;;  %v13611_v42 = vld [vmem:[%s20720_s5 + $0x3cc] sm:$0xf]  ;;  %v12231_v28 = vld [vmem:[%s20720_s5 + $0x148] sm:$0xf]  ;;  %7677 = vmatpush.bf16.msrb.mxu1 %v12552_v12  ;;  %v12520_v58 = vor.u32 %v13607_v14, %v12519_v50 }
 0xa78   : > { %v6384_v45 = vpop.f32.mrf.mxu1  ;;  %v6433_v15 = vpop.f32.mrf.mxu2  ;;  %v12556_v13 = vor.u32 %v13611_v42, %v12553_v6  ;;  %v12232_v4 = vor.u32 %v13535_v52, %v12231_v28  ;;  %v12521_v33 = vld [vmem:[%s20720_s5 + $0x3a8] sm:$0xf0]  ;;  %v12199_v34 = vld [vmem:[%s20720_s5 + $0x108] sm:$0xf] }
 0xa79   : > { %6618 = vst [vmem:[%s18443_s22 + $0xa0] sm:$0xff] %v6586_v7  ;;  %v6516_v51 = vadd.f32 %v6481_v36, %v18220_v11  ;;  %v6385_v31 = vadd.f32 %v6384_v45, %v6335_v59  ;;  %7509 = vmatmul.bf16.gmra.mxu1 %v18575_v49  ;;  %7607 = vmatmul.bf16.gmra.mxu3 %v18575_v49  ;;  %v13531_v11 = vld [vmem:[%s20720_s5 + $0x14c] sm:$0xf]  ;;  %v12487_v45 = vld [vmem:[%s20720_s5 + $0x348] sm:$0xf] }
 0xa7a   : > { %v6338_v48 = vpop.f32.mrf.mxu0  ;;  %7775 = vmatpush.bf16.msrb.mxu3 %v12556_v13  ;;  %v12236_v27 = vor.u32 %v13531_v11, %v12233_v37  ;;  %7630 = vmatpush.bf16.msrb.mxu0 %v12232_v4  ;;  %v12524_v17 = vor.u32 %v13603_v18, %v12521_v33  ;;  %v12200_v36 = vor.u32 %v13527_v10, %v12199_v34  ;;  %v13599_v12 = vld [vmem:[%s20720_s5 + $0x364] sm:$0xf0]  ;;  %v13515_v61 = vld [vmem:[%s20720_s5 + $0xcc] sm:$0xf] }
 0xa7b   : > { %v18610_v59 = vadd.f32 %v18445_v54, %v6516_v51  ;;  %v6517_v44 = vadd.f32 %v6385_v31, %v5996_v32  ;;  %7678 = vmatpush.bf16.msrb.mxu1 %v12520_v58  ;;  %v12204_v32 = vor.u32 %v13523_v39, %v12201_v47  ;;  %v12488_v51 = vor.u32 %v13599_v12, %v12487_v45  ;;  %v12167_v4 = vld [vmem:[%s20720_s5 + $0xc8] sm:$0xf]  ;;  %v13587_v18 = vld [vmem:[%s20720_s5 + $0x30c] sm:$0xf] }
 0xa7c   : > { %7728 = vmatpush.bf16.msrb.mxu2 %v12236_v27  ;;  %v13519_v11 = vld [vmem:[%s20720_s5 + $0xe4] sm:$0xf0]  ;;  %v12457_v33 = vld [vmem:[%s20720_s5 + $0x328] sm:$0xf0] }
 0xa7d   : > { %v6587_v20 = vmax.f32 %v18610_v59, 0.0  ;;  %v6556_v26 = vadd.f32 %v18435_v63, %v6517_v44  ;;  %v12168_v37 = vor.u32 %v13519_v11, %v12167_v4  ;;  %v12455_v50 = vld [vmem:[%s20720_s5 + $0x308] sm:$0xf]  ;;  %v13507_v47 = vld [vmem:[%s20720_s5 + $0x8c] sm:$0xf] }
 0xa7e   : > { %v6482_v24 = vpop.f32.mrf.mxu3  ;;  %7776 = vmatpush.bf16.msrb.mxu3 %v12524_v17  ;;  %7631 = vmatpush.bf16.msrb.mxu0 %v12200_v36  ;;  %v13591_v14 = vld [vmem:[%s20720_s5 + $0x324] sm:$0xf0]  ;;  %v12460_v17 = vor.u32 %v13587_v18, %v12457_v33  ;;  %v12105_v4 = vld [vmem:[%s20720_s5 + $0x68] sm:$0xf0]  ;;  %v6050_v18 = vadd.f32 %v18347_v55, %v18092_v30 }
 0xa7f   : > { %6619 = vst [vmem:[%s18443_s22 + $0xa8] sm:$0xff] %v6587_v20  ;;  %v6588_v1 = vmax.f32 %v6556_v26, 0.0  ;;  %v6483_v16 = vadd.f32 %v6482_v24, %v6433_v15  ;;  %v12489_v15 = vld [vmem:[%s20720_s5 + $0x368] sm:$0xf0]  ;;  %7679 = vmatpush.bf16.msrb.mxu1 %v12488_v51  ;;  %v12135_v34 = vld [vmem:[%s20720_s5 + $0x88] sm:$0xf]  ;;  %v5952_v24 = vadd.f32 %v18303_v38, %v18088_v56 }
 0xa80   : > { %v6387_v42 = vpop.f32.mrf.mxu1  ;;  %v6436_v6 = vpop.f32.mrf.mxu2  ;;  %v12492_v52 = vor.u32 %v13595_v22, %v12489_v15  ;;  %7729 = vmatpush.bf16.msrb.mxu2 %v12204_v32  ;;  %v13511_v10 = vld [vmem:[%s20720_s5 + $0xa4] sm:$0xf0]  ;;  %v13491_v30 = vld [vmem:[%s20720_s5 + $0xc] sm:$0xf] }
 0xa81   : > { %6620 = vst [vmem:[%s18443_s22 + $0xb0] sm:$0xff] %v6588_v1  ;;  %v18659_v31 = vpack.c.bf16 %v6588_v1, %v6586_v7  ;;  %v6518_v13 = vadd.f32 %v6483_v16, %v6094_v23  ;;  %v6388_v28 = vadd.f32 %v6387_v42, %v6338_v48  ;;  %v12169_v7 = vld [vmem:[%s20720_s5 + $0xe8] sm:$0xf0]  ;;  %v12136_v39 = vor.u32 %v13511_v10, %v12135_v34  ;;  %v12423_v32 = vld [vmem:[%s20720_s5 + $0x2c8] sm:$0xf] }
 0xa82   : > { %v12172_v27 = vor.u32 %v13515_v61, %v12169_v7  ;;  %v6340_v58 = vpop.f32.mrf.mxu0  ;;  %7777 = vmatpush.bf16.msrb.mxu3 %v12492_v52  ;;  %7632 = vmatpush.bf16.msrb.mxu0 %v12168_v37  ;;  %v12137_v23 = vld [vmem:[%s20720_s5 + $0xa8] sm:$0xf0]  ;;  %v13583_v45 = vld [vmem:[%s20720_s5 + $0x2e4] sm:$0xf0]  ;;  %v6001_v12 = vadd.f32 %v18345_v62, %v5952_v24  ;;  %v6099_v24 = vadd.f32 %v18388_v2, %v6050_v18 }
 0xa83   : > { %v6557_v48 = vadd.f32 %v18445_v54, %v6518_v13  ;;  %v6519_v44 = vadd.f32 %v6388_v28, %v18291_v41  ;;  %7465 = vmatmul.bf16.gmra.mxu0 %v18659_v31  ;;  %7563 = vmatmul.bf16.gmra.mxu2 %v18659_v31  ;;  %v12456_v41 = vor.u32 %v13591_v14, %v12455_v50  ;;  %v12103_v15 = vld [vmem:[%s20720_s5 + $0x48] sm:$0xf]  ;;  %v12073_v55 = vld [vmem:[%s20720_s5 + $0x28] sm:$0xf0] }
 0xa84   : > { %7730 = vmatpush.bf16.msrb.mxu2 %v12172_v27  ;;  %v12140_v16 = vor.u32 %v13507_v47, %v12137_v23  ;;  %v12424_v59 = vor.u32 %v13583_v45, %v12423_v32  ;;  %v13503_v13 = vld [vmem:[%s20720_s5 + $0x64] sm:$0xf0]  ;;  %v12393_v27 = vld [vmem:[%s20720_s5 + $0x2a8] sm:$0xf0]  ;;  %v12076_v47 = vor.u32 %v13491_v30, %v12073_v55 }
 0xa85   : > { %v6589_v9 = vmax.f32 %v6557_v48, 0.0  ;;  %v18690_v26 = vadd.f32 %v18435_v63, %v6519_v44  ;;  %7680 = vmatpush.bf16.msrb.mxu1 %v12456_v41  ;;  %v12104_v52 = vor.u32 %v13503_v13, %v12103_v15  ;;  %v12391_v11 = vld [vmem:[%s20720_s5 + $0x288] sm:$0xf]  ;;  %v13571_v44 = vld [vmem:[%s20720_s5 + $0x28c] sm:$0xf] }
 0xa86   : > { %v6485_v36 = vpop.f32.mrf.mxu3  ;;  %7778 = vmatpush.bf16.msrb.mxu3 %v12460_v17  ;;  %7633 = vmatpush.bf16.msrb.mxu0 %v12136_v39  ;;  %v13575_v48 = vld [vmem:[%s20720_s5 + $0x2a4] sm:$0xf0]  ;;  %v12396_v14 = vor.u32 %v13571_v44, %v12393_v27  ;;  %v13563_v2 = vld [vmem:[%s20720_s5 + $0x24c] sm:$0xf] }
 0xa87   : > { %6621 = vst [vmem:[%s18443_s22 + $0xb8] sm:$0xff] %v6589_v9  ;;  %v18709_v1 = vpack.c.bf16 %v6589_v9, %v6587_v20  ;;  %v6590_v56 = vmax.f32 %v18690_v26, 0.0  ;;  %v6486_v38 = vadd.f32 %v6485_v36, %v6436_v6  ;;  %v13579_v20 = vld [vmem:[%s20720_s5 + $0x2cc] sm:$0xf]  ;;  %v12392_v50 = vor.u32 %v13575_v48, %v12391_v11  ;;  %v12071_v33 = vld [vmem:[%s20720_s5 + $0x8] sm:$0xf] }
 0xa88   : > { %v6389_v42 = vpop.f32.mrf.mxu1  ;;  %v12425_v6 = vld [vmem:[%s20720_s5 + $0x2e8] sm:$0xf0]  ;;  %v6438_v28 = vpop.f32.mrf.mxu2  ;;  %7731 = vmatpush.bf16.msrb.mxu2 %v12140_v16  ;;  %v13495_v9 = vld [vmem:[%s20720_s5 + $0x24] sm:$0xf0] }
 0xa89   : > { %6622 = vst [vmem:[%s18443_s22 + $0xc0] sm:$0xff] %v6590_v56  ;;  %v6520_v51 = vadd.f32 %v6486_v38, %v18334_v8  ;;  %v6390_v22 = vadd.f32 %v6389_v42, %v6340_v58  ;;  %7514 = vmatmul.bf16.gmra.mxu1 %v18709_v1  ;;  %7612 = vmatmul.bf16.gmra.mxu3 %v18709_v1  ;;  %v13499_v8 = vld [vmem:[%s20720_s5 + $0x4c] sm:$0xf]  ;;  %v12359_v23 = vld [vmem:[%s20720_s5 + $0x248] sm:$0xf] }
 0xa8a   : > { %v12428_v62 = vor.u32 %v13579_v20, %v12425_v6  ;;  %7681 = vmatpush.bf16.msrb.mxu1 %v12424_v59  ;;  %v12108_v7 = vor.u32 %v13499_v8, %v12105_v4  ;;  %7634 = vmatpush.bf16.msrb.mxu0 %v12104_v52  ;;  %v6343_v17 = vpop.f32.mrf.mxu0  ;;  %v12072_v10 = vor.u32 %v13495_v9, %v12071_v33  ;;  %v13567_v38 = vld [vmem:[%s20720_s5 + $0x264] sm:$0xf0]  ;;  %v12361_v45 = vld [vmem:[%s20720_s5 + $0x268] sm:$0xf0] }
 0xa8b   : > { %v6559_v37 = vadd.f32 %v18445_v54, %v6520_v51  ;;  %v6521_v61 = vadd.f32 %v6390_v22, %v6001_v12  ;;  %v12360_v32 = vor.u32 %v13567_v38, %v12359_v23  ;;  %v12364_v20 = vor.u32 %v13563_v2, %v12361_v45  ;;  %v12327_v26 = vld [vmem:[%s20720_s5 + $0x208] sm:$0xf]  ;;  %v13555_v22 = vld [vmem:[%s20720_s5 + $0x20c] sm:$0xf] }
 0xa8c   : > { %7779 = vmatpush.bf16.msrb.mxu3 %v12428_v62  ;;  %7732 = vmatpush.bf16.msrb.mxu2 %v12108_v7  ;;  %v12329_v15 = vld [vmem:[%s20720_s5 + $0x228] sm:$0xf0]  ;;  %v5957_v4 = vadd.f32 %v18408_v57, %v18100_v35 }
 0xa8d   : > { %v6591_v58 = vmax.f32 %v6559_v37, 0.0  ;;  %v6560_v41 = vadd.f32 %v18435_v63, %v6521_v61  ;;  %v12332_v52 = vor.u32 %v13555_v22, %v12329_v15  ;;  %v20790_v18 = vld [vmem:[#allocation3_spill] sm:$0xff] }
 0xa8e   : > { %v6487_v34 = vpop.f32.mrf.mxu3  ;;  %7682 = vmatpush.bf16.msrb.mxu1 %v12392_v50  ;;  %7635 = vmatpush.bf16.msrb.mxu0 %v12072_v10  ;;  %v6006_v44 = vadd.f32 %v18426_v21, %v5957_v4 }
 0xa8f   : > { %6623 = vst [vmem:[%s18443_s22 + $0xc8] sm:$0xff] %v6591_v58  ;;  %v6592_v36 = vmax.f32 %v6560_v41, 0.0  ;;  %v6488_v39 = vadd.f32 %v6487_v34, %v6438_v28 }
 0xa90   : > { %v6392_v16 = vpop.f32.mrf.mxu1  ;;  %7780 = vmatpush.bf16.msrb.mxu3 %v12396_v14  ;;  %7733 = vmatpush.bf16.msrb.mxu2 %v12076_v47  ;;  %v6441_v62 = vpop.f32.mrf.mxu2  ;;  %v20789_v14 = vld [vmem:[#allocation5_spill] sm:$0xff] }
 0xa91   : > { %6624 = vst [vmem:[%s18443_s22 + $0xd0] sm:$0xff] %v6592_v36  ;;  %v18788_v12 = vpack.c.bf16 %v6592_v36, %v6590_v56  ;;  %v6522_v42 = vadd.f32 %v6488_v39, %v6099_v24  ;;  %v6393_v59 = vadd.f32 %v6392_v16, %v6343_v17  ;;  %v13559_v56 = vld [vmem:[%s20720_s5 + $0x224] sm:$0xf0]  ;;  %v20791_v17 = vld [vmem:[#allocation4_spill] sm:$0xff]  ;;  %v18837_v39 = vld [vmem:[%s20721_s6] sm:$0xff] }
 0xa92   : > { %7683 = vmatpush.bf16.msrb.mxu1 %v12360_v32  ;;  %v6345_v7 = vpop.f32.mrf.mxu0  ;;  %v18846_v2 = vperm.slane %v18837_v39, 1 }
 0xa93   : > { %v6561_v6 = vadd.f32 %v18445_v54, %v6522_v42  ;;  %v6523_v51 = vadd.f32 %v6393_v59, %v18405_v0  ;;  %7470 = vmatmul.bf16.gmra.mxu0 %v18788_v12  ;;  %7568 = vmatmul.bf16.gmra.mxu2 %v18788_v12  ;;  %v12328_v0 = vor.u32 %v13559_v56, %v12327_v26 }
 0xa94   : > { %7781 = vmatpush.bf16.msrb.mxu3 %v12364_v20 }
 0xa95   : > { %v6593_v13 = vmax.f32 %v6561_v6, 0.0  ;;  %v6562_v28 = vadd.f32 %v18435_v63, %v6523_v51 }
 0xa96   : > { %v6490_v8 = vpop.f32.mrf.mxu3  ;;  %7684 = vmatpush.bf16.msrb.mxu1 %v12328_v0 }
 0xa97   : > { %6625 = vst [vmem:[%s18443_s22 + $0xd8] sm:$0xff] %v6593_v13  ;;  %v18810_v11 = vpack.c.bf16 %v6593_v13, %v6591_v58  ;;  %v6594_v37 = vmax.f32 %v6562_v28, 0.0  ;;  %v6491_v61 = vadd.f32 %v6490_v8, %v6441_v62  ;;  %v6055_v58 = vadd.f32 %v20790_v18, %v20789_v14 }
 0xa98   : > { %v6394_v48 = vpop.f32.mrf.mxu1  ;;  %7782 = vmatpush.bf16.msrb.mxu3 %v12332_v52  ;;  %v6443_v21 = vpop.f32.mrf.mxu2 }
 0xa99   : > { %6626 = vst [vmem:[%s18443_s22 + $0xe0] sm:$0xff] %v6594_v37  ;;  %v6524_v27 = vadd.f32 %v6491_v61, %v18424_v60  ;;  %v6395_v50 = vadd.f32 %v6394_v48, %v6345_v7  ;;  %7519 = vmatmul.bf16.gmra.mxu1 %v18810_v11  ;;  %7617 = vmatmul.bf16.gmra.mxu3 %v18810_v11 }
 0xa9a   : > { %v6104_v34 = vadd.f32 %v20791_v17, %v6055_v58 }
 0xa9b   : > { %v6563_v35 = vadd.f32 %v18445_v54, %v6524_v27  ;;  %v6525_v57 = vadd.f32 %v6395_v50, %v6006_v44 }
 0xa9d   : > { %v6595_v41 = vmax.f32 %v6563_v35, 0.0  ;;  %v6564_v33 = vadd.f32 %v18435_v63, %v6525_v57 }
 0xa9e   : > { %v6492_v9 = vpop.f32.mrf.mxu3 }
 0xa9f   : > { %6627 = vst [vmem:[%s18443_s22 + $0xe8] sm:$0xff] %v6595_v41  ;;  %v6596_v60 = vmax.f32 %v6564_v33, 0.0  ;;  %v6493_v10 = vadd.f32 %v6492_v9, %v6443_v21 }
 0xaa1   : > { %6628 = vst [vmem:[%s18443_s22 + $0xf0] sm:$0xff] %v6596_v60  ;;  %v18824_v30 = vpack.c.bf16 %v6596_v60, %v6594_v37  ;;  %v6526_v55 = vadd.f32 %v6493_v10, %v6104_v34 }
 0xaa3   : > { %v6565_v24 = vadd.f32 %v18445_v54, %v6526_v55  ;;  %7475 = vmatmul.bf16.gmra.mxu0 %v18824_v30  ;;  %7573 = vmatmul.bf16.gmra.mxu2 %v18824_v30  ;;  %v18840_v54 = vperm.slane %v18837_v39, 0 }
 0xaa5   : > { %v6597_v36 = vmax.f32 %v6565_v24, 0.0 }
 0xaa7   : > { %6629 = vst [vmem:[%s18443_s22 + $0xf8] sm:$0xff] %v6597_v36  ;;  %v18830_v63 = vpack.c.bf16 %v6597_v36, %v6595_v41 }
 0xaa9   : > { %7524 = vmatmul.bf16.gmra.mxu1 %v18830_v63  ;;  %7622 = vmatmul.bf16.gmra.mxu3 %v18830_v63 }
 0xab0   : > { %v7441_v47 = vpop.f32.mrf.mxu0 }
 0xab1   : > { %v7442_v23 = vadd.f32 %v7441_v47, %v18840_v54 }
 0xab3   : > { %7636 = vmatmul.bf16.vlgmr.msrb.gmra.mxu0 %v18454_v46  ;;  %7734 = vmatmul.bf16.vlgmr.msrb.gmra.mxu2 %v18454_v46 }
 0xab6   : > { %v7490_v38 = vpop.f32.mrf.mxu1  ;;  %v7539_v16 = vpop.f32.mrf.mxu2 }
 0xab7   : > { %v7491_v32 = vadd.f32 %v7490_v38, %v7442_v23  ;;  %v7540_v42 = vadd.f32 %v7539_v16, %v18846_v2 }
 0xab8   : > { %v7443_v45 = vpop.f32.mrf.mxu0 }
 0xab9   : > { %7685 = vmatmul.bf16.vlgmr.msrb.gmra.mxu1 %v18463_v40  ;;  %7783 = vmatmul.bf16.vlgmr.msrb.gmra.mxu3 %v18463_v40  ;;  %v7444_v20 = vadd.f32 %v7443_v45, %v18840_v54  ;;  %v8216_v62 = vmax.f32 %v7491_v32, 0.0 }
 0xabc   : > { %v7588_v59 = vpop.f32.mrf.mxu3 }
 0xabd   : > { %v7589_v6 = vadd.f32 %v7588_v59, %v7540_v42 }
 0xabe   : > { %v7492_v51 = vpop.f32.mrf.mxu1  ;;  %v7541_v26 = vpop.f32.mrf.mxu2 }
 0xabf   : > { %v7493_v56 = vadd.f32 %v7492_v51, %v7444_v20  ;;  %v7542_v13 = vadd.f32 %v7541_v26, %v18846_v2  ;;  %v8217_v61 = vmax.f32 %v7589_v6, 0.0 }
 0xac0   : > { %v7446_v22 = vpop.f32.mrf.mxu0 }
 0xac1   : > { %v8224_v0 = vmax.f32 %v7493_v56, 0.0  ;;  %v7447_v52 = vadd.f32 %v7446_v22, %v18840_v54 }
 0xac3   : > { %v18852_v15 = vpack.c.bf16 %v8224_v0, %v8216_v62  ;;  %7641 = vmatmul.bf16.gmra.mxu0 %v18474_v19  ;;  %7739 = vmatmul.bf16.gmra.mxu2 %v18474_v19 }
 0xac4   : > { %v7590_v28 = vpop.f32.mrf.mxu3 }
 0xac5   : > { %v7591_v8 = vadd.f32 %v7590_v28, %v7542_v13 }
 0xac6   : > { %v7495_v4 = vpop.f32.mrf.mxu1  ;;  %v7544_v37 = vpop.f32.mrf.mxu2 }
 0xac7   : > { %v8225_v7 = vmax.f32 %v7591_v8, 0.0  ;;  %v7496_v48 = vadd.f32 %v7495_v4, %v7447_v52  ;;  %v7545_v50 = vadd.f32 %v7544_v37, %v18846_v2 }
 0xac8   : > { %v7448_v44 = vpop.f32.mrf.mxu0 }
 0xac9   : > { %v18858_v27 = vpack.c.bf16 %v8225_v7, %v8217_v61  ;;  %7690 = vmatmul.bf16.gmra.mxu1 %v18483_v25  ;;  %7788 = vmatmul.bf16.gmra.mxu3 %v18483_v25  ;;  %v7449_v57 = vadd.f32 %v7448_v44, %v18840_v54  ;;  %v8232_v21 = vmax.f32 %v7496_v48, 0.0 }
 0xacc   : > { %v7593_v35 = vpop.f32.mrf.mxu3 }
 0xacd   : > { %v7594_v14 = vadd.f32 %v7593_v35, %v7545_v50 }
 0xace   : > { %v7497_v18 = vpop.f32.mrf.mxu1  ;;  %v7546_v58 = vpop.f32.mrf.mxu2 }
 0xacf   : > { %v7498_v41 = vadd.f32 %v7497_v18, %v7449_v57  ;;  %v7547_v17 = vadd.f32 %v7546_v58, %v18846_v2  ;;  %v8233_v47 = vmax.f32 %v7594_v14, 0.0 }
 0xad0   : > { %v7451_v33 = vpop.f32.mrf.mxu0 }
 0xad1   : > { %v8240_v9 = vmax.f32 %v7498_v41, 0.0  ;;  %v7452_v10 = vadd.f32 %v7451_v33, %v18840_v54 }
 0xad3   : > { %7646 = vmatmul.bf16.gmra.mxu0 %v18494_v3  ;;  %7744 = vmatmul.bf16.gmra.mxu2 %v18494_v3  ;;  %v18867_v34 = vpack.c.bf16 %v8240_v9, %v8232_v21 }
 0xad4   : > { %v7595_v60 = vpop.f32.mrf.mxu3 }
 0xad5   : > { %v7596_v55 = vadd.f32 %v7595_v60, %v7547_v17  ;;  %v12303_v60 = vld [vmem:[%s20720_s5 + $0x1d0] sm:$0xf] }
 0xad6   : > { %v7500_v24 = vpop.f32.mrf.mxu1  ;;  %v7549_v36 = vpop.f32.mrf.mxu2 }
 0xad7   : > { %v8241_v23 = vmax.f32 %v7596_v55, 0.0  ;;  %v7501_v38 = vadd.f32 %v7500_v24, %v7452_v10  ;;  %v7550_v45 = vadd.f32 %v7549_v36, %v18846_v2  ;;  %v13552_v10 = vld [vmem:[%s20720_s5 + $0x1ec] sm:$0xf0]  ;;  %v13548_v24 = vld [vmem:[%s20720_s5 + $0x1d4] sm:$0xf] }
 0xad8   : > { %v7453_v16 = vpop.f32.mrf.mxu0  ;;  %v12304_v55 = vor.u32 %v13552_v10, %v12303_v60  ;;  %v12305_v36 = vld [vmem:[%s20720_s5 + $0x1f0] sm:$0xf0] }
 0xad9   : > { %7695 = vmatmul.bf16.gmra.mxu1 %v18503_v43  ;;  %7793 = vmatmul.bf16.gmra.mxu3 %v18503_v43  ;;  %v18872_v32 = vpack.c.bf16 %v8241_v23, %v8233_v47  ;;  %v7454_v59 = vadd.f32 %v7453_v16, %v18840_v54  ;;  %v8248_v22 = vmax.f32 %v7501_v38, 0.0  ;;  %v12308_v23 = vor.u32 %v13548_v24, %v12305_v36  ;;  %v13604_v60 = vld [vmem:[%s20720_s5 + $0x394] sm:$0xf] }
 0xada   : > { %7824 = vmatpush.bf16.msra.mxu0 %v12304_v55  ;;  %v12529_v24 = vld [vmem:[%s20720_s5 + $0x3b0] sm:$0xf0] }
 0xadb   : > { %7922 = vmatpush.bf16.msra.mxu2 %v12308_v23  ;;  %v12532_v23 = vor.u32 %v13604_v60, %v12529_v24 }
 0xadc   : > { %v7598_v42 = vpop.f32.mrf.mxu3 }
 0xadd   : > { %v7599_v20 = vadd.f32 %v7598_v42, %v7550_v45 }
 0xade   : > { %v7502_v6 = vpop.f32.mrf.mxu1  ;;  %v7551_v51 = vpop.f32.mrf.mxu2 }
 0xadf   : > { %v7503_v26 = vadd.f32 %v7502_v6, %v7454_v59  ;;  %v7552_v0 = vadd.f32 %v7551_v51, %v18846_v2  ;;  %v8249_v61 = vmax.f32 %v7599_v20, 0.0  ;;  %v12271_v59 = vld [vmem:[%s20720_s5 + $0x190] sm:$0xf]  ;;  %v13540_v6 = vld [vmem:[%s20720_s5 + $0x194] sm:$0xf] }
 0xae0   : > { %v7456_v56 = vpop.f32.mrf.mxu0  ;;  %v13544_v20 = vld [vmem:[%s20720_s5 + $0x1ac] sm:$0xf0] }
 0xae1   : > { %v8256_v62 = vmax.f32 %v7503_v26, 0.0  ;;  %v7457_v52 = vadd.f32 %v7456_v56, %v18840_v54  ;;  %v12272_v56 = vor.u32 %v13544_v20, %v12271_v59 }
 0xae3   : > { %7651 = vmatmul.bf16.gmra.mxu0 %v18514_v5  ;;  %7749 = vmatmul.bf16.gmra.mxu2 %v18514_v5  ;;  %v18879_v13 = vpack.c.bf16 %v8256_v62, %v8248_v22  ;;  %v12273_v22 = vld [vmem:[%s20720_s5 + $0x1b0] sm:$0xf0] }
 0xae4   : > { %v7600_v28 = vpop.f32.mrf.mxu3  ;;  %7825 = vmatpush.bf16.msra.mxu0 %v12272_v56 }
 0xae5   : > { %v7601_v8 = vadd.f32 %v7600_v28, %v7552_v0 }
 0xae6   : > { %v7505_v4 = vpop.f32.mrf.mxu1  ;;  %v7554_v37 = vpop.f32.mrf.mxu2 }
 0xae7   : > { %v8257_v7 = vmax.f32 %v7601_v8, 0.0  ;;  %v7506_v48 = vadd.f32 %v7505_v4, %v7457_v52  ;;  %v7555_v35 = vadd.f32 %v7554_v37, %v18846_v2  ;;  %v12276_v52 = vor.u32 %v13540_v6, %v12273_v22  ;;  %v12559_v8 = vld [vmem:[%s20720_s5 + $0x3d0] sm:$0xf] }
 0xae8   : > { %v7458_v44 = vpop.f32.mrf.mxu0  ;;  %v13616_v4 = vld [vmem:[%s20720_s5 + $0x3ec] sm:$0xf0] }
 0xae9   : > { %7700 = vmatmul.bf16.gmra.mxu1 %v18525_v29  ;;  %7798 = vmatmul.bf16.gmra.mxu3 %v18525_v29  ;;  %v18884_v50 = vpack.c.bf16 %v8257_v7, %v8249_v61  ;;  %v7459_v14 = vadd.f32 %v7458_v44, %v18840_v54  ;;  %v8264_v9 = vmax.f32 %v7506_v48, 0.0  ;;  %v12560_v61 = vor.u32 %v13616_v4, %v12559_v8  ;;  %v13612_v7 = vld [vmem:[%s20720_s5 + $0x3d4] sm:$0xf]  ;;  %v12495_v22 = vld [vmem:[%s20720_s5 + $0x350] sm:$0xf] }
 0xaea   : > { %v12561_v48 = vld [vmem:[%s20720_s5 + $0x3f0] sm:$0xf0]  ;;  %7923 = vmatpush.bf16.msra.mxu2 %v12276_v52 }
 0xaeb   : > { %v12564_v44 = vor.u32 %v13612_v7, %v12561_v48  ;;  %7873 = vmatpush.bf16.msra.mxu1 %v12560_v61  ;;  %v13596_v8 = vld [vmem:[%s20720_s5 + $0x354] sm:$0xf]  ;;  %v12175_v48 = vld [vmem:[%s20720_s5 + $0xd0] sm:$0xf] }
 0xaec   : > { %v7603_v57 = vpop.f32.mrf.mxu3  ;;  %v12497_v4 = vld [vmem:[%s20720_s5 + $0x370] sm:$0xf0] }
 0xaed   : > { %v7604_v18 = vadd.f32 %v7603_v57, %v7555_v35  ;;  %v12239_v35 = vld [vmem:[%s20720_s5 + $0x150] sm:$0xf]  ;;  %7971 = vmatpush.bf16.msra.mxu3 %v12564_v44  ;;  %v12500_v7 = vor.u32 %v13596_v8, %v12497_v4  ;;  %v12433_v4 = vld [vmem:[%s20720_s5 + $0x2f0] sm:$0xf0] }
 0xaee   : > { %v7507_v58 = vpop.f32.mrf.mxu1  ;;  %v7556_v41 = vpop.f32.mrf.mxu2  ;;  %v13536_v57 = vld [vmem:[%s20720_s5 + $0x16c] sm:$0xf0] }
 0xaef   : > { %v7508_v33 = vadd.f32 %v7507_v58, %v7459_v14  ;;  %v7557_v47 = vadd.f32 %v7556_v41, %v18846_v2  ;;  %v8265_v62 = vmax.f32 %v7604_v18, 0.0  ;;  %v12240_v18 = vor.u32 %v13536_v57, %v12239_v35  ;;  %v13532_v58 = vld [vmem:[%s20720_s5 + $0x154] sm:$0xf]  ;;  %v13520_v44 = vld [vmem:[%s20720_s5 + $0xec] sm:$0xf0] }
 0xaf0   : > { %v7461_v21 = vpop.f32.mrf.mxu0  ;;  %v12241_v41 = vld [vmem:[%s20720_s5 + $0x170] sm:$0xf0]  ;;  %v12176_v35 = vor.u32 %v13520_v44, %v12175_v48 }
 0xaf1   : > { %v8272_v17 = vmax.f32 %v7508_v33, 0.0  ;;  %v7462_v45 = vadd.f32 %v7461_v21, %v18840_v54  ;;  %v12244_v21 = vor.u32 %v13532_v58, %v12241_v41  ;;  %7826 = vmatpush.bf16.msra.mxu0 %v12240_v18  ;;  %7972 = vmatpush.bf16.msra.mxu3 %v12532_v23  ;;  %v13516_v57 = vld [vmem:[%s20720_s5 + $0xd4] sm:$0xf]  ;;  %v12463_v41 = vld [vmem:[%s20720_s5 + $0x310] sm:$0xf] }
 0xaf2   : > { %v12143_v23 = vld [vmem:[%s20720_s5 + $0x90] sm:$0xf] }
 0xaf3   : > { %7656 = vmatmul.bf16.gmra.mxu0 %v18539_v53  ;;  %7754 = vmatmul.bf16.gmra.mxu2 %v18539_v53  ;;  %v18903_v38 = vpack.c.bf16 %v8272_v17, %v8264_v9  ;;  %v12527_v9 = vld [vmem:[%s20720_s5 + $0x390] sm:$0xf] }
 0xaf4   : > { %v7605_v16 = vpop.f32.mrf.mxu3  ;;  %v13608_v17 = vld [vmem:[%s20720_s5 + $0x3ac] sm:$0xf0]  ;;  %7924 = vmatpush.bf16.msra.mxu2 %v12244_v21  ;;  %v13588_v21 = vld [vmem:[%s20720_s5 + $0x314] sm:$0xf] }
 0xaf5   : > { %v7606_v42 = vadd.f32 %v7605_v16, %v7557_v47  ;;  %v12528_v55 = vor.u32 %v13608_v17, %v12527_v9  ;;  %v12207_v16 = vld [vmem:[%s20720_s5 + $0x110] sm:$0xf]  ;;  %7973 = vmatpush.bf16.msra.mxu3 %v12500_v7 }
 0xaf6   : > { %v7510_v51 = vpop.f32.mrf.mxu1  ;;  %v7559_v26 = vpop.f32.mrf.mxu2  ;;  %v13504_v7 = vld [vmem:[%s20720_s5 + $0x6c] sm:$0xf0] }
 0xaf7   : > { %v8273_v0 = vmax.f32 %v7606_v42, 0.0  ;;  %v18918_v28 = vadd.f32 %v7510_v51, %v7462_v45  ;;  %v7560_v33 = vadd.f32 %v7559_v26, %v18846_v2  ;;  %v13528_v45 = vld [vmem:[%s20720_s5 + $0x12c] sm:$0xf0]  ;;  %v13524_v42 = vld [vmem:[%s20720_s5 + $0x114] sm:$0xf]  ;;  %7874 = vmatpush.bf16.msra.mxu1 %v12528_v55 }
 0xaf8   : > { %v7463_v37 = vpop.f32.mrf.mxu0  ;;  %v12208_v6 = vor.u32 %v13528_v45, %v12207_v16  ;;  %v12209_v51 = vld [vmem:[%s20720_s5 + $0x130] sm:$0xf0]  ;;  %v13512_v16 = vld [vmem:[%s20720_s5 + $0xac] sm:$0xf0] }
 0xaf9   : > { %7705 = vmatmul.bf16.gmra.mxu1 %v18575_v49  ;;  %7803 = vmatmul.bf16.gmra.mxu3 %v18575_v49  ;;  %v18940_v14 = vpack.c.bf16 %v8273_v0, %v8265_v62  ;;  %v7464_v36 = vadd.f32 %v7463_v37, %v18840_v54  ;;  %v12212_v56 = vor.u32 %v13524_v42, %v12209_v51  ;;  %v13600_v62 = vld [vmem:[%s20720_s5 + $0x36c] sm:$0xf0]  ;;  %v8280_v37 = vmax.f32 %v18918_v28, 0.0  ;;  %v12177_v28 = vld [vmem:[%s20720_s5 + $0xf0] sm:$0xf0] }
 0xafa   : > { %7827 = vmatpush.bf16.msra.mxu0 %v12208_v6  ;;  %v12496_v52 = vor.u32 %v13600_v62, %v12495_v22  ;;  %v12180_v58 = vor.u32 %v13516_v57, %v12177_v28  ;;  %v13508_v45 = vld [vmem:[%s20720_s5 + $0x94] sm:$0xf]  ;;  %v12431_v62 = vld [vmem:[%s20720_s5 + $0x2d0] sm:$0xf] }
 0xafb   : > { %7925 = vmatpush.bf16.msra.mxu2 %v12212_v56  ;;  %v12145_v6 = vld [vmem:[%s20720_s5 + $0xb0] sm:$0xf0] }
 0xafc   : > { %v7608_v10 = vpop.f32.mrf.mxu3  ;;  %7875 = vmatpush.bf16.msra.mxu1 %v12496_v52  ;;  %v12148_v22 = vor.u32 %v13508_v45, %v12145_v6  ;;  %v12113_v57 = vld [vmem:[%s20720_s5 + $0x70] sm:$0xf0] }
 0xafd   : > { %v18962_v47 = vadd.f32 %v7608_v10, %v7560_v33  ;;  %v13592_v33 = vld [vmem:[%s20720_s5 + $0x32c] sm:$0xf0]  ;;  %v12465_v10 = vld [vmem:[%s20720_s5 + $0x330] sm:$0xf0] }
 0xafe   : > { %v7512_v59 = vpop.f32.mrf.mxu1  ;;  %v7561_v20 = vpop.f32.mrf.mxu2  ;;  %7828 = vmatpush.bf16.msra.mxu0 %v12176_v35  ;;  %v12464_v60 = vor.u32 %v13592_v33, %v12463_v41  ;;  %v13500_v35 = vld [vmem:[%s20720_s5 + $0x54] sm:$0xf]  ;;  %v13576_v41 = vld [vmem:[%s20720_s5 + $0x2ac] sm:$0xf0] }
 0xaff   : > { %v7513_v26 = vadd.f32 %v7512_v59, %v7464_v36  ;;  %v7562_v18 = vadd.f32 %v7561_v20, %v18846_v2  ;;  %v12468_v36 = vor.u32 %v13588_v21, %v12465_v10  ;;  %7926 = vmatpush.bf16.msra.mxu2 %v12180_v58  ;;  %v12144_v20 = vor.u32 %v13512_v16, %v12143_v23  ;;  %v12399_v58 = vld [vmem:[%s20720_s5 + $0x290] sm:$0xf]  ;;  %v13572_v33 = vld [vmem:[%s20720_s5 + $0x294] sm:$0xf] }
 0xb00   : > { %v7466_v0 = vpop.f32.mrf.mxu0  ;;  %7876 = vmatpush.bf16.msra.mxu1 %v12464_v60  ;;  %v8281_v51 = vmax.f32 %v18962_v47, 0.0  ;;  %v13580_v47 = vld [vmem:[%s20720_s5 + $0x2d4] sm:$0xf]  ;;  %v13496_v23 = vld [vmem:[%s20720_s5 + $0x2c] sm:$0xf0] }
 0xb01   : > { %v8288_v61 = vmax.f32 %v7513_v26, 0.0  ;;  %v7467_v55 = vadd.f32 %v7466_v0, %v18840_v54  ;;  %v13584_v0 = vld [vmem:[%s20720_s5 + $0x2ec] sm:$0xf0]  ;;  %7974 = vmatpush.bf16.msra.mxu3 %v12468_v36  ;;  %v12401_v60 = vld [vmem:[%s20720_s5 + $0x2b0] sm:$0xf0] }
 0xb02   : > { %7829 = vmatpush.bf16.msra.mxu0 %v12144_v20  ;;  %v12432_v8 = vor.u32 %v13584_v0, %v12431_v62  ;;  %v12079_v36 = vld [vmem:[%s20720_s5 + $0x10] sm:$0xf]  ;;  %v13492_v16 = vld [vmem:[%s20720_s5 + $0x14] sm:$0xf] }
 0xb03   : > { %7661 = vmatmul.bf16.gmra.mxu0 %v18659_v31  ;;  %7759 = vmatmul.bf16.gmra.mxu2 %v18659_v31  ;;  %v19013_v9 = vpack.c.bf16 %v8288_v61, %v8280_v37  ;;  %v12436_v37 = vor.u32 %v13580_v47, %v12433_v4  ;;  %v12111_v61 = vld [vmem:[%s20720_s5 + $0x50] sm:$0xf]  ;;  %v12081_v20 = vld [vmem:[%s20720_s5 + $0x30] sm:$0xf0] }
 0xb04   : > { %v7610_v17 = vpop.f32.mrf.mxu3  ;;  %7927 = vmatpush.bf16.msra.mxu2 %v12148_v22  ;;  %7877 = vmatpush.bf16.msra.mxu1 %v12432_v8  ;;  %v12112_v44 = vor.u32 %v13504_v7, %v12111_v61  ;;  %v12084_v62 = vor.u32 %v13492_v16, %v12081_v20  ;;  %v12369_v8 = vld [vmem:[%s20720_s5 + $0x270] sm:$0xf0]  ;;  %v12335_v7 = vld [vmem:[%s20720_s5 + $0x210] sm:$0xf] }
 0xb05   : > { %v7611_v24 = vadd.f32 %v7610_v17, %v7562_v18  ;;  %v12116_v18 = vor.u32 %v13500_v35, %v12113_v57  ;;  %7975 = vmatpush.bf16.msra.mxu3 %v12436_v37  ;;  %v12400_v17 = vor.u32 %v13576_v41, %v12399_v58 }
 0xb06   : > { %v7515_v42 = vpop.f32.mrf.mxu1  ;;  %v7564_v59 = vpop.f32.mrf.mxu2  ;;  %7830 = vmatpush.bf16.msra.mxu0 %v12112_v44  ;;  %v13560_v44 = vld [vmem:[%s20720_s5 + $0x22c] sm:$0xf0] }
 0xb07   : > { %v8289_v26 = vmax.f32 %v7611_v24, 0.0  ;;  %v19032_v56 = vadd.f32 %v7515_v42, %v7467_v55  ;;  %v7565_v28 = vadd.f32 %v7564_v59, %v18846_v2  ;;  %v12404_v24 = vor.u32 %v13572_v33, %v12401_v60 }
 0xb08   : > { %v7468_v52 = vpop.f32.mrf.mxu0  ;;  %7928 = vmatpush.bf16.msra.mxu2 %v12116_v18  ;;  %7878 = vmatpush.bf16.msra.mxu1 %v12400_v17  ;;  %v12080_v59 = vor.u32 %v13496_v23, %v12079_v36  ;;  %v12337_v18 = vld [vmem:[%s20720_s5 + $0x230] sm:$0xf0] }
 0xb09   : > { %7710 = vmatmul.bf16.gmra.mxu1 %v18709_v1  ;;  %7808 = vmatmul.bf16.gmra.mxu3 %v18709_v1  ;;  %v19054_v48 = vpack.c.bf16 %v8289_v26, %v8281_v51  ;;  %v7469_v10 = vadd.f32 %v7468_v52, %v18840_v54  ;;  %v12367_v51 = vld [vmem:[%s20720_s5 + $0x250] sm:$0xf]  ;;  %v13564_v52 = vld [vmem:[%s20720_s5 + $0x254] sm:$0xf]  ;;  %v8296_v47 = vmax.f32 %v19032_v56, 0.0 }
 0xb0a   : > { %v13568_v26 = vld [vmem:[%s20720_s5 + $0x26c] sm:$0xf0]  ;;  %7976 = vmatpush.bf16.msra.mxu3 %v12404_v24  ;;  %7831 = vmatpush.bf16.msra.mxu0 %v12080_v59  ;;  %v12372_v37 = vor.u32 %v13564_v52, %v12369_v8  ;;  %v13556_v56 = vld [vmem:[%s20720_s5 + $0x214] sm:$0xf] }
 0xb0b   : > { %20792 = vst [vmem:[#allocation2_spill] sm:$0xff] %v19054_v48  ;;  %v12368_v0 = vor.u32 %v13568_v26, %v12367_v51  ;;  %v12340_v33 = vor.u32 %v13556_v56, %v12337_v18 }
 0xb0c   : > { %v7613_v21 = vpop.f32.mrf.mxu3  ;;  %7929 = vmatpush.bf16.msra.mxu2 %v12084_v62 }
 0xb0d   : > { %v7614_v55 = vadd.f32 %v7613_v21, %v7565_v28  ;;  %7879 = vmatpush.bf16.msra.mxu1 %v12368_v0  ;;  %v12336_v28 = vor.u32 %v13560_v44, %v12335_v7 }
 0xb0e   : > { %v7517_v45 = vpop.f32.mrf.mxu1  ;;  %v7566_v42 = vpop.f32.mrf.mxu2  ;;  %7977 = vmatpush.bf16.msra.mxu3 %v12372_v37 }
 0xb0f   : > { %v7518_v6 = vadd.f32 %v7517_v45, %v7469_v10  ;;  %v7567_v61 = vadd.f32 %v7566_v42, %v18846_v2  ;;  %v8297_v60 = vmax.f32 %v7614_v55, 0.0 }
 0xb10   : > { %v7471_v22 = vpop.f32.mrf.mxu0 }
 0xb11   : > { %v8304_v4 = vmax.f32 %v7518_v6, 0.0  ;;  %v7472_v58 = vadd.f32 %v7471_v22, %v18840_v54  ;;  %7880 = vmatpush.bf16.msra.mxu1 %v12336_v28 }
 0xb12   : > { %7978 = vmatpush.bf16.msra.mxu3 %v12340_v33 }
 0xb13   : > { %7666 = vmatmul.bf16.gmra.mxu0 %v18788_v12  ;;  %7764 = vmatmul.bf16.gmra.mxu2 %v18788_v12  ;;  %v19113_v35 = vpack.c.bf16 %v8304_v4, %v8296_v47 }
 0xb14   : > { %v7615_v57 = vpop.f32.mrf.mxu3 }
 0xb15   : > { %20793 = vst [vmem:[#allocation6_spill] sm:$0xff] %v19113_v35  ;;  %v7616_v41 = vadd.f32 %v7615_v57, %v7567_v61 }
 0xb16   : > { %v7520_v21 = vpop.f32.mrf.mxu1  ;;  %v7569_v17 = vpop.f32.mrf.mxu2 }
 0xb17   : > { %v8305_v10 = vmax.f32 %v7616_v41, 0.0  ;;  %v7521_v24 = vadd.f32 %v7520_v21, %v7472_v58  ;;  %v7570_v16 = vadd.f32 %v7569_v17, %v18846_v2 }
 0xb18   : > { %v7473_v36 = vpop.f32.mrf.mxu0 }
 0xb19   : > { %7715 = vmatmul.bf16.gmra.mxu1 %v18810_v11  ;;  %7813 = vmatmul.bf16.gmra.mxu3 %v18810_v11  ;;  %v19121_v23 = vpack.c.bf16 %v8305_v10, %v8297_v60  ;;  %v7474_v42 = vadd.f32 %v7473_v36, %v18840_v54  ;;  %v8312_v26 = vmax.f32 %v7521_v24, 0.0  ;;  %v19138_v36 = vperm.slane %v18837_v39, 2 }
 0xb1b   : > { %20794 = vst [vmem:[#allocation5_spill] sm:$0xff] %v19121_v23 }
 0xb1c   : > { %v7618_v45 = vpop.f32.mrf.mxu3 }
 0xb1d   : > { %v7619_v59 = vadd.f32 %v7618_v45, %v7570_v16 }
 0xb1e   : > { %v7522_v20 = vpop.f32.mrf.mxu1  ;;  %v7571_v6 = vpop.f32.mrf.mxu2 }
 0xb1f   : > { %v7523_v51 = vadd.f32 %v7522_v20, %v7474_v42  ;;  %v7572_v62 = vadd.f32 %v7571_v6, %v18846_v2  ;;  %v8313_v61 = vmax.f32 %v7619_v59, 0.0 }
 0xb20   : > { %v7476_v55 = vpop.f32.mrf.mxu0 }
 0xb21   : > { %v8320_v22 = vmax.f32 %v7523_v51, 0.0  ;;  %v7477_v8 = vadd.f32 %v7476_v55, %v18840_v54 }
 0xb23   : > { %7671 = vmatmul.bf16.gmra.mxu0 %v18824_v30  ;;  %7769 = vmatmul.bf16.gmra.mxu2 %v18824_v30  ;;  %v19128_v0 = vpack.c.bf16 %v8320_v22, %v8312_v26  ;;  %v19147_v22 = vperm.slane %v18837_v39, 3 }
 0xb24   : > { %v7620_v52 = vpop.f32.mrf.mxu3 }
 0xb25   : > { %20795 = vst [vmem:[#allocation3_spill] sm:$0xff] %v19128_v0  ;;  %v7621_v47 = vadd.f32 %v7620_v52, %v7572_v62 }
 0xb26   : > { %v7525_v4 = vpop.f32.mrf.mxu1  ;;  %v7574_v37 = vpop.f32.mrf.mxu2 }
 0xb27   : > { %v8321_v7 = vmax.f32 %v7621_v47, 0.0  ;;  %v7526_v44 = vadd.f32 %v7525_v4, %v7477_v8  ;;  %v7575_v28 = vadd.f32 %v7574_v37, %v18846_v2 }
 0xb28   : > { %v7478_v56 = vpop.f32.mrf.mxu0 }
 0xb29   : > { %7720 = vmatmul.bf16.gmra.mxu1 %v18830_v63  ;;  %7818 = vmatmul.bf16.gmra.mxu3 %v18830_v63  ;;  %v19133_v57 = vpack.c.bf16 %v8321_v7, %v8313_v61  ;;  %v7479_v58 = vadd.f32 %v7478_v56, %v18840_v54  ;;  %v8328_v10 = vmax.f32 %v7526_v44, 0.0 }
 0xb2c   : > { %v7623_v18 = vpop.f32.mrf.mxu3 }
 0xb2d   : > { %v7624_v41 = vadd.f32 %v7623_v18, %v7575_v28 }
 0xb2e   : > { %v7527_v33 = vpop.f32.mrf.mxu1  ;;  %v7576_v21 = vpop.f32.mrf.mxu2 }
 0xb2f   : > { %v7528_v17 = vadd.f32 %v7527_v33, %v7479_v58  ;;  %v7577_v16 = vadd.f32 %v7576_v21, %v18846_v2  ;;  %v8329_v51 = vmax.f32 %v7624_v41, 0.0 }
 0xb30   : > { %v7637_v60 = vpop.f32.mrf.mxu0 }
 0xb31   : > { %v8336_v24 = vmax.f32 %v7528_v17, 0.0  ;;  %v7638_v54 = vadd.f32 %v7637_v60, %v19138_v36 }
 0xb33   : > { %7832 = vmatmul.bf16.vlgmr.msra.gmra.mxu0 %v18454_v46  ;;  %7930 = vmatmul.bf16.vlgmr.msra.gmra.mxu2 %v18454_v46  ;;  %v19143_v45 = vpack.c.bf16 %v8336_v24, %v8328_v10 }
 0xb34   : > { %v7625_v42 = vpop.f32.mrf.mxu3 }
 0xb35   : > { %20796 = vst [vmem:[#allocation4_spill] sm:$0xff] %v19143_v45  ;;  %v7626_v59 = vadd.f32 %v7625_v42, %v7577_v16 }
 0xb36   : > { %v7686_v20 = vpop.f32.mrf.mxu1  ;;  %v7735_v6 = vpop.f32.mrf.mxu2 }
 0xb37   : > { %v8337_v55 = vmax.f32 %v7626_v59, 0.0  ;;  %v7687_v26 = vadd.f32 %v7686_v20, %v7638_v54  ;;  %v7736_v52 = vadd.f32 %v7735_v6, %v19147_v22 }
 0xb38   : > { %v7639_v62 = vpop.f32.mrf.mxu0 }
 0xb39   : > { %7881 = vmatmul.bf16.vlgmr.msra.gmra.mxu1 %v18463_v40  ;;  %7979 = vmatmul.bf16.vlgmr.msra.gmra.mxu3 %v18463_v40  ;;  %v19151_v2 = vpack.c.bf16 %v8337_v55, %v8329_v51  ;;  %v7640_v47 = vadd.f32 %v7639_v62, %v19138_v36  ;;  %v8218_v56 = vmax.f32 %v7687_v26, 0.0 }
 0xb3b   : > { %20797 = vst [vmem:[#allocation7_spill] sm:$0xff] %v19151_v2 }
 0xb3c   : > { %v7784_v8 = vpop.f32.mrf.mxu3 }
 0xb3d   : > { %v7785_v4 = vadd.f32 %v7784_v8, %v7736_v52 }
 0xb3e   : > { %v7688_v37 = vpop.f32.mrf.mxu1  ;;  %v7737_v61 = vpop.f32.mrf.mxu2 }
 0xb3f   : > { %v7689_v7 = vadd.f32 %v7688_v37, %v7640_v47  ;;  %v7738_v18 = vadd.f32 %v7737_v61, %v19147_v22  ;;  %v8219_v60 = vmax.f32 %v7785_v4, 0.0 }
 0xb40   : > { %v7642_v44 = vpop.f32.mrf.mxu0 }
 0xb41   : > { %v8226_v39 = vmax.f32 %v7689_v7, 0.0  ;;  %v7643_v41 = vadd.f32 %v7642_v44, %v19138_v36 }
 0xb43   : > { %v19155_v28 = vpack.c.bf16 %v8226_v39, %v8218_v56  ;;  %7837 = vmatmul.bf16.gmra.mxu0 %v18474_v19  ;;  %7935 = vmatmul.bf16.gmra.mxu2 %v18474_v19 }
 0xb44   : > { %v7786_v58 = vpop.f32.mrf.mxu3 }
 0xb45   : > { %v7787_v33 = vadd.f32 %v7786_v58, %v7738_v18 }
 0xb46   : > { %v7691_v21 = vpop.f32.mrf.mxu1  ;;  %v7740_v17 = vpop.f32.mrf.mxu2 }
 0xb47   : > { %v8227_v10 = vmax.f32 %v7787_v33, 0.0  ;;  %v7692_v24 = vadd.f32 %v7691_v21, %v7643_v41  ;;  %v7741_v54 = vadd.f32 %v7740_v17, %v19147_v22 }
 0xb48   : > { %v7644_v16 = vpop.f32.mrf.mxu0 }
 0xb49   : > { %v19161_v42 = vpack.c.bf16 %v8227_v10, %v8219_v60  ;;  %7886 = vmatmul.bf16.gmra.mxu1 %v18483_v25  ;;  %7984 = vmatmul.bf16.gmra.mxu3 %v18483_v25  ;;  %v7645_v20 = vadd.f32 %v7644_v16, %v19138_v36  ;;  %v8234_v52 = vmax.f32 %v7692_v24, 0.0 }
 0xb4c   : > { %v7789_v59 = vpop.f32.mrf.mxu3 }
 0xb4d   : > { %v7790_v6 = vadd.f32 %v7789_v59, %v7741_v54 }
 0xb4e   : > { %v7693_v51 = vpop.f32.mrf.mxu1  ;;  %v7742_v55 = vpop.f32.mrf.mxu2 }
 0xb4f   : > { %v7694_v26 = vadd.f32 %v7693_v51, %v7645_v20  ;;  %v7743_v47 = vadd.f32 %v7742_v55, %v19147_v22  ;;  %v8235_v39 = vmax.f32 %v7790_v6, 0.0 }
 0xb50   : > { %v7647_v62 = vpop.f32.mrf.mxu0 }
 0xb51   : > { %v8242_v8 = vmax.f32 %v7694_v26, 0.0  ;;  %v7648_v61 = vadd.f32 %v7647_v62, %v19138_v36 }
 0xb53   : > { %7842 = vmatmul.bf16.gmra.mxu0 %v18494_v3  ;;  %7940 = vmatmul.bf16.gmra.mxu2 %v18494_v3  ;;  %v19170_v4 = vpack.c.bf16 %v8242_v8, %v8234_v52 }
 0xb54   : > { %v7791_v37 = vpop.f32.mrf.mxu3 }
 0xb55   : > { %v7792_v7 = vadd.f32 %v7791_v37, %v7743_v47 }
 0xb56   : > { %v7696_v44 = vpop.f32.mrf.mxu1  ;;  %v7745_v56 = vpop.f32.mrf.mxu2 }
 0xb57   : > { %v8243_v18 = vmax.f32 %v7792_v7, 0.0  ;;  %v7697_v58 = vadd.f32 %v7696_v44, %v7648_v61  ;;  %v7746_v21 = vadd.f32 %v7745_v56, %v19147_v22 }
 0xb58   : > { %v7649_v41 = vpop.f32.mrf.mxu0 }
 0xb59   : > { %7891 = vmatmul.bf16.gmra.mxu1 %v18503_v43  ;;  %7989 = vmatmul.bf16.gmra.mxu3 %v18503_v43  ;;  %v19175_v33 = vpack.c.bf16 %v8243_v18, %v8235_v39  ;;  %v7650_v60 = vadd.f32 %v7649_v41, %v19138_v36  ;;  %v8250_v20 = vmax.f32 %v7697_v58, 0.0 }
 0xb5c   : > { %v7794_v17 = vpop.f32.mrf.mxu3 }
 0xb5d   : > { %v7795_v10 = vadd.f32 %v7794_v17, %v7746_v21 }
 0xb5e   : > { %v7698_v24 = vpop.f32.mrf.mxu1  ;;  %v7747_v16 = vpop.f32.mrf.mxu2 }
 0xb5f   : > { %v7699_v54 = vadd.f32 %v7698_v24, %v7650_v60  ;;  %v7748_v51 = vadd.f32 %v7747_v16, %v19147_v22  ;;  %v8251_v37 = vmax.f32 %v7795_v10, 0.0 }
 0xb60   : > { %v7652_v59 = vpop.f32.mrf.mxu0 }
 0xb61   : > { %v8258_v6 = vmax.f32 %v7699_v54, 0.0  ;;  %v7653_v62 = vadd.f32 %v7652_v59, %v19138_v36  ;;  %v12311_v54 = vld [vmem:[%s20720_s5 + $0x1d8] sm:$0xf] }
 0xb62   : > { %v13553_v59 = vld [vmem:[%s20720_s5 + $0x1f4] sm:$0xf0] }
 0xb63   : > { %7847 = vmatmul.bf16.gmra.mxu0 %v18514_v5  ;;  %7945 = vmatmul.bf16.gmra.mxu2 %v18514_v5  ;;  %v19182_v55 = vpack.c.bf16 %v8258_v6, %v8250_v20  ;;  %v12312_v20 = vor.u32 %v13553_v59, %v12311_v54  ;;  %v13549_v6 = vld [vmem:[%s20720_s5 + $0x1dc] sm:$0xf]  ;;  %v13617_v54 = vld [vmem:[%s20720_s5 + $0x3f4] sm:$0xf0] }
 0xb64   : > { %v7796_v26 = vpop.f32.mrf.mxu3 }
 0xb65   : > { %20798 = vst [vmem:[#allocation8_spill] sm:$0xff] %v19182_v55  ;;  %v7797_v52 = vadd.f32 %v7796_v26, %v7748_v51  ;;  %v12313_v51 = vld [vmem:[%s20720_s5 + $0x1f8] sm:$0xf0]  ;;  %8020 = vmatpush.bf16.msrb.mxu0 %v12312_v20 }
 0xb66   : > { %v7701_v8 = vpop.f32.mrf.mxu1  ;;  %v7750_v47 = vpop.f32.mrf.mxu2 }
 0xb67   : > { %v8259_v61 = vmax.f32 %v7797_v52, 0.0  ;;  %v7702_v7 = vadd.f32 %v7701_v8, %v7653_v62  ;;  %v7751_v39 = vadd.f32 %v7750_v47, %v19147_v22  ;;  %v12316_v62 = vor.u32 %v13549_v6, %v12313_v51  ;;  %v13613_v6 = vld [vmem:[%s20720_s5 + $0x3dc] sm:$0xf] }
 0xb68   : > { %v7654_v44 = vpop.f32.mrf.mxu0 }
 0xb69   : > { %7896 = vmatmul.bf16.gmra.mxu1 %v18525_v29  ;;  %7994 = vmatmul.bf16.gmra.mxu3 %v18525_v29  ;;  %v19187_v56 = vpack.c.bf16 %v8259_v61, %v8251_v37  ;;  %v7655_v58 = vadd.f32 %v7654_v44, %v19138_v36  ;;  %v8266_v10 = vmax.f32 %v7702_v7, 0.0  ;;  %v12279_v61 = vld [vmem:[%s20720_s5 + $0x198] sm:$0xf]  ;;  %v13541_v44 = vld [vmem:[%s20720_s5 + $0x19c] sm:$0xf] }
 0xb6a   : > { %8118 = vmatpush.bf16.msrb.mxu2 %v12316_v62  ;;  %v13545_v7 = vld [vmem:[%s20720_s5 + $0x1b4] sm:$0xf0] }
 0xb6b   : > { %20799 = vst [vmem:[#allocation9_spill] sm:$0xff] %v19187_v56  ;;  %v13537_v62 = vld [vmem:[%s20720_s5 + $0x174] sm:$0xf0] }
 0xb6c   : > { %v7799_v18 = vpop.f32.mrf.mxu3 }
 0xb6d   : > { %v7800_v41 = vadd.f32 %v7799_v18, %v7751_v39 }
 0xb6e   : > { %v7703_v21 = vpop.f32.mrf.mxu1  ;;  %v7752_v17 = vpop.f32.mrf.mxu2 }
 0xb6f   : > { %v7704_v60 = vadd.f32 %v7703_v21, %v7655_v58  ;;  %v7753_v26 = vadd.f32 %v7752_v17, %v19147_v22  ;;  %v12280_v58 = vor.u32 %v13545_v7, %v12279_v61  ;;  %v12281_v21 = vld [vmem:[%s20720_s5 + $0x1b8] sm:$0xf0]  ;;  %v8267_v17 = vmax.f32 %v7800_v41, 0.0 }
 0xb70   : > { %v7657_v24 = vpop.f32.mrf.mxu0  ;;  %v12569_v41 = vld [vmem:[%s20720_s5 + $0x3f8] sm:$0xf0] }
 0xb71   : > { %v8274_v16 = vmax.f32 %v7704_v60, 0.0  ;;  %v7658_v47 = vadd.f32 %v7657_v24, %v19138_v36  ;;  %8021 = vmatpush.bf16.msrb.mxu0 %v12280_v58  ;;  %v12572_v51 = vor.u32 %v13613_v6, %v12569_v41  ;;  %v12249_v61 = vld [vmem:[%s20720_s5 + $0x178] sm:$0xf0]  ;;  %v13609_v58 = vld [vmem:[%s20720_s5 + $0x3b4] sm:$0xf0] }
 0xb72   : > { %v13529_v6 = vld [vmem:[%s20720_s5 + $0x134] sm:$0xf0]  ;;  %v13525_v41 = vld [vmem:[%s20720_s5 + $0x11c] sm:$0xf] }
 0xb73   : > { %7852 = vmatmul.bf16.gmra.mxu0 %v18539_v53  ;;  %7950 = vmatmul.bf16.gmra.mxu2 %v18539_v53  ;;  %v19206_v52 = vpack.c.bf16 %v8274_v16, %v8266_v10  ;;  %v12284_v10 = vor.u32 %v13541_v44, %v12281_v21  ;;  %v12567_v16 = vld [vmem:[%s20720_s5 + $0x3d8] sm:$0xf]  ;;  %v13605_v21 = vld [vmem:[%s20720_s5 + $0x39c] sm:$0xf] }
 0xb74   : > { %v7801_v8 = vpop.f32.mrf.mxu3  ;;  %v12568_v20 = vor.u32 %v13617_v54, %v12567_v16  ;;  %8167 = vmatpush.bf16.msrb.mxu3 %v12572_v51 }
 0xb75   : > { %20800 = vst [vmem:[#allocation10_spill] sm:$0xff] %v19206_v52  ;;  %v7802_v37 = vadd.f32 %v7801_v8, %v7753_v26  ;;  %v12247_v26 = vld [vmem:[%s20720_s5 + $0x158] sm:$0xf]  ;;  %8119 = vmatpush.bf16.msrb.mxu2 %v12284_v10 }
 0xb76   : > { %v7706_v39 = vpop.f32.mrf.mxu1  ;;  %v7755_v18 = vpop.f32.mrf.mxu2  ;;  %8069 = vmatpush.bf16.msrb.mxu1 %v12568_v20  ;;  %v12215_v20 = vld [vmem:[%s20720_s5 + $0x118] sm:$0xf] }
 0xb77   : > { %v8275_v60 = vmax.f32 %v7802_v37, 0.0  ;;  %v19221_v24 = vadd.f32 %v7706_v39, %v7658_v47  ;;  %v12248_v47 = vor.u32 %v13537_v62, %v12247_v26  ;;  %v13533_v37 = vld [vmem:[%s20720_s5 + $0x15c] sm:$0xf]  ;;  %v7756_v7 = vadd.f32 %v7755_v18, %v19147_v22  ;;  %v12535_v39 = vld [vmem:[%s20720_s5 + $0x398] sm:$0xf] }
 0xb78   : > { %v7659_v59 = vpop.f32.mrf.mxu0  ;;  %v12252_v44 = vor.u32 %v13533_v37, %v12249_v61  ;;  %v12537_v18 = vld [vmem:[%s20720_s5 + $0x3b8] sm:$0xf0]  ;;  %v12503_v61 = vld [vmem:[%s20720_s5 + $0x358] sm:$0xf] }
 0xb79   : > { %7901 = vmatmul.bf16.gmra.mxu1 %v18575_v49  ;;  %7999 = vmatmul.bf16.gmra.mxu3 %v18575_v49  ;;  %v19243_v8 = vpack.c.bf16 %v8275_v60, %v8267_v17  ;;  %v12536_v60 = vor.u32 %v13609_v58, %v12535_v39  ;;  %v7660_v10 = vadd.f32 %v7659_v59, %v19138_v36  ;;  %v12217_v62 = vld [vmem:[%s20720_s5 + $0x138] sm:$0xf0] }
 0xb7a   : > { %8022 = vmatpush.bf16.msrb.mxu0 %v12248_v47  ;;  %v12540_v54 = vor.u32 %v13605_v21, %v12537_v18  ;;  %8120 = vmatpush.bf16.msrb.mxu2 %v12252_v44  ;;  %v12216_v59 = vor.u32 %v13529_v6, %v12215_v20  ;;  %v12220_v37 = vor.u32 %v13525_v41, %v12217_v62  ;;  %v13597_v58 = vld [vmem:[%s20720_s5 + $0x35c] sm:$0xf]  ;;  %v13593_v62 = vld [vmem:[%s20720_s5 + $0x334] sm:$0xf0] }
 0xb7b   : > { %8070 = vmatpush.bf16.msrb.mxu1 %v12536_v60  ;;  %v12505_v21 = vld [vmem:[%s20720_s5 + $0x378] sm:$0xf0] }
 0xb7c   : > { %v7804_v17 = vpop.f32.mrf.mxu3  ;;  %8168 = vmatpush.bf16.msrb.mxu3 %v12540_v54  ;;  %v12508_v18 = vor.u32 %v13597_v58, %v12505_v21  ;;  %v13521_v54 = vld [vmem:[%s20720_s5 + $0xf4] sm:$0xf0]  ;;  %v13517_v6 = vld [vmem:[%s20720_s5 + $0xdc] sm:$0xf] }
 0xb7d   : > { %v19265_v16 = vadd.f32 %v7804_v17, %v7756_v7  ;;  %v13601_v7 = vld [vmem:[%s20720_s5 + $0x374] sm:$0xf0]  ;;  %v8282_v17 = vmax.f32 %v19221_v24, 0.0  ;;  %v12185_v24 = vld [vmem:[%s20720_s5 + $0xf8] sm:$0xf0] }
 0xb7e   : > { %v7708_v51 = vpop.f32.mrf.mxu1  ;;  %v7757_v26 = vpop.f32.mrf.mxu2  ;;  %8023 = vmatpush.bf16.msrb.mxu0 %v12216_v59  ;;  %v12504_v44 = vor.u32 %v13601_v7, %v12503_v61  ;;  %8121 = vmatpush.bf16.msrb.mxu2 %v12220_v37  ;;  %v12471_v59 = vld [vmem:[%s20720_s5 + $0x318] sm:$0xf]  ;;  %v12473_v7 = vld [vmem:[%s20720_s5 + $0x338] sm:$0xf0] }
 0xb7f   : > { %v7709_v47 = vadd.f32 %v7708_v51, %v7660_v10  ;;  %v12183_v10 = vld [vmem:[%s20720_s5 + $0xd8] sm:$0xf]  ;;  %v7758_v41 = vadd.f32 %v7757_v26, %v19147_v22  ;;  %v12188_v51 = vor.u32 %v13517_v6, %v12185_v24  ;;  %v12472_v61 = vor.u32 %v13593_v62, %v12471_v59 }
 0xb80   : > { %v7662_v39 = vpop.f32.mrf.mxu0  ;;  %8071 = vmatpush.bf16.msrb.mxu1 %v12504_v44  ;;  %v12184_v20 = vor.u32 %v13521_v54, %v12183_v10  ;;  %8169 = vmatpush.bf16.msrb.mxu3 %v12508_v18  ;;  %v12151_v10 = vld [vmem:[%s20720_s5 + $0x98] sm:$0xf]  ;;  %v8283_v6 = vmax.f32 %v19265_v16, 0.0  ;;  %v13581_v16 = vld [vmem:[%s20720_s5 + $0x2dc] sm:$0xf] }
 0xb81   : > { %v8290_v60 = vmax.f32 %v7709_v47, 0.0  ;;  %v13589_v47 = vld [vmem:[%s20720_s5 + $0x31c] sm:$0xf]  ;;  %v7663_v44 = vadd.f32 %v7662_v39, %v19138_v36  ;;  %v12439_v62 = vld [vmem:[%s20720_s5 + $0x2d8] sm:$0xf] }
 0xb82   : > { %8024 = vmatpush.bf16.msrb.mxu0 %v12184_v20  ;;  %v12476_v21 = vor.u32 %v13589_v47, %v12473_v7  ;;  %8122 = vmatpush.bf16.msrb.mxu2 %v12188_v51  ;;  %v12153_v39 = vld [vmem:[%s20720_s5 + $0xb8] sm:$0xf0]  ;;  %v13585_v51 = vld [vmem:[%s20720_s5 + $0x2f4] sm:$0xf0] }
 0xb83   : > { %7857 = vmatmul.bf16.gmra.mxu0 %v18659_v31  ;;  %7955 = vmatmul.bf16.gmra.mxu2 %v18659_v31  ;;  %v19316_v37 = vpack.c.bf16 %v8290_v60, %v8282_v17  ;;  %v13513_v17 = vld [vmem:[%s20720_s5 + $0xb4] sm:$0xf0]  ;;  %v13509_v60 = vld [vmem:[%s20720_s5 + $0x9c] sm:$0xf] }
 0xb84   : > { %v7806_v26 = vpop.f32.mrf.mxu3  ;;  %8072 = vmatpush.bf16.msrb.mxu1 %v12472_v61  ;;  %v12152_v20 = vor.u32 %v13513_v17, %v12151_v10  ;;  %v12156_v59 = vor.u32 %v13509_v60, %v12153_v39  ;;  %8170 = vmatpush.bf16.msrb.mxu3 %v12476_v21  ;;  %v12441_v61 = vld [vmem:[%s20720_s5 + $0x2f8] sm:$0xf0]  ;;  %v12407_v39 = vld [vmem:[%s20720_s5 + $0x298] sm:$0xf] }
 0xb85   : > { %20801 = vst [vmem:[#allocation11_spill] sm:$0xff] %v19316_v37  ;;  %v7807_v58 = vadd.f32 %v7806_v26, %v7758_v41  ;;  %v12440_v26 = vor.u32 %v13585_v51, %v12439_v62  ;;  %v12444_v7 = vor.u32 %v13581_v16, %v12441_v61  ;;  %v13501_v17 = vld [vmem:[%s20720_s5 + $0x5c] sm:$0xf]  ;;  %v12087_v61 = vld [vmem:[%s20720_s5 + $0x18] sm:$0xf] }
 0xb86   : > { %v7711_v18 = vpop.f32.mrf.mxu1  ;;  %v7760_v54 = vpop.f32.mrf.mxu2  ;;  %8025 = vmatpush.bf16.msrb.mxu0 %v12152_v20  ;;  %8123 = vmatpush.bf16.msrb.mxu2 %v12156_v59  ;;  %v12121_v60 = vld [vmem:[%s20720_s5 + $0x78] sm:$0xf0] }
 0xb87   : > { %v8291_v24 = vmax.f32 %v7807_v58, 0.0  ;;  %v19335_v41 = vadd.f32 %v7711_v18, %v7663_v44  ;;  %v12119_v44 = vld [vmem:[%s20720_s5 + $0x58] sm:$0xf]  ;;  %v7761_v18 = vadd.f32 %v7760_v54, %v19147_v22  ;;  %v12124_v20 = vor.u32 %v13501_v17, %v12121_v60  ;;  %v12409_v54 = vld [vmem:[%s20720_s5 + $0x2b8] sm:$0xf0] }
 0xb88   : > { %v7664_v47 = vpop.f32.mrf.mxu0  ;;  %v13505_v58 = vld [vmem:[%s20720_s5 + $0x74] sm:$0xf0]  ;;  %8073 = vmatpush.bf16.msrb.mxu1 %v12440_v26  ;;  %8171 = vmatpush.bf16.msrb.mxu3 %v12444_v7  ;;  %v13493_v7 = vld [vmem:[%s20720_s5 + $0x1c] sm:$0xf] }
 0xb89   : > { %7906 = vmatmul.bf16.gmra.mxu1 %v18709_v1  ;;  %8004 = vmatmul.bf16.gmra.mxu3 %v18709_v1  ;;  %v19357_v21 = vpack.c.bf16 %v8291_v24, %v8283_v6  ;;  %v12120_v10 = vor.u32 %v13505_v58, %v12119_v44  ;;  %v13577_v6 = vld [vmem:[%s20720_s5 + $0x2b4] sm:$0xf0]  ;;  %v13573_v24 = vld [vmem:[%s20720_s5 + $0x29c] sm:$0xf]  ;;  %v7665_v51 = vadd.f32 %v7664_v47, %v19138_v36 }
 0xb8a   : > { %v12408_v62 = vor.u32 %v13577_v6, %v12407_v39  ;;  %v12412_v16 = vor.u32 %v13573_v24, %v12409_v54  ;;  %v13497_v44 = vld [vmem:[%s20720_s5 + $0x34] sm:$0xf0]  ;;  %8124 = vmatpush.bf16.msrb.mxu2 %v12124_v20  ;;  %v12089_v47 = vld [vmem:[%s20720_s5 + $0x38] sm:$0xf0]  ;;  %v8298_v54 = vmax.f32 %v19335_v41, 0.0 }
 0xb8b   : > { %20802 = vst [vmem:[#allocation12_spill] sm:$0xff] %v19357_v21  ;;  %8026 = vmatpush.bf16.msrb.mxu0 %v12120_v10  ;;  %v12088_v17 = vor.u32 %v13497_v44, %v12087_v61  ;;  %v13569_v39 = vld [vmem:[%s20720_s5 + $0x274] sm:$0xf0]  ;;  %v12092_v24 = vor.u32 %v13493_v7, %v12089_v47  ;;  %v13557_v41 = vld [vmem:[%s20720_s5 + $0x21c] sm:$0xf] }
 0xb8c   : > { %v7809_v59 = vpop.f32.mrf.mxu3  ;;  %8074 = vmatpush.bf16.msrb.mxu1 %v12408_v62  ;;  %8172 = vmatpush.bf16.msrb.mxu3 %v12412_v16  ;;  %v12377_v62 = vld [vmem:[%s20720_s5 + $0x278] sm:$0xf0]  ;;  %v12343_v16 = vld [vmem:[%s20720_s5 + $0x218] sm:$0xf] }
 0xb8d   : > { %v7810_v26 = vadd.f32 %v7809_v59, %v7761_v18  ;;  %v12375_v18 = vld [vmem:[%s20720_s5 + $0x258] sm:$0xf]  ;;  %v13565_v59 = vld [vmem:[%s20720_s5 + $0x25c] sm:$0xf] }
 0xb8e   : > { %v7713_v58 = vpop.f32.mrf.mxu1  ;;  %v7762_v10 = vpop.f32.mrf.mxu2  ;;  %v12376_v20 = vor.u32 %v13569_v39, %v12375_v18  ;;  %v12380_v61 = vor.u32 %v13565_v59, %v12377_v62  ;;  %8125 = vmatpush.bf16.msrb.mxu2 %v12092_v24  ;;  %v13561_v7 = vld [vmem:[%s20720_s5 + $0x234] sm:$0xf0]  ;;  %v12345_v47 = vld [vmem:[%s20720_s5 + $0x238] sm:$0xf0] }
 0xb8f   : > { %v7714_v60 = vadd.f32 %v7713_v58, %v7665_v51  ;;  %8027 = vmatpush.bf16.msrb.mxu0 %v12088_v17  ;;  %v7763_v44 = vadd.f32 %v7762_v10, %v19147_v22  ;;  %v12344_v10 = vor.u32 %v13561_v7, %v12343_v16  ;;  %v12348_v39 = vor.u32 %v13557_v41, %v12345_v47 }
 0xb90   : > { %v7667_v6 = vpop.f32.mrf.mxu0  ;;  %8075 = vmatpush.bf16.msrb.mxu1 %v12376_v20  ;;  %8173 = vmatpush.bf16.msrb.mxu3 %v12380_v61  ;;  %v8299_v59 = vmax.f32 %v7810_v26, 0.0 }
 0xb91   : > { %v8306_v51 = vmax.f32 %v7714_v60, 0.0  ;;  %v7668_v60 = vadd.f32 %v7667_v6, %v19138_v36 }
 0xb93   : > { %7862 = vmatmul.bf16.gmra.mxu0 %v18788_v12  ;;  %7960 = vmatmul.bf16.gmra.mxu2 %v18788_v12  ;;  %v19416_v58 = vpack.c.bf16 %v8306_v51, %v8298_v54 }
 0xb94   : > { %v7811_v17 = vpop.f32.mrf.mxu3  ;;  %8076 = vmatpush.bf16.msrb.mxu1 %v12344_v10  ;;  %8174 = vmatpush.bf16.msrb.mxu3 %v12348_v39 }
 0xb95   : > { %20803 = vst [vmem:[#allocation13_spill] sm:$0xff] %v19416_v58  ;;  %v7812_v18 = vadd.f32 %v7811_v17, %v7763_v44 }
 0xb96   : > { %v7716_v24 = vpop.f32.mrf.mxu1  ;;  %v7765_v20 = vpop.f32.mrf.mxu2 }
 0xb97   : > { %v8307_v62 = vmax.f32 %v7812_v18, 0.0  ;;  %v7717_v2 = vadd.f32 %v7716_v24, %v7668_v60  ;;  %v7766_v51 = vadd.f32 %v7765_v20, %v19147_v22 }
 0xb98   : > { %v7669_v45 = vpop.f32.mrf.mxu0 }
 0xb99   : > { %7911 = vmatmul.bf16.gmra.mxu1 %v18810_v11  ;;  %8009 = vmatmul.bf16.gmra.mxu3 %v18810_v11  ;;  %v19424_v54 = vpack.c.bf16 %v8307_v62, %v8299_v59  ;;  %v7670_v6 = vadd.f32 %v7669_v45, %v19138_v36  ;;  %v8314_v17 = vmax.f32 %v7717_v2, 0.0 }
 0xb9b   : > { %20804 = vst [vmem:[#allocation14_spill] sm:$0xff] %v19424_v54 }
 0xb9c   : > { %v7814_v61 = vpop.f32.mrf.mxu3 }
 0xb9d   : > { %v7815_v44 = vadd.f32 %v7814_v61, %v7766_v51 }
 0xb9e   : > { %v7718_v16 = vpop.f32.mrf.mxu1  ;;  %v7767_v7 = vpop.f32.mrf.mxu2 }
 0xb9f   : > { %v7719_v41 = vadd.f32 %v7718_v16, %v7670_v6  ;;  %v7768_v47 = vadd.f32 %v7767_v7, %v19147_v22  ;;  %v8315_v59 = vmax.f32 %v7815_v44, 0.0 }
 0xba0   : > { %v7672_v26 = vpop.f32.mrf.mxu0 }
 0xba1   : > { %v8322_v10 = vmax.f32 %v7719_v41, 0.0  ;;  %v7673_v39 = vadd.f32 %v7672_v26, %v19138_v36 }
 0xba3   : > { %7867 = vmatmul.bf16.gmra.mxu0 %v18824_v30  ;;  %7965 = vmatmul.bf16.gmra.mxu2 %v18824_v30  ;;  %v19431_v60 = vpack.c.bf16 %v8322_v10, %v8314_v17 }
 0xba4   : > { %v7816_v18 = vpop.f32.mrf.mxu3 }
 0xba5   : > { %20805 = vst [vmem:[#allocation15_spill] sm:$0xff] %v19431_v60  ;;  %v7817_v24 = vadd.f32 %v7816_v18, %v7768_v47 }
 0xba6   : > { %v7721_v45 = vpop.f32.mrf.mxu1  ;;  %v7770_v20 = vpop.f32.mrf.mxu2 }
 0xba7   : > { %v8323_v62 = vmax.f32 %v7817_v24, 0.0  ;;  %v7722_v51 = vadd.f32 %v7721_v45, %v7673_v39  ;;  %v7771_v6 = vadd.f32 %v7770_v20, %v19147_v22  ;;  %v19443_v39 = vld [vmem:[%s20721_s6] sm:$0xff] }
 0xba8   : > { %v7674_v61 = vpop.f32.mrf.mxu0  ;;  %v19446_v24 = vperm.slane %v19443_v39, 4 }
 0xba9   : > { %7916 = vmatmul.bf16.gmra.mxu1 %v18830_v63  ;;  %8014 = vmatmul.bf16.gmra.mxu3 %v18830_v63  ;;  %v19436_v2 = vpack.c.bf16 %v8323_v62, %v8315_v59  ;;  %v7675_v7 = vadd.f32 %v7674_v61, %v19138_v36  ;;  %v8330_v44 = vmax.f32 %v7722_v51, 0.0 }
 0xbac   : > { %v7819_v16 = vpop.f32.mrf.mxu3 }
 0xbad   : > { %v7820_v41 = vadd.f32 %v7819_v16, %v7771_v6 }
 0xbae   : > { %v7723_v26 = vpop.f32.mrf.mxu1  ;;  %v7772_v17 = vpop.f32.mrf.mxu2 }
 0xbaf   : > { %v7724_v10 = vadd.f32 %v7723_v26, %v7675_v7  ;;  %v7773_v45 = vadd.f32 %v7772_v17, %v19147_v22  ;;  %v8331_v6 = vmax.f32 %v7820_v41, 0.0  ;;  %v19455_v26 = vperm.slane %v19443_v39, 5 }
 0xbb0   : > { %v7833_v47 = vpop.f32.mrf.mxu0 }
 0xbb1   : > { %v8338_v18 = vmax.f32 %v7724_v10, 0.0  ;;  %v7834_v59 = vadd.f32 %v7833_v47, %v19446_v24 }
 0xbb3   : > { %8028 = vmatmul.bf16.vlgmr.msrb.gmra.mxu0 %v18454_v46  ;;  %8126 = vmatmul.bf16.vlgmr.msrb.gmra.mxu2 %v18454_v46  ;;  %v19451_v36 = vpack.c.bf16 %v8338_v18, %v8330_v44 }
 0xbb4   : > { %v7821_v20 = vpop.f32.mrf.mxu3 }
 0xbb5   : > { %20806 = vst [vmem:[#allocation16_spill] sm:$0xff] %v19451_v36  ;;  %v7822_v62 = vadd.f32 %v7821_v20, %v7773_v45 }
 0xbb6   : > { %v7882_v51 = vpop.f32.mrf.mxu1  ;;  %v7931_v61 = vpop.f32.mrf.mxu2 }
 0xbb7   : > { %v8339_v16 = vmax.f32 %v7822_v62, 0.0  ;;  %v7883_v7 = vadd.f32 %v7882_v51, %v7834_v59  ;;  %v7932_v22 = vadd.f32 %v7931_v61, %v19455_v26 }
 0xbb8   : > { %v7835_v10 = vpop.f32.mrf.mxu0 }
 0xbb9   : > { %8077 = vmatmul.bf16.vlgmr.msrb.gmra.mxu1 %v18463_v40  ;;  %8175 = vmatmul.bf16.vlgmr.msrb.gmra.mxu3 %v18463_v40  ;;  %v19459_v46 = vpack.c.bf16 %v8339_v16, %v8331_v6  ;;  %v7836_v47 = vadd.f32 %v7835_v10, %v19446_v24  ;;  %v8220_v59 = vmax.f32 %v7883_v7, 0.0 }
 0xbbc   : > { %v7980_v17 = vpop.f32.mrf.mxu3 }
 0xbbd   : > { %v7981_v44 = vadd.f32 %v7980_v17, %v7932_v22 }
 0xbbe   : > { %v7884_v18 = vpop.f32.mrf.mxu1  ;;  %v7933_v41 = vpop.f32.mrf.mxu2 }
 0xbbf   : > { %v7885_v45 = vadd.f32 %v7884_v18, %v7836_v47  ;;  %v7934_v36 = vadd.f32 %v7933_v41, %v19455_v26  ;;  %v8221_v22 = vmax.f32 %v7981_v44, 0.0 }
 0xbc0   : > { %v7838_v20 = vpop.f32.mrf.mxu0 }
 0xbc1   : > { %v8228_v62 = vmax.f32 %v7885_v45, 0.0  ;;  %v7839_v61 = vadd.f32 %v7838_v20, %v19446_v24 }
 0xbc3   : > { %v19463_v51 = vpack.c.bf16 %v8228_v62, %v8220_v59  ;;  %8033 = vmatmul.bf16.gmra.mxu0 %v18474_v19  ;;  %8131 = vmatmul.bf16.gmra.mxu2 %v18474_v19 }
 0xbc4   : > { %v7982_v40 = vpop.f32.mrf.mxu3 }
 0xbc5   : > { %v7983_v6 = vadd.f32 %v7982_v40, %v7934_v36 }
 0xbc6   : > { %v7887_v16 = vpop.f32.mrf.mxu1  ;;  %v7936_v10 = vpop.f32.mrf.mxu2 }
 0xbc7   : > { %v8229_v17 = vmax.f32 %v7983_v6, 0.0  ;;  %v7888_v47 = vadd.f32 %v7887_v16, %v7839_v61  ;;  %v7937_v41 = vadd.f32 %v7936_v10, %v19455_v26 }
 0xbc8   : > { %v7840_v18 = vpop.f32.mrf.mxu0 }
 0xbc9   : > { %v19469_v7 = vpack.c.bf16 %v8229_v17, %v8221_v22  ;;  %8082 = vmatmul.bf16.gmra.mxu1 %v18483_v25  ;;  %8180 = vmatmul.bf16.gmra.mxu3 %v18483_v25  ;;  %v7841_v19 = vadd.f32 %v7840_v18, %v19446_v24  ;;  %v8236_v44 = vmax.f32 %v7888_v47, 0.0 }
 0xbcc   : > { %v7985_v45 = vpop.f32.mrf.mxu3 }
 0xbcd   : > { %v7986_v59 = vadd.f32 %v7985_v45, %v7937_v41 }
 0xbce   : > { %v7889_v20 = vpop.f32.mrf.mxu1  ;;  %v7938_v36 = vpop.f32.mrf.mxu2 }
 0xbcf   : > { %v7890_v62 = vadd.f32 %v7889_v20, %v7841_v19  ;;  %v7939_v61 = vadd.f32 %v7938_v36, %v19455_v26  ;;  %v8237_v41 = vmax.f32 %v7986_v59, 0.0 }
 0xbd0   : > { %v7843_v40 = vpop.f32.mrf.mxu0 }
 0xbd1   : > { %v8244_v6 = vmax.f32 %v7890_v62, 0.0  ;;  %v7844_v10 = vadd.f32 %v7843_v40, %v19446_v24 }
 0xbd3   : > { %8038 = vmatmul.bf16.gmra.mxu0 %v18494_v3  ;;  %8136 = vmatmul.bf16.gmra.mxu2 %v18494_v3  ;;  %v19478_v16 = vpack.c.bf16 %v8244_v6, %v8236_v44 }
 0xbd4   : > { %v7987_v25 = vpop.f32.mrf.mxu3 }
 0xbd5   : > { %v7988_v22 = vadd.f32 %v7987_v25, %v7939_v61 }
 0xbd6   : > { %v7892_v17 = vpop.f32.mrf.mxu1  ;;  %v7941_v18 = vpop.f32.mrf.mxu2 }
 0xbd7   : > { %v8245_v45 = vmax.f32 %v7988_v22, 0.0  ;;  %v7893_v19 = vadd.f32 %v7892_v17, %v7844_v10  ;;  %v7942_v3 = vadd.f32 %v7941_v18, %v19455_v26 }
 0xbd8   : > { %v7845_v20 = vpop.f32.mrf.mxu0 }
 0xbd9   : > { %8087 = vmatmul.bf16.gmra.mxu1 %v18503_v43  ;;  %8185 = vmatmul.bf16.gmra.mxu3 %v18503_v43  ;;  %v19483_v47 = vpack.c.bf16 %v8245_v45, %v8237_v41  ;;  %v7846_v62 = vadd.f32 %v7845_v20, %v19446_v24  ;;  %v8252_v59 = vmax.f32 %v7893_v19, 0.0 }
 0xbdc   : > { %v7990_v36 = vpop.f32.mrf.mxu3 }
 0xbdd   : > { %v7991_v44 = vadd.f32 %v7990_v36, %v7942_v3 }
 0xbde   : > { %v7894_v40 = vpop.f32.mrf.mxu1  ;;  %v7943_v6 = vpop.f32.mrf.mxu2 }
 0xbdf   : > { %v7895_v61 = vadd.f32 %v7894_v40, %v7846_v62  ;;  %v7944_v10 = vadd.f32 %v7943_v6, %v19455_v26  ;;  %v8253_v3 = vmax.f32 %v7991_v44, 0.0 }
 0xbe0   : > { %v7848_v25 = vpop.f32.mrf.mxu0 }
 0xbe1   : > { %v8260_v22 = vmax.f32 %v7895_v61, 0.0  ;;  %v7849_v18 = vadd.f32 %v7848_v25, %v19446_v24 }
 0xbe3   : > { %8043 = vmatmul.bf16.gmra.mxu0 %v18514_v5  ;;  %8141 = vmatmul.bf16.gmra.mxu2 %v18514_v5  ;;  %v19490_v43 = vpack.c.bf16 %v8260_v22, %v8252_v59 }
 0xbe4   : > { %v7992_v17 = vpop.f32.mrf.mxu3 }
 0xbe5   : > { %v7993_v41 = vadd.f32 %v7992_v17, %v7944_v10 }
 0xbe6   : > { %v7897_v45 = vpop.f32.mrf.mxu1  ;;  %v7946_v20 = vpop.f32.mrf.mxu2 }
 0xbe7   : > { %v8261_v36 = vmax.f32 %v7993_v41, 0.0  ;;  %v7898_v62 = vadd.f32 %v7897_v45, %v7849_v18  ;;  %v7947_v5 = vadd.f32 %v7946_v20, %v19455_v26  ;;  %v12631_v18 = vld [vmem:[%s20722_s7 + $0x70] sm:$0xf] }
 0xbe8   : > { %v7850_v40 = vpop.f32.mrf.mxu0  ;;  %v12759_v20 = vld [vmem:[%s20722_s7 + $0x170] sm:$0xf] }
 0xbe9   : > { %8092 = vmatmul.bf16.gmra.mxu1 %v18525_v29  ;;  %8190 = vmatmul.bf16.gmra.mxu3 %v18525_v29  ;;  %v19495_v19 = vpack.c.bf16 %v8261_v36, %v8253_v3  ;;  %v7851_v61 = vadd.f32 %v7850_v40, %v19446_v24  ;;  %v8268_v44 = vmax.f32 %v7898_v62, 0.0  ;;  %v13633_v29 = vld [vmem:[%s20722_s7 + $0x74] sm:$0xf0] }
 0xbea   : > { %v12632_v45 = vor.u32 %v13633_v29, %v12631_v18  ;;  %v13665_v3 = vld [vmem:[%s20722_s7 + $0x174] sm:$0xf0] }
 0xbeb   : > { %v12760_v62 = vor.u32 %v13665_v3, %v12759_v20  ;;  %v12695_v3 = vld [vmem:[%s20722_s7 + $0xf0] sm:$0xf] }
 0xbec   : > { %v7995_v6 = vpop.f32.mrf.mxu3  ;;  %9182 = vmatpush.bf16.msra.mxu0 %v12632_v45 }
 0xbed   : > { %v7996_v59 = vadd.f32 %v7995_v6, %v7947_v5  ;;  %9280 = vmatpush.bf16.msra.mxu2 %v12760_v62 }
 0xbee   : > { %v7899_v25 = vpop.f32.mrf.mxu1  ;;  %v7948_v22 = vpop.f32.mrf.mxu2 }
 0xbef   : > { %v7900_v10 = vadd.f32 %v7899_v25, %v7851_v61  ;;  %v7949_v36 = vadd.f32 %v7948_v22, %v19455_v26  ;;  %v12623_v25 = vld [vmem:[%s20722_s7 + $0x60] sm:$0xf]  ;;  %v13631_v22 = vld [vmem:[%s20722_s7 + $0x64] sm:$0xf0]  ;;  %v8269_v18 = vmax.f32 %v7996_v59, 0.0 }
 0xbf0   : > { %v7853_v17 = vpop.f32.mrf.mxu0  ;;  %v13681_v59 = vld [vmem:[%s20722_s7 + $0x1f4] sm:$0xf0] }
 0xbf1   : > { %v8276_v41 = vmax.f32 %v7900_v10, 0.0  ;;  %v7854_v6 = vadd.f32 %v7853_v17, %v19446_v24  ;;  %v13663_v17 = vld [vmem:[%s20722_s7 + $0x164] sm:$0xf0] }
 0xbf3   : > { %8048 = vmatmul.bf16.gmra.mxu0 %v18539_v53  ;;  %8146 = vmatmul.bf16.gmra.mxu2 %v18539_v53  ;;  %v19514_v40 = vpack.c.bf16 %v8276_v41, %v8268_v44  ;;  %v12751_v53 = vld [vmem:[%s20722_s7 + $0x160] sm:$0xf]  ;;  %v12624_v41 = vor.u32 %v13631_v22, %v12623_v25  ;;  %v12823_v25 = vld [vmem:[%s20722_s7 + $0x1f0] sm:$0xf]  ;;  %v13629_v22 = vld [vmem:[%s20722_s7 + $0x54] sm:$0xf0] }
 0xbf4   : > { %v7997_v5 = vpop.f32.mrf.mxu3  ;;  %v12752_v20 = vor.u32 %v13663_v17, %v12751_v53 }
 0xbf5   : > { %20807 = vst [vmem:[#allocation17_spill] sm:$0xff] %v19514_v40  ;;  %v7998_v61 = vadd.f32 %v7997_v5, %v7949_v36  ;;  %v13649_v36 = vld [vmem:[%s20722_s7 + $0xf4] sm:$0xf0]  ;;  %9183 = vmatpush.bf16.msra.mxu0 %v12624_v41  ;;  %v12743_v41 = vld [vmem:[%s20722_s7 + $0x150] sm:$0xf] }
 0xbf6   : > { %v7902_v10 = vpop.f32.mrf.mxu1  ;;  %v7951_v44 = vpop.f32.mrf.mxu2  ;;  %v12696_v5 = vor.u32 %v13649_v36, %v12695_v3  ;;  %9281 = vmatpush.bf16.msra.mxu2 %v12752_v20  ;;  %v12815_v20 = vld [vmem:[%s20722_s7 + $0x1e0] sm:$0xf] }
 0xbf7   : > { %v8277_v29 = vmax.f32 %v7998_v61, 0.0  ;;  %v19529_v45 = vadd.f32 %v7902_v10, %v7854_v6  ;;  %v12824_v6 = vor.u32 %v13681_v59, %v12823_v25  ;;  %v12615_v61 = vld [vmem:[%s20722_s7 + $0x50] sm:$0xf]  ;;  %v7952_v17 = vadd.f32 %v7951_v44, %v19455_v26  ;;  %v13679_v44 = vld [vmem:[%s20722_s7 + $0x1e4] sm:$0xf0] }
 0xbf8   : > { %v7855_v62 = vpop.f32.mrf.mxu0  ;;  %9231 = vmatpush.bf16.msra.mxu1 %v12696_v5  ;;  %v12616_v10 = vor.u32 %v13629_v22, %v12615_v61  ;;  %v12607_v61 = vld [vmem:[%s20722_s7 + $0x40] sm:$0xf]  ;;  %v13627_v22 = vld [vmem:[%s20722_s7 + $0x44] sm:$0xf0] }
 0xbf9   : > { %8097 = vmatmul.bf16.gmra.mxu1 %v18575_v49  ;;  %8195 = vmatmul.bf16.gmra.mxu3 %v18575_v49  ;;  %v19551_v53 = vpack.c.bf16 %v8277_v29, %v8269_v18  ;;  %v13661_v49 = vld [vmem:[%s20722_s7 + $0x154] sm:$0xf0]  ;;  %v12687_v18 = vld [vmem:[%s20722_s7 + $0xe0] sm:$0xf]  ;;  %v13647_v29 = vld [vmem:[%s20722_s7 + $0xe4] sm:$0xf0]  ;;  %v7856_v25 = vadd.f32 %v7855_v62, %v19446_v24  ;;  %v12608_v62 = vor.u32 %v13627_v22, %v12607_v61 }
 0xbfa   : > { %9329 = vmatpush.bf16.msra.mxu3 %v12824_v6  ;;  %v12744_v3 = vor.u32 %v13661_v49, %v12743_v41  ;;  %9184 = vmatpush.bf16.msra.mxu0 %v12616_v10  ;;  %v12688_v5 = vor.u32 %v13647_v29, %v12687_v18  ;;  %v12816_v6 = vor.u32 %v13679_v44, %v12815_v20  ;;  %v12735_v10 = vld [vmem:[%s20722_s7 + $0x140] sm:$0xf]  ;;  %v12679_v20 = vld [vmem:[%s20722_s7 + $0xd0] sm:$0xf] }
 0xbfb   : > { %20808 = vst [vmem:[#allocation18_spill] sm:$0xff] %v19551_v53 }
 0xbfc   : > { %v8000_v36 = vpop.f32.mrf.mxu3  ;;  %9282 = vmatpush.bf16.msra.mxu2 %v12744_v3  ;;  %9232 = vmatpush.bf16.msra.mxu1 %v12688_v5  ;;  %v12807_v5 = vld [vmem:[%s20722_s7 + $0x1d0] sm:$0xf] }
 0xbfd   : > { %v19573_v59 = vadd.f32 %v8000_v36, %v7952_v17  ;;  %v13659_v17 = vld [vmem:[%s20722_s7 + $0x144] sm:$0xf0]  ;;  %v13645_v36 = vld [vmem:[%s20722_s7 + $0xd4] sm:$0xf0] }
 0xbfe   : > { %v7904_v41 = vpop.f32.mrf.mxu1  ;;  %v7953_v49 = vpop.f32.mrf.mxu2  ;;  %9330 = vmatpush.bf16.msra.mxu3 %v12816_v6  ;;  %v12736_v29 = vor.u32 %v13659_v17, %v12735_v10  ;;  %9185 = vmatpush.bf16.msra.mxu0 %v12608_v62  ;;  %v12680_v3 = vor.u32 %v13645_v36, %v12679_v20  ;;  %v8284_v6 = vmax.f32 %v19529_v45, 0.0  ;;  %v12599_v10 = vld [vmem:[%s20722_s7 + $0x30] sm:$0xf]  ;;  %v13657_v45 = vld [vmem:[%s20722_s7 + $0x134] sm:$0xf0] }
 0xbff   : > { %v7905_v18 = vadd.f32 %v7904_v41, %v7856_v25  ;;  %v13677_v25 = vld [vmem:[%s20722_s7 + $0x1d4] sm:$0xf0]  ;;  %v12727_v17 = vld [vmem:[%s20722_s7 + $0x130] sm:$0xf]  ;;  %v13643_v36 = vld [vmem:[%s20722_s7 + $0xc4] sm:$0xf0] }
 0xc00   : > { %v7858_v44 = vpop.f32.mrf.mxu0  ;;  %v12808_v22 = vor.u32 %v13677_v25, %v12807_v5  ;;  %v13625_v41 = vld [vmem:[%s20722_s7 + $0x34] sm:$0xf0]  ;;  %9283 = vmatpush.bf16.msra.mxu2 %v12736_v29  ;;  %9233 = vmatpush.bf16.msra.mxu1 %v12680_v3  ;;  %v12728_v20 = vor.u32 %v13657_v45, %v12727_v17  ;;  %v12671_v29 = vld [vmem:[%s20722_s7 + $0xc0] sm:$0xf] }
 0xc01   : > { %v8292_v61 = vmax.f32 %v7905_v18, 0.0  ;;  %v12600_v62 = vor.u32 %v13625_v41, %v12599_v10  ;;  %v7954_v18 = vadd.f32 %v7953_v49, %v19455_v26  ;;  %v12799_v3 = vld [vmem:[%s20722_s7 + $0x1c0] sm:$0xf]  ;;  %v12672_v25 = vor.u32 %v13643_v36, %v12671_v29 }
 0xc02   : > { %9331 = vmatpush.bf16.msra.mxu3 %v12808_v22  ;;  %v7859_v10 = vadd.f32 %v7858_v44, %v19446_v24  ;;  %v12591_v45 = vld [vmem:[%s20722_s7 + $0x20] sm:$0xf]  ;;  %v13655_v44 = vld [vmem:[%s20722_s7 + $0x124] sm:$0xf0] }
 0xc03   : > { %8053 = vmatmul.bf16.gmra.mxu0 %v18659_v31  ;;  %8151 = vmatmul.bf16.gmra.mxu2 %v18659_v31  ;;  %v19624_v5 = vpack.c.bf16 %v8292_v61, %v8284_v6  ;;  %v13675_v31 = vld [vmem:[%s20722_s7 + $0x1c4] sm:$0xf0]  ;;  %v12719_v61 = vld [vmem:[%s20722_s7 + $0x120] sm:$0xf] }
 0xc04   : > { %v8002_v49 = vpop.f32.mrf.mxu3  ;;  %9186 = vmatpush.bf16.msra.mxu0 %v12600_v62  ;;  %v12800_v17 = vor.u32 %v13675_v31, %v12799_v3  ;;  %v13623_v6 = vld [vmem:[%s20722_s7 + $0x24] sm:$0xf0]  ;;  %9284 = vmatpush.bf16.msra.mxu2 %v12728_v20  ;;  %v12663_v31 = vld [vmem:[%s20722_s7 + $0xb0] sm:$0xf]  ;;  %v13641_v20 = vld [vmem:[%s20722_s7 + $0xb4] sm:$0xf0] }
 0xc05   : > { %20809 = vst [vmem:[#allocation19_spill] sm:$0xff] %v19624_v5  ;;  %v8003_v41 = vadd.f32 %v8002_v49, %v7954_v18  ;;  %9234 = vmatpush.bf16.msra.mxu1 %v12672_v25  ;;  %v12592_v29 = vor.u32 %v13623_v6, %v12591_v45  ;;  %v8285_v18 = vmax.f32 %v19573_v59, 0.0  ;;  %v12720_v49 = vor.u32 %v13655_v44, %v12719_v61  ;;  %v12791_v59 = vld [vmem:[%s20722_s7 + $0x1b0] sm:$0xf] }
 0xc06   : > { %v7907_v22 = vpop.f32.mrf.mxu1  ;;  %v7956_v62 = vpop.f32.mrf.mxu2  ;;  %9332 = vmatpush.bf16.msra.mxu3 %v12800_v17  ;;  %v12664_v45 = vor.u32 %v13641_v20, %v12663_v31  ;;  %v12583_v6 = vld [vmem:[%s20722_s7 + $0x10] sm:$0xf]  ;;  %v13621_v17 = vld [vmem:[%s20722_s7 + $0x14] sm:$0xf0]  ;;  %v12655_v20 = vld [vmem:[%s20722_s7 + $0xa0] sm:$0xf] }
 0xc07   : > { %v8293_v36 = vmax.f32 %v8003_v41, 0.0  ;;  %v19643_v3 = vadd.f32 %v7907_v22, %v7859_v10  ;;  %v13673_v10 = vld [vmem:[%s20722_s7 + $0x1b4] sm:$0xf0]  ;;  %v12584_v22 = vor.u32 %v13621_v17, %v12583_v6  ;;  %v7957_v44 = vadd.f32 %v7956_v62, %v19455_v26  ;;  %v13671_v62 = vld [vmem:[%s20722_s7 + $0x1a4] sm:$0xf0] }
 0xc08   : > { %v7860_v25 = vpop.f32.mrf.mxu0  ;;  %9187 = vmatpush.bf16.msra.mxu0 %v12592_v29  ;;  %v12792_v41 = vor.u32 %v13673_v10, %v12791_v59  ;;  %9285 = vmatpush.bf16.msra.mxu2 %v12720_v49  ;;  %v12711_v29 = vld [vmem:[%s20722_s7 + $0x110] sm:$0xf]  ;;  %v12575_v17 = vld [vmem:[%s20722_s7] sm:$0xf] }
 0xc09   : > { %8102 = vmatmul.bf16.gmra.mxu1 %v18709_v1  ;;  %8200 = vmatmul.bf16.gmra.mxu3 %v18709_v1  ;;  %v19665_v61 = vpack.c.bf16 %v8293_v36, %v8285_v18  ;;  %v13653_v1 = vld [vmem:[%s20722_s7 + $0x114] sm:$0xf0]  ;;  %v13639_v18 = vld [vmem:[%s20722_s7 + $0xa4] sm:$0xf0]  ;;  %v12783_v36 = vld [vmem:[%s20722_s7 + $0x1a0] sm:$0xf]  ;;  %v7861_v59 = vadd.f32 %v7860_v25, %v19446_v24 }
 0xc0a   : > { %9235 = vmatpush.bf16.msra.mxu1 %v12664_v45  ;;  %v12712_v31 = vor.u32 %v13653_v1, %v12711_v29  ;;  %9333 = vmatpush.bf16.msra.mxu3 %v12792_v41  ;;  %v12656_v45 = vor.u32 %v13639_v18, %v12655_v20  ;;  %v12784_v6 = vor.u32 %v13671_v62, %v12783_v36  ;;  %v13619_v29 = vld [vmem:[%s20722_s7 + $0x4] sm:$0xf0]  ;;  %v12703_v41 = vld [vmem:[%s20722_s7 + $0x100] sm:$0xf]  ;;  %v12647_v18 = vld [vmem:[%s20722_s7 + $0x90] sm:$0xf] }
 0xc0b   : > { %20810 = vst [vmem:[#allocation20_spill] sm:$0xff] %v19665_v61  ;;  %v12576_v20 = vor.u32 %v13619_v29, %v12575_v17  ;;  %v13651_v25 = vld [vmem:[%s20722_s7 + $0x104] sm:$0xf0]  ;;  %v13637_v36 = vld [vmem:[%s20722_s7 + $0x94] sm:$0xf0]  ;;  %v8300_v17 = vmax.f32 %v19643_v3, 0.0 }
 0xc0c   : > { %v8005_v49 = vpop.f32.mrf.mxu3  ;;  %9188 = vmatpush.bf16.msra.mxu0 %v12584_v22  ;;  %9286 = vmatpush.bf16.msra.mxu2 %v12712_v31  ;;  %v12704_v62 = vor.u32 %v13651_v25, %v12703_v41  ;;  %v12648_v31 = vor.u32 %v13637_v36, %v12647_v18  ;;  %v13635_v41 = vld [vmem:[%s20722_s7 + $0x84] sm:$0xf0]  ;;  %v12767_v3 = vld [vmem:[%s20722_s7 + $0x180] sm:$0xf] }
 0xc0d   : > { %v8006_v10 = vadd.f32 %v8005_v49, %v7957_v44 }
 0xc0e   : > { %v7909_v22 = vpop.f32.mrf.mxu1  ;;  %v7958_v1 = vpop.f32.mrf.mxu2  ;;  %9236 = vmatpush.bf16.msra.mxu1 %v12656_v45  ;;  %9334 = vmatpush.bf16.msra.mxu3 %v12784_v6  ;;  %v12775_v45 = vld [vmem:[%s20722_s7 + $0x190] sm:$0xf]  ;;  %v12639_v6 = vld [vmem:[%s20722_s7 + $0x80] sm:$0xf] }
 0xc0f   : > { %v7910_v44 = vadd.f32 %v7909_v22, %v7861_v59  ;;  %v13669_v59 = vld [vmem:[%s20722_s7 + $0x194] sm:$0xf0]  ;;  %v7959_v61 = vadd.f32 %v7958_v1, %v19455_v26  ;;  %v12640_v1 = vor.u32 %v13635_v41, %v12639_v6 }
 0xc10   : > { %v7863_v49 = vpop.f32.mrf.mxu0  ;;  %9189 = vmatpush.bf16.msra.mxu0 %v12576_v20  ;;  %v12776_v22 = vor.u32 %v13669_v59, %v12775_v45  ;;  %9287 = vmatpush.bf16.msra.mxu2 %v12704_v62  ;;  %v8301_v45 = vmax.f32 %v8006_v10, 0.0 }
 0xc11   : > { %v8308_v29 = vmax.f32 %v7910_v44, 0.0  ;;  %v7864_v44 = vadd.f32 %v7863_v49, %v19446_v24 }
 0xc12   : > { %9237 = vmatpush.bf16.msra.mxu1 %v12648_v31  ;;  %9335 = vmatpush.bf16.msra.mxu3 %v12776_v22 }
 0xc13   : > { %8058 = vmatmul.bf16.gmra.mxu0 %v18788_v12  ;;  %8156 = vmatmul.bf16.gmra.mxu2 %v18788_v12  ;;  %v19724_v20 = vpack.c.bf16 %v8308_v29, %v8300_v17  ;;  %v13667_v12 = vld [vmem:[%s20722_s7 + $0x184] sm:$0xf0] }
 0xc14   : > { %v8007_v25 = vpop.f32.mrf.mxu3  ;;  %v12768_v36 = vor.u32 %v13667_v12, %v12767_v3 }
 0xc15   : > { %v8008_v18 = vadd.f32 %v8007_v25, %v7959_v61 }
 0xc16   : > { %v7912_v62 = vpop.f32.mrf.mxu1  ;;  %v7961_v31 = vpop.f32.mrf.mxu2  ;;  %9238 = vmatpush.bf16.msra.mxu1 %v12640_v1  ;;  %9336 = vmatpush.bf16.msra.mxu3 %v12768_v36 }
 0xc17   : > { %v8309_v59 = vmax.f32 %v8008_v18, 0.0  ;;  %v7913_v5 = vadd.f32 %v7912_v62, %v7864_v44  ;;  %v7962_v29 = vadd.f32 %v7961_v31, %v19455_v26 }
 0xc18   : > { %v7865_v53 = vpop.f32.mrf.mxu0 }
 0xc19   : > { %8107 = vmatmul.bf16.gmra.mxu1 %v18810_v11  ;;  %8205 = vmatmul.bf16.gmra.mxu3 %v18810_v11  ;;  %v19732_v17 = vpack.c.bf16 %v8309_v59, %v8301_v45  ;;  %v7866_v61 = vadd.f32 %v7865_v53, %v19446_v24  ;;  %v8316_v25 = vmax.f32 %v7913_v5, 0.0 }
 0xc1c   : > { %v8010_v22 = vpop.f32.mrf.mxu3 }
 0xc1d   : > { %v8011_v49 = vadd.f32 %v8010_v22, %v7962_v29 }
 0xc1e   : > { %v7914_v6 = vpop.f32.mrf.mxu1  ;;  %v7963_v41 = vpop.f32.mrf.mxu2 }
 0xc1f   : > { %v7915_v3 = vadd.f32 %v7914_v6, %v7866_v61  ;;  %v7964_v12 = vadd.f32 %v7963_v41, %v19455_v26  ;;  %v8317_v31 = vmax.f32 %v8011_v49, 0.0 }
 0xc20   : > { %v7868_v10 = vpop.f32.mrf.mxu0 }
 0xc21   : > { %v8324_v1 = vmax.f32 %v7915_v3, 0.0  ;;  %v7869_v18 = vadd.f32 %v7868_v10, %v19446_v24 }
 0xc23   : > { %8063 = vmatmul.bf16.gmra.mxu0 %v18824_v30  ;;  %8161 = vmatmul.bf16.gmra.mxu2 %v18824_v30  ;;  %v19739_v11 = vpack.c.bf16 %v8324_v1, %v8316_v25 }
 0xc24   : > { %v8012_v44 = vpop.f32.mrf.mxu3 }
 0xc25   : > { %20811 = vst [vmem:[#allocation21_spill] sm:$0xff] %v19739_v11  ;;  %v8013_v36 = vadd.f32 %v8012_v44, %v7964_v12  ;;  %v19749_v12 = vperm.slane %v19443_v39, 6 }
 0xc26   : > { %v7917_v53 = vpop.f32.mrf.mxu1  ;;  %v7966_v62 = vpop.f32.mrf.mxu2 }
 0xc27   : > { %v8325_v45 = vmax.f32 %v8013_v36, 0.0  ;;  %v7918_v59 = vadd.f32 %v7917_v53, %v7869_v18  ;;  %v7967_v30 = vadd.f32 %v7966_v62, %v19455_v26 }
 0xc28   : > { %v7870_v29 = vpop.f32.mrf.mxu0 }
 0xc29   : > { %8112 = vmatmul.bf16.gmra.mxu1 %v18830_v63  ;;  %8210 = vmatmul.bf16.gmra.mxu3 %v18830_v63  ;;  %v19744_v5 = vpack.c.bf16 %v8325_v45, %v8317_v31  ;;  %v7871_v61 = vadd.f32 %v7870_v29, %v19446_v24  ;;  %v8332_v49 = vmax.f32 %v7918_v59, 0.0  ;;  %v19758_v29 = vperm.slane %v19443_v39, 7 }
 0xc2c   : > { %v8015_v22 = vpop.f32.mrf.mxu3 }
 0xc2d   : > { %v8016_v6 = vadd.f32 %v8015_v22, %v7967_v30 }
 0xc2e   : > { %v7919_v41 = vpop.f32.mrf.mxu1  ;;  %v7968_v3 = vpop.f32.mrf.mxu2 }
 0xc2f   : > { %v7920_v10 = vadd.f32 %v7919_v41, %v7871_v61  ;;  %v7969_v44 = vadd.f32 %v7968_v3, %v19455_v26  ;;  %v8333_v31 = vmax.f32 %v8016_v6, 0.0 }
 0xc30   : > { %v8029_v25 = vpop.f32.mrf.mxu0 }
 0xc31   : > { %v8340_v1 = vmax.f32 %v7920_v10, 0.0  ;;  %v8030_v24 = vadd.f32 %v8029_v25, %v19749_v12 }
 0xc33   : > { %9190 = vmatmul.bf16.vlgmr.msra.gmra.mxu0 %v18852_v15  ;;  %9288 = vmatmul.bf16.vlgmr.msra.gmra.mxu2 %v19155_v28  ;;  %v19754_v63 = vpack.c.bf16 %v8340_v1, %v8332_v49 }
 0xc34   : > { %v8017_v18 = vpop.f32.mrf.mxu3 }
 0xc35   : > { %v8018_v36 = vadd.f32 %v8017_v18, %v7969_v44 }
 0xc36   : > { %v8078_v53 = vpop.f32.mrf.mxu1  ;;  %v8127_v62 = vpop.f32.mrf.mxu2 }
 0xc37   : > { %v8341_v45 = vmax.f32 %v8018_v36, 0.0  ;;  %v8079_v59 = vadd.f32 %v8078_v53, %v8030_v24  ;;  %v8128_v22 = vadd.f32 %v8127_v62, %v19758_v29 }
 0xc38   : > { %v8031_v30 = vpop.f32.mrf.mxu0 }
 0xc39   : > { %9239 = vmatmul.bf16.vlgmr.msra.gmra.mxu1 %v18858_v27  ;;  %9337 = vmatmul.bf16.vlgmr.msra.gmra.mxu3 %v19161_v42  ;;  %v19762_v26 = vpack.c.bf16 %v8341_v45, %v8333_v31  ;;  %v8032_v41 = vadd.f32 %v8031_v30, %v19749_v12  ;;  %v8222_v1 = vmax.f32 %v8079_v59, 0.0 }
 0xc3c   : > { %v8176_v61 = vpop.f32.mrf.mxu3 }
 0xc3d   : > { %v8177_v3 = vadd.f32 %v8176_v61, %v8128_v22 }
 0xc3e   : > { %v8080_v10 = vpop.f32.mrf.mxu1  ;;  %v8129_v6 = vpop.f32.mrf.mxu2 }
 0xc3f   : > { %v8081_v25 = vadd.f32 %v8080_v10, %v8032_v41  ;;  %v8130_v18 = vadd.f32 %v8129_v6, %v19758_v29  ;;  %v8223_v45 = vmax.f32 %v8177_v3, 0.0 }
 0xc40   : > { %v8034_v49 = vpop.f32.mrf.mxu0 }
 0xc41   : > { %v8230_v39 = vmax.f32 %v8081_v25, 0.0  ;;  %v8035_v36 = vadd.f32 %v8034_v49, %v19749_v12 }
 0xc43   : > { %v19766_v44 = vpack.c.bf16 %v8230_v39, %v8222_v1  ;;  %9195 = vmatmul.bf16.gmra.mxu0 %v18867_v34  ;;  %9293 = vmatmul.bf16.gmra.mxu2 %v19170_v4 }
 0xc44   : > { %v8178_v24 = vpop.f32.mrf.mxu3 }
 0xc45   : > { %20812 = vst [vmem:[#allocation22_spill] sm:$0xff] %v19766_v44  ;;  %v8179_v53 = vadd.f32 %v8178_v24, %v8130_v18 }
 0xc46   : > { %v8083_v62 = vpop.f32.mrf.mxu1  ;;  %v8132_v31 = vpop.f32.mrf.mxu2 }
 0xc47   : > { %v8231_v30 = vmax.f32 %v8179_v53, 0.0  ;;  %v8084_v22 = vadd.f32 %v8083_v62, %v8035_v36  ;;  %v8133_v41 = vadd.f32 %v8132_v31, %v19758_v29 }
 0xc48   : > { %v8036_v61 = vpop.f32.mrf.mxu0 }
 0xc49   : > { %v19772_v59 = vpack.c.bf16 %v8231_v30, %v8223_v45  ;;  %9244 = vmatmul.bf16.gmra.mxu1 %v18872_v32  ;;  %9342 = vmatmul.bf16.gmra.mxu3 %v19175_v33  ;;  %v8037_v6 = vadd.f32 %v8036_v61, %v19749_v12  ;;  %v8238_v3 = vmax.f32 %v8084_v22, 0.0 }
 0xc4c   : > { %v8181_v10 = vpop.f32.mrf.mxu3 }
 0xc4d   : > { %v8182_v25 = vadd.f32 %v8181_v10, %v8133_v41 }
 0xc4e   : > { %v8085_v49 = vpop.f32.mrf.mxu1  ;;  %v8134_v1 = vpop.f32.mrf.mxu2 }
 0xc4f   : > { %v8086_v39 = vadd.f32 %v8085_v49, %v8037_v6  ;;  %v8135_v36 = vadd.f32 %v8134_v1, %v19758_v29  ;;  %v8239_v41 = vmax.f32 %v8182_v25, 0.0 }
 0xc50   : > { %v8039_v18 = vpop.f32.mrf.mxu0 }
 0xc51   : > { %v8246_v24 = vmax.f32 %v8086_v39, 0.0  ;;  %v8040_v31 = vadd.f32 %v8039_v18, %v19749_v12 }
 0xc53   : > { %9200 = vmatmul.bf16.gmra.mxu0 %v18879_v13  ;;  %9298 = vmatmul.bf16.gmra.mxu2 %v19182_v55  ;;  %v19781_v53 = vpack.c.bf16 %v8246_v24, %v8238_v3 }
 0xc54   : > { %v8183_v62 = vpop.f32.mrf.mxu3 }
 0xc55   : > { %v8184_v45 = vadd.f32 %v8183_v62, %v8135_v36 }
 0xc56   : > { %v8088_v30 = vpop.f32.mrf.mxu1  ;;  %v8137_v61 = vpop.f32.mrf.mxu2 }
 0xc57   : > { %v8247_v10 = vmax.f32 %v8184_v45, 0.0  ;;  %v8089_v6 = vadd.f32 %v8088_v30, %v8040_v31  ;;  %v8138_v1 = vadd.f32 %v8137_v61, %v19758_v29 }
 0xc58   : > { %v8041_v49 = vpop.f32.mrf.mxu0 }
 0xc59   : > { %9249 = vmatmul.bf16.gmra.mxu1 %v18884_v50  ;;  %9347 = vmatmul.bf16.gmra.mxu3 %v19187_v56  ;;  %v19786_v22 = vpack.c.bf16 %v8247_v10, %v8239_v41  ;;  %v8042_v3 = vadd.f32 %v8041_v49, %v19749_v12  ;;  %v8254_v25 = vmax.f32 %v8089_v6, 0.0 }
 0xc5b   : > { %20813 = vst [vmem:[#allocation23_spill] sm:$0xff] %v19786_v22 }
 0xc5c   : > { %v8186_v39 = vpop.f32.mrf.mxu3 }
 0xc5d   : > { %v8187_v24 = vadd.f32 %v8186_v39, %v8138_v1 }
 0xc5e   : > { %v8090_v18 = vpop.f32.mrf.mxu1  ;;  %v8139_v36 = vpop.f32.mrf.mxu2 }
 0xc5f   : > { %v8091_v62 = vadd.f32 %v8090_v18, %v8042_v3  ;;  %v8140_v31 = vadd.f32 %v8139_v36, %v19758_v29  ;;  %v8255_v39 = vmax.f32 %v8187_v24, 0.0 }
 0xc60   : > { %v8044_v55 = vpop.f32.mrf.mxu0 }
 0xc61   : > { %v8262_v45 = vmax.f32 %v8091_v62, 0.0  ;;  %v8045_v61 = vadd.f32 %v8044_v55, %v19749_v12 }
 0xc63   : > { %9205 = vmatmul.bf16.gmra.mxu0 %v18903_v38  ;;  %9303 = vmatmul.bf16.gmra.mxu2 %v19206_v52  ;;  %v19793_v30 = vpack.c.bf16 %v8262_v45, %v8254_v25 }
 0xc64   : > { %v8188_v41 = vpop.f32.mrf.mxu3 }
 0xc65   : > { %20814 = vst [vmem:[#allocation24_spill] sm:$0xff] %v19793_v30  ;;  %v8189_v10 = vadd.f32 %v8188_v41, %v8140_v31 }
 0xc66   : > { %v8093_v49 = vpop.f32.mrf.mxu1  ;;  %v8142_v1 = vpop.f32.mrf.mxu2 }
 0xc67   : > { %v8263_v56 = vmax.f32 %v8189_v10, 0.0  ;;  %v8094_v3 = vadd.f32 %v8093_v49, %v8045_v61  ;;  %v8143_v36 = vadd.f32 %v8142_v1, %v19758_v29  ;;  %v12887_v61 = vld [vmem:[%s20722_s7 + $0x270] sm:$0xf] }
 0xc68   : > { %v8046_v18 = vpop.f32.mrf.mxu0  ;;  %v13015_v1 = vld [vmem:[%s20722_s7 + $0x370] sm:$0xf] }
 0xc69   : > { %9254 = vmatmul.bf16.gmra.mxu1 %v18940_v14  ;;  %9352 = vmatmul.bf16.gmra.mxu3 %v19243_v8  ;;  %v19798_v6 = vpack.c.bf16 %v8263_v56, %v8255_v39  ;;  %v8047_v25 = vadd.f32 %v8046_v18, %v19749_v12  ;;  %v8270_v24 = vmax.f32 %v8094_v3, 0.0  ;;  %v13697_v56 = vld [vmem:[%s20722_s7 + $0x274] sm:$0xf0] }
 0xc6a   : > { %v12888_v49 = vor.u32 %v13697_v56, %v12887_v61  ;;  %v13729_v39 = vld [vmem:[%s20722_s7 + $0x374] sm:$0xf0]  ;;  %v13007_v61 = vld [vmem:[%s20722_s7 + $0x360] sm:$0xf] }
 0xc6b   : > { %20815 = vst [vmem:[#allocation25_spill] sm:$0xff] %v19798_v6  ;;  %v13016_v18 = vor.u32 %v13729_v39, %v13015_v1 }
 0xc6c   : > { %v8191_v62 = vpop.f32.mrf.mxu3  ;;  %9378 = vmatpush.bf16.msrb.mxu0 %v12888_v49 }
 0xc6d   : > { %v8192_v45 = vadd.f32 %v8191_v62, %v8143_v36  ;;  %9476 = vmatpush.bf16.msrb.mxu2 %v13016_v18  ;;  %v12951_v18 = vld [vmem:[%s20722_s7 + $0x2f0] sm:$0xf] }
 0xc6e   : > { %v8095_v55 = vpop.f32.mrf.mxu1  ;;  %v8144_v31 = vpop.f32.mrf.mxu2 }
 0xc6f   : > { %v8096_v41 = vadd.f32 %v8095_v55, %v8047_v25  ;;  %v8145_v3 = vadd.f32 %v8144_v31, %v19758_v29  ;;  %v13695_v31 = vld [vmem:[%s20722_s7 + $0x264] sm:$0xf0]  ;;  %v8271_v49 = vmax.f32 %v8192_v45, 0.0  ;;  %v13745_v45 = vld [vmem:[%s20722_s7 + $0x3f4] sm:$0xf0] }
 0xc70   : > { %v8049_v52 = vpop.f32.mrf.mxu0 }
 0xc71   : > { %v8278_v10 = vmax.f32 %v8096_v41, 0.0  ;;  %v8050_v25 = vadd.f32 %v8049_v52, %v19749_v12  ;;  %v12879_v41 = vld [vmem:[%s20722_s7 + $0x260] sm:$0xf]  ;;  %v13727_v52 = vld [vmem:[%s20722_s7 + $0x364] sm:$0xf0] }
 0xc72   : > { %v12880_v56 = vor.u32 %v13695_v31, %v12879_v41  ;;  %v13079_v31 = vld [vmem:[%s20722_s7 + $0x3f0] sm:$0xf] }
 0xc73   : > { %9210 = vmatmul.bf16.gmra.mxu0 %v19013_v9  ;;  %9308 = vmatmul.bf16.gmra.mxu2 %v19316_v37  ;;  %v19817_v36 = vpack.c.bf16 %v8278_v10, %v8270_v24 }
 0xc74   : > { %v8193_v62 = vpop.f32.mrf.mxu3  ;;  %9379 = vmatpush.bf16.msrb.mxu0 %v12880_v56 }
 0xc75   : > { %20816 = vst [vmem:[#allocation26_spill] sm:$0xff] %v19817_v36  ;;  %v8194_v55 = vadd.f32 %v8193_v62, %v8145_v3  ;;  %v13008_v3 = vor.u32 %v13727_v52, %v13007_v61  ;;  %v13713_v62 = vld [vmem:[%s20722_s7 + $0x2f4] sm:$0xf0]  ;;  %v12999_v52 = vld [vmem:[%s20722_s7 + $0x350] sm:$0xf] }
 0xc76   : > { %v8098_v24 = vpop.f32.mrf.mxu1  ;;  %v8147_v10 = vpop.f32.mrf.mxu2  ;;  %v12952_v41 = vor.u32 %v13713_v62, %v12951_v18  ;;  %v13693_v61 = vld [vmem:[%s20722_s7 + $0x254] sm:$0xf0] }
 0xc77   : > { %v8279_v1 = vmax.f32 %v8194_v55, 0.0  ;;  %v19832_v39 = vadd.f32 %v8098_v24, %v8050_v25  ;;  %v13080_v25 = vor.u32 %v13745_v45, %v13079_v31  ;;  %v12871_v55 = vld [vmem:[%s20722_s7 + $0x250] sm:$0xf]  ;;  %9477 = vmatpush.bf16.msrb.mxu2 %v13008_v3  ;;  %v13725_v18 = vld [vmem:[%s20722_s7 + $0x354] sm:$0xf0]  ;;  %v8148_v62 = vadd.f32 %v8147_v10, %v19758_v29 }
 0xc78   : > { %v8051_v37 = vpop.f32.mrf.mxu0  ;;  %9427 = vmatpush.bf16.msrb.mxu1 %v12952_v41  ;;  %v12872_v56 = vor.u32 %v13693_v61, %v12871_v55  ;;  %v13000_v31 = vor.u32 %v13725_v18, %v12999_v52  ;;  %v13071_v3 = vld [vmem:[%s20722_s7 + $0x3e0] sm:$0xf]  ;;  %v13743_v10 = vld [vmem:[%s20722_s7 + $0x3e4] sm:$0xf0] }
 0xc79   : > { %9259 = vmatmul.bf16.gmra.mxu1 %v19054_v48  ;;  %9357 = vmatmul.bf16.gmra.mxu3 %v19357_v21  ;;  %v19854_v24 = vpack.c.bf16 %v8279_v1, %v8271_v49  ;;  %v12943_v49 = vld [vmem:[%s20722_s7 + $0x2e0] sm:$0xf]  ;;  %v13711_v1 = vld [vmem:[%s20722_s7 + $0x2e4] sm:$0xf0]  ;;  %v13072_v61 = vor.u32 %v13743_v10, %v13071_v3  ;;  %v12935_v10 = vld [vmem:[%s20722_s7 + $0x2d0] sm:$0xf] }
 0xc7a   : > { %9525 = vmatpush.bf16.msrb.mxu3 %v13080_v25  ;;  %9380 = vmatpush.bf16.msrb.mxu0 %v12872_v56  ;;  %v12944_v45 = vor.u32 %v13711_v1, %v12943_v49  ;;  %v8052_v25 = vadd.f32 %v8051_v37, %v19749_v12  ;;  %v12863_v52 = vld [vmem:[%s20722_s7 + $0x240] sm:$0xf]  ;;  %v13691_v18 = vld [vmem:[%s20722_s7 + $0x244] sm:$0xf0]  ;;  %v13709_v21 = vld [vmem:[%s20722_s7 + $0x2d4] sm:$0xf0] }
 0xc7b   : > { %20817 = vst [vmem:[#allocation27_spill] sm:$0xff] %v19854_v24  ;;  %v12991_v56 = vld [vmem:[%s20722_s7 + $0x340] sm:$0xf]  ;;  %9478 = vmatpush.bf16.msrb.mxu2 %v13000_v31  ;;  %v12864_v37 = vor.u32 %v13691_v18, %v12863_v52  ;;  %v12936_v31 = vor.u32 %v13709_v21, %v12935_v10  ;;  %v13689_v21 = vld [vmem:[%s20722_s7 + $0x234] sm:$0xf0] }
 0xc7c   : > { %v8196_v41 = vpop.f32.mrf.mxu3  ;;  %9428 = vmatpush.bf16.msrb.mxu1 %v12944_v45  ;;  %v13063_v45 = vld [vmem:[%s20722_s7 + $0x3d0] sm:$0xf]  ;;  %v13707_v10 = vld [vmem:[%s20722_s7 + $0x2c4] sm:$0xf0] }
 0xc7d   : > { %v19876_v55 = vadd.f32 %v8196_v41, %v8148_v62  ;;  %v13723_v62 = vld [vmem:[%s20722_s7 + $0x344] sm:$0xf0] }
 0xc7e   : > { %v8100_v49 = vpop.f32.mrf.mxu1  ;;  %v8149_v1 = vpop.f32.mrf.mxu2  ;;  %9526 = vmatpush.bf16.msrb.mxu3 %v13072_v61  ;;  %v12992_v41 = vor.u32 %v13723_v62, %v12991_v56  ;;  %9381 = vmatpush.bf16.msrb.mxu0 %v12864_v37  ;;  %v8286_v61 = vmax.f32 %v19832_v39, 0.0  ;;  %v12855_v56 = vld [vmem:[%s20722_s7 + $0x230] sm:$0xf]  ;;  %v13721_v39 = vld [vmem:[%s20722_s7 + $0x334] sm:$0xf0] }
 0xc7f   : > { %v8101_v3 = vadd.f32 %v8100_v49, %v8052_v25  ;;  %v13741_v25 = vld [vmem:[%s20722_s7 + $0x3d4] sm:$0xf0]  ;;  %v12856_v49 = vor.u32 %v13689_v21, %v12855_v56  ;;  %v12983_v37 = vld [vmem:[%s20722_s7 + $0x330] sm:$0xf]  ;;  %v8150_v62 = vadd.f32 %v8149_v1, %v19758_v29  ;;  %v13739_v56 = vld [vmem:[%s20722_s7 + $0x3c4] sm:$0xf0] }
 0xc80   : > { %v8054_v48 = vpop.f32.mrf.mxu0  ;;  %v13064_v18 = vor.u32 %v13741_v25, %v13063_v45  ;;  %9479 = vmatpush.bf16.msrb.mxu2 %v12992_v41  ;;  %9429 = vmatpush.bf16.msrb.mxu1 %v12936_v31  ;;  %v12927_v41 = vld [vmem:[%s20722_s7 + $0x2c0] sm:$0xf] }
 0xc81   : > { %v8294_v52 = vmax.f32 %v8101_v3, 0.0  ;;  %v12984_v3 = vor.u32 %v13721_v39, %v12983_v37  ;;  %v13055_v31 = vld [vmem:[%s20722_s7 + $0x3c0] sm:$0xf]  ;;  %v12928_v25 = vor.u32 %v13707_v10, %v12927_v41  ;;  %v8055_v21 = vadd.f32 %v8054_v48, %v19749_v12  ;;  %v13719_v48 = vld [vmem:[%s20722_s7 + $0x324] sm:$0xf0] }
 0xc82   : > { %9527 = vmatpush.bf16.msrb.mxu3 %v13064_v18  ;;  %9382 = vmatpush.bf16.msrb.mxu0 %v12856_v49  ;;  %v13056_v39 = vor.u32 %v13739_v56, %v13055_v31  ;;  %v12919_v56 = vld [vmem:[%s20722_s7 + $0x2b0] sm:$0xf] }
 0xc83   : > { %9215 = vmatmul.bf16.gmra.mxu0 %v19113_v35  ;;  %9313 = vmatmul.bf16.gmra.mxu2 %v19416_v58  ;;  %v19927_v45 = vpack.c.bf16 %v8294_v52, %v8286_v61  ;;  %v12847_v58 = vld [vmem:[%s20722_s7 + $0x220] sm:$0xf]  ;;  %v13687_v61 = vld [vmem:[%s20722_s7 + $0x224] sm:$0xf0] }
 0xc84   : > { %v8198_v1 = vpop.f32.mrf.mxu3  ;;  %v12975_v52 = vld [vmem:[%s20722_s7 + $0x320] sm:$0xf]  ;;  %9480 = vmatpush.bf16.msrb.mxu2 %v12984_v3  ;;  %9430 = vmatpush.bf16.msrb.mxu1 %v12928_v25  ;;  %v12848_v41 = vor.u32 %v13687_v61, %v12847_v58  ;;  %v13705_v3 = vld [vmem:[%s20722_s7 + $0x2b4] sm:$0xf0]  ;;  %v12839_v61 = vld [vmem:[%s20722_s7 + $0x210] sm:$0xf] }
 0xc85   : > { %20818 = vst [vmem:[#allocation28_spill] sm:$0xff] %v19927_v45  ;;  %v8199_v37 = vadd.f32 %v8198_v1, %v8150_v62  ;;  %v8287_v62 = vmax.f32 %v19876_v55, 0.0  ;;  %v12976_v1 = vor.u32 %v13719_v48, %v12975_v52  ;;  %v12920_v58 = vor.u32 %v13705_v3, %v12919_v56  ;;  %v13047_v55 = vld [vmem:[%s20722_s7 + $0x3b0] sm:$0xf]  ;;  %v13717_v48 = vld [vmem:[%s20722_s7 + $0x314] sm:$0xf0] }
 0xc86   : > { %v8103_v18 = vpop.f32.mrf.mxu1  ;;  %v8152_v49 = vpop.f32.mrf.mxu2  ;;  %9528 = vmatpush.bf16.msrb.mxu3 %v13056_v39  ;;  %9383 = vmatpush.bf16.msrb.mxu0 %v12848_v41  ;;  %v13685_v39 = vld [vmem:[%s20722_s7 + $0x214] sm:$0xf0]  ;;  %v12967_v41 = vld [vmem:[%s20722_s7 + $0x310] sm:$0xf] }
 0xc87   : > { %v8295_v10 = vmax.f32 %v8199_v37, 0.0  ;;  %v19946_v31 = vadd.f32 %v8103_v18, %v8055_v21  ;;  %v13737_v21 = vld [vmem:[%s20722_s7 + $0x3b4] sm:$0xf0]  ;;  %v12840_v18 = vor.u32 %v13685_v39, %v12839_v61  ;;  %v8153_v56 = vadd.f32 %v8152_v49, %v19758_v29  ;;  %v13735_v49 = vld [vmem:[%s20722_s7 + $0x3a4] sm:$0xf0] }
 0xc88   : > { %v8056_v25 = vpop.f32.mrf.mxu0  ;;  %v13048_v37 = vor.u32 %v13737_v21, %v13047_v55  ;;  %9481 = vmatpush.bf16.msrb.mxu2 %v12976_v1  ;;  %9431 = vmatpush.bf16.msrb.mxu1 %v12920_v58  ;;  %v12968_v3 = vor.u32 %v13717_v48, %v12967_v41  ;;  %v12911_v55 = vld [vmem:[%s20722_s7 + $0x2a0] sm:$0xf]  ;;  %v13683_v48 = vld [vmem:[%s20722_s7 + $0x204] sm:$0xf0] }
 0xc89   : > { %9264 = vmatmul.bf16.gmra.mxu1 %v19121_v23  ;;  %9362 = vmatmul.bf16.gmra.mxu3 %v19424_v54  ;;  %v19968_v52 = vpack.c.bf16 %v8295_v10, %v8287_v62  ;;  %v13703_v62 = vld [vmem:[%s20722_s7 + $0x2a4] sm:$0xf0]  ;;  %v13039_v10 = vld [vmem:[%s20722_s7 + $0x3a0] sm:$0xf]  ;;  %v8057_v21 = vadd.f32 %v8056_v25, %v19749_v12 }
 0xc8a   : > { %9529 = vmatpush.bf16.msrb.mxu3 %v13048_v37  ;;  %9384 = vmatpush.bf16.msrb.mxu0 %v12840_v18  ;;  %v12912_v58 = vor.u32 %v13703_v62, %v12911_v55  ;;  %v13040_v39 = vor.u32 %v13735_v49, %v13039_v10  ;;  %v12831_v41 = vld [vmem:[%s20722_s7 + $0x200] sm:$0xf]  ;;  %v13715_v25 = vld [vmem:[%s20722_s7 + $0x304] sm:$0xf0]  ;;  %v12903_v10 = vld [vmem:[%s20722_s7 + $0x290] sm:$0xf] }
 0xc8b   : > { %20819 = vst [vmem:[#allocation29_spill] sm:$0xff] %v19968_v52  ;;  %v12959_v37 = vld [vmem:[%s20722_s7 + $0x300] sm:$0xf]  ;;  %v12832_v62 = vor.u32 %v13683_v48, %v12831_v41  ;;  %v8302_v41 = vmax.f32 %v19946_v31, 0.0 }
 0xc8c   : > { %v8201_v1 = vpop.f32.mrf.mxu3  ;;  %9482 = vmatpush.bf16.msrb.mxu2 %v12968_v3  ;;  %9432 = vmatpush.bf16.msrb.mxu1 %v12912_v58  ;;  %v12960_v54 = vor.u32 %v13715_v25, %v12959_v37  ;;  %v13031_v58 = vld [vmem:[%s20722_s7 + $0x390] sm:$0xf]  ;;  %v13699_v37 = vld [vmem:[%s20722_s7 + $0x284] sm:$0xf0]  ;;  %v13023_v31 = vld [vmem:[%s20722_s7 + $0x380] sm:$0xf] }
 0xc8d   : > { %v8202_v61 = vadd.f32 %v8201_v1, %v8153_v56  ;;  %v13701_v1 = vld [vmem:[%s20722_s7 + $0x294] sm:$0xf0]  ;;  %v13731_v25 = vld [vmem:[%s20722_s7 + $0x384] sm:$0xf0] }
 0xc8e   : > { %v8105_v18 = vpop.f32.mrf.mxu1  ;;  %v8154_v55 = vpop.f32.mrf.mxu2  ;;  %9530 = vmatpush.bf16.msrb.mxu3 %v13040_v39  ;;  %9385 = vmatpush.bf16.msrb.mxu0 %v12832_v62  ;;  %v12904_v3 = vor.u32 %v13701_v1, %v12903_v10  ;;  %v12895_v39 = vld [vmem:[%s20722_s7 + $0x280] sm:$0xf]  ;;  %v13024_v1 = vor.u32 %v13731_v25, %v13023_v31 }
 0xc8f   : > { %v8106_v56 = vadd.f32 %v8105_v18, %v8057_v21  ;;  %v13733_v21 = vld [vmem:[%s20722_s7 + $0x394] sm:$0xf0]  ;;  %v8155_v23 = vadd.f32 %v8154_v55, %v19758_v29  ;;  %v12896_v55 = vor.u32 %v13699_v37, %v12895_v39 }
 0xc90   : > { %v8059_v49 = vpop.f32.mrf.mxu0  ;;  %v13032_v18 = vor.u32 %v13733_v21, %v13031_v58  ;;  %9483 = vmatpush.bf16.msrb.mxu2 %v12960_v54  ;;  %9433 = vmatpush.bf16.msrb.mxu1 %v12904_v3  ;;  %v8303_v21 = vmax.f32 %v8202_v61, 0.0 }
 0xc91   : > { %v8310_v48 = vmax.f32 %v8106_v56, 0.0  ;;  %v8060_v56 = vadd.f32 %v8059_v49, %v19749_v12 }
 0xc92   : > { %9531 = vmatpush.bf16.msrb.mxu3 %v13032_v18 }
 0xc93   : > { %9220 = vmatmul.bf16.gmra.mxu0 %v19128_v0  ;;  %9318 = vmatmul.bf16.gmra.mxu2 %v19431_v60  ;;  %v20027_v54 = vpack.c.bf16 %v8310_v48, %v8302_v41 }
 0xc94   : > { %v8203_v62 = vpop.f32.mrf.mxu3  ;;  %9434 = vmatpush.bf16.msrb.mxu1 %v12896_v55 }
 0xc95   : > { %20820 = vst [vmem:[#allocation30_spill] sm:$0xff] %v20027_v54  ;;  %v8204_v10 = vadd.f32 %v8203_v62, %v8155_v23 }
 0xc96   : > { %v8108_v3 = vpop.f32.mrf.mxu1  ;;  %v8157_v58 = vpop.f32.mrf.mxu2  ;;  %9532 = vmatpush.bf16.msrb.mxu3 %v13024_v1 }
 0xc97   : > { %v8311_v60 = vmax.f32 %v8204_v10, 0.0  ;;  %v8109_v0 = vadd.f32 %v8108_v3, %v8060_v56  ;;  %v8158_v48 = vadd.f32 %v8157_v58, %v19758_v29  ;;  %v20822_v56 = vld [vmem:[#allocation4_spill] sm:$0xff] }
 0xc98   : > { %v8061_v35 = vpop.f32.mrf.mxu0  ;;  %v20823_v10 = vld [vmem:[#allocation16_spill] sm:$0xff] }
 0xc99   : > { %9269 = vmatmul.bf16.gmra.mxu1 %v19133_v57  ;;  %9367 = vmatmul.bf16.gmra.mxu3 %v19436_v2  ;;  %v20035_v41 = vpack.c.bf16 %v8311_v60, %v8303_v21  ;;  %v8062_v23 = vadd.f32 %v8061_v35, %v19749_v12  ;;  %v8318_v62 = vmax.f32 %v8109_v0, 0.0  ;;  %v20825_v0 = vld [vmem:[#allocation7_spill] sm:$0xff] }
 0xc9b   : > { %20821 = vst [vmem:[#allocation31_spill] sm:$0xff] %v20035_v41 }
 0xc9c   : > { %v8206_v18 = vpop.f32.mrf.mxu3 }
 0xc9d   : > { %v8207_v49 = vadd.f32 %v8206_v18, %v8158_v48 }
 0xc9e   : > { %v8110_v39 = vpop.f32.mrf.mxu1  ;;  %v8159_v37 = vpop.f32.mrf.mxu2 }
 0xc9f   : > { %v8111_v31 = vadd.f32 %v8110_v39, %v8062_v23  ;;  %v8160_v25 = vadd.f32 %v8159_v37, %v19758_v29  ;;  %v8319_v48 = vmax.f32 %v8207_v49, 0.0  ;;  %v8536_v49 = vld [vmem:[%s20723_s8] sm:$0x3] }
 0xca0   : > { %v8064_v61 = vpop.f32.mrf.mxu0 }
 0xca1   : > { %v8326_v55 = vmax.f32 %v8111_v31, 0.0  ;;  %v8065_v3 = vadd.f32 %v8064_v61, %v19749_v12 }
 0xca3   : > { %9225 = vmatmul.bf16.gmra.mxu0 %v20822_v56  ;;  %9323 = vmatmul.bf16.gmra.mxu2 %v20823_v10  ;;  %v20042_v60 = vpack.c.bf16 %v8326_v55, %v8318_v62 }
 0xca4   : > { %v8208_v1 = vpop.f32.mrf.mxu3 }
 0xca5   : > { %20824 = vst [vmem:[#allocation4_spill] sm:$0xff] %v20042_v60  ;;  %v8209_v58 = vadd.f32 %v8208_v1, %v8160_v25 }
 0xca6   : > { %v8113_v35 = vpop.f32.mrf.mxu1  ;;  %v8162_v21 = vpop.f32.mrf.mxu2 }
 0xca7   : > { %v8327_v18 = vmax.f32 %v8209_v58, 0.0  ;;  %v8114_v23 = vadd.f32 %v8113_v35, %v8065_v3  ;;  %v8163_v31 = vadd.f32 %v8162_v21, %v19758_v29 }
 0xca8   : > { %v8066_v39 = vpop.f32.mrf.mxu0 }
 0xca9   : > { %9274 = vmatmul.bf16.gmra.mxu1 %v20825_v0  ;;  %9372 = vmatmul.bf16.gmra.mxu3 %v19459_v46  ;;  %v20047_v37 = vpack.c.bf16 %v8327_v18, %v8319_v48  ;;  %v8067_v55 = vadd.f32 %v8066_v39, %v19749_v12  ;;  %v8334_v58 = vmax.f32 %v8114_v23, 0.0  ;;  %v20054_v0 = vperm.slane %v8536_v49, 0 }
 0xcac   : > { %v8211_v62 = vpop.f32.mrf.mxu3 }
 0xcad   : > { %v8212_v10 = vadd.f32 %v8211_v62, %v8163_v31 }
 0xcae   : > { %v8115_v61 = vpop.f32.mrf.mxu1  ;;  %v8164_v25 = vpop.f32.mrf.mxu2 }
 0xcaf   : > { %v8116_v1 = vadd.f32 %v8115_v61, %v8067_v55  ;;  %v8165_v48 = vadd.f32 %v8164_v25, %v19758_v29  ;;  %v8335_v55 = vmax.f32 %v8212_v10, 0.0 }
 0xcb0   : > { %v9191_v3 = vpop.f32.mrf.mxu0 }
 0xcb1   : > { %v8342_v35 = vmax.f32 %v8116_v1, 0.0  ;;  %v9192_v18 = vadd.f32 %v9191_v3, %v20054_v0 }
 0xcb3   : > { %9386 = vmatmul.bf16.vlgmr.msrb.gmra.mxu0 %v19463_v51  ;;  %9484 = vmatmul.bf16.vlgmr.msrb.gmra.mxu2 %v19766_v44  ;;  %v20059_v12 = vpack.c.bf16 %v8342_v35, %v8334_v58 }
 0xcb4   : > { %v8213_v21 = vpop.f32.mrf.mxu3 }
 0xcb5   : > { %v8214_v39 = vadd.f32 %v8213_v21, %v8165_v48 }
 0xcb6   : > { %v9240_v31 = vpop.f32.mrf.mxu1  ;;  %v9289_v62 = vpop.f32.mrf.mxu2 }
 0xcb7   : > { %v8343_v61 = vmax.f32 %v8214_v39, 0.0  ;;  %v9241_v23 = vadd.f32 %v9240_v31, %v9192_v18 }
 0xcb8   : > { %v9193_v1 = vpop.f32.mrf.mxu0 }
 0xcb9   : > { %v9290_v49 = vadd.f32 %v9289_v62, %v9241_v23  ;;  %9435 = vmatmul.bf16.vlgmr.msrb.gmra.mxu1 %v19469_v7  ;;  %9533 = vmatmul.bf16.vlgmr.msrb.gmra.mxu3 %v19772_v59  ;;  %v20064_v29 = vpack.c.bf16 %v8343_v61, %v8335_v55  ;;  %v9194_v58 = vadd.f32 %v9193_v1, %v20054_v0 }
 0xcbb   : > { %20826 = vst [vmem:[#allocation32_spill] sm:$0xff] %v20064_v29 }
 0xcbc   : > { %v9338_v25 = vpop.f32.mrf.mxu3 }
 0xcbd   : > { %v20067_v35 = vadd.f32 %v9338_v25, %v9290_v49 }
 0xcbe   : > { %v9242_v3 = vpop.f32.mrf.mxu1  ;;  %v9291_v48 = vpop.f32.mrf.mxu2 }
 0xcbf   : > { %v9243_v21 = vadd.f32 %v9242_v3, %v9194_v58 }
 0xcc0   : > { %v9196_v44 = vpop.f32.mrf.mxu0 }
 0xcc1   : > { %v9292_v10 = vadd.f32 %v9291_v48, %v9243_v21  ;;  %v9197_v39 = vadd.f32 %v9196_v44, %v20054_v0 }
 0xcc3   : > { %9391 = vmatmul.bf16.gmra.mxu0 %v19478_v16  ;;  %9489 = vmatmul.bf16.gmra.mxu2 %v19781_v53 }
 0xcc4   : > { %v9340_v18 = vpop.f32.mrf.mxu3 }
 0xcc5   : > { %v20072_v31 = vadd.f32 %v9340_v18, %v9292_v10 }
 0xcc6   : > { %v9245_v62 = vpop.f32.mrf.mxu1  ;;  %v9294_v55 = vpop.f32.mrf.mxu2 }
 0xcc7   : > { %v9246_v61 = vadd.f32 %v9245_v62, %v9197_v39 }
 0xcc8   : > { %v9198_v23 = vpop.f32.mrf.mxu0 }
 0xcc9   : > { %v9295_v1 = vadd.f32 %v9294_v55, %v9246_v61  ;;  %9440 = vmatmul.bf16.gmra.mxu1 %v19483_v47  ;;  %9538 = vmatmul.bf16.gmra.mxu3 %v19786_v22  ;;  %v9199_v25 = vadd.f32 %v9198_v23, %v20054_v0 }
 0xccc   : > { %v9343_v49 = vpop.f32.mrf.mxu3 }
 0xccd   : > { %v20077_v58 = vadd.f32 %v9343_v49, %v9295_v1 }
 0xcce   : > { %v9247_v3 = vpop.f32.mrf.mxu1  ;;  %v9296_v48 = vpop.f32.mrf.mxu2 }
 0xccf   : > { %v9248_v21 = vadd.f32 %v9247_v3, %v9199_v25 }
 0xcd0   : > { %v9201_v44 = vpop.f32.mrf.mxu0 }
 0xcd1   : > { %v9297_v10 = vadd.f32 %v9296_v48, %v9248_v21  ;;  %v9202_v39 = vadd.f32 %v9201_v44, %v20054_v0 }
 0xcd3   : > { %9396 = vmatmul.bf16.gmra.mxu0 %v19490_v43  ;;  %9494 = vmatmul.bf16.gmra.mxu2 %v19793_v30 }
 0xcd4   : > { %v9345_v18 = vpop.f32.mrf.mxu3 }
 0xcd5   : > { %v20082_v62 = vadd.f32 %v9345_v18, %v9297_v10 }
 0xcd6   : > { %v9250_v55 = vpop.f32.mrf.mxu1  ;;  %v9299_v61 = vpop.f32.mrf.mxu2 }
 0xcd7   : > { %v9251_v22 = vadd.f32 %v9250_v55, %v9202_v39 }
 0xcd8   : > { %v9203_v23 = vpop.f32.mrf.mxu0 }
 0xcd9   : > { %v9300_v1 = vadd.f32 %v9299_v61, %v9251_v22  ;;  %9445 = vmatmul.bf16.gmra.mxu1 %v19495_v19  ;;  %9543 = vmatmul.bf16.gmra.mxu3 %v19798_v6  ;;  %v9204_v25 = vadd.f32 %v9203_v23, %v20054_v0 }
 0xcdc   : > { %v9348_v49 = vpop.f32.mrf.mxu3 }
 0xcdd   : > { %v20087_v3 = vadd.f32 %v9348_v49, %v9300_v1  ;;  %v20827_v49 = vld [vmem:[#allocation18_spill] sm:$0xff] }
 0xcde   : > { %v9252_v48 = vpop.f32.mrf.mxu1  ;;  %v9301_v21 = vpop.f32.mrf.mxu2 }
 0xcdf   : > { %v9253_v30 = vadd.f32 %v9252_v48, %v9204_v25 }
 0xce0   : > { %v9206_v44 = vpop.f32.mrf.mxu0 }
 0xce1   : > { %v9302_v10 = vadd.f32 %v9301_v21, %v9253_v30  ;;  %v9207_v22 = vadd.f32 %v9206_v44, %v20054_v0 }
 0xce3   : > { %9401 = vmatmul.bf16.gmra.mxu0 %v19514_v40  ;;  %9499 = vmatmul.bf16.gmra.mxu2 %v19817_v36 }
 0xce4   : > { %v9350_v18 = vpop.f32.mrf.mxu3 }
 0xce5   : > { %v20092_v39 = vadd.f32 %v9350_v18, %v9302_v10  ;;  %v13632_v18 = vld [vmem:[%s20722_s7 + $0x74] sm:$0xf] }
 0xce6   : > { %v9255_v55 = vpop.f32.mrf.mxu1  ;;  %v9304_v61 = vpop.f32.mrf.mxu2 }
 0xce7   : > { %v9256_v6 = vadd.f32 %v9255_v55, %v9207_v22  ;;  %v13664_v22 = vld [vmem:[%s20722_s7 + $0x174] sm:$0xf] }
 0xce8   : > { %v9208_v23 = vpop.f32.mrf.mxu0 }
 0xce9   : > { %v9305_v1 = vadd.f32 %v9304_v61, %v9256_v6  ;;  %9450 = vmatmul.bf16.gmra.mxu1 %v20827_v49  ;;  %9548 = vmatmul.bf16.gmra.mxu3 %v19854_v24  ;;  %v9209_v30 = vadd.f32 %v9208_v23, %v20054_v0  ;;  %v12633_v6 = vld [vmem:[%s20722_s7 + $0x78] sm:$0xf0]  ;;  %v20828_v23 = vld [vmem:[#allocation19_spill] sm:$0xff] }
 0xcea   : > { %v12636_v55 = vor.u32 %v13632_v18, %v12633_v6  ;;  %v12761_v61 = vld [vmem:[%s20722_s7 + $0x178] sm:$0xf0]  ;;  %v13662_v18 = vld [vmem:[%s20722_s7 + $0x164] sm:$0xf] }
 0xceb   : > { %v12617_v24 = vld [vmem:[%s20722_s7 + $0x58] sm:$0xf0] }
 0xcec   : > { %v9353_v25 = vpop.f32.mrf.mxu3  ;;  %9574 = vmatpush.bf16.msra.mxu0 %v12636_v55 }
 0xced   : > { %v20097_v48 = vadd.f32 %v9353_v25, %v9305_v1 }
 0xcee   : > { %v9257_v21 = vpop.f32.mrf.mxu1  ;;  %v9306_v36 = vpop.f32.mrf.mxu2 }
 0xcef   : > { %v9258_v40 = vadd.f32 %v9257_v21, %v9209_v30  ;;  %v13630_v30 = vld [vmem:[%s20722_s7 + $0x64] sm:$0xf]  ;;  %v12625_v21 = vld [vmem:[%s20722_s7 + $0x68] sm:$0xf0] }
 0xcf0   : > { %v9211_v44 = vpop.f32.mrf.mxu0  ;;  %v12628_v55 = vor.u32 %v13630_v30, %v12625_v21 }
 0xcf1   : > { %v9307_v10 = vadd.f32 %v9306_v36, %v9258_v40  ;;  %v12764_v40 = vor.u32 %v13664_v22, %v12761_v61  ;;  %v9212_v1 = vadd.f32 %v9211_v44, %v20054_v0  ;;  %v12753_v44 = vld [vmem:[%s20722_s7 + $0x168] sm:$0xf0] }
 0xcf2   : > { %v12756_v61 = vor.u32 %v13662_v18, %v12753_v44  ;;  %9575 = vmatpush.bf16.msra.mxu0 %v12628_v55  ;;  %v20829_v18 = vld [vmem:[#allocation20_spill] sm:$0xff] }
 0xcf3   : > { %9406 = vmatmul.bf16.gmra.mxu0 %v20828_v23  ;;  %9504 = vmatmul.bf16.gmra.mxu2 %v19927_v45  ;;  %v13680_v45 = vld [vmem:[%s20722_s7 + $0x1f4] sm:$0xf] }
 0xcf4   : > { %v9355_v36 = vpop.f32.mrf.mxu3  ;;  %9672 = vmatpush.bf16.msra.mxu2 %v12764_v40  ;;  %v13648_v40 = vld [vmem:[%s20722_s7 + $0xf4] sm:$0xf] }
 0xcf5   : > { %v20114_v25 = vadd.f32 %v9355_v36, %v9307_v10  ;;  %v12697_v36 = vld [vmem:[%s20722_s7 + $0xf8] sm:$0xf0]  ;;  %v13628_v44 = vld [vmem:[%s20722_s7 + $0x54] sm:$0xf] }
 0xcf6   : > { %v9260_v6 = vpop.f32.mrf.mxu1  ;;  %v9309_v22 = vpop.f32.mrf.mxu2  ;;  %v12700_v30 = vor.u32 %v13648_v40, %v12697_v36  ;;  %v13660_v55 = vld [vmem:[%s20722_s7 + $0x154] sm:$0xf]  ;;  %v13646_v40 = vld [vmem:[%s20722_s7 + $0xe4] sm:$0xf]  ;;  %v12689_v36 = vld [vmem:[%s20722_s7 + $0xe8] sm:$0xf0] }
 0xcf7   : > { %v9261_v10 = vadd.f32 %v9260_v6, %v9212_v1  ;;  %v12825_v1 = vld [vmem:[%s20722_s7 + $0x1f8] sm:$0xf0] }
 0xcf8   : > { %v9213_v23 = vpop.f32.mrf.mxu0  ;;  %v12828_v6 = vor.u32 %v13680_v45, %v12825_v1  ;;  %9673 = vmatpush.bf16.msra.mxu2 %v12756_v61  ;;  %9623 = vmatpush.bf16.msra.mxu1 %v12700_v30  ;;  %v13678_v61 = vld [vmem:[%s20722_s7 + $0x1e4] sm:$0xf]  ;;  %v12817_v1 = vld [vmem:[%s20722_s7 + $0x1e8] sm:$0xf0] }
 0xcf9   : > { %v9310_v21 = vadd.f32 %v9309_v22, %v9261_v10  ;;  %9455 = vmatmul.bf16.gmra.mxu1 %v20829_v18  ;;  %9553 = vmatmul.bf16.gmra.mxu3 %v19968_v52  ;;  %v12620_v22 = vor.u32 %v13628_v44, %v12617_v24  ;;  %v12745_v10 = vld [vmem:[%s20722_s7 + $0x158] sm:$0xf0]  ;;  %v12692_v24 = vor.u32 %v13646_v40, %v12689_v36  ;;  %v12609_v52 = vld [vmem:[%s20722_s7 + $0x48] sm:$0xf0] }
 0xcfa   : > { %9721 = vmatpush.bf16.msra.mxu3 %v12828_v6  ;;  %v12748_v45 = vor.u32 %v13660_v55, %v12745_v10  ;;  %v9214_v6 = vadd.f32 %v9213_v23, %v20054_v0  ;;  %v12820_v55 = vor.u32 %v13678_v61, %v12817_v1  ;;  %v13626_v10 = vld [vmem:[%s20722_s7 + $0x44] sm:$0xf]  ;;  %v13644_v1 = vld [vmem:[%s20722_s7 + $0xd4] sm:$0xf]  ;;  %v12681_v18 = vld [vmem:[%s20722_s7 + $0xd8] sm:$0xf0] }
 0xcfb   : > { %9576 = vmatpush.bf16.msra.mxu0 %v12620_v22  ;;  %v13658_v22 = vld [vmem:[%s20722_s7 + $0x144] sm:$0xf]  ;;  %v12612_v23 = vor.u32 %v13626_v10, %v12609_v52 }
 0xcfc   : > { %v9358_v30 = vpop.f32.mrf.mxu3  ;;  %9674 = vmatpush.bf16.msra.mxu2 %v12748_v45  ;;  %9624 = vmatpush.bf16.msra.mxu1 %v12692_v24  ;;  %v13676_v45 = vld [vmem:[%s20722_s7 + $0x1d4] sm:$0xf]  ;;  %v12684_v24 = vor.u32 %v13644_v1, %v12681_v18  ;;  %v12673_v1 = vld [vmem:[%s20722_s7 + $0xc8] sm:$0xf0] }
 0xcfd   : > { %v20167_v44 = vadd.f32 %v9358_v30, %v9310_v21  ;;  %v12737_v21 = vld [vmem:[%s20722_s7 + $0x148] sm:$0xf0] }
 0xcfe   : > { %v9262_v40 = vpop.f32.mrf.mxu1  ;;  %v9311_v36 = vpop.f32.mrf.mxu2  ;;  %9722 = vmatpush.bf16.msra.mxu3 %v12820_v55  ;;  %v12740_v30 = vor.u32 %v13658_v22, %v12737_v21  ;;  %v13624_v22 = vld [vmem:[%s20722_s7 + $0x34] sm:$0xf] }
 0xcff   : > { %v9263_v61 = vadd.f32 %v9262_v40, %v9214_v6  ;;  %9577 = vmatpush.bf16.msra.mxu0 %v12612_v23  ;;  %v12809_v6 = vld [vmem:[%s20722_s7 + $0x1d8] sm:$0xf0]  ;;  %v13656_v21 = vld [vmem:[%s20722_s7 + $0x134] sm:$0xf] }
 0xd00   : > { %v9216_v52 = vpop.f32.mrf.mxu0  ;;  %v12812_v10 = vor.u32 %v13676_v45, %v12809_v6  ;;  %v12601_v40 = vld [vmem:[%s20722_s7 + $0x38] sm:$0xf0]  ;;  %9675 = vmatpush.bf16.msra.mxu2 %v12740_v30  ;;  %9625 = vmatpush.bf16.msra.mxu1 %v12684_v24  ;;  %v13674_v30 = vld [vmem:[%s20722_s7 + $0x1c4] sm:$0xf]  ;;  %v12801_v6 = vld [vmem:[%s20722_s7 + $0x1c8] sm:$0xf0] }
 0xd01   : > { %v9312_v55 = vadd.f32 %v9311_v36, %v9263_v61  ;;  %v12604_v18 = vor.u32 %v13624_v22, %v12601_v40  ;;  %v12729_v36 = vld [vmem:[%s20722_s7 + $0x138] sm:$0xf0]  ;;  %v13642_v61 = vld [vmem:[%s20722_s7 + $0xc4] sm:$0xf]  ;;  %v9217_v22 = vadd.f32 %v9216_v52, %v20054_v0 }
 0xd02   : > { %v12732_v23 = vor.u32 %v13656_v21, %v12729_v36  ;;  %9723 = vmatpush.bf16.msra.mxu3 %v12812_v10  ;;  %v12676_v24 = vor.u32 %v13642_v61, %v12673_v1  ;;  %v12804_v21 = vor.u32 %v13674_v30, %v12801_v6  ;;  %v13622_v36 = vld [vmem:[%s20722_s7 + $0x24] sm:$0xf]  ;;  %v12665_v6 = vld [vmem:[%s20722_s7 + $0xb8] sm:$0xf0] }
 0xd03   : > { %9411 = vmatmul.bf16.gmra.mxu0 %v19724_v20  ;;  %9509 = vmatmul.bf16.gmra.mxu2 %v20027_v54  ;;  %v12593_v54 = vld [vmem:[%s20722_s7 + $0x28] sm:$0xf0]  ;;  %v13654_v10 = vld [vmem:[%s20722_s7 + $0x124] sm:$0xf] }
 0xd04   : > { %v9360_v45 = vpop.f32.mrf.mxu3  ;;  %9578 = vmatpush.bf16.msra.mxu0 %v12604_v18  ;;  %9676 = vmatpush.bf16.msra.mxu2 %v12732_v23  ;;  %v12596_v52 = vor.u32 %v13622_v36, %v12593_v54  ;;  %v13672_v23 = vld [vmem:[%s20722_s7 + $0x1b4] sm:$0xf] }
 0xd05   : > { %v20220_v40 = vadd.f32 %v9360_v45, %v9312_v55  ;;  %9626 = vmatpush.bf16.msra.mxu1 %v12676_v24  ;;  %v12721_v55 = vld [vmem:[%s20722_s7 + $0x128] sm:$0xf0]  ;;  %v13640_v45 = vld [vmem:[%s20722_s7 + $0xb4] sm:$0xf] }
 0xd06   : > { %v9265_v18 = vpop.f32.mrf.mxu1  ;;  %v9314_v61 = vpop.f32.mrf.mxu2  ;;  %v12724_v30 = vor.u32 %v13654_v10, %v12721_v55  ;;  %9724 = vmatpush.bf16.msra.mxu3 %v12804_v21  ;;  %v12668_v54 = vor.u32 %v13640_v45, %v12665_v6  ;;  %v12585_v21 = vld [vmem:[%s20722_s7 + $0x18] sm:$0xf0]  ;;  %v13638_v45 = vld [vmem:[%s20722_s7 + $0xa4] sm:$0xf]  ;;  %v12657_v6 = vld [vmem:[%s20722_s7 + $0xa8] sm:$0xf0] }
 0xd07   : > { %v9266_v1 = vadd.f32 %v9265_v18, %v9217_v22  ;;  %v12793_v22 = vld [vmem:[%s20722_s7 + $0x1b8] sm:$0xf0]  ;;  %v13620_v18 = vld [vmem:[%s20722_s7 + $0x14] sm:$0xf] }
 0xd08   : > { %v9218_v24 = vpop.f32.mrf.mxu0  ;;  %9579 = vmatpush.bf16.msra.mxu0 %v12596_v52  ;;  %v12796_v10 = vor.u32 %v13672_v23, %v12793_v22  ;;  %v13652_v52 = vld [vmem:[%s20722_s7 + $0x114] sm:$0xf]  ;;  %9677 = vmatpush.bf16.msra.mxu2 %v12724_v30  ;;  %v12713_v55 = vld [vmem:[%s20722_s7 + $0x118] sm:$0xf0]  ;;  %v13670_v23 = vld [vmem:[%s20722_s7 + $0x1a4] sm:$0xf] }
 0xd09   : > { %v9315_v36 = vadd.f32 %v9314_v61, %v9266_v1  ;;  %9460 = vmatmul.bf16.gmra.mxu1 %v19732_v17  ;;  %9558 = vmatmul.bf16.gmra.mxu3 %v20035_v41  ;;  %v12588_v61 = vor.u32 %v13620_v18, %v12585_v21  ;;  %v12716_v1 = vor.u32 %v13652_v52, %v12713_v55  ;;  %v12785_v22 = vld [vmem:[%s20722_s7 + $0x1a8] sm:$0xf0]  ;;  %v13618_v55 = vld [vmem:[%s20722_s7 + $0x4] sm:$0xf] }
 0xd0a   : > { %9627 = vmatpush.bf16.msra.mxu1 %v12668_v54  ;;  %9725 = vmatpush.bf16.msra.mxu3 %v12796_v10  ;;  %v12660_v54 = vor.u32 %v13638_v45, %v12657_v6  ;;  %v9219_v18 = vadd.f32 %v9218_v24, %v20054_v0  ;;  %v12788_v52 = vor.u32 %v13670_v23, %v12785_v22  ;;  %v12577_v41 = vld [vmem:[%s20722_s7 + $0x8] sm:$0xf0]  ;;  %v13650_v10 = vld [vmem:[%s20722_s7 + $0x104] sm:$0xf]  ;;  %v12649_v22 = vld [vmem:[%s20722_s7 + $0x98] sm:$0xf0] }
 0xd0b   : > { %v12580_v24 = vor.u32 %v13618_v55, %v12577_v41 }
 0xd0c   : > { %v9363_v30 = vpop.f32.mrf.mxu3  ;;  %9580 = vmatpush.bf16.msra.mxu0 %v12588_v61  ;;  %9678 = vmatpush.bf16.msra.mxu2 %v12716_v1  ;;  %v13668_v1 = vld [vmem:[%s20722_s7 + $0x194] sm:$0xf] }
 0xd0d   : > { %v20273_v21 = vadd.f32 %v9363_v30, %v9315_v36  ;;  %v12705_v36 = vld [vmem:[%s20722_s7 + $0x108] sm:$0xf0]  ;;  %v13636_v30 = vld [vmem:[%s20722_s7 + $0x94] sm:$0xf] }
 0xd0e   : > { %v9267_v61 = vpop.f32.mrf.mxu1  ;;  %v9316_v45 = vpop.f32.mrf.mxu2  ;;  %9628 = vmatpush.bf16.msra.mxu1 %v12660_v54  ;;  %v12708_v23 = vor.u32 %v13650_v10, %v12705_v36  ;;  %9726 = vmatpush.bf16.msra.mxu3 %v12788_v52  ;;  %v12652_v41 = vor.u32 %v13636_v30, %v12649_v22  ;;  %v12641_v52 = vld [vmem:[%s20722_s7 + $0x88] sm:$0xf0] }
 0xd0f   : > { %v9268_v6 = vadd.f32 %v9267_v61, %v9219_v18  ;;  %v12777_v18 = vld [vmem:[%s20722_s7 + $0x198] sm:$0xf0]  ;;  %v13634_v61 = vld [vmem:[%s20722_s7 + $0x84] sm:$0xf] }
 0xd10   : > { %v9221_v54 = vpop.f32.mrf.mxu0  ;;  %9581 = vmatpush.bf16.msra.mxu0 %v12580_v24  ;;  %v12780_v10 = vor.u32 %v13668_v1, %v12777_v18  ;;  %9679 = vmatpush.bf16.msra.mxu2 %v12708_v23  ;;  %v13666_v24 = vld [vmem:[%s20722_s7 + $0x184] sm:$0xf]  ;;  %v12644_v36 = vor.u32 %v13634_v61, %v12641_v52 }
 0xd11   : > { %v9317_v55 = vadd.f32 %v9316_v45, %v9268_v6  ;;  %v12769_v6 = vld [vmem:[%s20722_s7 + $0x188] sm:$0xf0]  ;;  %v9222_v23 = vadd.f32 %v9221_v54, %v20054_v0 }
 0xd12   : > { %9629 = vmatpush.bf16.msra.mxu1 %v12652_v41  ;;  %9727 = vmatpush.bf16.msra.mxu3 %v12780_v10  ;;  %v12772_v22 = vor.u32 %v13666_v24, %v12769_v6 }
 0xd13   : > { %9416 = vmatmul.bf16.gmra.mxu0 %v19739_v11  ;;  %9514 = vmatmul.bf16.gmra.mxu2 %v20042_v60 }
 0xd14   : > { %v9365_v45 = vpop.f32.mrf.mxu3 }
 0xd15   : > { %v20314_v30 = vadd.f32 %v9365_v45, %v9317_v55 }
 0xd16   : > { %v9270_v1 = vpop.f32.mrf.mxu1  ;;  %v9319_v41 = vpop.f32.mrf.mxu2  ;;  %9630 = vmatpush.bf16.msra.mxu1 %v12644_v36  ;;  %9728 = vmatpush.bf16.msra.mxu3 %v12772_v22 }
 0xd17   : > { %v9271_v18 = vadd.f32 %v9270_v1, %v9222_v23 }
 0xd18   : > { %v9223_v60 = vpop.f32.mrf.mxu0 }
 0xd19   : > { %v9320_v11 = vadd.f32 %v9319_v41, %v9271_v18  ;;  %9465 = vmatmul.bf16.gmra.mxu1 %v19744_v5  ;;  %9563 = vmatmul.bf16.gmra.mxu3 %v20047_v37  ;;  %v9224_v61 = vadd.f32 %v9223_v60, %v20054_v0 }
 0xd1c   : > { %v9368_v10 = vpop.f32.mrf.mxu3 }
 0xd1d   : > { %v20319_v52 = vadd.f32 %v9368_v10, %v9320_v11 }
 0xd1e   : > { %v9272_v54 = vpop.f32.mrf.mxu1  ;;  %v9321_v55 = vpop.f32.mrf.mxu2 }
 0xd1f   : > { %v9273_v45 = vadd.f32 %v9272_v54, %v9224_v61 }
 0xd20   : > { %v9226_v24 = vpop.f32.mrf.mxu0 }
 0xd21   : > { %v9322_v6 = vadd.f32 %v9321_v55, %v9273_v45  ;;  %v9227_v23 = vadd.f32 %v9226_v24, %v20054_v0 }
 0xd23   : > { %9421 = vmatmul.bf16.gmra.mxu0 %v19754_v63  ;;  %9519 = vmatmul.bf16.gmra.mxu2 %v20059_v12 }
 0xd24   : > { %v9370_v36 = vpop.f32.mrf.mxu3 }
 0xd25   : > { %v20324_v22 = vadd.f32 %v9370_v36, %v9322_v6 }
 0xd26   : > { %v9275_v1 = vpop.f32.mrf.mxu1  ;;  %v9324_v41 = vpop.f32.mrf.mxu2 }
 0xd27   : > { %v9276_v18 = vadd.f32 %v9275_v1, %v9227_v23 }
 0xd28   : > { %v9228_v60 = vpop.f32.mrf.mxu0 }
 0xd29   : > { %v9325_v11 = vadd.f32 %v9324_v41, %v9276_v18  ;;  %9470 = vmatmul.bf16.gmra.mxu1 %v19762_v26  ;;  %9568 = vmatmul.bf16.gmra.mxu3 %v20064_v29  ;;  %v9229_v61 = vadd.f32 %v9228_v60, %v20054_v0 }
 0xd2c   : > { %v9373_v10 = vpop.f32.mrf.mxu3 }
 0xd2d   : > { %v20329_v54 = vadd.f32 %v9373_v10, %v9325_v11 }
 0xd2e   : > { %v9277_v55 = vpop.f32.mrf.mxu1  ;;  %v9326_v45 = vpop.f32.mrf.mxu2 }
 0xd2f   : > { %v9278_v24 = vadd.f32 %v9277_v55, %v9229_v61 }
 0xd30   : > { %v9387_v6 = vpop.f32.mrf.mxu0 }
 0xd31   : > { %v9327_v36 = vadd.f32 %v9326_v45, %v9278_v24  ;;  %v9388_v1 = vadd.f32 %v9387_v6, %v20067_v35 }
 0xd33   : > { %9582 = vmatmul.bf16.vlgmr.msra.gmra.mxu0 %v18852_v15  ;;  %9680 = vmatmul.bf16.vlgmr.msra.gmra.mxu2 %v19155_v28 }
 0xd34   : > { %v9375_v23 = vpop.f32.mrf.mxu3 }
 0xd35   : > { %v20334_v41 = vadd.f32 %v9375_v23, %v9327_v36 }
 0xd36   : > { %v9436_v18 = vpop.f32.mrf.mxu1  ;;  %v9485_v29 = vpop.f32.mrf.mxu2 }
 0xd37   : > { %v9437_v0 = vadd.f32 %v9436_v18, %v9388_v1 }
 0xd38   : > { %v9389_v60 = vpop.f32.mrf.mxu0 }
 0xd39   : > { %9631 = vmatmul.bf16.vlgmr.msra.gmra.mxu1 %v18858_v27  ;;  %9729 = vmatmul.bf16.vlgmr.msra.gmra.mxu3 %v19161_v42  ;;  %v9486_v11 = vadd.f32 %v9485_v29, %v9437_v0  ;;  %v9390_v28 = vadd.f32 %v9389_v60, %v20072_v31 }
 0xd3c   : > { %v9534_v15 = vpop.f32.mrf.mxu3 }
 0xd3d   : > { %v9535_v35 = vadd.f32 %v9534_v15, %v9486_v11 }
 0xd3e   : > { %v9438_v10 = vpop.f32.mrf.mxu1  ;;  %v9487_v61 = vpop.f32.mrf.mxu2 }
 0xd3f   : > { %9966 = vst [vmem:[%s20342_s12] sm:$0xff] %v9535_v35  ;;  %v9439_v55 = vadd.f32 %v9438_v10, %v9390_v28  ;;  %v20830_v28 = vld [vmem:[#allocation8_spill] sm:$0xff] }
 0xd40   : > { %v9392_v45 = vpop.f32.mrf.mxu0 }
 0xd41   : > { %v9488_v27 = vadd.f32 %v9487_v61, %v9439_v55  ;;  %v9393_v29 = vadd.f32 %v9392_v45, %v20077_v58  ;;  %v20831_v45 = vld [vmem:[#allocation9_spill] sm:$0xff] }
 0xd43   : > { %9587 = vmatmul.bf16.gmra.mxu0 %v18867_v34  ;;  %9685 = vmatmul.bf16.gmra.mxu2 %v19170_v4 }
 0xd44   : > { %v9536_v42 = vpop.f32.mrf.mxu3 }
 0xd45   : > { %v9537_v24 = vadd.f32 %v9536_v42, %v9488_v27 }
 0xd46   : > { %v9441_v6 = vpop.f32.mrf.mxu1  ;;  %v9490_v36 = vpop.f32.mrf.mxu2 }
 0xd47   : > { %9968 = vst [vmem:[%s20342_s12 + $0x10] sm:$0xff] %v9537_v24  ;;  %v9442_v31 = vadd.f32 %v9441_v6, %v9393_v29 }
 0xd48   : > { %v9394_v23 = vpop.f32.mrf.mxu0 }
 0xd49   : > { %9636 = vmatmul.bf16.gmra.mxu1 %v18872_v32  ;;  %9734 = vmatmul.bf16.gmra.mxu3 %v19175_v33  ;;  %v9491_v1 = vadd.f32 %v9490_v36, %v9442_v31  ;;  %v9395_v34 = vadd.f32 %v9394_v23, %v20082_v62  ;;  %v20832_v23 = vld [vmem:[#allocation10_spill] sm:$0xff] }
 0xd4c   : > { %v9539_v18 = vpop.f32.mrf.mxu3 }
 0xd4d   : > { %v9540_v4 = vadd.f32 %v9539_v18, %v9491_v1 }
 0xd4e   : > { %v9443_v0 = vpop.f32.mrf.mxu1  ;;  %v9492_v60 = vpop.f32.mrf.mxu2 }
 0xd4f   : > { %9970 = vst [vmem:[%s20342_s12 + $0x20] sm:$0xff] %v9540_v4  ;;  %v9444_v58 = vadd.f32 %v9443_v0, %v9395_v34 }
 0xd50   : > { %v9397_v11 = vpop.f32.mrf.mxu0 }
 0xd51   : > { %v9493_v15 = vadd.f32 %v9492_v60, %v9444_v58  ;;  %v9398_v32 = vadd.f32 %v9397_v11, %v20087_v3 }
 0xd53   : > { %9592 = vmatmul.bf16.gmra.mxu0 %v18879_v13  ;;  %9690 = vmatmul.bf16.gmra.mxu2 %v20830_v28 }
 0xd54   : > { %v9541_v35 = vpop.f32.mrf.mxu3 }
 0xd55   : > { %v9542_v33 = vadd.f32 %v9541_v35, %v9493_v15 }
 0xd56   : > { %v9446_v10 = vpop.f32.mrf.mxu1  ;;  %v9495_v61 = vpop.f32.mrf.mxu2 }
 0xd57   : > { %9972 = vst [vmem:[%s20342_s12 + $0x30] sm:$0xff] %v9542_v33  ;;  %v9447_v62 = vadd.f32 %v9446_v10, %v9398_v32  ;;  %v13696_v32 = vld [vmem:[%s20722_s7 + $0x274] sm:$0xf] }
 0xd58   : > { %v9399_v55 = vpop.f32.mrf.mxu0 }
 0xd59   : > { %9641 = vmatmul.bf16.gmra.mxu1 %v18884_v50  ;;  %9739 = vmatmul.bf16.gmra.mxu3 %v20831_v45  ;;  %v9496_v27 = vadd.f32 %v9495_v61, %v9447_v62  ;;  %v9400_v13 = vadd.f32 %v9399_v55, %v20092_v39  ;;  %v20833_v61 = vld [vmem:[#allocation11_spill] sm:$0xff] }
 0xd5c   : > { %v9544_v42 = vpop.f32.mrf.mxu3 }
 0xd5d   : > { %v9545_v29 = vadd.f32 %v9544_v42, %v9496_v27  ;;  %v13694_v42 = vld [vmem:[%s20722_s7 + $0x264] sm:$0xf] }
 0xd5e   : > { %v9448_v24 = vpop.f32.mrf.mxu1  ;;  %v9497_v6 = vpop.f32.mrf.mxu2 }
 0xd5f   : > { %9974 = vst [vmem:[%s20342_s12 + $0x40] sm:$0xff] %v9545_v29  ;;  %v9449_v3 = vadd.f32 %v9448_v24, %v9400_v13  ;;  %v12881_v13 = vld [vmem:[%s20722_s7 + $0x268] sm:$0xf0] }
 0xd60   : > { %v9402_v36 = vpop.f32.mrf.mxu0 }
 0xd61   : > { %v9498_v31 = vadd.f32 %v9497_v6, %v9449_v3  ;;  %v9403_v50 = vadd.f32 %v9402_v36, %v20097_v48  ;;  %v12884_v6 = vor.u32 %v13694_v42, %v12881_v13 }
 0xd63   : > { %9597 = vmatmul.bf16.gmra.mxu0 %v18903_v38  ;;  %9695 = vmatmul.bf16.gmra.mxu2 %v20832_v23  ;;  %v12953_v23 = vld [vmem:[%s20722_s7 + $0x2f8] sm:$0xf0] }
 0xd64   : > { %v9546_v1 = vpop.f32.mrf.mxu3 }
 0xd65   : > { %v9547_v18 = vadd.f32 %v9546_v1, %v9498_v31  ;;  %v13712_v31 = vld [vmem:[%s20722_s7 + $0x2f4] sm:$0xf] }
 0xd66   : > { %v9451_v34 = vpop.f32.mrf.mxu1  ;;  %v9500_v4 = vpop.f32.mrf.mxu2 }
 0xd67   : > { %9976 = vst [vmem:[%s20342_s12 + $0x50] sm:$0xff] %v9547_v18  ;;  %v9452_v39 = vadd.f32 %v9451_v34, %v9403_v50  ;;  %v12956_v50 = vor.u32 %v13712_v31, %v12953_v23  ;;  %v13744_v18 = vld [vmem:[%s20722_s7 + $0x3f4] sm:$0xf]  ;;  %v13081_v34 = vld [vmem:[%s20722_s7 + $0x3f8] sm:$0xf0] }
 0xd68   : > { %v9404_v0 = vpop.f32.mrf.mxu0  ;;  %v13740_v31 = vld [vmem:[%s20722_s7 + $0x3d4] sm:$0xf]  ;;  %v13065_v23 = vld [vmem:[%s20722_s7 + $0x3d8] sm:$0xf0] }
 0xd69   : > { %9646 = vmatmul.bf16.gmra.mxu1 %v18940_v14  ;;  %9744 = vmatmul.bf16.gmra.mxu3 %v19243_v8  ;;  %v9501_v60 = vadd.f32 %v9500_v4, %v9452_v39  ;;  %v9405_v38 = vadd.f32 %v9404_v0, %v20114_v25  ;;  %v12889_v14 = vld [vmem:[%s20722_s7 + $0x278] sm:$0xf0]  ;;  %v13728_v8 = vld [vmem:[%s20722_s7 + $0x374] sm:$0xf]  ;;  %v20834_v4 = vld [vmem:[#allocation2_spill] sm:$0xff]  ;;  %v13084_v0 = vor.u32 %v13744_v18, %v13081_v34 }
 0xd6a   : > { %v12892_v33 = vor.u32 %v13696_v32, %v12889_v14  ;;  %v13017_v25 = vld [vmem:[%s20722_s7 + $0x378] sm:$0xf0]  ;;  %v20835_v39 = vld [vmem:[#allocation12_spill] sm:$0xff]  ;;  %9819 = vmatpush.bf16.msrb.mxu1 %v12956_v50  ;;  %v12945_v32 = vld [vmem:[%s20722_s7 + $0x2e8] sm:$0xf0] }
 0xd6b   : > { %v13020_v62 = vor.u32 %v13728_v8, %v13017_v25  ;;  %9917 = vmatpush.bf16.msrb.mxu3 %v13084_v0  ;;  %v13742_v14 = vld [vmem:[%s20722_s7 + $0x3e4] sm:$0xf]  ;;  %v13073_v25 = vld [vmem:[%s20722_s7 + $0x3e8] sm:$0xf0]  ;;  %v13688_v50 = vld [vmem:[%s20722_s7 + $0x234] sm:$0xf] }
 0xd6c   : > { %v9549_v58 = vpop.f32.mrf.mxu3  ;;  %9770 = vmatpush.bf16.msrb.mxu0 %v12892_v33  ;;  %v12857_v18 = vld [vmem:[%s20722_s7 + $0x238] sm:$0xf0]  ;;  %v13720_v34 = vld [vmem:[%s20722_s7 + $0x334] sm:$0xf] }
 0xd6d   : > { %v9550_v11 = vadd.f32 %v9549_v58, %v9501_v60  ;;  %9868 = vmatpush.bf16.msrb.mxu2 %v13020_v62  ;;  %v13692_v60 = vld [vmem:[%s20722_s7 + $0x254] sm:$0xf]  ;;  %v12873_v58 = vld [vmem:[%s20722_s7 + $0x258] sm:$0xf0]  ;;  %v13076_v62 = vor.u32 %v13742_v14, %v13073_v25  ;;  %v13686_v25 = vld [vmem:[%s20722_s7 + $0x224] sm:$0xf] }
 0xd6e   : > { %v9453_v15 = vpop.f32.mrf.mxu1  ;;  %v9502_v28 = vpop.f32.mrf.mxu2 }
 0xd6f   : > { %9978 = vst [vmem:[%s20342_s12 + $0x60] sm:$0xff] %v9550_v11  ;;  %v9454_v35 = vadd.f32 %v9453_v15, %v9405_v38  ;;  %v13724_v38 = vld [vmem:[%s20722_s7 + $0x354] sm:$0xf]  ;;  %v12876_v11 = vor.u32 %v13692_v60, %v12873_v58  ;;  %v13001_v15 = vld [vmem:[%s20722_s7 + $0x358] sm:$0xf0]  ;;  %9918 = vmatpush.bf16.msrb.mxu3 %v13076_v62  ;;  %v20836_v60 = vld [vmem:[#allocation6_spill] sm:$0xff] }
 0xd70   : > { %v9407_v48 = vpop.f32.mrf.mxu0  ;;  %9771 = vmatpush.bf16.msrb.mxu0 %v12884_v6  ;;  %v13708_v6 = vld [vmem:[%s20722_s7 + $0x2d4] sm:$0xf]  ;;  %v20837_v58 = vld [vmem:[#allocation13_spill] sm:$0xff] }
 0xd71   : > { %v9503_v10 = vadd.f32 %v9502_v28, %v9454_v35  ;;  %v9408_v45 = vadd.f32 %v9407_v48, %v20167_v44  ;;  %v13009_v44 = vld [vmem:[%s20722_s7 + $0x368] sm:$0xf0]  ;;  %v13004_v35 = vor.u32 %v13724_v38, %v13001_v15  ;;  %v13710_v48 = vld [vmem:[%s20722_s7 + $0x2e4] sm:$0xf] }
 0xd72   : > { %v12948_v33 = vor.u32 %v13710_v48, %v12945_v32  ;;  %v12929_v15 = vld [vmem:[%s20722_s7 + $0x2c8] sm:$0xf0] }
 0xd73   : > { %9602 = vmatmul.bf16.gmra.mxu0 %v19013_v9  ;;  %9700 = vmatmul.bf16.gmra.mxu2 %v20833_v61  ;;  %v13726_v9 = vld [vmem:[%s20722_s7 + $0x364] sm:$0xf]  ;;  %v13057_v32 = vld [vmem:[%s20722_s7 + $0x3c8] sm:$0xf0] }
 0xd74   : > { %v9551_v55 = vpop.f32.mrf.mxu3  ;;  %v13012_v36 = vor.u32 %v13726_v9, %v13009_v44  ;;  %9772 = vmatpush.bf16.msrb.mxu0 %v12876_v11  ;;  %9820 = vmatpush.bf16.msrb.mxu1 %v12948_v33  ;;  %v12937_v44 = vld [vmem:[%s20722_s7 + $0x2d8] sm:$0xf0]  ;;  %v13706_v11 = vld [vmem:[%s20722_s7 + $0x2c4] sm:$0xf] }
 0xd75   : > { %v9552_v27 = vadd.f32 %v9551_v55, %v9503_v10  ;;  %v13690_v55 = vld [vmem:[%s20722_s7 + $0x244] sm:$0xf]  ;;  %v12932_v48 = vor.u32 %v13706_v11, %v12929_v15  ;;  %v13041_v11 = vld [vmem:[%s20722_s7 + $0x3a8] sm:$0xf0] }
 0xd76   : > { %v9456_v29 = vpop.f32.mrf.mxu1  ;;  %v9505_v24 = vpop.f32.mrf.mxu2  ;;  %9869 = vmatpush.bf16.msrb.mxu2 %v13012_v36  ;;  %v12940_v36 = vor.u32 %v13708_v6, %v12937_v44  ;;  %v13049_v6 = vld [vmem:[%s20722_s7 + $0x3b8] sm:$0xf0] }
 0xd77   : > { %9980 = vst [vmem:[%s20342_s12 + $0x70] sm:$0xff] %v9552_v27  ;;  %v9457_v3 = vadd.f32 %v9456_v29, %v9408_v45  ;;  %v12865_v45 = vld [vmem:[%s20722_s7 + $0x248] sm:$0xf0]  ;;  %v13722_v27 = vld [vmem:[%s20722_s7 + $0x344] sm:$0xf]  ;;  %v20838_v44 = vld [vmem:[#allocation5_spill] sm:$0xff] }
 0xd78   : > { %v9409_v1 = vpop.f32.mrf.mxu0  ;;  %v12868_v9 = vor.u32 %v13690_v55, %v12865_v45  ;;  %9821 = vmatpush.bf16.msrb.mxu1 %v12940_v36 }
 0xd79   : > { %9651 = vmatmul.bf16.gmra.mxu1 %v20834_v4  ;;  %9749 = vmatmul.bf16.gmra.mxu3 %v20835_v39  ;;  %v9506_v28 = vadd.f32 %v9505_v24, %v9457_v3  ;;  %v9410_v10 = vadd.f32 %v9409_v1, %v20220_v40  ;;  %v12993_v40 = vld [vmem:[%s20722_s7 + $0x348] sm:$0xf0]  ;;  %v13068_v1 = vor.u32 %v13740_v31, %v13065_v23  ;;  %v12985_v39 = vld [vmem:[%s20722_s7 + $0x338] sm:$0xf0]  ;;  %v13684_v31 = vld [vmem:[%s20722_s7 + $0x214] sm:$0xf] }
 0xd7a   : > { %9870 = vmatpush.bf16.msrb.mxu2 %v13004_v35  ;;  %v12996_v24 = vor.u32 %v13722_v27, %v12993_v40  ;;  %9773 = vmatpush.bf16.msrb.mxu0 %v12868_v9  ;;  %v12860_v4 = vor.u32 %v13688_v50, %v12857_v18  ;;  %v12988_v38 = vor.u32 %v13720_v34, %v12985_v39  ;;  %v12921_v9 = vld [vmem:[%s20722_s7 + $0x2b8] sm:$0xf0]  ;;  %v13702_v39 = vld [vmem:[%s20722_s7 + $0x2a4] sm:$0xf] }
 0xd7b   : > { %9919 = vmatpush.bf16.msrb.mxu3 %v13068_v1  ;;  %v12841_v23 = vld [vmem:[%s20722_s7 + $0x218] sm:$0xf0]  ;;  %v13716_v1 = vld [vmem:[%s20722_s7 + $0x314] sm:$0xf] }
 0xd7c   : > { %v9554_v8 = vpop.f32.mrf.mxu3  ;;  %9822 = vmatpush.bf16.msrb.mxu1 %v12932_v48  ;;  %v12844_v50 = vor.u32 %v13684_v31, %v12841_v23  ;;  %v12969_v18 = vld [vmem:[%s20722_s7 + $0x318] sm:$0xf0]  ;;  %v13682_v48 = vld [vmem:[%s20722_s7 + $0x204] sm:$0xf]  ;;  %v13025_v31 = vld [vmem:[%s20722_s7 + $0x388] sm:$0xf0] }
 0xd7d   : > { %v9555_v61 = vadd.f32 %v9554_v8, %v9506_v28  ;;  %v13738_v28 = vld [vmem:[%s20722_s7 + $0x3c4] sm:$0xf] }
 0xd7e   : > { %v9458_v42 = vpop.f32.mrf.mxu1  ;;  %v9507_v13 = vpop.f32.mrf.mxu2  ;;  %9871 = vmatpush.bf16.msrb.mxu2 %v12996_v24  ;;  %9774 = vmatpush.bf16.msrb.mxu0 %v12860_v4  ;;  %v13060_v33 = vor.u32 %v13738_v28, %v13057_v32  ;;  %v13736_v24 = vld [vmem:[%s20722_s7 + $0x3b4] sm:$0xf]  ;;  %v12972_v4 = vor.u32 %v13716_v1, %v12969_v18  ;;  %v12833_v32 = vld [vmem:[%s20722_s7 + $0x208] sm:$0xf0] }
 0xd7f   : > { %9982 = vst [vmem:[%s20342_s12 + $0x80] sm:$0xff] %v9555_v61  ;;  %v9459_v29 = vadd.f32 %v9458_v42, %v9410_v10  ;;  %v12849_v10 = vld [vmem:[%s20722_s7 + $0x228] sm:$0xf0]  ;;  %v13718_v61 = vld [vmem:[%s20722_s7 + $0x324] sm:$0xf]  ;;  %v13052_v36 = vor.u32 %v13736_v24, %v13049_v6 }
 0xd80   : > { %v9412_v3 = vpop.f32.mrf.mxu0  ;;  %v12852_v45 = vor.u32 %v13686_v25, %v12849_v10  ;;  %9920 = vmatpush.bf16.msrb.mxu3 %v13060_v33  ;;  %v12836_v25 = vor.u32 %v13682_v48, %v12833_v32  ;;  %v13698_v24 = vld [vmem:[%s20722_s7 + $0x284] sm:$0xf]  ;;  %v12897_v6 = vld [vmem:[%s20722_s7 + $0x288] sm:$0xf0]  ;;  %v20842_v48 = vld [vmem:[#allocation16_spill] sm:$0xff] }
 0xd81   : > { %v9508_v0 = vadd.f32 %v9507_v13, %v9459_v29  ;;  %v9413_v14 = vadd.f32 %v9412_v3, %v20273_v21  ;;  %v12977_v21 = vld [vmem:[%s20722_s7 + $0x328] sm:$0xf0]  ;;  %v13704_v13 = vld [vmem:[%s20722_s7 + $0x2b4] sm:$0xf]  ;;  %v20839_v3 = vld [vmem:[#allocation14_spill] sm:$0xff] }
 0xd82   : > { %9872 = vmatpush.bf16.msrb.mxu2 %v12988_v38  ;;  %v12980_v42 = vor.u32 %v13718_v61, %v12977_v21  ;;  %9775 = vmatpush.bf16.msrb.mxu0 %v12852_v45  ;;  %v12924_v29 = vor.u32 %v13704_v13, %v12921_v9 }
 0xd83   : > { %9607 = vmatmul.bf16.gmra.mxu0 %v20836_v60  ;;  %9705 = vmatmul.bf16.gmra.mxu2 %v20837_v58  ;;  %v13734_v60 = vld [vmem:[%s20722_s7 + $0x3a4] sm:$0xf] }
 0xd84   : > { %v9556_v35 = vpop.f32.mrf.mxu3  ;;  %9823 = vmatpush.bf16.msrb.mxu1 %v12924_v29  ;;  %9921 = vmatpush.bf16.msrb.mxu3 %v13052_v36  ;;  %v20841_v29 = vld [vmem:[#allocation15_spill] sm:$0xff]  ;;  %v12900_v36 = vor.u32 %v13698_v24, %v12897_v6 }
 0xd85   : > { %v9557_v8 = vadd.f32 %v9556_v35, %v9508_v0  ;;  %v12913_v0 = vld [vmem:[%s20722_s7 + $0x2a8] sm:$0xf0]  ;;  %v13044_v35 = vor.u32 %v13734_v60, %v13041_v11 }
 0xd86   : > { %v9461_v62 = vpop.f32.mrf.mxu1  ;;  %v9510_v55 = vpop.f32.mrf.mxu2  ;;  %9873 = vmatpush.bf16.msrb.mxu2 %v12980_v42  ;;  %9776 = vmatpush.bf16.msrb.mxu0 %v12844_v50  ;;  %v12916_v38 = vor.u32 %v13702_v39, %v12913_v0  ;;  %v13033_v42 = vld [vmem:[%s20722_s7 + $0x398] sm:$0xf0] }
 0xd87   : > { %9984 = vst [vmem:[%s20342_s12 + $0x90] sm:$0xff] %v9557_v8  ;;  %v9462_v27 = vadd.f32 %v9461_v62, %v9413_v14  ;;  %v13714_v14 = vld [vmem:[%s20722_s7 + $0x304] sm:$0xf]  ;;  %v13700_v62 = vld [vmem:[%s20722_s7 + $0x294] sm:$0xf] }
 0xd88   : > { %v9414_v40 = vpop.f32.mrf.mxu0  ;;  %9824 = vmatpush.bf16.msrb.mxu1 %v12916_v38  ;;  %9922 = vmatpush.bf16.msrb.mxu3 %v13044_v35 }
 0xd89   : > { %9656 = vmatmul.bf16.gmra.mxu1 %v20838_v44  ;;  %9754 = vmatmul.bf16.gmra.mxu3 %v20839_v3  ;;  %v9511_v34 = vadd.f32 %v9510_v55, %v9462_v27  ;;  %v9415_v15 = vadd.f32 %v9414_v40, %v20314_v30  ;;  %v12961_v30 = vld [vmem:[%s20722_s7 + $0x308] sm:$0xf0]  ;;  %v12905_v55 = vld [vmem:[%s20722_s7 + $0x298] sm:$0xf0]  ;;  %v13732_v27 = vld [vmem:[%s20722_s7 + $0x394] sm:$0xf] }
 0xd8a   : > { %9874 = vmatpush.bf16.msrb.mxu2 %v12972_v4  ;;  %v12964_v61 = vor.u32 %v13714_v14, %v12961_v30  ;;  %9777 = vmatpush.bf16.msrb.mxu0 %v12836_v25  ;;  %v12908_v21 = vor.u32 %v13700_v62, %v12905_v55  ;;  %v13036_v13 = vor.u32 %v13732_v27, %v13033_v42  ;;  %v20840_v40 = vld [vmem:[#allocation3_spill] sm:$0xff]  ;;  %v13730_v44 = vld [vmem:[%s20722_s7 + $0x384] sm:$0xf] }
 0xd8b   : > { %v13028_v50 = vor.u32 %v13730_v44, %v13025_v31  ;;  %v20843_v25 = vld [vmem:[#allocation7_spill] sm:$0xff] }
 0xd8c   : > { %v9559_v58 = vpop.f32.mrf.mxu3  ;;  %9825 = vmatpush.bf16.msrb.mxu1 %v12908_v21  ;;  %9923 = vmatpush.bf16.msrb.mxu3 %v13036_v13  ;;  %v13803_v21 = vld [vmem:[%s20723_s8] sm:$0x3] }
 0xd8d   : > { %v9560_v28 = vadd.f32 %v9559_v58, %v9511_v34  ;;  %v20597_v27 = vperm.slane %v13803_v21, 1  ;;  %v20848_v21 = vld [vmem:[#allocation17_spill] sm:$0xff] }
 0xd8e   : > { %v9463_v8 = vpop.f32.mrf.mxu1  ;;  %v9512_v33 = vpop.f32.mrf.mxu2  ;;  %9875 = vmatpush.bf16.msrb.mxu2 %v12964_v61 }
 0xd8f   : > { %9986 = vst [vmem:[%s20342_s12 + $0xa0] sm:$0xff] %v9560_v28  ;;  %v9464_v10 = vadd.f32 %v9463_v8, %v9415_v15 }
 0xd90   : > { %v9417_v45 = vpop.f32.mrf.mxu0  ;;  %9826 = vmatpush.bf16.msrb.mxu1 %v12900_v36  ;;  %9924 = vmatpush.bf16.msrb.mxu3 %v13028_v50 }
 0xd91   : > { %v9513_v9 = vadd.f32 %v9512_v33, %v9464_v10  ;;  %v9418_v23 = vadd.f32 %v9417_v45, %v20319_v52 }
 0xd93   : > { %9612 = vmatmul.bf16.gmra.mxu0 %v20840_v40  ;;  %9710 = vmatmul.bf16.gmra.mxu2 %v20841_v29 }
 0xd94   : > { %v9561_v3 = vpop.f32.mrf.mxu3 }
 0xd95   : > { %v9562_v1 = vadd.f32 %v9561_v3, %v9513_v9 }
 0xd96   : > { %v9466_v18 = vpop.f32.mrf.mxu1  ;;  %v9515_v34 = vpop.f32.mrf.mxu2 }
 0xd97   : > { %9988 = vst [vmem:[%s20342_s12 + $0xb0] sm:$0xff] %v9562_v1  ;;  %v9467_v4 = vadd.f32 %v9466_v18, %v9418_v23 }
 0xd98   : > { %v9419_v39 = vpop.f32.mrf.mxu0 }
 0xd99   : > { %9661 = vmatmul.bf16.gmra.mxu1 %v19133_v57  ;;  %9759 = vmatmul.bf16.gmra.mxu3 %v19436_v2  ;;  %v9516_v0 = vadd.f32 %v9515_v34, %v9467_v4  ;;  %v9420_v58 = vadd.f32 %v9419_v39, %v20324_v22 }
 0xd9c   : > { %v9564_v60 = vpop.f32.mrf.mxu3 }
 0xd9d   : > { %v9565_v52 = vadd.f32 %v9564_v60, %v9516_v0 }
 0xd9e   : > { %v9468_v38 = vpop.f32.mrf.mxu1  ;;  %v9517_v11 = vpop.f32.mrf.mxu2 }
 0xd9f   : > { %9990 = vst [vmem:[%s20342_s12 + $0xc0] sm:$0xff] %v9565_v52  ;;  %v9469_v15 = vadd.f32 %v9468_v38, %v9420_v58  ;;  %v20845_v52 = vld [vmem:[#allocation23_spill] sm:$0xff] }
 0xda0   : > { %v9422_v28 = vpop.f32.mrf.mxu0 }
 0xda1   : > { %v9518_v35 = vadd.f32 %v9517_v11, %v9469_v15  ;;  %v9423_v57 = vadd.f32 %v9422_v28, %v20329_v54 }
 0xda3   : > { %9617 = vmatmul.bf16.gmra.mxu0 %v20822_v56  ;;  %9715 = vmatmul.bf16.gmra.mxu2 %v20842_v48 }
 0xda4   : > { %v9566_v32 = vpop.f32.mrf.mxu3 }
 0xda5   : > { %v9567_v2 = vadd.f32 %v9566_v32, %v9518_v35  ;;  %v20846_v32 = vld [vmem:[#allocation24_spill] sm:$0xff] }
 0xda6   : > { %v9471_v14 = vpop.f32.mrf.mxu1  ;;  %v9520_v8 = vpop.f32.mrf.mxu2 }
 0xda7   : > { %9992 = vst [vmem:[%s20342_s12 + $0xd0] sm:$0xff] %v9567_v2  ;;  %v9472_v22 = vadd.f32 %v9471_v14, %v9423_v57 }
 0xda8   : > { %v9424_v33 = vpop.f32.mrf.mxu0 }
 0xda9   : > { %9666 = vmatmul.bf16.gmra.mxu1 %v20843_v25  ;;  %9764 = vmatmul.bf16.gmra.mxu3 %v19459_v46  ;;  %v9521_v30 = vadd.f32 %v9520_v8, %v9472_v22  ;;  %v9425_v56 = vadd.f32 %v9424_v33, %v20334_v41  ;;  %v20844_v46 = vld [vmem:[#allocation22_spill] sm:$0xff] }
 0xdac   : > { %v9569_v10 = vpop.f32.mrf.mxu3 }
 0xdad   : > { %v9570_v61 = vadd.f32 %v9569_v10, %v9521_v30  ;;  %v20847_v30 = vld [vmem:[#allocation25_spill] sm:$0xff] }
 0xdae   : > { %v9473_v62 = vpop.f32.mrf.mxu1  ;;  %v9522_v55 = vpop.f32.mrf.mxu2 }
 0xdaf   : > { %9994 = vst [vmem:[%s20342_s12 + $0xe0] sm:$0xff] %v9570_v61  ;;  %v9474_v54 = vadd.f32 %v9473_v62, %v9425_v56 }
 0xdb0   : > { %v9583_v45 = vpop.f32.mrf.mxu0 }
 0xdb1   : > { %v9523_v42 = vadd.f32 %v9522_v55, %v9474_v54  ;;  %v9584_v41 = vadd.f32 %v9583_v45, %v20597_v27 }
 0xdb3   : > { %9778 = vmatmul.bf16.vlgmr.msrb.gmra.mxu0 %v19463_v51  ;;  %9876 = vmatmul.bf16.vlgmr.msrb.gmra.mxu2 %v20844_v46 }
 0xdb4   : > { %v9571_v13 = vpop.f32.mrf.mxu3 }
 0xdb5   : > { %v9572_v9 = vadd.f32 %v9571_v13, %v9523_v42  ;;  %v20849_v42 = vld [vmem:[#allocation26_spill] sm:$0xff] }
 0xdb6   : > { %v9632_v40 = vpop.f32.mrf.mxu1  ;;  %v9681_v29 = vpop.f32.mrf.mxu2 }
 0xdb7   : > { %9996 = vst [vmem:[%s20342_s12 + $0xf0] sm:$0xff] %v9572_v9  ;;  %v9633_v24 = vadd.f32 %v9632_v40, %v9584_v41 }
 0xdb8   : > { %v9585_v6 = vpop.f32.mrf.mxu0 }
 0xdb9   : > { %v9682_v44 = vadd.f32 %v9681_v29, %v9633_v24  ;;  %9827 = vmatmul.bf16.vlgmr.msrb.gmra.mxu1 %v19469_v7  ;;  %9925 = vmatmul.bf16.vlgmr.msrb.gmra.mxu3 %v19772_v59  ;;  %v9586_v36 = vadd.f32 %v9585_v6, %v20597_v27  ;;  %v20850_v6 = vld [vmem:[#allocation27_spill] sm:$0xff] }
 0xdbc   : > { %v9730_v3 = vpop.f32.mrf.mxu3 }
 0xdbd   : > { %v20606_v51 = vadd.f32 %v9730_v3, %v9682_v44 }
 0xdbe   : > { %v9634_v31 = vpop.f32.mrf.mxu1  ;;  %v9683_v23 = vpop.f32.mrf.mxu2 }
 0xdbf   : > { %v9635_v1 = vadd.f32 %v9634_v31, %v9586_v36 }
 0xdc0   : > { %v9588_v50 = vpop.f32.mrf.mxu0 }
 0xdc1   : > { %v9684_v18 = vadd.f32 %v9683_v23, %v9635_v1  ;;  %v9589_v4 = vadd.f32 %v9588_v50, %v20597_v27 }
 0xdc3   : > { %9783 = vmatmul.bf16.gmra.mxu0 %v19478_v16  ;;  %9881 = vmatmul.bf16.gmra.mxu2 %v19781_v53 }
 0xdc4   : > { %v9732_v34 = vpop.f32.mrf.mxu3 }
 0xdc5   : > { %v20611_v7 = vadd.f32 %v9732_v34, %v9684_v18  ;;  %v20851_v34 = vld [vmem:[#allocation19_spill] sm:$0xff] }
 0xdc6   : > { %v9637_v59 = vpop.f32.mrf.mxu1  ;;  %v9686_v39 = vpop.f32.mrf.mxu2 }
 0xdc7   : > { %v9638_v0 = vadd.f32 %v9637_v59, %v9589_v4  ;;  %v20852_v4 = vld [vmem:[#allocation28_spill] sm:$0xff] }
 0xdc8   : > { %v9590_v60 = vpop.f32.mrf.mxu0 }
 0xdc9   : > { %v9687_v58 = vadd.f32 %v9686_v39, %v9638_v0  ;;  %9832 = vmatmul.bf16.gmra.mxu1 %v19483_v47  ;;  %9930 = vmatmul.bf16.gmra.mxu3 %v20845_v52  ;;  %v9591_v11 = vadd.f32 %v9590_v60, %v20597_v27 }
 0xdcc   : > { %v9735_v38 = vpop.f32.mrf.mxu3 }
 0xdcd   : > { %v20616_v16 = vadd.f32 %v9735_v38, %v9687_v58 }
 0xdce   : > { %v9639_v53 = vpop.f32.mrf.mxu1  ;;  %v9688_v15 = vpop.f32.mrf.mxu2 }
 0xdcf   : > { %v9640_v28 = vadd.f32 %v9639_v53, %v9591_v11  ;;  %v20853_v11 = vld [vmem:[#allocation20_spill] sm:$0xff]  ;;  %v20854_v53 = vld [vmem:[#allocation29_spill] sm:$0xff] }
 0xdd0   : > { %v9593_v35 = vpop.f32.mrf.mxu0 }
 0xdd1   : > { %v9689_v48 = vadd.f32 %v9688_v15, %v9640_v28  ;;  %v9594_v2 = vadd.f32 %v9593_v35, %v20597_v27 }
 0xdd3   : > { %9788 = vmatmul.bf16.gmra.mxu0 %v19490_v43  ;;  %9886 = vmatmul.bf16.gmra.mxu2 %v20846_v32 }
 0xdd4   : > { %v9737_v57 = vpop.f32.mrf.mxu3 }
 0xdd5   : > { %v20621_v47 = vadd.f32 %v9737_v57, %v9689_v48 }
 0xdd6   : > { %v9642_v14 = vpop.f32.mrf.mxu1  ;;  %v9691_v8 = vpop.f32.mrf.mxu2 }
 0xdd7   : > { %v9643_v22 = vadd.f32 %v9642_v14, %v9594_v2 }
 0xdd8   : > { %v9595_v33 = vpop.f32.mrf.mxu0 }
 0xdd9   : > { %v9692_v25 = vadd.f32 %v9691_v8, %v9643_v22  ;;  %9837 = vmatmul.bf16.gmra.mxu1 %v19495_v19  ;;  %9935 = vmatmul.bf16.gmra.mxu3 %v20847_v30  ;;  %v9596_v56 = vadd.f32 %v9595_v33, %v20597_v27  ;;  %v20855_v8 = vld [vmem:[#allocation30_spill] sm:$0xff] }
 0xddc   : > { %v9740_v10 = vpop.f32.mrf.mxu3 }
 0xddd   : > { %v20626_v43 = vadd.f32 %v9740_v10, %v9692_v25 }
 0xdde   : > { %v9644_v61 = vpop.f32.mrf.mxu1  ;;  %v9693_v62 = vpop.f32.mrf.mxu2 }
 0xddf   : > { %v9645_v55 = vadd.f32 %v9644_v61, %v9596_v56 }
 0xde0   : > { %v9598_v54 = vpop.f32.mrf.mxu0 }
 0xde1   : > { %v9694_v45 = vadd.f32 %v9693_v62, %v9645_v55  ;;  %v9599_v13 = vadd.f32 %v9598_v54, %v20597_v27  ;;  %v20856_v55 = vld [vmem:[#allocation31_spill] sm:$0xff] }
 0xde3   : > { %9793 = vmatmul.bf16.gmra.mxu0 %v20848_v21  ;;  %9891 = vmatmul.bf16.gmra.mxu2 %v20849_v42 }
 0xde4   : > { %v9742_v46 = vpop.f32.mrf.mxu3 }
 0xde5   : > { %v20631_v19 = vadd.f32 %v9742_v46, %v9694_v45 }
 0xde6   : > { %v9647_v41 = vpop.f32.mrf.mxu1  ;;  %v9696_v9 = vpop.f32.mrf.mxu2 }
 0xde7   : > { %v9648_v40 = vadd.f32 %v9647_v41, %v9599_v13 }
 0xde8   : > { %v9600_v29 = vpop.f32.mrf.mxu0 }
 0xde9   : > { %v9697_v24 = vadd.f32 %v9696_v9, %v9648_v40  ;;  %9842 = vmatmul.bf16.gmra.mxu1 %v20827_v49  ;;  %9940 = vmatmul.bf16.gmra.mxu3 %v20850_v6  ;;  %v9601_v3 = vadd.f32 %v9600_v29, %v20597_v27  ;;  %v20857_v9 = vld [vmem:[#allocation21_spill] sm:$0xff]  ;;  %v20858_v40 = vld [vmem:[#allocation4_spill] sm:$0xff] }
 0xdec   : > { %v9745_v44 = vpop.f32.mrf.mxu3 }
 0xded   : > { %v20636_v36 = vadd.f32 %v9745_v44, %v9697_v24 }
 0xdee   : > { %v9649_v31 = vpop.f32.mrf.mxu1  ;;  %v9698_v23 = vpop.f32.mrf.mxu2 }
 0xdef   : > { %v9650_v1 = vadd.f32 %v9649_v31, %v9601_v3 }
 0xdf0   : > { %v9603_v50 = vpop.f32.mrf.mxu0 }
 0xdf1   : > { %v9699_v18 = vadd.f32 %v9698_v23, %v9650_v1  ;;  %v9604_v39 = vadd.f32 %v9603_v50, %v20597_v27 }
 0xdf3   : > { %9798 = vmatmul.bf16.gmra.mxu0 %v20851_v34  ;;  %9896 = vmatmul.bf16.gmra.mxu2 %v20852_v4 }
 0xdf4   : > { %v9747_v59 = vpop.f32.mrf.mxu3 }
 0xdf5   : > { %v20641_v49 = vadd.f32 %v9747_v59, %v9699_v18 }
 0xdf6   : > { %v9652_v0 = vpop.f32.mrf.mxu1  ;;  %v9701_v60 = vpop.f32.mrf.mxu2 }
 0xdf7   : > { %v9653_v58 = vadd.f32 %v9652_v0, %v9604_v39 }
 0xdf8   : > { %v9605_v52 = vpop.f32.mrf.mxu0 }
 0xdf9   : > { %v9702_v38 = vadd.f32 %v9701_v60, %v9653_v58  ;;  %9847 = vmatmul.bf16.gmra.mxu1 %v20853_v11  ;;  %9945 = vmatmul.bf16.gmra.mxu3 %v20854_v53  ;;  %v9606_v28 = vadd.f32 %v9605_v52, %v20597_v27 }
 0xdfc   : > { %v9750_v15 = vpop.f32.mrf.mxu3 }
 0xdfd   : > { %v20646_v35 = vadd.f32 %v9750_v15, %v9702_v38  ;;  %v20859_v15 = vld [vmem:[#allocation32_spill] sm:$0xff] }
 0xdfe   : > { %v9654_v48 = vpop.f32.mrf.mxu1  ;;  %v9703_v32 = vpop.f32.mrf.mxu2 }
 0xdff   : > { %v9655_v57 = vadd.f32 %v9654_v48, %v9606_v28 }
 0xe00   : > { %v9608_v2 = vpop.f32.mrf.mxu0 }
 0xe01   : > { %v9704_v14 = vadd.f32 %v9703_v32, %v9655_v57  ;;  %v9609_v33 = vadd.f32 %v9608_v2, %v20597_v27 }
 0xe03   : > { %9803 = vmatmul.bf16.gmra.mxu0 %v19724_v20  ;;  %9901 = vmatmul.bf16.gmra.mxu2 %v20855_v8 }
 0xe04   : > { %v9752_v22 = vpop.f32.mrf.mxu3 }
 0xe05   : > { %v20651_v25 = vadd.f32 %v9752_v22, %v9704_v14 }
 0xe06   : > { %v9657_v30 = vpop.f32.mrf.mxu1  ;;  %v9706_v10 = vpop.f32.mrf.mxu2 }
 0xe07   : > { %v9658_v56 = vadd.f32 %v9657_v30, %v9609_v33 }
 0xe08   : > { %v9610_v61 = vpop.f32.mrf.mxu0 }
 0xe09   : > { %v9707_v62 = vadd.f32 %v9706_v10, %v9658_v56  ;;  %9852 = vmatmul.bf16.gmra.mxu1 %v19732_v17  ;;  %9950 = vmatmul.bf16.gmra.mxu3 %v20856_v55  ;;  %v9611_v45 = vadd.f32 %v9610_v61, %v20597_v27 }
 0xe0c   : > { %v9755_v54 = vpop.f32.mrf.mxu3 }
 0xe0d   : > { %v20656_v20 = vadd.f32 %v9755_v54, %v9707_v62 }
 0xe0e   : > { %v9659_v21 = vpop.f32.mrf.mxu1  ;;  %v9708_v42 = vpop.f32.mrf.mxu2 }
 0xe0f   : > { %v9660_v46 = vadd.f32 %v9659_v21, %v9611_v45 }
 0xe10   : > { %v9613_v13 = vpop.f32.mrf.mxu0 }
 0xe11   : > { %v9709_v41 = vadd.f32 %v9708_v42, %v9660_v46  ;;  %v9614_v24 = vadd.f32 %v9613_v13, %v20597_v27 }
 0xe13   : > { %9808 = vmatmul.bf16.gmra.mxu0 %v20857_v9  ;;  %9906 = vmatmul.bf16.gmra.mxu2 %v20858_v40 }
 0xe14   : > { %v9757_v29 = vpop.f32.mrf.mxu3 }
 0xe15   : > { %v20661_v17 = vadd.f32 %v9757_v29, %v9709_v41 }
 0xe16   : > { %v9662_v6 = vpop.f32.mrf.mxu1  ;;  %v9711_v44 = vpop.f32.mrf.mxu2 }
 0xe17   : > { %v9663_v3 = vadd.f32 %v9662_v6, %v9614_v24 }
 0xe18   : > { %v9615_v31 = vpop.f32.mrf.mxu0 }
 0xe19   : > { %v9712_v23 = vadd.f32 %v9711_v44, %v9663_v3  ;;  %9857 = vmatmul.bf16.gmra.mxu1 %v19744_v5  ;;  %9955 = vmatmul.bf16.gmra.mxu3 %v20047_v37  ;;  %v9616_v50 = vadd.f32 %v9615_v31, %v20597_v27 }
 0xe1c   : > { %v9760_v1 = vpop.f32.mrf.mxu3 }
 0xe1d   : > { %v20666_v18 = vadd.f32 %v9760_v1, %v9712_v23 }
 0xe1e   : > { %v9664_v34 = vpop.f32.mrf.mxu1  ;;  %v9713_v4 = vpop.f32.mrf.mxu2 }
 0xe1f   : > { %v9665_v59 = vadd.f32 %v9664_v34, %v9616_v50 }
 0xe20   : > { %v9618_v39 = vpop.f32.mrf.mxu0 }
 0xe21   : > { %v9714_v0 = vadd.f32 %v9713_v4, %v9665_v59  ;;  %v9619_v58 = vadd.f32 %v9618_v39, %v20597_v27 }
 0xe23   : > { %9813 = vmatmul.bf16.gmra.mxu0 %v19754_v63  ;;  %9911 = vmatmul.bf16.gmra.mxu2 %v20059_v12 }
 0xe24   : > { %v9762_v60 = vpop.f32.mrf.mxu3 }
 0xe25   : > { %v20671_v5 = vadd.f32 %v9762_v60, %v9714_v0 }
 0xe26   : > { %v9667_v37 = vpop.f32.mrf.mxu1  ;;  %v9716_v52 = vpop.f32.mrf.mxu2 }
 0xe27   : > { %v9668_v38 = vadd.f32 %v9667_v37, %v9619_v58 }
 0xe28   : > { %v9620_v11 = vpop.f32.mrf.mxu0 }
 0xe29   : > { %v9717_v53 = vadd.f32 %v9716_v52, %v9668_v38  ;;  %9862 = vmatmul.bf16.gmra.mxu1 %v19762_v26  ;;  %9960 = vmatmul.bf16.gmra.mxu3 %v20859_v15  ;;  %v9621_v48 = vadd.f32 %v9620_v11, %v20597_v27 }
 0xe2c   : > { %v9765_v28 = vpop.f32.mrf.mxu3 }
 0xe2d   : > { %v20676_v63 = vadd.f32 %v9765_v28, %v9717_v53 }
 0xe2e   : > { %v9669_v12 = vpop.f32.mrf.mxu1  ;;  %v9718_v32 = vpop.f32.mrf.mxu2 }
 0xe2f   : > { %v9670_v57 = vadd.f32 %v9669_v12, %v9621_v48 }
 0xe30   : > { %v9779_v2 = vpop.f32.mrf.mxu0 }
 0xe31   : > { %v9719_v14 = vadd.f32 %v9718_v32, %v9670_v57  ;;  %v9780_v22 = vadd.f32 %v9779_v2, %v20606_v51 }
 0xe34   : > { %v9767_v8 = vpop.f32.mrf.mxu3 }
 0xe35   : > { %v20679_v33 = vadd.f32 %v9767_v8, %v9719_v14 }
 0xe36   : > { %v9828_v30 = vpop.f32.mrf.mxu1  ;;  %v9877_v26 = vpop.f32.mrf.mxu2 }
 0xe37   : > { %v9829_v10 = vadd.f32 %v9828_v30, %v9780_v22 }
 0xe38   : > { %v9781_v56 = vpop.f32.mrf.mxu0 }
 0xe39   : > { %v9878_v61 = vadd.f32 %v9877_v26, %v9829_v10  ;;  %v9782_v62 = vadd.f32 %v9781_v56, %v20611_v7 }
 0xe3c   : > { %v9926_v27 = vpop.f32.mrf.mxu3 }
 0xe3d   : > { %v9927_v55 = vadd.f32 %v9926_v27, %v9878_v61 }
 0xe3e   : > { %v9830_v54 = vpop.f32.mrf.mxu1  ;;  %v9879_v45 = vpop.f32.mrf.mxu2 }
 0xe3f   : > { %9967 = vst [vmem:[%s20342_s12 + $0x8] sm:$0xff] %v9927_v55  ;;  %v9831_v21 = vadd.f32 %v9830_v54, %v9782_v62 }
 0xe40   : > { %v9784_v42 = vpop.f32.mrf.mxu0 }
 0xe41   : > { %v9880_v46 = vadd.f32 %v9879_v45, %v9831_v21  ;;  %v9785_v13 = vadd.f32 %v9784_v42, %v20616_v16 }
 0xe44   : > { %v9928_v51 = vpop.f32.mrf.mxu3 }
 0xe45   : > { %v9929_v41 = vadd.f32 %v9928_v51, %v9880_v46 }
 0xe46   : > { %v9833_v9 = vpop.f32.mrf.mxu1  ;;  %v9882_v40 = vpop.f32.mrf.mxu2 }
 0xe47   : > { %9969 = vst [vmem:[%s20342_s12 + $0x18] sm:$0xff] %v9929_v41  ;;  %v9834_v29 = vadd.f32 %v9833_v9, %v9785_v13 }
 0xe48   : > { %v9786_v24 = vpop.f32.mrf.mxu0 }
 0xe49   : > { %v9883_v6 = vadd.f32 %v9882_v40, %v9834_v29  ;;  %v9787_v44 = vadd.f32 %v9786_v24, %v20621_v47 }
 0xe4c   : > { %v9931_v7 = vpop.f32.mrf.mxu3 }
 0xe4d   : > { %v9932_v3 = vadd.f32 %v9931_v7, %v9883_v6 }
 0xe4e   : > { %v9835_v31 = vpop.f32.mrf.mxu1  ;;  %v9884_v23 = vpop.f32.mrf.mxu2 }
 0xe4f   : > { %9971 = vst [vmem:[%s20342_s12 + $0x28] sm:$0xff] %v9932_v3  ;;  %v9836_v1 = vadd.f32 %v9835_v31, %v9787_v44 }
 0xe50   : > { %v9789_v50 = vpop.f32.mrf.mxu0 }
 0xe51   : > { %v9885_v34 = vadd.f32 %v9884_v23, %v9836_v1  ;;  %v9790_v4 = vadd.f32 %v9789_v50, %v20626_v43 }
 0xe54   : > { %v9933_v16 = vpop.f32.mrf.mxu3 }
 0xe55   : > { %v9934_v59 = vadd.f32 %v9933_v16, %v9885_v34 }
 0xe56   : > { %v9838_v39 = vpop.f32.mrf.mxu1  ;;  %v9887_v0 = vpop.f32.mrf.mxu2 }
 0xe57   : > { %9973 = vst [vmem:[%s20342_s12 + $0x38] sm:$0xff] %v9934_v59  ;;  %v9839_v60 = vadd.f32 %v9838_v39, %v9790_v4 }
 0xe58   : > { %v9791_v58 = vpop.f32.mrf.mxu0 }
 0xe59   : > { %v9888_v37 = vadd.f32 %v9887_v0, %v9839_v60  ;;  %v9792_v52 = vadd.f32 %v9791_v58, %v20631_v19 }
 0xe5c   : > { %v9936_v47 = vpop.f32.mrf.mxu3 }
 0xe5d   : > { %v9937_v38 = vadd.f32 %v9936_v47, %v9888_v37 }
 0xe5e   : > { %v9840_v11 = vpop.f32.mrf.mxu1  ;;  %v9889_v53 = vpop.f32.mrf.mxu2 }
 0xe5f   : > { %9975 = vst [vmem:[%s20342_s12 + $0x48] sm:$0xff] %v9937_v38  ;;  %v9841_v15 = vadd.f32 %v9840_v11, %v9792_v52 }
 0xe60   : > { %v9794_v28 = vpop.f32.mrf.mxu0 }
 0xe61   : > { %v9890_v48 = vadd.f32 %v9889_v53, %v9841_v15  ;;  %v9795_v12 = vadd.f32 %v9794_v28, %v20636_v36 }
 0xe64   : > { %v9938_v43 = vpop.f32.mrf.mxu3 }
 0xe65   : > { %v9939_v32 = vadd.f32 %v9938_v43, %v9890_v48 }
 0xe66   : > { %v9843_v57 = vpop.f32.mrf.mxu1  ;;  %v9892_v2 = vpop.f32.mrf.mxu2 }
 0xe67   : > { %9977 = vst [vmem:[%s20342_s12 + $0x58] sm:$0xff] %v9939_v32  ;;  %v9844_v14 = vadd.f32 %v9843_v57, %v9795_v12 }
 0xe68   : > { %v9796_v8 = vpop.f32.mrf.mxu0 }
 0xe69   : > { %v9893_v22 = vadd.f32 %v9892_v2, %v9844_v14  ;;  %v9797_v30 = vadd.f32 %v9796_v8, %v20641_v49 }
 0xe6c   : > { %v9941_v19 = vpop.f32.mrf.mxu3 }
 0xe6d   : > { %v9942_v26 = vadd.f32 %v9941_v19, %v9893_v22 }
 0xe6e   : > { %v9845_v10 = vpop.f32.mrf.mxu1  ;;  %v9894_v56 = vpop.f32.mrf.mxu2 }
 0xe6f   : > { %9979 = vst [vmem:[%s20342_s12 + $0x68] sm:$0xff] %v9942_v26  ;;  %v9846_v61 = vadd.f32 %v9845_v10, %v9797_v30 }
 0xe70   : > { %v9799_v27 = vpop.f32.mrf.mxu0 }
 0xe71   : > { %v9895_v62 = vadd.f32 %v9894_v56, %v9846_v61  ;;  %v9800_v55 = vadd.f32 %v9799_v27, %v20646_v35 }
 0xe74   : > { %v9943_v36 = vpop.f32.mrf.mxu3 }
 0xe75   : > { %v9944_v54 = vadd.f32 %v9943_v36, %v9895_v62 }
 0xe76   : > { %v9848_v45 = vpop.f32.mrf.mxu1  ;;  %v9897_v21 = vpop.f32.mrf.mxu2 }
 0xe77   : > { %9981 = vst [vmem:[%s20342_s12 + $0x78] sm:$0xff] %v9944_v54  ;;  %v9849_v42 = vadd.f32 %v9848_v45, %v9800_v55 }
 0xe78   : > { %v9801_v46 = vpop.f32.mrf.mxu0 }
 0xe79   : > { %v9898_v51 = vadd.f32 %v9897_v21, %v9849_v42  ;;  %v9802_v13 = vadd.f32 %v9801_v46, %v20651_v25 }
 0xe7c   : > { %v9946_v49 = vpop.f32.mrf.mxu3 }
 0xe7d   : > { %v9947_v41 = vadd.f32 %v9946_v49, %v9898_v51 }
 0xe7e   : > { %v9850_v9 = vpop.f32.mrf.mxu1  ;;  %v9899_v40 = vpop.f32.mrf.mxu2 }
 0xe7f   : > { %9983 = vst [vmem:[%s20342_s12 + $0x88] sm:$0xff] %v9947_v41  ;;  %v9851_v29 = vadd.f32 %v9850_v9, %v9802_v13 }
 0xe80   : > { %v9804_v24 = vpop.f32.mrf.mxu0 }
 0xe81   : > { %v9900_v6 = vadd.f32 %v9899_v40, %v9851_v29  ;;  %v9805_v7 = vadd.f32 %v9804_v24, %v20656_v20 }
 0xe84   : > { %v9948_v35 = vpop.f32.mrf.mxu3 }
 0xe85   : > { %v9949_v44 = vadd.f32 %v9948_v35, %v9900_v6 }
 0xe86   : > { %v9853_v3 = vpop.f32.mrf.mxu1  ;;  %v9902_v31 = vpop.f32.mrf.mxu2 }
 0xe87   : > { %9985 = vst [vmem:[%s20342_s12 + $0x98] sm:$0xff] %v9949_v44  ;;  %v9854_v23 = vadd.f32 %v9853_v3, %v9805_v7 }
 0xe88   : > { %v9806_v1 = vpop.f32.mrf.mxu0 }
 0xe89   : > { %v9903_v50 = vadd.f32 %v9902_v31, %v9854_v23  ;;  %v9807_v34 = vadd.f32 %v9806_v1, %v20661_v17 }
 0xe8c   : > { %v9951_v25 = vpop.f32.mrf.mxu3 }
 0xe8d   : > { %v9952_v16 = vadd.f32 %v9951_v25, %v9903_v50 }
 0xe8e   : > { %v9855_v4 = vpop.f32.mrf.mxu1  ;;  %v9904_v59 = vpop.f32.mrf.mxu2 }
 0xe8f   : > { %9987 = vst [vmem:[%s20342_s12 + $0xa8] sm:$0xff] %v9952_v16  ;;  %v9856_v39 = vadd.f32 %v9855_v4, %v9807_v34 }
 0xe90   : > { %v9809_v0 = vpop.f32.mrf.mxu0 }
 0xe91   : > { %v9905_v60 = vadd.f32 %v9904_v59, %v9856_v39  ;;  %v9810_v58 = vadd.f32 %v9809_v0, %v20666_v18 }
 0xe94   : > { %v9953_v20 = vpop.f32.mrf.mxu3 }
 0xe95   : > { %v9954_v37 = vadd.f32 %v9953_v20, %v9905_v60 }
 0xe96   : > { %v9858_v47 = vpop.f32.mrf.mxu1  ;;  %v9907_v52 = vpop.f32.mrf.mxu2 }
 0xe97   : > { %9989 = vst [vmem:[%s20342_s12 + $0xb8] sm:$0xff] %v9954_v37  ;;  %v9859_v38 = vadd.f32 %v9858_v47, %v9810_v58 }
 0xe98   : > { %v9811_v11 = vpop.f32.mrf.mxu0 }
 0xe99   : > { %v9908_v53 = vadd.f32 %v9907_v52, %v9859_v38  ;;  %v9812_v15 = vadd.f32 %v9811_v11, %v20671_v5 }
 0xe9c   : > { %v9956_v17 = vpop.f32.mrf.mxu3 }
 0xe9d   : > { %v9957_v28 = vadd.f32 %v9956_v17, %v9908_v53 }
 0xe9e   : > { %v9860_v48 = vpop.f32.mrf.mxu1  ;;  %v9909_v43 = vpop.f32.mrf.mxu2 }
 0xe9f   : > { %9991 = vst [vmem:[%s20342_s12 + $0xc8] sm:$0xff] %v9957_v28  ;;  %v9861_v12 = vadd.f32 %v9860_v48, %v9812_v15 }
 0xea0   : > { %v9814_v32 = vpop.f32.mrf.mxu0 }
 0xea1   : > { %v9910_v57 = vadd.f32 %v9909_v43, %v9861_v12  ;;  %v9815_v2 = vadd.f32 %v9814_v32, %v20676_v63 }
 0xea4   : > { %v9958_v18 = vpop.f32.mrf.mxu3 }
 0xea5   : > { %v9959_v14 = vadd.f32 %v9958_v18, %v9910_v57 }
 0xea6   : > { %v9863_v8 = vpop.f32.mrf.mxu1  ;;  %v9912_v19 = vpop.f32.mrf.mxu2 }
 0xea7   : > { %9993 = vst [vmem:[%s20342_s12 + $0xd8] sm:$0xff] %v9959_v14  ;;  %v9864_v22 = vadd.f32 %v9863_v8, %v9815_v2 }
 0xea8   : > { %v9816_v30 = vpop.f32.mrf.mxu0 }
 0xea9   : > { %v9913_v26 = vadd.f32 %v9912_v19, %v9864_v22  ;;  %v9817_v10 = vadd.f32 %v9816_v30, %v20679_v33 }
 0xeac   : > { %v9961_v5 = vpop.f32.mrf.mxu3 }
 0xead   : > { %v9962_v56 = vadd.f32 %v9961_v5, %v9913_v26 }
 0xeae   : > { %v9865_v61 = vpop.f32.mrf.mxu1  ;;  %v9914_v62 = vpop.f32.mrf.mxu2 }
 0xeaf   : > { %9995 = vst [vmem:[%s20342_s12 + $0xe8] sm:$0xff] %v9962_v56  ;;  %v9866_v27 = vadd.f32 %v9865_v61, %v9817_v10 }
 0xeb1   : > { %v9915_v36 = vadd.f32 %v9914_v62, %v9866_v27 }
 0xeb4   : > { %v9963_v55 = vpop.f32.mrf.mxu3 }
 0xeb5   : > { %v9964_v54 = vadd.f32 %v9963_v55, %v9915_v36 }
 0xeb7   : > { %9997 = vst [vmem:[%s20342_s12 + $0xf8] sm:$0xff] %v9964_v54 }
 0xeb8 PF: > { %s21_s13 = sadd.s32 1, %s13810_s13  }
 0xeb9   : > { %p18_p4 = scmp.ge.s32.totalorder %s21_s13, 6  }
 0xebb   :  { %20 = sbr.rel (!%p18_p4) target bundleno = 1 (0x1), region = 112 }

</bundles_post_ra>
